<compile_context>
chip_gen: v5e
topology: v5e:2x2
jax: 0.10.0
libtpu: 0.0.40
codegen_flags: <defaults>
</compile_context>

<pallas_src>
import jax
import jax.numpy as jnp
from jax.experimental import pallas as pl
from jax.experimental.pallas import tpu as pltpu

VOCAB = 256
EMBED = 128
CONTEXT = 2
HIDDEN = 128
MAX_BATCH_TILE = 512  # rows per grid step (multiple of 8 sublanes)


def ngram_kernel(idx_ref, tbl_ref, b1_ref, w2_ref, b2_ref, out_ref):
    tb, context = idx_ref.shape          # (TB, CONTEXT)
    kdim, hidden = tbl_ref.shape         # (CONTEXT*VOCAB, HIDDEN), bf16
    vocab = kdim // context

    ids = idx_ref[...]                   # (TB, CONTEXT) int32

    # Multi-hot selector over the fused emb@w1 table: column c*VOCAB + id[c].
    # The per-context vocab slices are disjoint, so OR-ing the one-hots is an
    # exact multi-hot; 0/1 values are exact in bf16.
    iota = jax.lax.broadcasted_iota(jnp.int32, (tb, kdim), 1)
    hot = iota == ids[:, 0:1]
    for c in range(1, context):
        hot = jnp.logical_or(hot, iota == ids[:, c:c + 1] + c * vocab)
    multihot = hot.astype(jnp.bfloat16)                                  # (TB, K)

    # Fused embedding + linear1: one bf16 MXU matmul, f32 accumulate.
    h = jnp.dot(multihot, tbl_ref[...], preferred_element_type=jnp.float32)
    h = jnp.maximum(h + b1_ref[...], 0.0)                                # (TB, HIDDEN)

    # linear2 (bf16 operands, f32 accumulate).
    o = jnp.dot(h.astype(jnp.bfloat16), w2_ref[...],
                preferred_element_type=jnp.float32) + b2_ref[...]        # (TB, VOCAB)

    # log_softmax along the vocab axis (exp/log go to the EUP slot).
    m = jnp.max(o, axis=-1, keepdims=True)
    z = o - m
    lse = jnp.log(jnp.sum(jnp.exp(z), axis=-1, keepdims=True))
    out_ref[...] = z - lse


def _round_up(x, m):
    return ((x + m - 1) // m) * m


def _choose_batch_tile(b):
    """Pick an activation-row tile: multiple of 8, capped at MAX_BATCH_TILE,
    and capped at ~half the batch so the parallel grid axis keeps >= 2 steps
    for v7x's two TensorCores.  Small batches get a single 8-row tile."""
    b8 = _round_up(max(b, 1), 8)
    if b8 <= 8:
        return 8
    half = _round_up((b8 + 1) // 2, 8)
    return min(MAX_BATCH_TILE, half)


def _ngram_batched(ids, tbl, b1, w2, b2, batch_tile):
    b = ids.shape[0]
    kdim = CONTEXT * VOCAB
    grid = (b // batch_tile,)

    grid_spec = pltpu.PrefetchScalarGridSpec(
        num_scalar_prefetch=0,
        grid=grid,
        in_specs=[
            pl.BlockSpec((batch_tile, CONTEXT), lambda i: (i, 0)),  # ids (per tile)
            pl.BlockSpec((kdim, HIDDEN), lambda i: (0, 0)),         # fused emb@w1 (resident)
            pl.BlockSpec((1, HIDDEN), lambda i: (0, 0)),            # b1 (resident)
            pl.BlockSpec((HIDDEN, VOCAB), lambda i: (0, 0)),        # w2 (resident)
            pl.BlockSpec((1, VOCAB), lambda i: (0, 0)),             # b2 (resident)
        ],
        out_specs=pl.BlockSpec((batch_tile, VOCAB), lambda i: (i, 0)),
    )

    cost = pl.CostEstimate(
        flops=2 * b * (kdim * HIDDEN + HIDDEN * VOCAB),   # fused matmul + linear2
        transcendentals=b * (VOCAB + 1),                  # exp + log
        bytes_accessed=(4 * b * CONTEXT                   # ids (int32)
                        + 2 * (kdim * HIDDEN + HIDDEN * VOCAB)   # bf16 tables
                        + 4 * (HIDDEN + VOCAB)            # f32 biases
                        + 4 * b * VOCAB),                 # f32 output
    )

    return pl.pallas_call(
        ngram_kernel,
        out_shape=jax.ShapeDtypeStruct((b, VOCAB), jnp.float32),
        grid_spec=grid_spec,
        compiler_params=pltpu.CompilerParams(
            dimension_semantics=("parallel",),
        ),
        cost_estimate=cost,
    )(ids, tbl, b1, w2, b2)


def ngram_forward(inputs, emb, w1, b1, w2, b2):
    """Matches NGramLanguageModeler.forward: a (CONTEXT,) int context returns
    (1, VOCAB) log-probs; also accepts a batch (B, CONTEXT) -> (B, VOCAB)."""
    ids = jnp.asarray(inputs, jnp.int32)
    if ids.ndim == 1:
        ids = ids[None, :]
    # PyTorch nn.Embedding errors on out-of-range ids; clamp so stray ids stay
    # inside their per-context slice of the fused table (no cross-slice hits).
    ids = jnp.clip(ids, 0, VOCAB - 1)

    b = ids.shape[0]
    tile = _choose_batch_tile(b)
    b_pad = _round_up(b, tile)
    if b_pad != b:
        ids = jnp.pad(ids, ((0, b_pad - b), (0, 0)))

    # Algebraic fusion (f32 precompute, bf16 storage):
    #   (onehot_c @ emb) @ w1_c == onehot_c @ (emb @ w1_c)
    w1_r = jnp.asarray(w1, jnp.float32).reshape(CONTEXT, EMBED, HIDDEN)
    tbl = jnp.einsum("ve,ceh->cvh", jnp.asarray(emb, jnp.float32), w1_r)
    tbl = tbl.reshape(CONTEXT * VOCAB, HIDDEN).astype(jnp.bfloat16)

    out = _ngram_batched(
        ids,
        tbl,
        jnp.asarray(b1, jnp.float32).reshape(1, HIDDEN),
        jnp.asarray(w2, jnp.bfloat16),
        jnp.asarray(b2, jnp.float32).reshape(1, VOCAB),
        tile,
    )
    return out[:b]


def ngram_reference(inputs, emb, w1, b1, w2, b2):
    ids = jnp.asarray(inputs, jnp.int32)
    if ids.ndim == 1:
        ids = ids[None, :]
    x = emb[ids].reshape(ids.shape[0], -1)
    h = jnp.maximum(x @ w1 + b1, 0.0)
    o = h @ w2 + b2
    return jax.nn.log_softmax(o, axis=-1)


if __name__ == "__main__":
    key = jax.random.PRNGKey(0)
    k_emb, k_w1, k_b1, k_w2, k_b2, k_big, k_odd, k_one = jax.random.split(key, 8)

    in_dim = CONTEXT * EMBED
    emb = jax.random.normal(k_emb, (VOCAB, EMBED), jnp.float32) * 0.1
    w1 = jax.random.normal(k_w1, (in_dim, HIDDEN), jnp.float32) * 0.05
    b1 = jax.random.normal(k_b1, (1, HIDDEN), jnp.float32) * 0.05
    w2 = jax.random.normal(k_w2, (HIDDEN, VOCAB), jnp.float32) * 0.05
    b2 = jax.random.normal(k_b2, (1, VOCAB), jnp.float32) * 0.05

    # Large batch: 1024 rows -> 2 "parallel" 512-row tiles (fills the MXU,
    # still >= 2 grid steps for v7x's two TensorCores).
    ids_big = jax.random.randint(k_big, (1024, CONTEXT), 0, VOCAB, jnp.int32)
    out_big = jax.block_until_ready(ngram_forward(ids_big, emb, w1, b1, w2, b2))
    ref_big = ngram_reference(ids_big, emb, w1, b1, w2, b2)
    assert out_big.shape == (1024, VOCAB)
    assert jnp.allclose(out_big, ref_big, atol=2e-2, rtol=2e-2), "large-batch mismatch"

    # Ragged batch: exercises tile selection + padding (200 -> 2 x 104 rows).
    ids_odd = jax.random.randint(k_odd, (200, CONTEXT), 0, VOCAB, jnp.int32)
    out_odd = jax.block_until_ready(ngram_forward(ids_odd, emb, w1, b1, w2, b2))
    ref_odd = ngram_reference(ids_odd, emb, w1, b1, w2, b2)
    assert out_odd.shape == (200, VOCAB)
    assert jnp.allclose(out_odd, ref_odd, atol=2e-2, rtol=2e-2), "ragged-batch mismatch"

    # Original module semantics: a single (CONTEXT,) context -> (1, VOCAB),
    # via the small-batch fast path (single 8-row tile).
    ids_one = jax.random.randint(k_one, (CONTEXT,), 0, VOCAB, jnp.int32)
    out_one = jax.block_until_ready(ngram_forward(ids_one, emb, w1, b1, w2, b2))
    ref_one = ngram_reference(ids_one, emb, w1, b1, w2, b2)
    assert out_one.shape == (1, VOCAB)
    assert jnp.allclose(out_one, ref_one, atol=2e-2, rtol=2e-2), "single-context mismatch"

    print("KERNEL_OK")
</pallas_src>

<mosaic_0001>
module attributes {stable_mosaic.version = 11 : i64} {
  func.func @ngram_kernel(%arg0: i32, %arg1: memref<512x2xi32, #tpu.memory_space<vmem>>, %arg2: memref<512x128xbf16, #tpu.memory_space<vmem>>, %arg3: memref<1x128xf32, #tpu.memory_space<vmem>>, %arg4: memref<128x256xbf16, #tpu.memory_space<vmem>>, %arg5: memref<1x256xf32, #tpu.memory_space<vmem>>, %arg6: memref<512x256xf32, #tpu.memory_space<vmem>>) attributes {dimension_semantics = [#tpu.dimension_semantics<parallel>], iteration_bounds = array<i64: 2>, scalar_prefetch = 0 : i64, scratch_operands = 0 : i64, tpu.core_type = #tpu.core_type<tc>, window_params = [{transform_indices = @transform_0, window_bounds = array<i64: 512, 2>}, {pipeline_mode = #tpu.pipeline_mode<synchronous>, transform_indices = @transform_1, window_bounds = array<i64: 512, 128>}, {pipeline_mode = #tpu.pipeline_mode<synchronous>, transform_indices = @transform_2, window_bounds = array<i64: 1, 128>}, {pipeline_mode = #tpu.pipeline_mode<synchronous>, transform_indices = @transform_3, window_bounds = array<i64: 128, 256>}, {pipeline_mode = #tpu.pipeline_mode<synchronous>, transform_indices = @transform_4, window_bounds = array<i64: 1, 256>}, {transform_indices = @transform_5, window_bounds = array<i64: 512, 256>}]} {
    %c0 = arith.constant 0 : index
    %c0_0 = arith.constant 0 : index
    %0 = vector.load %arg1[%c0, %c0_0] : memref<512x2xi32, #tpu.memory_space<vmem>>, vector<512x2xi32>
    %1 = tpu.iota {dimensions = array<i32: 1>} : vector<512x512xi32>
    %2 = vector.extract_strided_slice %0 {offsets = [0, 0], sizes = [512, 1], strides = [1, 1]} : vector<512x2xi32> to vector<512x1xi32>
    %3 = vector.broadcast %2 : vector<512x1xi32> to vector<512x512xi32>
    %4 = arith.cmpi eq, %1, %3 : vector<512x512xi32>
    %5 = vector.extract_strided_slice %0 {offsets = [0, 1], sizes = [512, 1], strides = [1, 1]} : vector<512x2xi32> to vector<512x1xi32>
    %c256_i32 = arith.constant 256 : i32
    %6 = vector.broadcast %c256_i32 : i32 to vector<512x1xi32>
    %7 = arith.addi %5, %6 : vector<512x1xi32>
    %8 = vector.broadcast %7 : vector<512x1xi32> to vector<512x512xi32>
    %9 = arith.cmpi eq, %1, %8 : vector<512x512xi32>
    %10 = arith.ori %4, %9 : vector<512x512xi1>
    %11 = arith.extui %10 : vector<512x512xi1> to vector<512x512xi32>
    %12 = arith.sitofp %11 : vector<512x512xi32> to vector<512x512xf32>
    %13 = arith.truncf %12 : vector<512x512xf32> to vector<512x512xbf16>
    %c0_1 = arith.constant 0 : index
    %c0_2 = arith.constant 0 : index
    %14 = vector.load %arg2[%c0_1, %c0_2] : memref<512x128xbf16, #tpu.memory_space<vmem>>, vector<512x128xbf16>
    %cst = arith.constant dense<0.000000e+00> : vector<512x128xf32>
    %15 = tpu.matmul %13, %14, %cst {dimension_numbers = #tpu.dot_dimension_numbers<[1], [0], [0], [1], [0, 0, 1, 1], [], []>} : vector<512x512xbf16>, vector<512x128xbf16>, vector<512x128xf32> -> vector<512x128xf32>
    %c0_3 = arith.constant 0 : index
    %c0_4 = arith.constant 0 : index
    %16 = vector.load %arg3[%c0_3, %c0_4] : memref<1x128xf32, #tpu.memory_space<vmem>>, vector<1x128xf32>
    %17 = vector.broadcast %16 : vector<1x128xf32> to vector<512x128xf32>
    %18 = arith.addf %15, %17 : vector<512x128xf32>
    %cst_5 = arith.constant 0.000000e+00 : f32
    %19 = vector.broadcast %cst_5 : f32 to vector<512x128xf32>
    %20 = arith.maximumf %18, %19 : vector<512x128xf32>
    %21 = arith.truncf %20 : vector<512x128xf32> to vector<512x128xbf16>
    %c0_6 = arith.constant 0 : index
    %c0_7 = arith.constant 0 : index
    %22 = vector.load %arg4[%c0_6, %c0_7] : memref<128x256xbf16, #tpu.memory_space<vmem>>, vector<128x256xbf16>
    %cst_8 = arith.constant dense<0.000000e+00> : vector<512x256xf32>
    %23 = tpu.matmul %21, %22, %cst_8 {dimension_numbers = #tpu.dot_dimension_numbers<[1], [0], [0], [1], [0, 0, 1, 1], [], []>} : vector<512x128xbf16>, vector<128x256xbf16>, vector<512x256xf32> -> vector<512x256xf32>
    %c0_9 = arith.constant 0 : index
    %c0_10 = arith.constant 0 : index
    %24 = vector.load %arg5[%c0_9, %c0_10] : memref<1x256xf32, #tpu.memory_space<vmem>>, vector<1x256xf32>
    %25 = vector.broadcast %24 : vector<1x256xf32> to vector<512x256xf32>
    %26 = arith.addf %23, %25 : vector<512x256xf32>
    %cst_11 = arith.constant dense<0xFF800000> : vector<512xf32>
    %27 = vector.multi_reduction <maximumf>, %26, %cst_11 [1] : vector<512x256xf32> to vector<512xf32>
    %28 = vector.shape_cast %27 : vector<512xf32> to vector<512x1xf32>
    %29 = vector.broadcast %28 : vector<512x1xf32> to vector<512x256xf32>
    %30 = arith.subf %26, %29 : vector<512x256xf32>
    %31 = math.exp %30 : vector<512x256xf32>
    %cst_12 = arith.constant dense<0.000000e+00> : vector<512xf32>
    %32 = vector.multi_reduction <add>, %31, %cst_12 [1] : vector<512x256xf32> to vector<512xf32>
    %33 = vector.shape_cast %32 : vector<512xf32> to vector<512x1xf32>
    %34 = math.log %33 : vector<512x1xf32>
    %35 = vector.broadcast %34 : vector<512x1xf32> to vector<512x256xf32>
    %36 = arith.subf %30, %35 : vector<512x256xf32>
    %c0_13 = arith.constant 0 : index
    %c0_14 = arith.constant 0 : index
    %37 = vector.load %arg6[%c0_13, %c0_14] : memref<512x256xf32, #tpu.memory_space<vmem>>, vector<512x256xf32>
    tpu.vector_store %arg6[%c0_13, %c0_14], %36 {strides = array<i32>} : memref<512x256xf32, #tpu.memory_space<vmem>>, vector<512x256xf32>,
    return
  }
  func.func @transform_0(%arg0: i32) -> (i32, i32) {
    %c0_i32 = arith.constant 0 : i32
    %c0_i32_0 = arith.constant 0 : i32
    return %arg0, %c0_i32 : i32, i32
  }
  func.func @transform_1(%arg0: i32) -> (i32, i32) {
    %c0_i32 = arith.constant 0 : i32
    %c0_i32_0 = arith.constant 0 : i32
    %c0_i32_1 = arith.constant 0 : i32
    return %c0_i32, %c0_i32_0 : i32, i32
  }
  func.func @transform_2(%arg0: i32) -> (i32, i32) {
    %c0_i32 = arith.constant 0 : i32
    %c0_i32_0 = arith.constant 0 : i32
    %c0_i32_1 = arith.constant 0 : i32
    return %c0_i32, %c0_i32_0 : i32, i32
  }
  func.func @transform_3(%arg0: i32) -> (i32, i32) {
    %c0_i32 = arith.constant 0 : i32
    %c0_i32_0 = arith.constant 0 : i32
    %c0_i32_1 = arith.constant 0 : i32
    return %c0_i32, %c0_i32_0 : i32, i32
  }
  func.func @transform_4(%arg0: i32) -> (i32, i32) {
    %c0_i32 = arith.constant 0 : i32
    %c0_i32_0 = arith.constant 0 : i32
    %c0_i32_1 = arith.constant 0 : i32
    return %c0_i32, %c0_i32_0 : i32, i32
  }
  func.func @transform_5(%arg0: i32) -> (i32, i32) {
    %c0_i32 = arith.constant 0 : i32
    %c0_i32_0 = arith.constant 0 : i32
    return %arg0, %c0_i32 : i32, i32
  }
}

</mosaic_0001>

<bundles_post_ra>
// kernel: tpu_custom_call.1
= control target key start
LH: loop header
LB: loop body
LE: loop exit
PB: predicated region body
PF: predicated region fallthrough
CT: control target
= control target key end

     0   :  { %10 = vsyncpa [#allocation3], 0  ;;  %s10582_s0 = inlined_call_operand.vmem [shape: s32[1024,2], index: 0, kind: input, shape index: {}]   ;;  %s10583_s1 = inlined_call_operand.vmem [shape: bf16[512,128], index: 1, kind: input, shape index: {}]   ;;  %s10584_s2 = inlined_call_operand.vmem [shape: f32[1,128], index: 2, kind: input, shape index: {}]   ;;  %s10585_s3 = inlined_call_operand.vmem [shape: bf16[128,256], index: 3, kind: input, shape index: {}]   ;;  %s10586_s4 = inlined_call_operand.vmem [shape: f32[1,256], index: 4, kind: input, shape index: {}]   ;;  %s10587_s5 = inlined_call_operand.hbm [shape: f32[1024,256], index: 5, kind: output, shape index: {}]  }
   0x1   :  { %12 = vsyncpa [#allocation3 + $0x1], 0  ;;  %s6243_s18 = smov 0   ;;  %s6245_s19 = smov 0  }
   0x2   :  { %s6247_s20 = smov 0   ;;  %s6249_s21 = smov 0  }
   0x3 LB: > { %s6264_s22 = sadd.s32 4294967295, %s6206_s21   ;;  %s4854_s23 = sadd.s32 4294967294, %s6206_s21   ;;  %s6206_s21 = sphi %s6249_s21, %s11399_s21   ;;  %s6202_s20 = sphi %s6247_s20, %s11398_s20   ;;  %s6198_s19 = sphi %s6245_s19, %s11397_s19   ;;  %s6194_s18 = sphi %s6243_s18, %s11396_s18  }
   0x4   : > { %s6268_s24 = sadd.s32 1, %s6206_s21   ;;  %s135_s25 = sadd.s32 1, %s6202_s20 }
   0x5   : > { %s132_s26 = ssub.s32 %s6206_s21, %s6268_s24  ;;  %p145_p0 = scmp.ne.s32.totalorder %s6202_s20, %s6198_s19 }
   0x6   : > { %p133_p1 = scmp.eq.s32.totalorder %s132_s26, 0  ;;  %p146_p2 = scmp.eq.s32.totalorder %s6264_s22, 1 }
   0x7   : > { %p151_p3 = scmp.ne.s32.totalorder %s6198_s19, %s6194_s18  ;;  %p152_p4 = scmp.eq.s32.totalorder %s4854_s23, 1 }
   0x8   : > { %s6279_s27 = scalar_select %p133_p1, %s6202_s20, %s135_s25  }
   0x9   : > { %p6281_p5 = por %p146_p2, %p145_p0  ;;  %p6285_p6 = por %p152_p4, %p151_p3 }
   0xa   : > { %p4857_p7 = scmp.ge.s32.totalorder %s6206_s21, 1  ;;  %p191_p8 = scmp.lt.s32.totalorder %s6206_s21, 3 }
   0xc   : > { %p192_p9 = pnand %p4857_p7, %p191_p8 }
   0xe   : > { %195 = sbr.rel (%p192_p9) target bundleno = 1492 (0x5d4), region = 40 }
  0x13   : > { %s4859_s30 = sshll.u32 %s6264_s22, 6  ;;  %v10588_v0 = vmov 0   ;;  %v10594_v1 = vmov 1   ;;  %v5578_v29 = vld [vmem:[%s10583_s1 + $0x38] sm:$0xff]  ;;  %v5577_v32 = vld [vmem:[%s10583_s1 + $0x30] sm:$0xff]  ;;  %v5576_v35 = vld [vmem:[%s10583_s1 + $0x28] sm:$0xff] }
  0x14   : > { %5682 = vset.pattern.permute.xlu2 %v10588_v0  ;;  %5681 = vset.pattern.permute.xlu0 %v10588_v0  ;;  %p220_p10 = scmp.lt.s32.totalorder %s4859_s30, 127  ;;  %v5586_v30 = vld [vmem:[%s10583_s1 + $0x78] sm:$0xff]  ;;  %v5585_v34 = vld [vmem:[%s10583_s1 + $0x70] sm:$0xff]  ;;  %v5584_v36 = vld [vmem:[%s10583_s1 + $0x68] sm:$0xff]  ;;  %s216_s10 = sand.u32 1, %s6198_s19  }
  0x15   : > { %5683 = vset.pattern.permute.xlu1 %v10594_v1  ;;  %5621 = vmatpush.bf16.msra.mxu2 %v5578_v29  ;;  %v5575_v39 = vld [vmem:[%s10583_s1 + $0x20] sm:$0xff]  ;;  %v5574_v41 = vld [vmem:[%s10583_s1 + $0x18] sm:$0xff]  ;;  %v5573_v45 = vld [vmem:[%s10583_s1 + $0x10] sm:$0xff]  ;;  %s4858_s11 = sshll.u32 %s216_s10, 10  ;;  %s5620_s15 = sshll.u32 %s6264_s22, 10 }
  0x16   : > { %s11401_s30 = smov (!%p220_p10, %s4859_s30), 127  ;;  %5629 = vmatpush.bf16.msra.mxu3 %v5586_v30  ;;  %2411 = vmatpush.bf16.msra.mxu0 %v5578_v29  ;;  %v5583_v40 = vld [vmem:[%s10583_s1 + $0x60] sm:$0xff]  ;;  %v5582_v42 = vld [vmem:[%s10583_s1 + $0x58] sm:$0xff]  ;;  %v5581_v46 = vld [vmem:[%s10583_s1 + $0x50] sm:$0xff]  ;;  %s9663_s12 = scalar_lea.vmem [#allocation2], %s4858_s11 }
  0x17   : > { %s4860_s6 = sshll.u32 %s11401_s30, 3  ;;  %2580 = vmatpush.bf16.msra.mxu1 %v5586_v30  ;;  %v5572_v47 = vld [vmem:[%s10583_s1 + $0x8] sm:$0xff]  ;;  %v5571_v52 = vld [vmem:[%s10583_s1] sm:$0xff]  ;;  %s4789_s23 = sshll.u32 %s9663_s12, 4  ;;  %s4790_s23 = int_to_ptr.vmem [resolvable:$true] %s4789_s23 }
  0x18   : > { %s6298_s9 = scalar_lea.vmem %s10582_s0, %s4860_s6  ;;  %v5580_v48 = vld [vmem:[%s10583_s1 + $0x48] sm:$0xff]  ;;  %v5579_v53 = vld [vmem:[%s10583_s1 + $0x40] sm:$0xff]  ;;  %s4776_s22 = scalar_lea.sflag [#allocation3], %s216_s10 }
  0x19   : > { %v260_v2 = vld [vmem:[%s6298_s9 + $0x110] sm:$0xff]  ;;  %v258_v3 = vld [vmem:[%s6298_s9 + $0x100] sm:$0xff]  ;;  %v259_v5 = vld [vmem:[%s6298_s9 + $0x108] sm:$0xff]  ;;  %5622 = vmatpush.bf16.msra.mxu2 %v5577_v32  ;;  %s6164_s8 = scalar_lea.hbm %s10587_s5, 2048 }
  0x1a   : > { %398 = vperm.xlu2 %5682, %v260_v2   ;;  %392 = vperm.xlu0 %5681, %v258_v3   ;;  %v775_v4 = vadd.s32 256, %v258_v3  ;;  %v261_v6 = vld [vmem:[%s6298_s9 + $0x118] sm:$0xff]  ;;  %v776_v7 = vadd.s32 256, %v259_v5  ;;  %v777_v8 = vadd.s32 256, %v260_v2  ;;  %v262_v9 = vld [vmem:[%s6298_s9 + $0x120] sm:$0xff]  ;;  %v263_v11 = vld [vmem:[%s6298_s9 + $0x128] sm:$0xff]  ;;  %v290_v2 = vlaneseq }
  0x1b   : > { %v778_v10 = vadd.s32 256, %v261_v6  ;;  %v779_v12 = vadd.s32 256, %v262_v9  ;;  %v780_v13 = vadd.s32 256, %v263_v11  ;;  %v264_v14 = vld [vmem:[%s6298_s9 + $0x130] sm:$0xff]  ;;  %v265_v16 = vld [vmem:[%s6298_s9 + $0x138] sm:$0xff]  ;;  %v266_v17 = vld [vmem:[%s6298_s9 + $0x140] sm:$0xff]  ;;  %5630 = vmatpush.bf16.msra.mxu3 %v5585_v34  ;;  %2412 = vmatpush.bf16.msra.mxu0 %v5577_v32 }
  0x1c   : > { %904 = vperm.xlu1 %5683, %v775_v4   ;;  %v781_v15 = vadd.s32 256, %v264_v14  ;;  %v782_v18 = vadd.s32 256, %v265_v16  ;;  %v267_v19 = vld [vmem:[%s6298_s9 + $0x148] sm:$0xff]  ;;  %v268_v20 = vld [vmem:[%s6298_s9 + $0x150] sm:$0xff]  ;;  %v783_v23 = vadd.s32 256, %v266_v17  ;;  %v269_v26 = vld [vmem:[%s6298_s9 + $0x158] sm:$0xff]  ;;  %2581 = vmatpush.bf16.msra.mxu1 %v5585_v34 }
  0x1d   : > { %v784_v21 = vadd.s32 256, %v267_v19  ;;  %v785_v22 = vadd.s32 256, %v268_v20  ;;  %v271_v24 = vld [vmem:[%s6298_s9 + $0x168] sm:$0xff]  ;;  %v272_v27 = vld [vmem:[%s6298_s9 + $0x170] sm:$0xff]  ;;  %v270_v31 = vld [vmem:[%s6298_s9 + $0x160] sm:$0xff]  ;;  %v786_v33 = vadd.s32 256, %v269_v26  ;;  %5623 = vmatpush.bf16.msra.mxu2 %v5576_v35 }
  0x1e   : > { %v788_v25 = vadd.s32 256, %v271_v24  ;;  %v789_v28 = vadd.s32 256, %v272_v27  ;;  %v787_v37 = vadd.s32 256, %v270_v31  ;;  %v275_v38 = vld [vmem:[%s6298_s9 + $0x188] sm:$0xff]  ;;  %v6361_v43 = vld [vmem:[%s6298_s9 + $0x18] sm:$0xff]  ;;  %v274_v51 = vld [vmem:[%s6298_s9 + $0x180] sm:$0xff] }
  0x1f   : > { %5631 = vmatpush.bf16.msra.mxu3 %v5584_v36  ;;  %2413 = vmatpush.bf16.msra.mxu0 %v5576_v35  ;;  %v273_v44 = vld [vmem:[%s6298_s9 + $0x178] sm:$0xff]  ;;  %v276_v55 = vld [vmem:[%s6298_s9 + $0x190] sm:$0xff]  ;;  %v792_v58 = vadd.s32 256, %v275_v38  ;;  %v791_v59 = vadd.s32 256, %v274_v51  ;;  %v227_v60 = vld [vmem:[%s6298_s9 + $0x8] sm:$0xff] }
  0x20   : > { %2582 = vmatpush.bf16.msra.mxu1 %v5584_v36  ;;  %v6379_v49 = vld [vmem:[%s6298_s9 + $0x38] sm:$0xff]  ;;  %v790_v54 = vadd.s32 256, %v273_v44  ;;  %v793_v56 = vadd.s32 256, %v276_v55  ;;  %v744_v61 = vadd.s32 256, %v227_v60  ;;  %v6402_v3 = vld [vmem:[%s6298_s9 + $0x1a0] sm:$0xff]  ;;  %v228_v32 = vld [vmem:[%s6298_s9 + $0x10] sm:$0xff] }
  0x21   : > { %5624 = vmatpush.bf16.msra.mxu2 %v5575_v39  ;;  %v277_v63 = vld [vmem:[%s6298_s9 + $0x198] sm:$0xff]  ;;  %v795_v4 = vadd.s32 256, %v6402_v3 }
  0x22   : > { %401 = vperm.xlu2 %5682, %v261_v6   ;;  %395 = vperm.xlu0 %5681, %v259_v5   ;;  %v6409_v6 = vand.u32 127, %v290_v2 }
  0x23   : > { %5632 = vmatpush.bf16.msra.mxu3 %v5583_v40  ;;  %2414 = vmatpush.bf16.msra.mxu0 %v5575_v39  ;;  %v746_v39 = vadd.s32 256, %v6361_v43 }
  0x24   : > { %907 = vperm.xlu1 %5683, %v776_v7   ;;  %2583 = vmatpush.bf16.msra.mxu1 %v5583_v40  ;;  %v745_v40 = vadd.s32 256, %v228_v32 }
  0x25   : > { %5625 = vmatpush.bf16.msra.mxu2 %v5574_v41 }
  0x27   : > { %5633 = vmatpush.bf16.msra.mxu3 %v5582_v42  ;;  %2415 = vmatpush.bf16.msra.mxu0 %v5574_v41 }
  0x28   : > { %2584 = vmatpush.bf16.msra.mxu1 %v5582_v42 }
  0x29   : > { %5626 = vmatpush.bf16.msra.mxu2 %v5573_v45 }
  0x2a   : > { %404 = vperm.xlu2 %5682, %v262_v9   ;;  %5684 = vset.pattern.permute.xlu0 %v10594_v1  ;;  %v226_v9 = vld [vmem:[%s6298_s9] sm:$0xff] }
  0x2b   : > { %910 = vperm.xlu0 %5684, %v777_v8   ;;  %5634 = vmatpush.bf16.msra.mxu3 %v5581_v46 }
  0x2c   : > { %913 = vperm.xlu1 %5683, %v778_v10   ;;  %2416 = vmatpush.bf16.msra.mxu0 %v5573_v45  ;;  %v794_v10 = vadd.s32 256, %v277_v63 }
  0x2d   : > { %5627 = vmatpush.bf16.msra.mxu2 %v5572_v47  ;;  %2585 = vmatpush.bf16.msra.mxu1 %v5581_v46  ;;  %v281_v46 = vld [vmem:[%s6298_s9 + $0x1b8] sm:$0xff] }
  0x2f   : > { %5635 = vmatpush.bf16.msra.mxu3 %v5580_v48 }
  0x30   : > { %2417 = vmatpush.bf16.msra.mxu0 %v5572_v47 }
  0x31   : > { %5628 = vmatpush.bf16.msra.mxu2 %v5571_v52  ;;  %2586 = vmatpush.bf16.msra.mxu1 %v5580_v48  ;;  %v5593_v48 = vld [vmem:[%s10583_s1 + $0xb0] sm:$0xff] }
  0x32   : > { %5686 = vset.pattern.permute.xlu2 %v10594_v1 }
  0x33   : > { %916 = vperm.xlu2 %5686, %v779_v12   ;;  %919 = vperm.xlu0 %5684, %v780_v13   ;;  %v6420_v12 = vld [vmem:[%s6298_s9 + $0x1b0] sm:$0xff] }
  0x34   : > { %5685 = vset.pattern.permute.xlu1 %v10588_v0  ;;  %5636 = vmatpush.bf16.msra.mxu3 %v5579_v53  ;;  %v797_v13 = vadd.s32 256, %v6420_v12 }
  0x35   : > { %407 = vperm.xlu1 %5685, %v263_v11   ;;  %2418 = vmatpush.bf16.msra.mxu0 %v5571_v52  ;;  %v6417_v11 = vadd.s32 128, %v6409_v6 }
  0x36   : > { %2587 = vmatpush.bf16.msra.mxu1 %v5579_v53 }
  0x3b   : > { %5687 = vset.pattern.permute.xlu2 %v10588_v0  ;;  %922 = vperm.xlu0 %5684, %v781_v15   ;;  %v743_v15 = vadd.s32 256, %v226_v9 }
  0x3c   : > { %413 = vperm.xlu2 %5687, %v265_v16  }
  0x3d   : > { %410 = vperm.xlu1 %5685, %v264_v14  }
  0x43   : > { %5689 = vset.pattern.permute.xlu0 %v10588_v0 }
  0x44   : > { %416 = vperm.xlu2 %5687, %v266_v17   ;;  %419 = vperm.xlu0 %5689, %v267_v19   ;;  %v10596_v19 = vmov 1.0|1.0  }
  0x45   : > { %5688 = vset.pattern.permute.xlu1 %v10594_v1 }
  0x46   : > { %925 = vperm.xlu1 %5688, %v782_v18   ;;  %v6447_v18 = vld [vmem:[%s6298_s9 + $0x28] sm:$0xff] }
  0x4c   : > { %5690 = vset.pattern.permute.xlu2 %v10594_v1  ;;  %5693 = vset.pattern.permute.xlu0 %v10594_v1 }
  0x4d   : > { %931 = vperm.xlu2 %5690, %v784_v21   ;;  %934 = vperm.xlu0 %5693, %v785_v22   ;;  %v5594_v21 = vld [vmem:[%s10583_s1 + $0xb8] sm:$0xff] }
  0x4e   : > { %928 = vperm.xlu1 %5688, %v783_v23   ;;  %v5602_v22 = vld [vmem:[%s10583_s1 + $0xf8] sm:$0xff]  ;;  %2749 = vmatpush.bf16.msrb.mxu2 %v5594_v21 }
  0x4f   : > { %2918 = vmatpush.bf16.msrb.mxu3 %v5602_v22 }
  0x52   : > { %2750 = vmatpush.bf16.msrb.mxu2 %v5593_v48  ;;  %v5591_v48 = vld [vmem:[%s10583_s1 + $0xa0] sm:$0xff] }
  0x55   : > { %5692 = vset.pattern.permute.xlu2 %v10588_v0  ;;  %943 = vperm.xlu0 %5693, %v788_v25  }
  0x56   : > { %425 = vperm.xlu2 %5692, %v269_v26   ;;  %5691 = vset.pattern.permute.xlu1 %v10588_v0  ;;  %v6467_v26 = vld [vmem:[%s6298_s9 + $0x1c0] sm:$0xff] }
  0x57   : > { %422 = vperm.xlu1 %5691, %v268_v20   ;;  %v748_v20 = vadd.s32 256, %v6447_v18 }
  0x5d   : > { %946 = vperm.xlu0 %5693, %v789_v28   ;;  %v799_v28 = vadd.s32 256, %v6467_v26 }
  0x5e   : > { %428 = vperm.xlu2 %5692, %v270_v31   ;;  %v6494_v31 = vld [vmem:[%s6298_s9 + $0x1d0] sm:$0xff] }
  0x5f   : > { %5694 = vset.pattern.permute.xlu1 %v10594_v1  ;;  %v801_v34 = vadd.s32 256, %v6494_v31 }
  0x60   : > { %937 = vperm.xlu1 %5694, %v786_v33  }
  0x65   : > { %5699 = vset.pattern.permute.xlu0 %v10588_v0 }
  0x66   : > { %5696 = vset.pattern.permute.xlu2 %v10594_v1  ;;  %443 = vperm.xlu0 %5699, %v275_v38   ;;  %v6508_v38 = vld [vmem:[%s6298_s9 + $0x48] sm:$0xff] }
  0x67   : > { %940 = vperm.xlu2 %5696, %v787_v37   ;;  %v752_v41 = vadd.s32 256, %v6508_v38 }
  0x68   : > { %5695 = vset.pattern.permute.xlu1 %v10588_v0 }
  0x69   : > { %431 = vperm.xlu1 %5695, %v271_v24  }
  0x6e   : > { %305 = vperm.xlu0 %5699, %v6361_v43  }
  0x6f   : > { %5697 = vset.pattern.permute.xlu2 %v10588_v0 }
  0x70   : > { %437 = vperm.xlu2 %5697, %v273_v44   ;;  %v6534_v44 = vld [vmem:[%s6298_s9 + $0x1e0] sm:$0xff] }
  0x71   : > { %434 = vperm.xlu1 %5695, %v272_v27   ;;  %v279_v27 = vld [vmem:[%s6298_s9 + $0x1a8] sm:$0xff]  ;;  %v803_v47 = vadd.s32 256, %v6534_v44 }
  0x72   : > { %v796_v33 = vadd.s32 256, %v279_v27 }
  0x74   : > { %v6381_v50 = vpop.permute.xlu2 %398 }
  0x75   : > { %10803 = vst [vmem:[#allocation5_spill] sm:$0xff] %v6381_v50 }
  0x76   : > { %317 = vperm.xlu0 %5699, %v6379_v49  }
  0x78   : > { %440 = vperm.xlu2 %5697, %v274_v51   ;;  %v5601_v51 = vld [vmem:[%s10583_s1 + $0xf0] sm:$0xff] }
  0x79   : > { %5698 = vset.pattern.permute.xlu1 %v10594_v1  ;;  %2919 = vmatpush.bf16.msrb.mxu3 %v5601_v51 }
  0x7a   : > { %949 = vperm.xlu1 %5698, %v790_v54  }
  0x7c   : > { %v6393_v57 = vpop.permute.xlu2 %401 }
  0x7d   : > { %10804 = vst [vmem:[#allocation6_spill] sm:$0xff] %v6393_v57 }
  0x7e   : > { %5716 = vset.pattern.permute.xlu0 %v10594_v1 }
  0x7f   : > { %958 = vperm.xlu0 %5716, %v793_v56   ;;  %v798_v56 = vadd.s32 256, %v281_v46 }
  0x80   : > { %5700 = vset.pattern.permute.xlu2 %v10594_v1 }
  0x81   : > { %955 = vperm.xlu2 %5700, %v792_v58  }
  0x82   : > { %952 = vperm.xlu1 %5698, %v791_v59  }
  0x84   : > { %v6398_v62 = vpop.permute.xlu2 %404 }
  0x85   : > { %10805 = vst [vmem:[#allocation7_spill] sm:$0xff] %v6398_v62 }
  0x87   : > { %811 = vperm.xlu0 %5716, %v744_v61  }
  0x89   : > { %5702 = vset.pattern.permute.xlu2 %v10588_v0 }
  0x8a   : > { %449 = vperm.xlu2 %5702, %v277_v63   ;;  %5701 = vset.pattern.permute.xlu1 %v10588_v0 }
  0x8b   : > { %446 = vperm.xlu1 %5701, %v276_v55   ;;  %v230_v55 = vld [vmem:[%s6298_s9 + $0x20] sm:$0xff] }
  0x8c   : > { %v6407_v5 = vpop.permute.xlu0 %392 }
  0x8d   : > { %10806 = vst [vmem:[#allocation8_spill] sm:$0xff] %v6407_v5  ;;  %v6413_v8 = vpop.permute.xlu2 %916  ;;  %vm615_vm0 = vcmp.eq.s32.totalorder %v6409_v6, %v6407_v5  ;;  %vm616_vm2 = vcmp.eq.s32.totalorder %v6417_v11, %v6407_v5  ;;  %v10991_v5 = vmov 0 }
  0x8e   : > { %v6411_v7 = vpop.permute.xlu1 %904  ;;  %10808 = vst [vmem:[#allocation10_spill] sm:$0xff] %v6413_v8 }
  0x8f   : > { %10807 = vst [vmem:[#allocation9_spill] sm:$0xff] %v6411_v7  ;;  %964 = vperm.xlu0 %5716, %v795_v4   ;;  %vm1127_vm1 = vcmp.eq.s32.totalorder %v6409_v6, %v6411_v7  ;;  %vm1128_vm3 = vcmp.eq.s32.totalorder %v6417_v11, %v6411_v7  ;;  %v283_v4 = vld [vmem:[%s6298_s9 + $0x1c8] sm:$0xff]  ;;  %v5513_v7 = vld [vmem:[%s10585_s3 + $0x18] sm:$0xf0] }
  0x90   : > { %vm1383_vm5 = vmor %vm615_vm0, %vm1127_vm1  ;;  %vm623_vm0 = vcmp.eq.s32.totalorder %v6409_v6, %v6381_v50 }
  0x91   : > { %vm1384_vm9 = vmor %vm616_vm2, %vm1128_vm3  ;;  %vm627_vm2 = vcmp.eq.s32.totalorder %v6409_v6, %v6393_v57 }
  0x92   : > { %296 = vperm.xlu2 %5702, %v226_v9  }
  0x93   : > { %5703 = vset.pattern.permute.xlu1 %v10594_v1 }
  0x94   : > { %961 = vperm.xlu1 %5703, %v794_v10   ;;  %v6428_v14 = vpop.permute.xlu0 %395 }
  0x95   : > { %10809 = vst [vmem:[#allocation11_spill] sm:$0xff] %v6428_v14  ;;  %vm619_vm4 = vcmp.eq.s32.totalorder %v6409_v6, %v6428_v14  ;;  %vm620_vm7 = vcmp.eq.s32.totalorder %v6417_v11, %v6428_v14 }
  0x96   : > { %v6436_v16 = vpop.permute.xlu1 %907  ;;  %v6438_v17 = vpop.permute.xlu2 %413 }
  0x97   : > { %10810 = vst [vmem:[#allocation12_spill] sm:$0xff] %v6436_v16  ;;  %vm1131_vm6 = vcmp.eq.s32.totalorder %v6409_v6, %v6436_v16  ;;  %vm1132_vm8 = vcmp.eq.s32.totalorder %v6417_v11, %v6436_v16  ;;  %970 = vperm.xlu0 %5716, %v797_v13  }
  0x98   : > { %10811 = vst [vmem:[#allocation13_spill] sm:$0xff] %v6438_v17  ;;  %vm1387_vm10 = vmor %vm619_vm4, %vm1131_vm6  ;;  %vm624_vm6 = vcmp.eq.s32.totalorder %v6417_v11, %v6381_v50 }
  0x99   : > { %vm5277_vm11 = vmpackc.low %vm1387_vm10, %vm1383_vm5 }
  0x9a   : > { %5278 = vmatmul.msk.bf16.vlgmr.msra.gmra.mxu2 %vm5277_vm11, %v10596_v19  ;;  %vm1388_vm12 = vmor %vm620_vm7, %vm1132_vm8  ;;  %5705 = vset.pattern.permute.xlu2 %v10594_v1  ;;  %vm628_vm7 = vcmp.eq.s32.totalorder %v6417_v11, %v6393_v57 }
  0x9b   : > { %vm5341_vm13 = vmpackc.low %vm1388_vm12, %vm1384_vm9  ;;  %808 = vperm.xlu2 %5705, %v743_v15   ;;  %v232_v15 = vld [vmem:[%s6298_s9 + $0x30] sm:$0xff] }
  0x9c   : > { %5342 = vmatmul.msk.bf16.vlgmr.msra.gmra.mxu3 %vm5341_vm13, %v10596_v19  ;;  %5704 = vset.pattern.permute.xlu1 %v10588_v0 }
  0x9d   : > { %299 = vperm.xlu1 %5704, %v227_v60   ;;  %v6464_v25 = vpop.permute.xlu0 %910  ;;  %v747_v60 = vadd.s32 256, %v230_v55 }
  0x9e   : > { %v6460_v23 = vpop.permute.xlu1 %913  ;;  %v6462_v24 = vpop.permute.xlu2 %416  ;;  %10814 = vst [vmem:[#allocation16_spill] sm:$0xff] %v6464_v25  ;;  %vm1135_vm14 = vcmp.eq.s32.totalorder %v6409_v6, %v6464_v25  ;;  %vm1136_vm1 = vcmp.eq.s32.totalorder %v6417_v11, %v6464_v25  ;;  %v5605_v25 = vld [vmem:[%s10585_s3 + $0x14] sm:$0xf] }
  0x9f   : > { %10812 = vst [vmem:[#allocation14_spill] sm:$0xff] %v6460_v23  ;;  %823 = vperm.xlu0 %5716, %v748_v20   ;;  %vm1139_vm15 = vcmp.eq.s32.totalorder %v6409_v6, %v6460_v23  ;;  %vm1391_vm3 = vmor %vm623_vm0, %vm1135_vm14  ;;  %vm1140_vm4 = vcmp.eq.s32.totalorder %v6417_v11, %v6460_v23  ;;  %vm631_vm14 = vcmp.eq.s32.totalorder %v6409_v6, %v6398_v62  ;;  %v800_v20 = vadd.s32 256, %v283_v4 }
  0xa0   : > { %10813 = vst [vmem:[#allocation15_spill] sm:$0xff] %v6462_v24  ;;  %vm1395_vm5 = vmor %vm627_vm2, %vm1139_vm15  ;;  %vm1143_vm15 = vcmp.eq.s32.totalorder %v6409_v6, %v6413_v8 }
  0xa1   : > { %vm1392_vm8 = vmor %vm624_vm6, %vm1136_vm1 }
  0xa2   : > { %vm1396_vm9 = vmor %vm628_vm7, %vm1140_vm4  ;;  %vm632_vm4 = vcmp.eq.s32.totalorder %v6417_v11, %v6398_v62 }
  0xa3   : > { %5706 = vset.pattern.permute.xlu2 %v10588_v0  ;;  %vm5279_vm10 = vmpackc.low %vm1395_vm5, %vm1391_vm3  ;;  %vm1144_vm5 = vcmp.eq.s32.totalorder %v6417_v11, %v6413_v8 }
  0xa4   : > { %455 = vperm.xlu2 %5706, %v279_v27   ;;  %vm5343_vm11 = vmpackc.low %vm1396_vm9, %vm1392_vm8  ;;  %v749_v27 = vadd.s32 256, %v232_v15 }
  0xa5   : > { %452 = vperm.xlu1 %5704, %v6402_v3   ;;  %v6501_v35 = vpop.permute.xlu0 %919  ;;  %vm1399_vm3 = vmor %vm631_vm14, %vm1143_vm15 }
  0xa6   : > { %10817 = vst [vmem:[#allocation19_spill] sm:$0xff] %v6501_v35  ;;  %vm1147_vm13 = vcmp.eq.s32.totalorder %v6409_v6, %v6501_v35  ;;  %vm1148_vm1 = vcmp.eq.s32.totalorder %v6417_v11, %v6501_v35  ;;  %vm1400_vm8 = vmor %vm632_vm4, %vm1144_vm5 }
  0xa7   : > { %v6487_v29 = vpop.permute.xlu1 %407  ;;  %v6491_v30 = vpop.permute.xlu2 %931  ;;  %976 = vperm.xlu0 %5716, %v799_v28  }
  0xa8   : > { %10815 = vst [vmem:[#allocation17_spill] sm:$0xff] %v6487_v29  ;;  %vm635_vm12 = vcmp.eq.s32.totalorder %v6409_v6, %v6487_v29  ;;  %vm636_vm0 = vcmp.eq.s32.totalorder %v6417_v11, %v6487_v29 }
  0xa9   : > { %10816 = vst [vmem:[#allocation18_spill] sm:$0xff] %v6491_v30  ;;  %vm1403_vm2 = vmor %vm635_vm12, %vm1147_vm13  ;;  %vm643_vm13 = vcmp.eq.s32.totalorder %v6409_v6, %v6438_v17 }
  0xaa   : > { %5280 = vmatmul.msk.bf16.gmra.mxu2 %vm5279_vm10, %v10596_v19  ;;  %vm1404_vm6 = vmor %vm636_vm0, %vm1148_vm1 }
  0xab   : > { %vm5281_vm7 = vmpackc.low %vm1403_vm2, %vm1399_vm3  ;;  %vm644_vm2 = vcmp.eq.s32.totalorder %v6417_v11, %v6438_v17 }
  0xac   : > { %5344 = vmatmul.msk.bf16.gmra.mxu3 %vm5343_vm11, %v10596_v19  ;;  %302 = vperm.xlu2 %5706, %v228_v32   ;;  %vm5345_vm9 = vmpackc.low %vm1404_vm6, %vm1400_vm8 }
  0xad   : > { %5707 = vset.pattern.permute.xlu1 %v10594_v1  ;;  %v6536_v45 = vpop.permute.xlu0 %922 }
  0xae   : > { %967 = vperm.xlu1 %5707, %v796_v33   ;;  %10822 = vst [vmem:[#allocation24_spill] sm:$0xff] %v6536_v45  ;;  %vm1151_vm12 = vcmp.eq.s32.totalorder %v6409_v6, %v6536_v45  ;;  %vm1152_vm3 = vcmp.eq.s32.totalorder %v6417_v11, %v6536_v45 }
  0xaf   : > { %v6503_v36 = vpop.permute.xlu1 %410  ;;  %982 = vperm.xlu0 %5716, %v801_v34   ;;  %v285_v34 = vld [vmem:[%s6298_s9 + $0x1d8] sm:$0xff] }
  0xb0   : > { %10818 = vst [vmem:[#allocation20_spill] sm:$0xff] %v6503_v36  ;;  %v6505_v37 = vpop.permute.xlu2 %425  ;;  %vm639_vm11 = vcmp.eq.s32.totalorder %v6409_v6, %v6503_v36  ;;  %vm640_vm1 = vcmp.eq.s32.totalorder %v6417_v11, %v6503_v36 }
  0xb1   : > { %10819 = vst [vmem:[#allocation21_spill] sm:$0xff] %v6505_v37  ;;  %vm1407_vm0 = vmor %vm639_vm11, %vm1151_vm12  ;;  %vm1164_vm12 = vcmp.eq.s32.totalorder %v6417_v11, %v6491_v30 }
  0xb2   : > { %vm1408_vm6 = vmor %vm640_vm1, %vm1152_vm3  ;;  %vm648_vm1 = vcmp.eq.s32.totalorder %v6417_v11, %v6462_v24 }
  0xb4   : > { %5708 = vset.pattern.permute.xlu2 %v10594_v1 }
  0xb5   : > { %817 = vperm.xlu2 %5708, %v746_v39  }
  0xb6   : > { %814 = vperm.xlu1 %5707, %v745_v40   ;;  %v6553_v53 = vpop.permute.xlu0 %419  ;;  %v234_v40 = vld [vmem:[%s6298_s9 + $0x40] sm:$0xff] }
  0xb7   : > { %835 = vperm.xlu0 %5716, %v752_v41   ;;  %10824 = vst [vmem:[#allocation26_spill] sm:$0xff] %v6553_v53  ;;  %vm651_vm8 = vcmp.eq.s32.totalorder %v6409_v6, %v6553_v53  ;;  %vm652_vm11 = vcmp.eq.s32.totalorder %v6417_v11, %v6553_v53  ;;  %v6686_v41 = vld [vmem:[%s6298_s9 + $0x58] sm:$0xff] }
  0xb8   : > { %v6529_v42 = vpop.permute.xlu1 %925  ;;  %v6531_v43 = vpop.permute.xlu2 %428 }
  0xb9   : > { %10820 = vst [vmem:[#allocation22_spill] sm:$0xff] %v6529_v42  ;;  %vm1155_vm10 = vcmp.eq.s32.totalorder %v6409_v6, %v6529_v42  ;;  %vm1156_vm14 = vcmp.eq.s32.totalorder %v6417_v11, %v6529_v42 }
  0xba   : > { %10821 = vst [vmem:[#allocation23_spill] sm:$0xff] %v6531_v43  ;;  %5282 = vmatmul.msk.bf16.gmra.mxu2 %vm5281_vm7, %v10596_v19  ;;  %vm1411_vm15 = vmor %vm643_vm13, %vm1155_vm10  ;;  %vm647_vm13 = vcmp.eq.s32.totalorder %v6409_v6, %v6462_v24 }
  0xbb   : > { %vm1412_vm4 = vmor %vm644_vm2, %vm1156_vm14 }
  0xbc   : > { %5346 = vmatmul.msk.bf16.gmra.mxu3 %vm5345_vm9, %v10596_v19  ;;  %vm5283_vm5 = vmpackc.low %vm1411_vm15, %vm1407_vm0  ;;  %vm1163_vm9 = vcmp.eq.s32.totalorder %v6409_v6, %v6491_v30 }
  0xbd   : > { %5710 = vset.pattern.permute.xlu2 %v10588_v0  ;;  %vm5347_vm7 = vmpackc.low %vm1412_vm4, %vm1408_vm6 }
  0xbe   : > { %5709 = vset.pattern.permute.xlu1 %v10588_v0  ;;  %461 = vperm.xlu2 %5710, %v281_v46   ;;  %vm1419_vm14 = vmor %vm651_vm8, %vm1163_vm9  ;;  %vm659_vm9 = vcmp.eq.s32.totalorder %v6409_v6, %v6505_v37  ;;  %v802_v46 = vadd.s32 256, %v285_v34 }
  0xbf   : > { %458 = vperm.xlu1 %5709, %v6420_v12   ;;  %988 = vperm.xlu0 %5716, %v803_v47   ;;  %v6581_v61 = vpop.permute.xlu0 %934  ;;  %vm1420_vm2 = vmor %vm652_vm11, %vm1164_vm12  ;;  %v5592_v12 = vld [vmem:[%s10583_s1 + $0xa8] sm:$0xff] }
  0xc0   : > { %v6551_v52 = vpop.permute.xlu1 %928  ;;  %10828 = vst [vmem:[#allocation30_spill] sm:$0xff] %v6581_v61  ;;  %2751 = vmatpush.bf16.msrb.mxu2 %v5592_v12  ;;  %vm1167_vm8 = vcmp.eq.s32.totalorder %v6409_v6, %v6581_v61 }
  0xc1   : > { %10823 = vst [vmem:[#allocation25_spill] sm:$0xff] %v6551_v52  ;;  %v6555_v54 = vpop.permute.xlu2 %940  ;;  %vm1159_vm10 = vcmp.eq.s32.totalorder %v6409_v6, %v6551_v52  ;;  %vm1160_vm15 = vcmp.eq.s32.totalorder %v6417_v11, %v6551_v52 }
  0xc2   : > { %10825 = vst [vmem:[#allocation27_spill] sm:$0xff] %v6555_v54  ;;  %vm1415_vm0 = vmor %vm647_vm13, %vm1159_vm10 }
  0xc3   : > { %vm1416_vm3 = vmor %vm648_vm1, %vm1160_vm15  ;;  %vm1168_vm15 = vcmp.eq.s32.totalorder %v6417_v11, %v6581_v61  ;;  %v7290_v61 = vld [vmem:[%s6298_s9 + $0xe8] sm:$0xff] }
  0xc4   : > { %vm5285_vm4 = vmpackc.low %vm1419_vm14, %vm1415_vm0  ;;  %vm660_vm14 = vcmp.eq.s32.totalorder %v6417_v11, %v6505_v37  ;;  %2752 = vmatpush.bf16.msrb.mxu2 %v5591_v48  ;;  %v6770_v48 = vld [vmem:[%s6298_s9 + $0x70] sm:$0xff]  ;;  %v5595_v37 = vld [vmem:[%s10583_s1 + $0xc0] sm:$0xff] }
  0xc6   : > { %308 = vperm.xlu2 %5710, %v230_v55  }
  0xc7   : > { %5711 = vset.pattern.permute.xlu1 %v10594_v1  ;;  %5725 = vset.pattern.permute.xlu0 %v10588_v0  ;;  %v6595_v3 = vpop.permute.xlu0 %943 }
  0xc8   : > { %973 = vperm.xlu1 %5711, %v798_v56   ;;  %10831 = vst [vmem:[#allocation33_spill] sm:$0xff] %v6595_v3  ;;  %329 = vperm.xlu0 %5725, %v6686_v41   ;;  %v751_v56 = vadd.s32 256, %v234_v40 }
  0xc9   : > { %v6576_v58 = vpop.permute.xlu1 %422 }
  0xca   : > { %10826 = vst [vmem:[#allocation28_spill] sm:$0xff] %v6576_v58  ;;  %5284 = vmatmul.msk.bf16.gmra.mxu2 %vm5283_vm5, %v10596_v19  ;;  %v6579_v59 = vpop.permute.xlu2 %437  ;;  %vm5349_vm5 = vmpackc.low %vm1420_vm2, %vm1416_vm3  ;;  %vm656_vm13 = vcmp.eq.s32.totalorder %v6417_v11, %v6576_v58 }
  0xcb   : > { %10827 = vst [vmem:[#allocation29_spill] sm:$0xff] %v6579_v59  ;;  %vm1424_vm2 = vmor %vm656_vm13, %vm1168_vm15  ;;  %vm1176_vm13 = vcmp.eq.s32.totalorder %v6417_v11, %v6555_v54 }
  0xcc   : > { %5348 = vmatmul.msk.bf16.gmra.mxu3 %vm5347_vm7, %v10596_v19  ;;  %vm655_vm7 = vcmp.eq.s32.totalorder %v6409_v6, %v6576_v58  ;;  %v772_v58 = vadd.s32 256, %v7290_v61 }
  0xcd   : > { %vm1423_vm12 = vmor %vm655_vm7, %vm1167_vm8  ;;  %vm1175_vm7 = vcmp.eq.s32.totalorder %v6409_v6, %v6555_v54 }
  0xce   : > { %5713 = vset.pattern.permute.xlu2 %v10594_v1 }
  0xcf   : > { %820 = vperm.xlu2 %5713, %v747_v60   ;;  %v6621_v13 = vpop.permute.xlu0 %946  ;;  %v5599_v60 = vld [vmem:[%s10583_s1 + $0xe0] sm:$0xff] }
  0xd0   : > { %5712 = vset.pattern.permute.xlu1 %v10588_v0  ;;  %10834 = vst [vmem:[#allocation36_spill] sm:$0xff] %v6621_v13  ;;  %5729 = vset.pattern.permute.xlu0 %v10594_v1 }
  0xd1   : > { %311 = vperm.xlu1 %5712, %v6447_v18   ;;  %v5600_v18 = vld [vmem:[%s10583_s1 + $0xe8] sm:$0xff] }
  0xd2   : > { %v6587_v63 = vpop.permute.xlu1 %937  ;;  %v6593_v2 = vpop.permute.xlu2 %440  ;;  %2920 = vmatpush.bf16.msrb.mxu3 %v5600_v18 }
  0xd3   : > { %10829 = vst [vmem:[#allocation31_spill] sm:$0xff] %v6587_v63  ;;  %vm1171_vm6 = vcmp.eq.s32.totalorder %v6409_v6, %v6587_v63  ;;  %vm1172_vm10 = vcmp.eq.s32.totalorder %v6417_v11, %v6587_v63 }
  0xd4   : > { %10830 = vst [vmem:[#allocation32_spill] sm:$0xff] %v6593_v2  ;;  %vm1427_vm11 = vmor %vm659_vm9, %vm1171_vm6  ;;  %vm663_vm6 = vcmp.eq.s32.totalorder %v6409_v6, %v6531_v43  ;;  %vm1180_vm9 = vcmp.eq.s32.totalorder %v6417_v11, %v6595_v3 }
  0xd5   : > { %vm1428_vm0 = vmor %vm660_vm14, %vm1172_vm10 }
  0xd6   : > { %vm5287_vm1 = vmpackc.low %vm1427_vm11, %vm1423_vm12  ;;  %vm664_vm12 = vcmp.eq.s32.totalorder %v6417_v11, %v6531_v43  ;;  %2921 = vmatpush.bf16.msrb.mxu3 %v5599_v60  ;;  %v757_v60 = vadd.s32 256, %v6770_v48  ;;  %v5616_v43 = vld [vmem:[%s10585_s3 + $0x64] sm:$0xf0] }
  0xd7   : > { %5714 = vset.pattern.permute.xlu2 %v10588_v0  ;;  %vm5351_vm3 = vmpackc.low %vm1428_vm0, %vm1424_vm2 }
  0xd8   : > { %467 = vperm.xlu2 %5714, %v283_v4   ;;  %v6643_v28 = vpop.permute.xlu0 %443  ;;  %vm1431_vm11 = vmor %vm663_vm6, %vm1175_vm7  ;;  %v6706_v4 = vld [vmem:[%s6298_s9 + $0x1f0] sm:$0xff] }
  0xd9   : > { %464 = vperm.xlu1 %5712, %v6467_v26   ;;  %v750_v26 = vadd.s32 256, %v6379_v49  ;;  %10837 = vst [vmem:[#allocation39_spill] sm:$0xff] %v6643_v28  ;;  %vm1432_vm0 = vmor %vm664_vm12, %vm1176_vm13  ;;  %v805_v12 = vadd.s32 256, %v6706_v4 }
  0xda   : > { %5286 = vmatmul.msk.bf16.gmra.mxu2 %vm5285_vm4, %v10596_v19 }
  0xdb   : > { %v6613_v9 = vpop.permute.xlu1 %431  ;;  %v6615_v10 = vpop.permute.xlu2 %955  ;;  %994 = vperm.xlu0 %5729, %v805_v12   ;;  %v236_v12 = vld [vmem:[%s6298_s9 + $0x50] sm:$0xff] }
  0xdc   : > { %10832 = vst [vmem:[#allocation34_spill] sm:$0xff] %v6613_v9  ;;  %5350 = vmatmul.msk.bf16.gmra.mxu3 %vm5349_vm5, %v10596_v19  ;;  %vm667_vm4 = vcmp.eq.s32.totalorder %v6409_v6, %v6613_v9  ;;  %vm1179_vm5 = vcmp.eq.s32.totalorder %v6409_v6, %v6595_v3  ;;  %vm668_vm8 = vcmp.eq.s32.totalorder %v6417_v11, %v6613_v9 }
  0xdd   : > { %10833 = vst [vmem:[#allocation35_spill] sm:$0xff] %v6615_v10  ;;  %vm1435_vm10 = vmor %vm667_vm4, %vm1179_vm5  ;;  %vm1183_vm4 = vcmp.eq.s32.totalorder %v6409_v6, %v6621_v13  ;;  %vm675_vm5 = vcmp.eq.s32.totalorder %v6409_v6, %v6579_v59 }
  0xde   : > { %vm1436_vm14 = vmor %vm668_vm8, %vm1180_vm9 }
  0xdf   : > { %vm5289_vm15 = vmpackc.low %vm1435_vm10, %vm1431_vm11  ;;  %vm676_vm10 = vcmp.eq.s32.totalorder %v6417_v11, %v6579_v59  ;;  %vm1184_vm11 = vcmp.eq.s32.totalorder %v6417_v11, %v6621_v13  ;;  %v5617_v59 = vld [vmem:[%s10585_s3 + $0x74] sm:$0xf] }
  0xe0   : > { %314 = vperm.xlu2 %5714, %v232_v15   ;;  %v6658_v33 = vpop.permute.xlu0 %305 }
  0xe1   : > { %5715 = vset.pattern.permute.xlu1 %v10594_v1 }
  0xe2   : > { %979 = vperm.xlu1 %5715, %v800_v20  }
  0xe3   : > { %v6628_v21 = vpop.permute.xlu1 %434 }
  0xe4   : > { %10835 = vst [vmem:[#allocation37_spill] sm:$0xff] %v6628_v21  ;;  %v6636_v22 = vpop.permute.xlu2 %449  ;;  %vm672_vm9 = vcmp.eq.s32.totalorder %v6417_v11, %v6628_v21 }
  0xe5   : > { %10836 = vst [vmem:[#allocation38_spill] sm:$0xff] %v6636_v22 }
  0xe8   : > { %5717 = vset.pattern.permute.xlu2 %v10594_v1  ;;  %v6690_v47 = vpop.permute.xlu0 %317 }
  0xe9   : > { %829 = vperm.xlu2 %5717, %v750_v26   ;;  %v6738_v26 = vld [vmem:[%s6298_s9 + $0x68] sm:$0xff] }
  0xea   : > { %5288 = vmatmul.msk.bf16.gmra.mxu2 %vm5287_vm1, %v10596_v19  ;;  %826 = vperm.xlu1 %5715, %v749_v27   ;;  %vm5353_vm1 = vmpackc.low %vm1436_vm14, %vm1432_vm0  ;;  %v756_v27 = vadd.s32 256, %v6738_v26 }
  0xeb   : > { %vm1440_vm14 = vmor %vm672_vm9, %vm1184_vm11 }
  0xec   : > { %5352 = vmatmul.msk.bf16.gmra.mxu3 %vm5351_vm3, %v10596_v19  ;;  %v6654_v49 = vpop.permute.xlu1 %949  ;;  %v6656_v32 = vpop.permute.xlu2 %296  ;;  %vm671_vm3 = vcmp.eq.s32.totalorder %v6409_v6, %v6628_v21  ;;  %847 = vperm.xlu0 %5729, %v756_v27  }
  0xed   : > { %10838 = vst [vmem:[#allocation40_spill] sm:$0xff] %v6654_v49  ;;  %vm1187_vm2 = vcmp.eq.s32.totalorder %v6409_v6, %v6654_v49  ;;  %vm1188_vm6 = vcmp.eq.s32.totalorder %v6417_v11, %v6654_v49  ;;  %vm1439_vm8 = vmor %vm671_vm3, %vm1183_vm4  ;;  %vm487_vm0 = vcmp.eq.s32.totalorder %v6409_v6, %v6656_v32 }
  0xee   : > { %vm1443_vm7 = vmor %vm675_vm5, %vm1187_vm2  ;;  %vm488_vm2 = vcmp.eq.s32.totalorder %v6417_v11, %v6656_v32 }
  0xef   : > { %vm1444_vm12 = vmor %vm676_vm10, %vm1188_vm6 }
  0xf0   : > { %vm5291_vm13 = vmpackc.low %vm1443_vm7, %vm1439_vm8 }
  0xf1   : > { %5719 = vset.pattern.permute.xlu2 %v10588_v0  ;;  %v6717_v15 = vpop.permute.xlu0 %958 }
  0xf2   : > { %5718 = vset.pattern.permute.xlu1 %v10588_v0  ;;  %473 = vperm.xlu2 %5719, %v285_v34   ;;  %10842 = vst [vmem:[#allocation44_spill] sm:$0xff] %v6717_v15 }
  0xf3   : > { %470 = vperm.xlu1 %5718, %v6494_v31  }
  0xf4   : > { %v6668_v39 = vpop.permute.xlu1 %952  ;;  %850 = vperm.xlu0 %5729, %v757_v60   ;;  %v753_v60 = vadd.s32 256, %v236_v12 }
  0xf5   : > { %10839 = vst [vmem:[#allocation41_spill] sm:$0xff] %v6668_v39  ;;  %v6678_v31 = vpop.permute.xlu2 %808 }
  0xf6   : > { %vm1000_vm3 = vcmp.eq.s32.totalorder %v6417_v11, %v6678_v31 }
  0xf7   : > { %vm6765_vm9 = vmor %vm488_vm2, %vm1000_vm3  ;;  %vm1196_vm2 = vcmp.eq.s32.totalorder %v6417_v11, %v6615_v10  ;;  %vm679_vm3 = vcmp.eq.s32.totalorder %v6409_v6, %v6593_v2 }
  0xf9   : > { %v6746_v34 = vpop.permute.xlu0 %811 }
  0xfa   : > { %5290 = vmatmul.msk.bf16.gmra.mxu2 %vm5289_vm15, %v10596_v19  ;;  %320 = vperm.xlu2 %5719, %v234_v40   ;;  %vm5355_vm15 = vmpackc.low %vm1444_vm12, %vm1440_vm14  ;;  %vm1003_vm4 = vcmp.eq.s32.totalorder %v6409_v6, %v6746_v34  ;;  %vm1004_vm8 = vcmp.eq.s32.totalorder %v6417_v11, %v6746_v34  ;;  %vm683_vm12 = vcmp.eq.s32.totalorder %v6409_v6, %v6643_v28 }
  0xfb   : > { %5720 = vset.pattern.permute.xlu1 %v10594_v1 }
  0xfc   : > { %5354 = vmatmul.msk.bf16.gmra.mxu3 %vm5353_vm1, %v10596_v19  ;;  %985 = vperm.xlu1 %5720, %v802_v46   ;;  %vm999_vm1 = vcmp.eq.s32.totalorder %v6409_v6, %v6678_v31 }
  0xfd   : > { %v6697_v51 = vpop.permute.xlu1 %446  ;;  %vm1255_vm5 = vmor %vm487_vm0, %vm999_vm1  ;;  %vm684_vm1 = vcmp.eq.s32.totalorder %v6417_v11, %v6643_v28  ;;  %v5618_v28 = vld [vmem:[%s10585_s3 + $0x74] sm:$0xf0] }
  0xfe   : > { %10840 = vst [vmem:[#allocation42_spill] sm:$0xff] %v6697_v51  ;;  %v6699_v55 = vpop.permute.xlu2 %455 }
  0xff   : > { %10841 = vst [vmem:[#allocation43_spill] sm:$0xff] %v6699_v55 }
 0x102   : > { %5722 = vset.pattern.permute.xlu2 %v10594_v1 }
 0x103   : > { %832 = vperm.xlu2 %5722, %v751_v56  }
 0x104   : > { %5721 = vset.pattern.permute.xlu1 %v10588_v0 }
 0x105   : > { %323 = vperm.xlu1 %5721, %v6508_v38   ;;  %v287_v38 = vld [vmem:[%s6298_s9 + $0x1e8] sm:$0xff] }
 0x106   : > { %v6724_v18 = vpop.permute.xlu1 %961  ;;  %v6726_v20 = vpop.permute.xlu2 %302  ;;  %v804_v56 = vadd.s32 256, %v287_v38 }
 0x107   : > { %10843 = vst [vmem:[#allocation45_spill] sm:$0xff] %v6724_v18 }
 0x10a   : > { %5292 = vmatmul.msk.bf16.gmra.mxu2 %vm5291_vm13, %v10596_v19  ;;  %vm1195_vm13 = vcmp.eq.s32.totalorder %v6409_v6, %v6615_v10 }
 0x10b   : > { %5723 = vset.pattern.permute.xlu2 %v10588_v0  ;;  %v5590_v0 = vld [vmem:[%s10583_s1 + $0x98] sm:$0xff] }
 0x10c   : > { %5356 = vmatmul.msk.bf16.gmra.mxu3 %vm5355_vm15, %v10596_v19  ;;  %479 = vperm.xlu2 %5723, %v287_v38   ;;  %vm1191_vm15 = vcmp.eq.s32.totalorder %v6409_v6, %v6668_v39 }
 0x10d   : > { %476 = vperm.xlu1 %5721, %v6534_v44   ;;  %v754_v44 = vadd.s32 256, %v6686_v41  ;;  %2753 = vmatpush.bf16.msrb.mxu2 %v5590_v0  ;;  %v5598_v0 = vld [vmem:[%s10583_s1 + $0xd8] sm:$0xff] }
 0x10e   : > { %2922 = vmatpush.bf16.msrb.mxu3 %v5598_v0  ;;  %v289_v0 = vld [vmem:[%s6298_s9 + $0x1f8] sm:$0xff] }
 0x10f   : > { %v6755_v40 = vpop.permute.xlu1 %299  ;;  %v6757_v46 = vpop.permute.xlu2 %817 }
 0x110   : > { %vm491_vm6 = vcmp.eq.s32.totalorder %v6409_v6, %v6755_v40  ;;  %vm492_vm7 = vcmp.eq.s32.totalorder %v6417_v11, %v6755_v40 }
 0x111   : > { %vm1259_vm10 = vmor %vm491_vm6, %vm1003_vm4 }
 0x112   : > { %vm5245_vm11 = vmpackc.low %vm1259_vm10, %vm1255_vm5  ;;  %vm1192_vm5 = vcmp.eq.s32.totalorder %v6417_v11, %v6668_v39 }
 0x113   : > { %5246 = vmatmul.msk.bf16.vlgmr.msra.gmra.mxu0 %vm5245_vm11, %v10596_v19  ;;  %vm1260_vm14 = vmor %vm492_vm7, %vm1004_vm8  ;;  %vm680_vm7 = vcmp.eq.s32.totalorder %v6417_v11, %v6593_v2 }
 0x114   : > { %vm5309_vm0 = vmpackc.low %vm1260_vm14, %vm6765_vm9  ;;  %326 = vperm.xlu2 %5723, %v236_v12   ;;  %v10848_v12 = vmov 0   ;;  %vm1203_vm14 = vcmp.eq.s32.totalorder %v6409_v6, %v6724_v18 }
 0x115   : > { %5310 = vmatmul.msk.bf16.vlgmr.msra.gmra.mxu1 %vm5309_vm0, %v10596_v19  ;;  %5724 = vset.pattern.permute.xlu1 %v10594_v1  ;;  %vm1451_vm4 = vmor %vm683_vm12, %vm1195_vm13  ;;  %vm687_vm12 = vcmp.eq.s32.totalorder %v6409_v6, %v6697_v51  ;;  %vm1199_vm13 = vcmp.eq.s32.totalorder %v6409_v6, %v6717_v15  ;;  %vm691_vm0 = vcmp.eq.s32.totalorder %v6409_v6, %v6636_v22 }
 0x116   : > { %991 = vperm.xlu1 %5724, %v804_v56   ;;  %vm1447_vm6 = vmor %vm679_vm3, %vm1191_vm15  ;;  %v6804_v56 = vld [vmem:[%s10584_s2] ss:$0 sm:$0xff]  ;;  %5735 = vset.pattern.permute.xlu0 %v10848_v12  ;;  %vm1204_vm15 = vcmp.eq.s32.totalorder %v6417_v11, %v6724_v18  ;;  %vm1200_vm3 = vcmp.eq.s32.totalorder %v6417_v11, %v6717_v15 }
 0x117   : > { %v6793_v38 = vpop.permute.xlu1 %452  ;;  %vm1452_vm8 = vmor %vm684_vm1, %vm1196_vm2  ;;  %vm688_vm2 = vcmp.eq.s32.totalorder %v6417_v11, %v6697_v51 }
 0x118   : > { %10846 = vst [vmem:[#allocation46_spill] sm:$0xff] %v6793_v38  ;;  %vm1448_vm9 = vmor %vm680_vm7, %vm1192_vm5  ;;  %v6797_v27 = vpop.permute.xlu2 %461  ;;  %vm692_vm5 = vcmp.eq.s32.totalorder %v6417_v11, %v6636_v22 }
 0x119   : > { %10847 = vst [vmem:[#allocation47_spill] sm:$0xff] %v6797_v27  ;;  %vm5293_vm10 = vmpackc.low %vm1451_vm4, %vm1447_vm6 }
 0x11a   : > { %5294 = vmatmul.msk.bf16.gmra.mxu2 %vm5293_vm10, %v10596_v19  ;;  %vm5357_vm11 = vmpackc.low %vm1452_vm8, %vm1448_vm9  ;;  %vm499_vm8 = vcmp.eq.s32.totalorder %v6409_v6, %v6658_v33  ;;  %vm1011_vm9 = vcmp.eq.s32.totalorder %v6409_v6, %v6757_v46 }
 0x11b   : > { %vm6832_vm1 = vmor %vm687_vm12, %vm1199_vm13  ;;  %vm1012_vm12 = vcmp.eq.s32.totalorder %v6417_v11, %v6757_v46 }
 0x11c   : > { %5358 = vmatmul.msk.bf16.gmra.mxu3 %vm5357_vm11, %v10596_v19  ;;  %5726 = vset.pattern.permute.xlu2 %v10594_v1  ;;  %vm6840_vm4 = vmor %vm691_vm0, %vm1203_vm14  ;;  %vm500_vm11 = vcmp.eq.s32.totalorder %v6417_v11, %v6658_v33 }
 0x11d   : > { %v2500_v2 = vpop.f32.mrf.mxu2  ;;  %841 = vperm.xlu2 %5726, %v754_v44   ;;  %vm6846_vm6 = vmor %vm692_vm5, %vm1204_vm15  ;;  %vm495_vm15 = vcmp.eq.s32.totalorder %v6409_v6, %v6726_v20  ;;  %v6901_v44 = vpop.permute.xlu0 %964 }
 0x11e   : > { %v2501_v41 = vadd.f32 %v6804_v56, %v2500_v2  ;;  %838 = vperm.xlu1 %5724, %v753_v60   ;;  %vm6850_vm7 = vmor %vm688_vm2, %vm1200_vm3  ;;  %10861 = vst [vmem:[#allocation51_spill] sm:$0xff] %v6901_v44 }
 0x11f   : > { %v2669_v39 = vpop.f32.mrf.mxu3  ;;  %vm5295_vm10 = vmpackc.low %vm6840_vm4, %vm6832_vm1  ;;  %vm695_vm4 = vcmp.eq.s32.totalorder %v6409_v6, %v6793_v38 }
 0x120   : > { %v6817_v1 = vadd.f32 %v2669_v39, %v2501_v41  ;;  %v6819_v19 = vpop.permute.xlu1 %967  ;;  %v6821_v10 = vpop.permute.xlu2 %308  ;;  %vm5359_vm13 = vmpackc.low %vm6846_vm6, %vm6850_vm7  ;;  %vm496_vm7 = vcmp.eq.s32.totalorder %v6417_v11, %v6726_v20 }
 0x121   : > { %10850 = vst [vmem:[#allocation49_spill] sm:$0xff] %v6819_v19  ;;  %vm1267_vm14 = vmor %vm499_vm8, %vm1011_vm9  ;;  %vm1211_vm1 = vcmp.eq.s32.totalorder %v6409_v6, %v6819_v19 }
 0x122   : > { %10849 = vst [vmem:[#allocation48_spill] sm:$0xff] %v6817_v1  ;;  %vm1268_vm3 = vmor %vm500_vm11, %vm1012_vm12  ;;  %vm699_vm11 = vcmp.eq.s32.totalorder %v6409_v6, %v6699_v55  ;;  %vm1212_vm12 = vcmp.eq.s32.totalorder %v6417_v11, %v6819_v19 }
 0x125   : > { %v2502_v60 = vpop.f32.mrf.mxu2  ;;  %5728 = vset.pattern.permute.xlu2 %v10848_v12 }
 0x126   : > { %v2503_v22 = vadd.f32 %v6804_v56, %v2502_v60  ;;  %5727 = vset.pattern.permute.xlu1 %v10848_v12  ;;  %485 = vperm.xlu2 %5728, %v289_v0  }
 0x127   : > { %v2671_v15 = vpop.f32.mrf.mxu3  ;;  %482 = vperm.xlu1 %5727, %v6706_v4   ;;  %v238_v4 = vld [vmem:[%s6298_s9 + $0x60] sm:$0xff] }
 0x128   : > { %v6875_v60 = vadd.f32 %v2671_v15, %v2503_v22  ;;  %v6877_v51 = vpop.permute.xlu1 %814  ;;  %v10860_v22 = vmov 1.0|1.0   ;;  %v806_v15 = vadd.s32 256, %v289_v0  ;;  %v5559_v0 = vld [vmem:[%s10585_s3 + $0x70] sm:$0xf]  ;;  %v755_v21 = vadd.s32 256, %v238_v4 }
 0x129   : > { %v6882_v18 = vpop.permute.xlu2 %820  ;;  %vm1007_vm0 = vcmp.eq.s32.totalorder %v6409_v6, %v6877_v51  ;;  %vm1008_vm2 = vcmp.eq.s32.totalorder %v6417_v11, %v6877_v51  ;;  %v5560_v13 = vor.u32 %v5618_v28, %v5559_v0 }
 0x12a   : > { %10859 = vst [vmem:[#allocation50_spill] sm:$0xff] %v6875_v60  ;;  %5296 = vmatmul.msk.bf16.gmra.mxu2 %vm5295_vm10, %v10860_v22  ;;  %vm1263_vm5 = vmor %vm495_vm15, %vm1007_vm0  ;;  %v10862_v60 = vmov 1   ;;  %vm1207_vm10 = vcmp.eq.s32.totalorder %v6409_v6, %v6901_v44  ;;  %vm696_vm15 = vcmp.eq.s32.totalorder %v6417_v11, %v6793_v38  ;;  %vm700_vm0 = vcmp.eq.s32.totalorder %v6417_v11, %v6699_v55  ;;  %v241_v55 = vld [vmem:[%s6298_s9 + $0x78] sm:$0xff] }
 0x12b   : > { %vm5247_vm6 = vmpackc.low %vm1267_vm14, %vm1263_vm5  ;;  %3285 = vmatpush.bf16.msrb.mxu0 %v5560_v13  ;;  %v6944_v13 = vpop.permute.xlu0 %970  ;;  %v758_v49 = vadd.s32 256, %v241_v55 }
 0x12c   : > { %5360 = vmatmul.msk.bf16.gmra.mxu3 %vm5359_vm13, %v10860_v22  ;;  %5248 = vmatmul.msk.bf16.gmra.mxu0 %vm5247_vm6, %v10860_v22  ;;  %vm1264_vm8 = vmor %vm496_vm7, %vm1008_vm2  ;;  %10868 = vst [vmem:[#allocation55_spill] sm:$0xff] %v6944_v13  ;;  %vm1208_vm2 = vcmp.eq.s32.totalorder %v6417_v11, %v6901_v44 }
 0x12d   : > { %vm5311_vm9 = vmpackc.low %vm1268_vm3, %vm1264_vm8  ;;  %v2505_v39 = vpop.f32.mrf.mxu2  ;;  %vm503_vm8 = vcmp.eq.s32.totalorder %v6409_v6, %v6821_v10 }
 0x12e   : > { %5312 = vmatmul.msk.bf16.gmra.mxu1 %vm5311_vm9, %v10860_v22  ;;  %v2506_v2 = vadd.f32 %v6804_v56, %v2505_v39  ;;  %332 = vperm.xlu2 %5728, %v238_v4   ;;  %vm6939_vm13 = vmor %vm699_vm11, %vm1211_vm1  ;;  %vm1015_vm9 = vcmp.eq.s32.totalorder %v6409_v6, %v6882_v18  ;;  %vm504_vm1 = vcmp.eq.s32.totalorder %v6417_v11, %v6821_v10 }
 0x12f   : > { %v2674_v41 = vpop.f32.mrf.mxu3  ;;  %5730 = vset.pattern.permute.xlu1 %v10862_v60  ;;  %vm1463_vm14 = vmor %vm695_vm4, %vm1207_vm10  ;;  %vm1016_vm4 = vcmp.eq.s32.totalorder %v6417_v11, %v6882_v18  ;;  %vm1215_vm11 = vcmp.eq.s32.totalorder %v6409_v6, %v6944_v13 }
 0x130   : > { %v6906_v1 = vadd.f32 %v2674_v41, %v2506_v2  ;;  %997 = vperm.xlu1 %5730, %v806_v15   ;;  %v5561_v2 = vld [vmem:[%s10585_s3 + $0x78] sm:$0xf0]  ;;  %v6923_v15 = vld [vmem:[%s6298_s9 + $0x88] sm:$0xff]  ;;  %vm1468_vm3 = vmor %vm700_vm0, %vm1212_vm12 }
 0x131   : > { %v6917_v39 = vpop.permute.xlu1 %458  ;;  %347 = vperm.xlu0 %5735, %v6923_v15   ;;  %vm5297_vm5 = vmpackc.low %vm6939_vm13, %vm1463_vm14 }
 0x132   : > { %10863 = vst [vmem:[#allocation52_spill] sm:$0xff] %v6906_v1  ;;  %v6925_v41 = vpop.permute.xlu2 %467  ;;  %v5564_v1 = vor.u32 %v5617_v59, %v5561_v2  ;;  %vm1464_vm6 = vmor %vm696_vm15, %vm1208_vm2  ;;  %vm703_vm10 = vcmp.eq.s32.totalorder %v6409_v6, %v6917_v39  ;;  %vm707_vm2 = vcmp.eq.s32.totalorder %v6409_v6, %v6797_v27 }
 0x133   : > { %10864 = vst [vmem:[#allocation53_spill] sm:$0xff] %v6917_v39  ;;  %vm5361_vm7 = vmpackc.low %vm1468_vm3, %vm1464_vm6  ;;  %v6998_v38 = vpop.permute.xlu0 %823  ;;  %vm708_vm6 = vcmp.eq.s32.totalorder %v6417_v11, %v6797_v27 }
 0x134   : > { %10865 = vst [vmem:[#allocation54_spill] sm:$0xff] %v6925_v41  ;;  %3454 = vmatpush.bf16.msrb.mxu1 %v5564_v1  ;;  %vm6989_vm12 = vmor %vm503_vm8, %vm1015_vm9  ;;  %vm1019_vm0 = vcmp.eq.s32.totalorder %v6409_v6, %v6998_v38  ;;  %vm1020_vm9 = vcmp.eq.s32.totalorder %v6417_v11, %v6998_v38 }
 0x135   : > { %v2507_v28 = vpop.f32.mrf.mxu2  ;;  %vm7004_vm14 = vmor %vm504_vm1, %vm1016_vm4 }
 0x136   : > { %v2508_v59 = vadd.f32 %v6804_v56, %v2507_v28  ;;  %5732 = vset.pattern.permute.xlu2 %v10862_v60  ;;  %vm7014_vm3 = vmor %vm703_vm10, %vm1215_vm11 }
 0x137   : > { %v2676_v0 = vpop.f32.mrf.mxu3  ;;  %844 = vperm.xlu2 %5732, %v755_v21   ;;  %v6965_v21 = vld [vmem:[%s6298_s9 + $0x90] sm:$0xff] }
 0x138   : > { %v6952_v1 = vadd.f32 %v2676_v0, %v2508_v59  ;;  %5731 = vset.pattern.permute.xlu1 %v10848_v12  ;;  %v761_v59 = vadd.s32 256, %v6965_v21 }
 0x139   : > { %335 = vperm.xlu1 %5731, %v6738_v26   ;;  %5739 = vset.pattern.permute.xlu0 %v10862_v60  ;;  %v5589_v26 = vld [vmem:[%s10583_s1 + $0x90] sm:$0xff] }
 0x13a   : > { %10869 = vst [vmem:[#allocation56_spill] sm:$0xff] %v6952_v1  ;;  %v6958_v2 = vpop.permute.xlu1 %973  ;;  %5298 = vmatmul.msk.bf16.gmra.mxu2 %vm5297_vm5, %v10860_v22  ;;  %v6961_v28 = vpop.permute.xlu2 %314  ;;  %862 = vperm.xlu0 %5739, %v761_v59  }
 0x13b   : > { %10870 = vst [vmem:[#allocation57_spill] sm:$0xff] %v6958_v2  ;;  %2754 = vmatpush.bf16.msrb.mxu2 %v5589_v26  ;;  %vm1219_vm13 = vcmp.eq.s32.totalorder %v6409_v6, %v6958_v2  ;;  %v5597_v26 = vld [vmem:[%s10583_s1 + $0xd0] sm:$0xff]  ;;  %vm1220_vm15 = vcmp.eq.s32.totalorder %v6417_v11, %v6958_v2 }
 0x13c   : > { %5362 = vmatmul.msk.bf16.gmra.mxu3 %vm5361_vm7, %v10860_v22  ;;  %vm7023_vm5 = vmor %vm707_vm2, %vm1219_vm13  ;;  %vm704_vm13 = vcmp.eq.s32.totalorder %v6417_v11, %v6917_v39 }
 0x13d   : > { %v2510_v4 = vpop.f32.mrf.mxu2  ;;  %2923 = vmatpush.bf16.msrb.mxu3 %v5597_v26  ;;  %vm7038_vm1 = vmor %vm708_vm6, %vm1220_vm15  ;;  %vm1216_vm15 = vcmp.eq.s32.totalorder %v6417_v11, %v6944_v13  ;;  %v5551_v26 = vld [vmem:[%s10585_s3 + $0x60] sm:$0xf] }
 0x13e   : > { %v2511_v0 = vadd.f32 %v6804_v56, %v2510_v4  ;;  %vm1472_vm2 = vmor %vm704_vm13, %vm1216_vm15 }
 0x13f   : > { %v2679_v1 = vpop.f32.mrf.mxu3  ;;  %5733 = vset.pattern.permute.xlu2 %v10848_v12 }
 0x140   : > { %v6987_v59 = vadd.f32 %v2679_v1, %v2511_v0  ;;  %341 = vperm.xlu2 %5733, %v241_v55   ;;  %v760_v0 = vadd.s32 256, %v6923_v15  ;;  %v5615_v15 = vld [vmem:[%s10585_s3 + $0x64] sm:$0xf] }
 0x141   : > { %338 = vperm.xlu1 %5731, %v6770_v48   ;;  %v7019_v48 = vld [vmem:[%s6298_s9 + $0xa8] sm:$0xff] }
 0x142   : > { %10871 = vst [vmem:[#allocation58_spill] sm:$0xff] %v6987_v59  ;;  %v764_v2 = vadd.s32 256, %v7019_v48 }
 0x143   : > { %v7021_v59 = vpop.permute.xlu1 %311  ;;  %v7030_v44 = vpop.permute.xlu2 %829 }
 0x144   : > { %vm507_vm7 = vcmp.eq.s32.totalorder %v6409_v6, %v7021_v59  ;;  %vm508_vm8 = vcmp.eq.s32.totalorder %v6417_v11, %v7021_v59  ;;  %871 = vperm.xlu0 %5739, %v764_v2   ;;  %v7060_v2 = vld [vmem:[%s6298_s9 + $0xb0] sm:$0xff] }
 0x145   : > { %v7042_v27 = vpop.f32.mrf.mxu2  ;;  %vm1275_vm4 = vmor %vm507_vm7, %vm1019_vm0  ;;  %v765_v55 = vadd.s32 256, %v7060_v2 }
 0x146   : > { %10882 = vst [vmem:[#allocation59_spill] sm:$0xff] %v7042_v27  ;;  %vm5249_vm10 = vmpackc.low %vm1275_vm4, %vm6989_vm12  ;;  %v242_v27 = vld [vmem:[%s6298_s9 + $0x80] sm:$0xff] }
 0x147   : > { %v7049_v54 = vpop.f32.mrf.mxu3  ;;  %5250 = vmatmul.msk.bf16.gmra.mxu0 %vm5249_vm10, %v10860_v22  ;;  %vm1276_vm11 = vmor %vm508_vm8, %vm1020_vm9  ;;  %v759_v13 = vadd.s32 256, %v242_v27  ;;  %vm716_vm10 = vcmp.eq.s32.totalorder %v6417_v11, %v6925_v41 }
 0x148   : > { %10883 = vst [vmem:[#allocation60_spill] sm:$0xff] %v7049_v54  ;;  %vm5313_vm0 = vmpackc.low %vm1276_vm11, %vm7004_vm14  ;;  %344 = vperm.xlu2 %5733, %v242_v27   ;;  %v5553_v27 = vld [vmem:[%s10585_s3 + $0x68] sm:$0xf0] }
 0x149   : > { %5314 = vmatmul.msk.bf16.gmra.mxu1 %vm5313_vm0, %v10860_v22  ;;  %5734 = vset.pattern.permute.xlu1 %v10862_v60  ;;  %vm5299_vm12 = vmpackc.low %vm7023_vm5, %vm7014_vm3  ;;  %vm715_vm5 = vcmp.eq.s32.totalorder %v6409_v6, %v6925_v41  ;;  %vm1027_vm0 = vcmp.eq.s32.totalorder %v6409_v6, %v7030_v44 }
 0x14a   : > { %853 = vperm.xlu1 %5734, %v758_v49   ;;  %5300 = vmatmul.msk.bf16.gmra.mxu2 %vm5299_vm12, %v10860_v22  ;;  %vm5363_vm14 = vmpackc.low %vm7038_vm1, %vm1472_vm2  ;;  %vm1028_vm2 = vcmp.eq.s32.totalorder %v6417_v11, %v7030_v44 }
 0x14b   : > { %v7072_v4 = vpop.permute.xlu1 %464 }
 0x14c   : > { %10884 = vst [vmem:[#allocation61_spill] sm:$0xff] %v7072_v4  ;;  %5364 = vmatmul.msk.bf16.gmra.mxu3 %vm5363_vm14, %v10860_v22  ;;  %v7075_v1 = vpop.permute.xlu2 %473  ;;  %874 = vperm.xlu0 %5739, %v765_v55   ;;  %v5556_v55 = vor.u32 %v5615_v15, %v5553_v27  ;;  %vm711_vm3 = vcmp.eq.s32.totalorder %v6409_v6, %v7072_v4 }
 0x14d   : > { %10885 = vst [vmem:[#allocation62_spill] sm:$0xff] %v7075_v1  ;;  %v2515_v54 = vpop.f32.mrf.mxu2  ;;  %vm712_vm4 = vcmp.eq.s32.totalorder %v6417_v11, %v7072_v4 }
 0x14e   : > { %v2516_v19 = vadd.f32 %v6804_v56, %v2515_v54  ;;  %v5552_v54 = vor.u32 %v5616_v43, %v5551_v26  ;;  %3455 = vmatpush.bf16.msrb.mxu1 %v5556_v55 }
 0x14f   : > { %v2684_v49 = vpop.f32.mrf.mxu3 }
 0x150   : > { %v7079_v39 = vadd.f32 %v2684_v49, %v2516_v19  ;;  %5736 = vset.pattern.permute.xlu2 %v10862_v60  ;;  %3286 = vmatpush.bf16.msrb.mxu0 %v5552_v54  ;;  %v5588_v54 = vld [vmem:[%s10583_s1 + $0x88] sm:$0xff] }
 0x151   : > { %859 = vperm.xlu2 %5736, %v760_v0   ;;  %2755 = vmatpush.bf16.msrb.mxu2 %v5588_v54 }
 0x152   : > { %10886 = vst [vmem:[#allocation63_spill] sm:$0xff] %v7079_v39  ;;  %856 = vperm.xlu1 %5734, %v759_v13   ;;  %v7100_v39 = vpop.permute.xlu0 %976  ;;  %v245_v13 = vld [vmem:[%s6298_s9 + $0x98] sm:$0xff] }
 0x153   : > { %10888 = vst [vmem:[#allocation65_spill] sm:$0xff] %v7100_v39  ;;  %vm1223_vm8 = vcmp.eq.s32.totalorder %v6409_v6, %v7100_v39  ;;  %vm1224_vm15 = vcmp.eq.s32.totalorder %v6417_v11, %v7100_v39 }
 0x154   : > { %v7094_v19 = vpop.permute.xlu1 %979  ;;  %v7098_v49 = vpop.permute.xlu2 %320  ;;  %5745 = vset.pattern.permute.xlu0 %v10848_v12  ;;  %vm1479_vm1 = vmor %vm711_vm3, %vm1223_vm8  ;;  %vm515_vm3 = vcmp.eq.s32.totalorder %v6409_v6, %v6690_v47 }
 0x155   : > { %10887 = vst [vmem:[#allocation64_spill] sm:$0xff] %v7094_v19  ;;  %v7102_v3 = vpop.f32.mrf.mxu2  ;;  %vm1227_vm6 = vcmp.eq.s32.totalorder %v6409_v6, %v7094_v19  ;;  %vm1228_vm7 = vcmp.eq.s32.totalorder %v6417_v11, %v7094_v19  ;;  %vm1480_vm12 = vmor %vm712_vm4, %vm1224_vm15  ;;  %v246_v19 = vld [vmem:[%s6298_s9 + $0xa0] sm:$0xff] }
 0x156   : > { %10889 = vst [vmem:[#allocation66_spill] sm:$0xff] %v7102_v3  ;;  %vm1483_vm9 = vmor %vm715_vm5, %vm1227_vm6  ;;  %vm516_vm6 = vcmp.eq.s32.totalorder %v6417_v11, %v6690_v47 }
 0x157   : > { %v7113_v43 = vpop.f32.mrf.mxu3  ;;  %vm1484_vm11 = vmor %vm716_vm10, %vm1228_vm7  ;;  %vm511_vm7 = vcmp.eq.s32.totalorder %v6409_v6, %v6961_v28 }
 0x158   : > { %10890 = vst [vmem:[#allocation67_spill] sm:$0xff] %v7113_v43  ;;  %vm5301_vm13 = vmpackc.low %vm1483_vm9, %vm1479_vm1  ;;  %v762_v43 = vadd.s32 256, %v245_v13 }
 0x159   : > { %5738 = vset.pattern.permute.xlu2 %v10848_v12  ;;  %vm5365_vm14 = vmpackc.low %vm1484_vm11, %vm1480_vm12  ;;  %vm512_vm11 = vcmp.eq.s32.totalorder %v6417_v11, %v6961_v28 }
 0x15a   : > { %5737 = vset.pattern.permute.xlu1 %v10848_v12  ;;  %5302 = vmatmul.msk.bf16.gmra.mxu2 %vm5301_vm13, %v10860_v22  ;;  %vm7135_vm5 = vmor %vm515_vm3, %vm1027_vm0 }
 0x15b   : > { %350 = vperm.xlu1 %5737, %v6965_v21   ;;  %353 = vperm.xlu2 %5738, %v245_v13   ;;  %vm7147_vm1 = vmor %vm516_vm6, %vm1028_vm2  ;;  %v7187_v21 = vpop.permute.xlu0 %982 }
 0x15c   : > { %5366 = vmatmul.msk.bf16.gmra.mxu3 %vm5365_vm14, %v10860_v22  ;;  %v7133_v0 = vpop.permute.xlu1 %826  ;;  %10900 = vst [vmem:[#allocation73_spill] sm:$0xff] %v7187_v21  ;;  %vm1231_vm2 = vcmp.eq.s32.totalorder %v6409_v6, %v7187_v21  ;;  %vm1232_vm3 = vcmp.eq.s32.totalorder %v6417_v11, %v7187_v21  ;;  %v7219_v21 = vld [vmem:[%s6298_s9 + $0xd0] sm:$0xff] }
 0x15d   : > { %v2520_v15 = vpop.f32.mrf.mxu2  ;;  %vm1023_vm8 = vcmp.eq.s32.totalorder %v6409_v6, %v7133_v0  ;;  %vm1024_vm9 = vcmp.eq.s32.totalorder %v6417_v11, %v7133_v0  ;;  %v7155_v55 = vpop.permute.xlu2 %832 }
 0x15e   : > { %v2521_v27 = vadd.f32 %v6804_v56, %v2520_v15  ;;  %vm1279_vm4 = vmor %vm511_vm7, %vm1023_vm8  ;;  %v5596_v15 = vld [vmem:[%s10583_s1 + $0xc8] sm:$0xff] }
 0x15f   : > { %v2689_v39 = vpop.f32.mrf.mxu3  ;;  %vm5251_vm10 = vmpackc.low %vm7135_vm5, %vm1279_vm4  ;;  %2924 = vmatpush.bf16.msrb.mxu3 %v5596_v15  ;;  %vm723_vm5 = vcmp.eq.s32.totalorder %v6409_v6, %v7075_v1  ;;  %vm724_vm4 = vcmp.eq.s32.totalorder %v6417_v11, %v7075_v1 }
 0x160   : > { %v7161_v41 = vadd.f32 %v2689_v39, %v2521_v27  ;;  %5252 = vmatmul.msk.bf16.gmra.mxu0 %vm5251_vm10, %v10860_v22  ;;  %vm1280_vm13 = vmor %vm512_vm11, %vm1024_vm9  ;;  %v763_v27 = vadd.s32 256, %v246_v19 }
 0x161   : > { %vm5315_vm15 = vmpackc.low %vm7147_vm1, %vm1280_vm13  ;;  %vm519_vm13 = vcmp.eq.s32.totalorder %v6409_v6, %v7098_v49 }
 0x162   : > { %10895 = vst [vmem:[#allocation68_spill] sm:$0xff] %v7161_v41  ;;  %5316 = vmatmul.msk.bf16.gmra.mxu1 %vm5315_vm15, %v10860_v22  ;;  %v7181_v41 = vld [vmem:[%s6298_s9 + $0xc8] sm:$0xff]  ;;  %vm1031_vm15 = vcmp.eq.s32.totalorder %v6409_v6, %v7155_v55 }
 0x163   : > { %5740 = vset.pattern.permute.xlu1 %v10862_v60  ;;  %356 = vperm.xlu2 %5738, %v246_v19  }
 0x164   : > { %865 = vperm.xlu1 %5740, %v762_v43   ;;  %371 = vperm.xlu0 %5745, %v7181_v41  }
 0x165   : > { %v7172_v39 = vpop.f32.mrf.mxu2  ;;  %v7174_v26 = vpop.permute.xlu1 %470  ;;  %2925 = vmatpush.bf16.msrb.mxu3 %v5595_v37 }
 0x166   : > { %10896 = vst [vmem:[#allocation69_spill] sm:$0xff] %v7172_v39  ;;  %v7176_v13 = vpop.permute.xlu2 %479  ;;  %vm719_vm0 = vcmp.eq.s32.totalorder %v6409_v6, %v7174_v26  ;;  %vm720_vm12 = vcmp.eq.s32.totalorder %v6417_v11, %v7174_v26  ;;  %v5543_v39 = vld [vmem:[%s10585_s3 + $0x50] sm:$0xf] }
 0x167   : > { %10897 = vst [vmem:[#allocation70_spill] sm:$0xff] %v7174_v26  ;;  %v7178_v54 = vpop.f32.mrf.mxu3  ;;  %vm7198_vm14 = vmor %vm719_vm0, %vm1231_vm2  ;;  %vm520_vm0 = vcmp.eq.s32.totalorder %v6417_v11, %v7098_v49 }
 0x168   : > { %10898 = vst [vmem:[#allocation71_spill] sm:$0xff] %v7176_v13  ;;  %vm7212_vm8 = vmor %vm720_vm12, %vm1232_vm3  ;;  %vm1032_vm12 = vcmp.eq.s32.totalorder %v6417_v11, %v7155_v55 }
 0x169   : > { %10899 = vst [vmem:[#allocation72_spill] sm:$0xff] %v7178_v54  ;;  %vm1287_vm2 = vmor %vm519_vm13, %vm1031_vm15 }
 0x16b   : > { %5742 = vset.pattern.permute.xlu2 %v10862_v60 }
 0x16c   : > { %5741 = vset.pattern.permute.xlu1 %v10848_v12  ;;  %868 = vperm.xlu2 %5742, %v763_v27  }
 0x16d   : > { %v2525_v43 = vpop.f32.mrf.mxu2  ;;  %359 = vperm.xlu1 %5741, %v7019_v48   ;;  %5749 = vset.pattern.permute.xlu0 %v10862_v60  ;;  %v7256_v48 = vpop.permute.xlu0 %835 }
 0x16e   : > { %v2526_v19 = vadd.f32 %v6804_v56, %v2525_v43  ;;  %v7196_v15 = vpop.permute.xlu1 %985  ;;  %v7204_v26 = vpop.permute.xlu2 %326  ;;  %vm1035_vm3 = vcmp.eq.s32.totalorder %v6409_v6, %v7256_v48 }
 0x16f   : > { %10901 = vst [vmem:[#allocation74_spill] sm:$0xff] %v7196_v15  ;;  %v2694_v27 = vpop.f32.mrf.mxu3  ;;  %vm1235_vm6 = vcmp.eq.s32.totalorder %v6409_v6, %v7196_v15  ;;  %vm1236_vm7 = vcmp.eq.s32.totalorder %v6417_v11, %v7196_v15  ;;  %v769_v15 = vadd.s32 256, %v7219_v21 }
 0x170   : > { %v7216_v43 = vadd.f32 %v2694_v27, %v2526_v19  ;;  %vm1491_vm9 = vmor %vm723_vm5, %vm1235_vm6  ;;  %v5614_v19 = vld [vmem:[%s10585_s3 + $0x54] sm:$0xf0]  ;;  %v5613_v27 = vld [vmem:[%s10585_s3 + $0x54] sm:$0xf] }
 0x171   : > { %vm5303_vm1 = vmpackc.low %vm1491_vm9, %vm7198_vm14  ;;  %v5544_v54 = vor.u32 %v5614_v19, %v5543_v39  ;;  %886 = vperm.xlu0 %5749, %v769_v15   ;;  %v249_v15 = vld [vmem:[%s6298_s9 + $0xb8] sm:$0xff]  ;;  %vm1036_vm9 = vcmp.eq.s32.totalorder %v6417_v11, %v7256_v48 }
 0x172   : > { %10906 = vst [vmem:[#allocation75_spill] sm:$0xff] %v7216_v43  ;;  %5304 = vmatmul.msk.bf16.gmra.mxu2 %vm5303_vm1, %v10860_v22  ;;  %vm1492_vm10 = vmor %vm724_vm4, %vm1236_vm7  ;;  %v5545_v43 = vld [vmem:[%s10585_s3 + $0x58] sm:$0xf0] }
 0x173   : > { %vm5367_vm11 = vmpackc.low %vm1492_vm10, %vm7212_vm8  ;;  %v5548_v1 = vor.u32 %v5613_v27, %v5545_v43  ;;  %3287 = vmatpush.bf16.msrb.mxu0 %v5544_v54  ;;  %v5587_v27 = vld [vmem:[%s10583_s1 + $0x80] sm:$0xff] }
 0x174   : > { %5368 = vmatmul.msk.bf16.gmra.mxu3 %vm5367_vm11, %v10860_v22  ;;  %5743 = vset.pattern.permute.xlu2 %v10848_v12  ;;  %vm1288_vm6 = vmor %vm520_vm0, %vm1032_vm12  ;;  %vm731_vm12 = vcmp.eq.s32.totalorder %v6409_v6, %v7176_v13 }
 0x175   : > { %v7248_v39 = vpop.f32.mrf.mxu2  ;;  %362 = vperm.xlu1 %5741, %v7060_v2   ;;  %3456 = vmatpush.bf16.msrb.mxu1 %v5548_v1  ;;  %v766_v1 = vadd.s32 256, %v249_v15 }
 0x176   : > { %10907 = vst [vmem:[#allocation76_spill] sm:$0xff] %v7248_v39  ;;  %365 = vperm.xlu2 %5743, %v249_v15   ;;  %2756 = vmatpush.bf16.msrb.mxu2 %v5587_v27 }
 0x177   : > { %v7258_v43 = vpop.f32.mrf.mxu3  ;;  %v7260_v19 = vpop.permute.xlu1 %323 }
 0x178   : > { %10908 = vst [vmem:[#allocation77_spill] sm:$0xff] %v7258_v43  ;;  %vm523_vm14 = vcmp.eq.s32.totalorder %v6409_v6, %v7260_v19  ;;  %vm524_vm5 = vcmp.eq.s32.totalorder %v6417_v11, %v7260_v19  ;;  %v7268_v2 = vpop.permute.xlu2 %841  ;;  %v250_v43 = vld [vmem:[%s6298_s9 + $0xc0] sm:$0xff] }
 0x179   : > { %vm1291_vm7 = vmor %vm523_vm14, %vm1035_vm3  ;;  %v767_v63 = vadd.s32 256, %v250_v43  ;;  %895 = vperm.xlu0 %5749, %v772_v58   ;;  %v7312_v58 = vld [vmem:[%s6298_s9 + $0xf0] sm:$0xff] }
 0x17a   : > { %vm5253_vm8 = vmpackc.low %vm1291_vm7, %vm1287_vm2  ;;  %vm732_vm7 = vcmp.eq.s32.totalorder %v6417_v11, %v7176_v13 }
 0x17b   : > { %5254 = vmatmul.msk.bf16.gmra.mxu0 %vm5253_vm8, %v10860_v22  ;;  %vm1292_vm1 = vmor %vm524_vm5, %vm1036_vm9 }
 0x17c   : > { %vm5317_vm4 = vmpackc.low %vm1292_vm1, %vm1288_vm6  ;;  %vm1043_vm1 = vcmp.eq.s32.totalorder %v6409_v6, %v7268_v2 }
 0x17d   : > { %5318 = vmatmul.msk.bf16.gmra.mxu1 %vm5317_vm4, %v10860_v22  ;;  %v2530_v54 = vpop.f32.mrf.mxu2  ;;  %5744 = vset.pattern.permute.xlu1 %v10862_v60 }
 0x17e   : > { %v2531_v39 = vadd.f32 %v6804_v56, %v2530_v54  ;;  %877 = vperm.xlu1 %5744, %v766_v1   ;;  %368 = vperm.xlu2 %5743, %v250_v43   ;;  %v7293_v1 = vpop.permute.xlu0 %988  ;;  %v768_v54 = vadd.s32 256, %v7181_v41  ;;  %v773_v41 = vadd.s32 256, %v7312_v58 }
 0x17f   : > { %v2699_v15 = vpop.f32.mrf.mxu3  ;;  %v7280_v4 = vpop.permute.xlu1 %476  ;;  %10912 = vst [vmem:[#allocation81_spill] sm:$0xff] %v7293_v1  ;;  %vm1239_vm13 = vcmp.eq.s32.totalorder %v6409_v6, %v7293_v1  ;;  %vm1240_vm0 = vcmp.eq.s32.totalorder %v6417_v11, %v7293_v1 }
 0x180   : > { %10909 = vst [vmem:[#allocation78_spill] sm:$0xff] %v7280_v4  ;;  %v7282_v3 = vadd.f32 %v2699_v15, %v2531_v39  ;;  %v7284_v9 = vpop.permute.xlu2 %485  ;;  %vm727_vm10 = vcmp.eq.s32.totalorder %v6409_v6, %v7280_v4  ;;  %vm728_vm11 = vcmp.eq.s32.totalorder %v6417_v11, %v7280_v4 }
 0x181   : > { %10911 = vst [vmem:[#allocation80_spill] sm:$0xff] %v7284_v9  ;;  %vm1495_vm15 = vmor %vm727_vm10, %vm1239_vm13  ;;  %898 = vperm.xlu0 %5749, %v773_v41  }
 0x182   : > { %10910 = vst [vmem:[#allocation79_spill] sm:$0xff] %v7282_v3  ;;  %vm7320_vm3 = vmor %vm728_vm11, %vm1240_vm0  ;;  %vm1044_vm11 = vcmp.eq.s32.totalorder %v6417_v11, %v7268_v2  ;;  %vm527_vm0 = vcmp.eq.s32.totalorder %v6409_v6, %v7204_v26 }
 0x185   : > { %v7296_v39 = vpop.f32.mrf.mxu2 }
 0x186   : > { %10913 = vst [vmem:[#allocation82_spill] sm:$0xff] %v7296_v39  ;;  %880 = vperm.xlu1 %5744, %v767_v63   ;;  %5746 = vset.pattern.permute.xlu2 %v10862_v60  ;;  %v7327_v15 = vpop.permute.xlu0 %329  ;;  %v253_v63 = vld [vmem:[%s6298_s9 + $0xd8] sm:$0xff] }
 0x187   : > { %v7303_v27 = vpop.f32.mrf.mxu3  ;;  %883 = vperm.xlu2 %5746, %v768_v54   ;;  %vm531_vm9 = vcmp.eq.s32.totalorder %v6409_v6, %v7327_v15  ;;  %vm532_vm10 = vcmp.eq.s32.totalorder %v6417_v11, %v7327_v15  ;;  %v770_v53 = vadd.s32 256, %v253_v63 }
 0x188   : > { %10914 = vst [vmem:[#allocation83_spill] sm:$0xff] %v7303_v27  ;;  %v7307_v37 = vpop.permute.xlu1 %991  ;;  %v7325_v43 = vpop.permute.xlu2 %332  ;;  %vm7346_vm13 = vmor %vm531_vm9, %vm1043_vm1 }
 0x189   : > { %10915 = vst [vmem:[#allocation84_spill] sm:$0xff] %v7307_v37  ;;  %vm1243_vm2 = vcmp.eq.s32.totalorder %v6409_v6, %v7307_v37  ;;  %vm1244_vm14 = vcmp.eq.s32.totalorder %v6417_v11, %v7307_v37  ;;  %v5537_v37 = vld [vmem:[%s10585_s3 + $0x48] sm:$0xf0] }
 0x18a   : > { %vm1499_vm5 = vmor %vm731_vm12, %vm1243_vm2 }
 0x18b   : > { %vm5305_vm6 = vmpackc.low %vm1499_vm5, %vm1495_vm15  ;;  %vm528_vm5 = vcmp.eq.s32.totalorder %v6417_v11, %v7204_v26 }
 0x18c   : > { %5306 = vmatmul.msk.bf16.gmra.mxu2 %vm5305_vm6, %v10860_v22  ;;  %vm1500_vm8 = vmor %vm732_vm7, %vm1244_vm14 }
 0x18d   : > { %vm5369_vm4 = vmpackc.low %vm1500_vm8, %vm7320_vm3  ;;  %v2535_v54 = vpop.f32.mrf.mxu2 }
 0x18e   : > { %5370 = vmatmul.msk.bf16.gmra.mxu3 %vm5369_vm4, %v10860_v22  ;;  %v2536_v41 = vadd.f32 %v6804_v56, %v2535_v54  ;;  %5747 = vset.pattern.permute.xlu1 %v10848_v12  ;;  %vm7356_vm15 = vmor %vm532_vm10, %vm1044_vm11  ;;  %v7401_v4 = vpop.permute.xlu0 %994  ;;  %vm739_vm11 = vcmp.eq.s32.totalorder %v6409_v6, %v7284_v9 }
 0x18f   : > { %v2704_v3 = vpop.f32.mrf.mxu3  ;;  %374 = vperm.xlu1 %5747, %v7219_v21   ;;  %5748 = vset.pattern.permute.xlu2 %v10848_v12  ;;  %v5612_v21 = vld [vmem:[%s10585_s3 + $0x44] sm:$0xf0]  ;;  %10926 = vst [vmem:[#allocation89_spill] sm:$0xff] %v7401_v4  ;;  %vm1247_vm9 = vcmp.eq.s32.totalorder %v6409_v6, %v7401_v4  ;;  %vm1248_vm4 = vcmp.eq.s32.totalorder %v6417_v11, %v7401_v4  ;;  %v7485_v4 = vadd.s32 384, %v6409_v6 }
 0x190   : > { %v7352_v39 = vadd.f32 %v2704_v3, %v2536_v41  ;;  %v7354_v1 = vpop.permute.xlu1 %838  ;;  %v2420_v13 = vpop.f32.mrf.mxu0  ;;  %377 = vperm.xlu2 %5748, %v253_v63   ;;  %v5535_v3 = vld [vmem:[%s10585_s3 + $0x40] sm:$0xf] }
 0x191   : > { %v2421_v54 = vadd.f32 %v6804_v56, %v2420_v13  ;;  %vm1039_vm12 = vcmp.eq.s32.totalorder %v6409_v6, %v7354_v1  ;;  %vm1040_vm2 = vcmp.eq.s32.totalorder %v6417_v11, %v7354_v1  ;;  %v5611_v13 = vld [vmem:[%s10585_s3 + $0x44] sm:$0xf]  ;;  %v7386_v52 = vpop.permute.xlu2 %844 }
 0x192   : > { %10920 = vst [vmem:[#allocation85_spill] sm:$0xff] %v7352_v39  ;;  %v2589_v41 = vpop.f32.mrf.mxu1  ;;  %vm1295_vm14 = vmor %vm527_vm0, %vm1039_vm12  ;;  %v5536_v39 = vor.u32 %v5612_v21, %v5535_v3  ;;  %v5540_v30 = vor.u32 %v5611_v13, %v5537_v37  ;;  %v254_v37 = vld [vmem:[%s6298_s9 + $0xe0] sm:$0xff] }
 0x193   : > { %v7379_v24 = vadd.f32 %v2589_v41, %v2421_v54  ;;  %vm5255_vm3 = vmpackc.low %vm7346_vm13, %vm1295_vm14  ;;  %vm740_vm14 = vcmp.eq.s32.totalorder %v6417_v11, %v7284_v9 }
 0x194   : > { %5256 = vmatmul.msk.bf16.gmra.mxu0 %vm5255_vm3, %v10860_v22  ;;  %vm1296_vm6 = vmor %vm528_vm5, %vm1040_vm2  ;;  %3457 = vmatpush.bf16.msrb.mxu1 %v5540_v30 }
 0x195   : > { %vm5319_vm7 = vmpackc.low %vm7356_vm15, %vm1296_vm6  ;;  %v7390_v3 = vpop.f32.mrf.mxu2  ;;  %3288 = vmatpush.bf16.msrb.mxu0 %v5536_v39  ;;  %v771_v39 = vadd.s32 256, %v254_v37  ;;  %vm535_vm6 = vcmp.eq.s32.totalorder %v6409_v6, %v7325_v43 }
 0x196   : > { %10923 = vst [vmem:[#allocation86_spill] sm:$0xff] %v7390_v3  ;;  %5320 = vmatmul.msk.bf16.gmra.mxu1 %vm5319_vm7, %v10860_v22  ;;  %vm1047_vm7 = vcmp.eq.s32.totalorder %v6409_v6, %v7386_v52 }
 0x197   : > { %v7393_v27 = vpop.f32.mrf.mxu3  ;;  %5750 = vset.pattern.permute.xlu1 %v10862_v60 }
 0x198   : > { %10924 = vst [vmem:[#allocation87_spill] sm:$0xff] %v7393_v27  ;;  %889 = vperm.xlu1 %5750, %v770_v53   ;;  %380 = vperm.xlu2 %5748, %v254_v37   ;;  %v7415_v41 = vpop.f32.mrf.mxu0 }
 0x199   : > { %v7397_v54 = vpop.permute.xlu1 %482 }
 0x19a   : > { %10925 = vst [vmem:[#allocation88_spill] sm:$0xff] %v7397_v54  ;;  %v7399_v63 = vpop.permute.xlu2 %341  ;;  %vm735_vm8 = vcmp.eq.s32.totalorder %v6409_v6, %v7397_v54  ;;  %vm736_vm1 = vcmp.eq.s32.totalorder %v6417_v11, %v7397_v54  ;;  %v7472_v54 = vadd.s32 256, %v6409_v6 }
 0x19b   : > { %vm1503_vm10 = vmor %vm735_vm8, %vm1247_vm9  ;;  %vm536_vm8 = vcmp.eq.s32.totalorder %v6417_v11, %v7325_v43  ;;  %vm1048_vm9 = vcmp.eq.s32.totalorder %v6417_v11, %v7386_v52 }
 0x19c   : > { %vm1504_vm0 = vmor %vm736_vm1, %vm1248_vm4 }
 0x19d   : > { %v2540_v21 = vpop.f32.mrf.mxu2  ;;  %vm7455_vm1 = vmor %vm535_vm6, %vm1047_vm7  ;;  %vm489_vm6 = vcmp.eq.s32.totalorder %v7472_v54, %v6656_v32  ;;  %vm1001_vm7 = vcmp.eq.s32.totalorder %v7472_v54, %v6678_v31 }
 0x19e   : > { %v2541_v13 = vadd.f32 %v6804_v56, %v2540_v21  ;;  %v7421_v21 = vpop.f32.mrf.mxu1 }
 0x19f   : > { %v2709_v30 = vpop.f32.mrf.mxu3 }
 0x1a0   : > { %v7408_v53 = vadd.f32 %v2709_v30, %v2541_v13  ;;  %5751 = vset.pattern.permute.xlu1 %v10848_v12  ;;  %5752 = vset.pattern.permute.xlu2 %v10862_v60 }
 0x1a1   : > { %383 = vperm.xlu1 %5751, %v7290_v61   ;;  %892 = vperm.xlu2 %5752, %v771_v39  }
 0x1a2   : > { %10927 = vst [vmem:[#allocation90_spill] sm:$0xff] %v7408_v53  ;;  %v7419_v37 = vpop.permute.xlu1 %997  ;;  %v7434_v13 = vpop.permute.xlu2 %344 }
 0x1a3   : > { %10928 = vst [vmem:[#allocation91_spill] sm:$0xff] %v7419_v37  ;;  %vm1251_vm13 = vcmp.eq.s32.totalorder %v6409_v6, %v7419_v37  ;;  %vm1252_vm15 = vcmp.eq.s32.totalorder %v6417_v11, %v7419_v37  ;;  %v7448_v53 = vpop.permute.xlu0 %847 }
 0x1a4   : > { %vm1507_vm12 = vmor %vm739_vm11, %vm1251_vm13 }
 0x1a5   : > { %v7429_v61 = vpop.f32.mrf.mxu2  ;;  %vm5307_vm2 = vmpackc.low %vm1507_vm12, %vm1503_vm10  ;;  %vm1051_vm10 = vcmp.eq.s32.totalorder %v6409_v6, %v7448_v53  ;;  %vm1052_vm12 = vcmp.eq.s32.totalorder %v6417_v11, %v7448_v53 }
 0x1a6   : > { %10929 = vst [vmem:[#allocation92_spill] sm:$0xff] %v7429_v61  ;;  %5308 = vmatmul.msk.bf16.gmra.mxu2 %vm5307_vm2, %v10860_v22  ;;  %vm1508_vm3 = vmor %vm740_vm14, %vm1252_vm15  ;;  %v257_v61 = vld [vmem:[%s6298_s9 + $0xf8] sm:$0xff]  ;;  %vm493_vm14 = vcmp.eq.s32.totalorder %v7472_v54, %v6755_v40  ;;  %s4788_s9 = scalar_lea.hbm %s10587_s5, %s5620_s15 }
 0x1a7   : > { %v7436_v39 = vpop.f32.mrf.mxu3  ;;  %vm5371_vm5 = vmpackc.low %vm1508_vm3, %vm1504_vm0  ;;  %vm1005_vm3 = vcmp.eq.s32.totalorder %v7472_v54, %v6746_v34  ;;  %s4791_s25 = sshll.u32 %s4788_s9, 4  ;;  %s4792_s25 = int_to_ptr.hbm [resolvable:$true] %s4791_s25 }
 0x1a8   : > { %10930 = vst [vmem:[#allocation93_spill] sm:$0xff] %v7436_v39  ;;  %5372 = vmatmul.msk.bf16.gmra.mxu3 %vm5371_vm5, %v10860_v22  ;;  %vm7467_vm13 = vmor %vm536_vm8, %vm1048_vm9  ;;  %vm494_vm8 = vcmp.eq.s32.totalorder %v7485_v4, %v6755_v40  ;;  %vm1006_vm9 = vcmp.eq.s32.totalorder %v7485_v4, %v6746_v34  ;;  %v5609_v40 = vld [vmem:[%s10585_s3 + $0x34] sm:$0xf]  ;;  %s6158_s26 = sshra.s32 %s4792_s25, 4  ;;  %s6159_s26 = int_to_ptr.hbm [resolvable:$true] %s6158_s26 }
 0x1a9   : > { %386 = vperm.xlu1 %5751, %v7312_v58   ;;  %v2425_v30 = vpop.f32.mrf.mxu0  ;;  %5753 = vset.pattern.permute.xlu2 %v10848_v12  ;;  %v5610_v12 = vld [vmem:[%s10585_s3 + $0x34] sm:$0xf0]  ;;  %s6160_s30 = scalar_lea.hbm %s6159_s26, 1024  ;;  %p6165_p0 = scmp.lt.s32.totalorder %s6159_s26, %s10587_s5 }
 0x1aa   : > { %v2426_v39 = vadd.f32 %v6804_v56, %v2425_v30  ;;  %389 = vperm.xlu2 %5753, %v257_v61   ;;  %p6161_p11 = scmp.ne.s32.totalorder %s6159_s26, %s6160_s30  ;;  %p6166_p1 = scmp.lt.s32.totalorder %s6164_s8, %s6160_s30 }
 0x1ab   : > { %v2594_v27 = vpop.f32.mrf.mxu1  ;;  %v7453_v3 = vpop.permute.xlu1 %335 }
 0x1ac   : > { %v7459_v58 = vadd.f32 %v2594_v27, %v2426_v39  ;;  %vm539_vm4 = vcmp.eq.s32.totalorder %v6409_v6, %v7453_v3  ;;  %vm540_vm11 = vcmp.eq.s32.totalorder %v6417_v11, %v7453_v3  ;;  %v774_v39 = vadd.s32 256, %v257_v61  ;;  %v7495_v9 = vpop.permute.xlu2 %859  ;;  %v5527_v61 = vld [vmem:[%s10585_s3 + $0x30] sm:$0xf]  ;;  %p6162_p12 = pnand %p6161_p11, %p6281_p5  ;;  %p6167_p2 = por %p6166_p1, %p6165_p0 }
 0x1ad   : > { %v2545_v30 = vpop.f32.mrf.mxu2  ;;  %vm1307_vm15 = vmor %vm539_vm4, %vm1051_vm10  ;;  %vm490_vm10 = vcmp.eq.s32.totalorder %v7485_v4, %v6656_v32  ;;  %v5528_v34 = vor.u32 %v5610_v12, %v5527_v61  ;;  %v5519_v61 = vld [vmem:[%s10585_s3 + $0x20] sm:$0xf] }
 0x1ae   : > { %v2546_v27 = vadd.f32 %v6804_v56, %v2545_v30  ;;  %vm5257_vm0 = vmpackc.low %vm1307_vm15, %vm7455_vm1  ;;  %v5529_v30 = vld [vmem:[%s10585_s3 + $0x38] sm:$0xf0]  ;;  %p6163_p13 = pneg %p6162_p12 }
 0x1af   : > { %v2714_v37 = vpop.f32.mrf.mxu3  ;;  %5258 = vmatmul.msk.bf16.gmra.mxu0 %vm5257_vm0, %v10860_v22  ;;  %vm1308_vm2 = vmor %vm540_vm11, %vm1052_vm12  ;;  %vm1002_vm11 = vcmp.eq.s32.totalorder %v7485_v4, %v6678_v31  ;;  %v7532_v31 = vpop.permute.xlu0 %850 }
 0x1b0   : > { %v7487_v56 = vadd.f32 %v2714_v37, %v2546_v27  ;;  %vm5321_vm5 = vmpackc.low %vm1308_vm2, %vm7467_vm13  ;;  %v5532_v27 = vor.u32 %v5609_v40, %v5529_v30  ;;  %3289 = vmatpush.bf16.msrb.mxu0 %v5528_v34  ;;  %vm501_vm2 = vcmp.eq.s32.totalorder %v7472_v54, %v6658_v33  ;;  %p6168_p3 = pnand %p6167_p2, %p6163_p13 }
 0x1b1   : > { %5322 = vmatmul.msk.bf16.gmra.mxu1 %vm5321_vm5, %v10860_v22  ;;  %5754 = vset.pattern.permute.xlu1 %v10862_v60  ;;  %vm7503_vm1 = vmor %vm493_vm14, %vm1005_vm3  ;;  %vm1013_vm14 = vcmp.eq.s32.totalorder %v7472_v54, %v6757_v46  ;;  %v7553_v12 = vpop.f32.mrf.mxu0 }
 0x1b2   : > { %10935 = vst [vmem:[#allocation94_spill] sm:$0xff] %v7487_v56  ;;  %901 = vperm.xlu1 %5754, %v774_v39   ;;  %vm1257_vm4 = vmor %vm489_vm6, %vm1001_vm7  ;;  %3458 = vmatpush.bf16.msrb.mxu1 %v5532_v27  ;;  %vm547_vm6 = vcmp.eq.s32.totalorder %v6409_v6, %v7399_v63  ;;  %vm1055_vm7 = vcmp.eq.s32.totalorder %v6409_v6, %v7532_v31 }
 0x1b3   : > { %v7513_v60 = vpop.permute.xlu1 %338  ;;  %vm1262_vm13 = vmor %vm494_vm8, %vm1006_vm9  ;;  %v7573_v56 = vpop.f32.mrf.mxu1 }
 0x1b4   : > { %vm5373_vm15 = vmpackc.low %vm7503_vm1, %vm1257_vm4  ;;  %vm543_vm3 = vcmp.eq.s32.totalorder %v6409_v6, %v7513_v60  ;;  %vm544_vm5 = vcmp.eq.s32.totalorder %v6417_v11, %v7513_v60  ;;  %vm1056_vm1 = vcmp.eq.s32.totalorder %v6417_v11, %v7532_v31 }
 0x1b5   : > { %v7525_v39 = vpop.f32.mrf.mxu2  ;;  %vm1258_vm0 = vmor %vm490_vm10, %vm1002_vm11  ;;  %v7543_v37 = vpop.permute.xlu2 %353  ;;  %vm548_vm10 = vcmp.eq.s32.totalorder %v6417_v11, %v7399_v63 }
 0x1b6   : > { %10938 = vst [vmem:[#allocation95_spill] sm:$0xff] %v7525_v39  ;;  %5374 = vmatmul.msk.bf16.vlgmr.msrb.gmra.mxu2 %vm5373_vm15, %v10860_v22  ;;  %vm5437_vm12 = vmpackc.low %vm1262_vm13, %vm1258_vm0 }
 0x1b7   : > { %v7530_v32 = vpop.f32.mrf.mxu3  ;;  %vm7549_vm8 = vmor %vm501_vm2, %vm1013_vm14  ;;  %vm502_vm14 = vcmp.eq.s32.totalorder %v7485_v4, %v6658_v33 }
 0x1b8   : > { %10939 = vst [vmem:[#allocation96_spill] sm:$0xff] %v7530_v32  ;;  %5438 = vmatmul.msk.bf16.vlgmr.msrb.gmra.mxu3 %vm5437_vm12, %v10860_v22  ;;  %vm7557_vm9 = vmor %vm543_vm3, %vm1055_vm7  ;;  %v7578_v32 = vld [vmem:[%s10584_s2] ss:$0 sm:$0xff]  ;;  %vm1009_vm12 = vcmp.eq.s32.totalorder %v7472_v54, %v6877_v51  ;;  %vm1014_vm3 = vcmp.eq.s32.totalorder %v7485_v4, %v6757_v46  ;;  %vm1010_vm7 = vcmp.eq.s32.totalorder %v7485_v4, %v6877_v51 }
 0x1b9   : > { %vm7569_vm13 = vmor %vm544_vm5, %vm1056_vm1  ;;  %vm498_vm1 = vcmp.eq.s32.totalorder %v7485_v4, %v6726_v20 }
 0x1bc   : > { %v7555_v34 = vpop.permute.xlu1 %853 }
 0x1bd   : > { %v2550_v30 = vpop.f32.mrf.mxu2  ;;  %vm1059_vm4 = vcmp.eq.s32.totalorder %v6409_v6, %v7555_v34  ;;  %vm1060_vm11 = vcmp.eq.s32.totalorder %v6417_v11, %v7555_v34  ;;  %v7606_v46 = vpop.permute.xlu2 %356 }
 0x1be   : > { %v2551_v39 = vadd.f32 %v7578_v32, %v2550_v30  ;;  %vm1315_vm15 = vmor %vm547_vm6, %vm1059_vm4  ;;  %vm497_vm6 = vcmp.eq.s32.totalorder %v7472_v54, %v6726_v20 }
 0x1bf   : > { %v2719_v17 = vpop.f32.mrf.mxu3  ;;  %vm5259_vm0 = vmpackc.low %vm1315_vm15, %vm7557_vm9 }
 0x1c0   : > { %v7588_v45 = vadd.f32 %v2719_v17, %v2551_v39  ;;  %5260 = vmatmul.msk.bf16.gmra.mxu0 %vm5259_vm0, %v10860_v22  ;;  %vm1316_vm2 = vmor %vm548_vm10, %vm1060_vm11  ;;  %v7602_v17 = vpop.permute.xlu0 %347  ;;  %vm1067_vm0 = vcmp.eq.s32.totalorder %v6409_v6, %v7495_v9 }
 0x1c1   : > { %vm5323_vm5 = vmpackc.low %vm1316_vm2, %vm7569_vm13  ;;  %vm555_vm15 = vcmp.eq.s32.totalorder %v6409_v6, %v7602_v17  ;;  %vm1068_vm2 = vcmp.eq.s32.totalorder %v6417_v11, %v7495_v9 }
 0x1c2   : > { %10946 = vst [vmem:[#allocation97_spill] sm:$0xff] %v7588_v45  ;;  %5324 = vmatmul.msk.bf16.gmra.mxu1 %vm5323_vm5, %v10860_v22  ;;  %vm1265_vm9 = vmor %vm497_vm6, %vm1009_vm12  ;;  %v5521_v45 = vld [vmem:[%s10585_s3 + $0x28] sm:$0xf0]  ;;  %vm556_vm12 = vcmp.eq.s32.totalorder %v6417_v11, %v7602_v17 }
 0x1c3   : > { %vm1270_vm4 = vmor %vm502_vm14, %vm1014_vm3  ;;  %vm551_vm14 = vcmp.eq.s32.totalorder %v6409_v6, %v7434_v13 }
 0x1c4   : > { %v2430_v33 = vpop.f32.mrf.mxu0  ;;  %vm1266_vm10 = vmor %vm498_vm1, %vm1010_vm7  ;;  %v7608_v39 = vpop.permute.xlu1 %856  ;;  %vm552_vm7 = vcmp.eq.s32.totalorder %v6417_v11, %v7434_v13 }
 0x1c5   : > { %v2431_v40 = vadd.f32 %v7578_v32, %v2430_v33  ;;  %v7611_v30 = vpop.f32.mrf.mxu2  ;;  %vm5375_vm11 = vmpackc.low %vm7549_vm8, %vm1265_vm9  ;;  %v5608_v33 = vld [vmem:[%s10585_s3 + $0x24] sm:$0xf0]  ;;  %vm1063_vm8 = vcmp.eq.s32.totalorder %v6409_v6, %v7608_v39  ;;  %vm1064_vm5 = vcmp.eq.s32.totalorder %v6417_v11, %v7608_v39 }
 0x1c6   : > { %10947 = vst [vmem:[#allocation98_spill] sm:$0xff] %v7611_v30  ;;  %v2599_v51 = vpop.f32.mrf.mxu1  ;;  %5376 = vmatmul.msk.bf16.gmra.mxu2 %vm5375_vm11, %v10860_v22  ;;  %vm5439_vm13 = vmpackc.low %vm1270_vm4, %vm1266_vm10  ;;  %vm509_vm10 = vcmp.eq.s32.totalorder %v7472_v54, %v7021_v59  ;;  %vm1021_vm11 = vcmp.eq.s32.totalorder %v7472_v54, %v6998_v38 }
 0x1c7   : > { %v7616_v27 = vadd.f32 %v2599_v51, %v2431_v40  ;;  %v7618_v20 = vpop.f32.mrf.mxu3  ;;  %v5520_v40 = vor.u32 %v5608_v33, %v5519_v61  ;;  %v5607_v51 = vld [vmem:[%s10585_s3 + $0x24] sm:$0xf]  ;;  %vm7645_vm3 = vmor %vm555_vm15, %vm1067_vm0  ;;  %vm1017_vm15 = vcmp.eq.s32.totalorder %v7472_v54, %v6882_v18 }
 0x1c8   : > { %10948 = vst [vmem:[#allocation99_spill] sm:$0xff] %v7618_v20  ;;  %5440 = vmatmul.msk.bf16.gmra.mxu3 %vm5439_vm13, %v10860_v22  ;;  %v5524_v20 = vor.u32 %v5607_v51, %v5521_v45  ;;  %vm7651_vm6 = vmor %vm551_vm14, %vm1063_vm8  ;;  %v7663_v51 = vpop.permute.xlu0 %862  ;;  %vm505_vm13 = vcmp.eq.s32.totalorder %v7472_v54, %v6821_v10  ;;  %vm510_vm8 = vcmp.eq.s32.totalorder %v7485_v4, %v7021_v59 }
 0x1c9   : > { %3290 = vmatpush.bf16.msrb.mxu0 %v5520_v40  ;;  %vm7659_vm9 = vmor %vm556_vm12, %vm1068_vm2  ;;  %v7666_v40 = vpop.permute.xlu2 %868  ;;  %vm1022_vm12 = vcmp.eq.s32.totalorder %v7485_v4, %v6998_v38 }
 0x1ca   : > { %3459 = vmatpush.bf16.msrb.mxu1 %v5524_v20  ;;  %vm1320_vm1 = vmor %vm552_vm7, %vm1064_vm5  ;;  %vm1018_vm5 = vcmp.eq.s32.totalorder %v7485_v4, %v6882_v18  ;;  %v5511_v18 = vld [vmem:[%s10585_s3 + $0x10] sm:$0xf] }
 0x1cb   : > { %vm5261_vm4 = vmpackc.low %vm7645_vm3, %vm7651_vm6  ;;  %vm506_vm3 = vcmp.eq.s32.totalorder %v7485_v4, %v6821_v10 }
 0x1cc   : > { %vm5325_vm0 = vmpackc.low %vm7659_vm9, %vm1320_vm1 }
 0x1cd   : > { %v2555_v30 = vpop.f32.mrf.mxu2  ;;  %v7655_v36 = vpop.permute.xlu1 %350  ;;  %vm1277_vm2 = vmor %vm509_vm10, %vm1021_vm11  ;;  %vm1029_vm11 = vcmp.eq.s32.totalorder %v7472_v54, %v7030_v44 }
 0x1ce   : > { %v2556_v42 = vadd.f32 %v7578_v32, %v2555_v30  ;;  %vm1273_vm14 = vmor %vm505_vm13, %vm1017_vm15  ;;  %v7703_v30 = vpop.f32.mrf.mxu1  ;;  %vm559_vm13 = vcmp.eq.s32.totalorder %v6409_v6, %v7655_v36  ;;  %vm1071_vm15 = vcmp.eq.s32.totalorder %v6409_v6, %v7663_v51 }
 0x1cf   : > { %v2724_v8 = vpop.f32.mrf.mxu3  ;;  %vm1278_vm6 = vmor %vm510_vm8, %vm1022_vm12  ;;  %vm517_vm12 = vcmp.eq.s32.totalorder %v7472_v54, %v6690_v47 }
 0x1d0   : > { %v7676_v20 = vadd.f32 %v2724_v8, %v2556_v42  ;;  %5262 = vmatmul.msk.bf16.gmra.mxu0 %vm5261_vm4, %v10860_v22  ;;  %v7694_v8 = vpop.f32.mrf.mxu0  ;;  %vm5377_vm7 = vmpackc.low %vm1277_vm2, %vm1273_vm14  ;;  %v7707_v10 = vpop.permute.xlu0 %871  ;;  %vm563_vm4 = vcmp.eq.s32.totalorder %v6409_v6, %v7543_v37 }
 0x1d1   : > { %vm1274_vm9 = vmor %vm506_vm3, %vm1018_vm5  ;;  %v7701_v38 = vpop.permute.xlu2 %365  ;;  %vm560_vm5 = vcmp.eq.s32.totalorder %v6417_v11, %v7655_v36 }
 0x1d2   : > { %10955 = vst [vmem:[#allocation100_spill] sm:$0xff] %v7676_v20  ;;  %5326 = vmatmul.msk.bf16.gmra.mxu1 %vm5325_vm0, %v10860_v22  ;;  %vm5441_vm1 = vmpackc.low %vm1278_vm6, %vm1274_vm9  ;;  %vm564_vm0 = vcmp.eq.s32.totalorder %v6417_v11, %v7543_v37  ;;  %vm1072_vm6 = vcmp.eq.s32.totalorder %v6417_v11, %v7663_v51 }
 0x1d3   : > { %vm7730_vm14 = vmor %vm517_vm12, %vm1029_vm11  ;;  %vm518_vm12 = vcmp.eq.s32.totalorder %v7485_v4, %v6690_v47 }
 0x1d4   : > { %vm1327_vm3 = vmor %vm559_vm13, %vm1071_vm15  ;;  %vm513_vm13 = vcmp.eq.s32.totalorder %v7472_v54, %v6961_v28  ;;  %vm1030_vm15 = vcmp.eq.s32.totalorder %v7485_v4, %v7030_v44 }
 0x1d5   : > { %v7696_v42 = vpop.f32.mrf.mxu2 }
 0x1d6   : > { %10956 = vst [vmem:[#allocation101_spill] sm:$0xff] %v7696_v42  ;;  %v7698_v59 = vpop.permute.xlu1 %865  ;;  %5378 = vmatmul.msk.bf16.gmra.mxu2 %vm5377_vm7, %v10860_v22 }
 0x1d7   : > { %v7705_v61 = vpop.f32.mrf.mxu3  ;;  %vm1075_vm10 = vcmp.eq.s32.totalorder %v6409_v6, %v7698_v59  ;;  %vm1076_vm8 = vcmp.eq.s32.totalorder %v6417_v11, %v7698_v59 }
 0x1d8   : > { %10957 = vst [vmem:[#allocation102_spill] sm:$0xff] %v7705_v61  ;;  %5442 = vmatmul.msk.bf16.gmra.mxu3 %vm5441_vm1, %v10860_v22  ;;  %vm7726_vm2 = vmor %vm563_vm4, %vm1075_vm10  ;;  %vm1025_vm1 = vcmp.eq.s32.totalorder %v7472_v54, %v7133_v0  ;;  %vm1026_vm10 = vcmp.eq.s32.totalorder %v7485_v4, %v7133_v0  ;;  %v10985_v0 = vmov 0 }
 0x1d9   : > { %vm7740_vm7 = vmor %vm564_vm0, %vm1076_vm8  ;;  %vm514_vm8 = vcmp.eq.s32.totalorder %v7485_v4, %v6961_v28  ;;  %v11010_v28 = vmov 0 }
 0x1da   : > { %vm5263_vm9 = vmpackc.low %vm7726_vm2, %vm1327_vm3 }
 0x1db   : > { %vm1328_vm4 = vmor %vm560_vm5, %vm1072_vm6  ;;  %vm521_vm5 = vcmp.eq.s32.totalorder %v7472_v54, %v7098_v49  ;;  %vm1033_vm6 = vcmp.eq.s32.totalorder %v7472_v54, %v7155_v55 }
 0x1dc   : > { %vm5327_vm11 = vmpackc.low %vm7740_vm7, %vm1328_vm4  ;;  %vm522_vm4 = vcmp.eq.s32.totalorder %v7485_v4, %v7098_v49 }
 0x1dd   : > { %v2435_v45 = vpop.f32.mrf.mxu0  ;;  %v2560_v20 = vpop.f32.mrf.mxu2  ;;  %vm1281_vm0 = vmor %vm513_vm13, %vm1025_vm1  ;;  %vm1079_vm13 = vcmp.eq.s32.totalorder %v6409_v6, %v7666_v40 }
 0x1de   : > { %v2436_v61 = vadd.f32 %v7578_v32, %v2435_v45  ;;  %v2561_v42 = vadd.f32 %v7578_v32, %v2560_v20  ;;  %v7757_v20 = vpop.permute.xlu2 %368  ;;  %vm7772_vm2 = vmor %vm514_vm8, %vm1026_vm10  ;;  %vm526_vm10 = vcmp.eq.s32.totalorder %v7485_v4, %v7260_v19 }
 0x1df   : > { %v2604_v35 = vpop.f32.mrf.mxu1  ;;  %v2729_v29 = vpop.f32.mrf.mxu3  ;;  %vm1286_vm3 = vmor %vm518_vm12, %vm1030_vm15  ;;  %vm1037_vm15 = vcmp.eq.s32.totalorder %v7472_v54, %v7256_v48 }
 0x1e0   : > { %v7748_v57 = vadd.f32 %v2604_v35, %v2436_v61  ;;  %v7750_v50 = vadd.f32 %v2729_v29, %v2561_v42  ;;  %v7752_v23 = vpop.permute.xlu1 %359  ;;  %5264 = vmatmul.msk.bf16.gmra.mxu0 %vm5263_vm9, %v10860_v22  ;;  %v7765_v29 = vpop.permute.xlu0 %874  ;;  %vm5379_vm7 = vmpackc.low %vm7730_vm14, %vm1281_vm0  ;;  %vm525_vm9 = vcmp.eq.s32.totalorder %v7472_v54, %v7260_v19  ;;  %vm567_vm14 = vcmp.eq.s32.totalorder %v6409_v6, %v7606_v46 }
 0x1e1   : > { %vm5443_vm1 = vmpackc.low %vm1286_vm3, %vm7772_vm2  ;;  %v10967_v35 = vmov 0  ;;  %vm571_vm8 = vcmp.eq.s32.totalorder %v6409_v6, %v7752_v23  ;;  %vm1038_vm2 = vcmp.eq.s32.totalorder %v7485_v4, %v7256_v48  ;;  %vm572_vm3 = vcmp.eq.s32.totalorder %v6417_v11, %v7752_v23 }
 0x1e2   : > { %10964 = vst [vmem:[#allocation103_spill] sm:$0xff] %v7750_v50  ;;  %5328 = vmatmul.msk.bf16.gmra.mxu1 %vm5327_vm11, %v10860_v22  ;;  %vm1034_vm11 = vcmp.eq.s32.totalorder %v7485_v4, %v7155_v55  ;;  %vm7799_vm0 = vmor %vm521_vm5, %vm1033_vm6  ;;  %v10987_v19 = vmov 0  ;;  %v5606_v50 = vld [vmem:[%s10585_s3 + $0x14] sm:$0xf0] }
 0x1e3   : > { %v10968_v35 = vsel %vm7799_vm0, 4294967295, %v10967_v35  ;;  %vm7808_vm12 = vmor %vm525_vm9, %vm1037_vm15 }
 0x1e4   : > { %vm7816_vm5 = vmor %vm522_vm4, %vm1034_vm11  ;;  %vm1080_vm4 = vcmp.eq.s32.totalorder %v6417_v11, %v7666_v40  ;;  %vm1084_vm11 = vcmp.eq.s32.totalorder %v6417_v11, %v7707_v10 }
 0x1e5   : > { %vm7820_vm6 = vmor %vm526_vm10, %vm1038_vm2  ;;  %v7848_v61 = vpop.f32.mrf.mxu2  ;;  %v7876_v45 = vpop.f32.mrf.mxu0 }
 0x1e6   : > { %5380 = vmatmul.msk.bf16.gmra.mxu2 %vm5379_vm7, %v10860_v22  ;;  %vm1083_vm7 = vcmp.eq.s32.totalorder %v6409_v6, %v7707_v10  ;;  %vm7826_vm9 = vmor %vm567_vm14, %vm1079_vm13  ;;  %v7836_v48 = vpop.permute.xlu2 %883  ;;  %10981 = vst [vmem:[#allocation104_spill] sm:$0xff] %v7848_v61  ;;  %v5512_v61 = vor.u32 %v5606_v50, %v5511_v18  ;;  %v5516_v50 = vor.u32 %v5605_v25, %v5513_v7  ;;  %v10993_v18 = vmov 0 }
 0x1e7   : > { %vm7838_vm10 = vmor %vm571_vm8, %vm1083_vm7  ;;  %vm1101_vm2 = vcmp.eq.s32.totalorder %v7472_v54, %v7836_v48  ;;  %v7870_v33 = vpop.f32.mrf.mxu3  ;;  %v7893_v42 = vpop.f32.mrf.mxu1 }
 0x1e8   : > { %5444 = vmatmul.msk.bf16.gmra.mxu3 %vm5443_vm1, %v10860_v22  ;;  %v7804_v47 = vpop.permute.xlu1 %362  ;;  %vm568_vm1 = vcmp.eq.s32.totalorder %v6417_v11, %v7606_v46  ;;  %v7834_v55 = vpop.permute.xlu0 %371  ;;  %vm7844_vm14 = vmor %vm572_vm3, %vm1084_vm11  ;;  %10984 = vst [vmem:[#allocation105_spill] sm:$0xff] %v7870_v33  ;;  %3291 = vmatpush.bf16.msrb.mxu0 %v5512_v61 }
 0x1e9   : > { %vm7850_vm13 = vmor %vm568_vm1, %vm1080_vm4  ;;  %vm589_vm8 = vcmp.eq.s32.totalorder %v7472_v54, %v7834_v55  ;;  %vm590_vm7 = vcmp.eq.s32.totalorder %v7485_v4, %v7834_v55  ;;  %vm1102_vm1 = vcmp.eq.s32.totalorder %v7485_v4, %v7836_v48  ;;  %vm578_vm15 = vcmp.eq.s32.totalorder %v7485_v4, %v7804_v47  ;;  %3460 = vmatpush.bf16.msrb.mxu1 %v5516_v50 }
 0x1ea   : > { %vm5265_vm3 = vmpackc.low %vm7838_vm10, %vm7826_vm9  ;;  %vm575_vm9 = vcmp.eq.s32.totalorder %v6409_v6, %v7804_v47  ;;  %vm577_vm10 = vcmp.eq.s32.totalorder %v7472_v54, %v7804_v47 }
 0x1eb   : > { %vm5329_vm4 = vmpackc.low %vm7844_vm14, %vm7850_vm13  ;;  %vm11008_vm13 = vcmp.eq.s32.totalorder %v7472_v54, %v7268_v2 }
 0x1ec   : > { %vm7883_vm11 = vmor %vm589_vm8, %vm1101_vm2  ;;  %vm1087_vm8 = vcmp.eq.s32.totalorder %v6409_v6, %v7765_v29 }
 0x1ed   : > { %v10986_v0 = vsel %vm7883_vm11, 4294967295, %v10985_v0  ;;  %vm7889_vm0 = vmor %vm590_vm7, %vm1102_vm1 }
 0x1ee   : > { %v10988_v19 = vsel %vm7889_vm0, 4294967295, %v10987_v19  ;;  %vm7913_vm7 = vmor %vm575_vm9, %vm1087_vm8  ;;  %vm1090_vm8 = vcmp.eq.s32.totalorder %v7485_v4, %v7765_v29  ;;  %v8089_v14 = vpop.permute.xlu2 %377 }
 0x1ef   : > { %vm7942_vm1 = vmor %vm578_vm15, %vm1090_vm8  ;;  %vm11000_vm15 = vcmp.eq.s32.totalorder %v7472_v54, %v7701_v38 }
 0x1f0   : > { %v878_v62 = vpop.permute.xlu1 %877  ;;  %5266 = vmatmul.msk.bf16.gmra.mxu0 %vm5265_vm3, %v10860_v22  ;;  %vm1089_vm3 = vcmp.eq.s32.totalorder %v7472_v54, %v7765_v29  ;;  %v10994_v18 = vsel %vm7942_vm1, 4294967295, %v10993_v18 }
 0x1f1   : > { %vm1091_vm2 = vcmp.eq.s32.totalorder %v6409_v6, %v878_v62  ;;  %vm7929_vm9 = vmor %vm577_vm10, %vm1089_vm3  ;;  %vm10995_vm10 = vcmp.eq.s32.totalorder %v6409_v6, %v7701_v38  ;;  %vm11012_vm14 = vcmp.eq.s32.totalorder %v7485_v4, %v878_v62 }
 0x1f2   : > { %5330 = vmatmul.msk.bf16.gmra.mxu1 %vm5329_vm4, %v10860_v22  ;;  %vm1093_vm4 = vcmp.eq.s32.totalorder %v7472_v54, %v878_v62  ;;  %v10992_v5 = vsel %vm7929_vm9, 4294967295, %v10991_v5  ;;  %vm7951_vm3 = vmor %vm10995_vm10, %vm1091_vm2  ;;  %vm10998_vm2 = vnez %v10968_v35  ;;  %vm11019_vm9 = vcmp.eq.s32.totalorder %v7485_v4, %v7268_v2 }
 0x1f3   : > { %vm10999_vm10 = vmpackc.low %vm7808_vm12, %vm10998_vm2  ;;  %vm11005_vm12 = vcmp.eq.s32.totalorder %v7472_v54, %v7354_v1 }
 0x1f4   : > { %vm7978_vm8 = vmor %vm11000_vm15, %vm1093_vm4  ;;  %vm576_vm15 = vcmp.eq.s32.totalorder %v6417_v11, %v7804_v47  ;;  %v11014_v47 = vmov 0 }
 0x1f5   : > { %v2565_v16 = vpop.f32.mrf.mxu2  ;;  %vm11004_vm4 = vmpackc.low %vm7820_vm6, %vm7816_vm5  ;;  %vm11009_vm5 = vcmp.eq.s32.totalorder %v7472_v54, %v7327_v15 }
 0x1f6   : > { %v2566_v7 = vadd.f32 %v7578_v32, %v2565_v16  ;;  %5382 = vmatmul.msk.bf16.gmra.mxu2 %vm10999_vm10, %v10860_v22  ;;  %v11001_v16 = vmov 0  ;;  %vm529_vm10 = vcmp.eq.s32.totalorder %v7472_v54, %v7204_v26  ;;  %vm8016_vm6 = vmor %vm11009_vm5, %vm11008_vm13  ;;  %vm11016_vm13 = vcmp.eq.s32.totalorder %v7485_v4, %v7354_v1 }
 0x1f7   : > { %v11002_v16 = vsel %vm7978_vm8, 4294967295, %v11001_v16  ;;  %v2734_v25 = vpop.f32.mrf.mxu3  ;;  %vm8006_vm2 = vmor %vm529_vm10, %vm11005_vm12  ;;  %v11011_v28 = vsel %vm8016_vm6, 4294967295, %v11010_v28  ;;  %vm11013_vm12 = vcmp.eq.s32.totalorder %v7485_v4, %v7701_v38  ;;  %vm11020_vm8 = vcmp.eq.s32.totalorder %v7485_v4, %v7327_v15 }
 0x1f8   : > { %v7991_v35 = vadd.f32 %v2734_v25, %v2566_v7  ;;  %5446 = vmatmul.msk.bf16.gmra.mxu3 %vm11004_vm4, %v10860_v22  ;;  %v2440_v44 = vpop.f32.mrf.mxu0  ;;  %v7999_v61 = vpop.permute.xlu1 %880  ;;  %vm530_vm4 = vcmp.eq.s32.totalorder %v7485_v4, %v7204_v26  ;;  %vm8027_vm10 = vmor %vm11013_vm12, %vm11012_vm14  ;;  %v11017_v7 = vmov 0  ;;  %vm11023_vm12 = vcmp.eq.s32.totalorder %v6417_v11, %v878_v62 }
 0x1f9   : > { %v11015_v47 = vsel %vm8027_vm10, 4294967295, %v11014_v47  ;;  %v2441_v49 = vadd.f32 %v7578_v32, %v2440_v44  ;;  %vm8035_vm5 = vmor %vm530_vm4, %vm11016_vm13  ;;  %vm1088_vm4 = vcmp.eq.s32.totalorder %v6417_v11, %v7765_v29  ;;  %vm11024_vm13 = vcmp.eq.s32.totalorder %v6417_v11, %v7701_v38  ;;  %v8102_v62 = vpop.permute.xlu0 %886 }
 0x1fa   : > { %11003 = vst [vmem:[#allocation106_spill] sm:$0xff] %v7991_v35  ;;  %v11018_v7 = vsel %vm8035_vm5, 4294967295, %v11017_v7  ;;  %vm8045_vm6 = vmor %vm11020_vm8, %vm11019_vm9  ;;  %v2609_v1 = vpop.f32.mrf.mxu1  ;;  %vm585_vm8 = vcmp.eq.s32.totalorder %v7472_v54, %v7757_v20  ;;  %vm1097_vm14 = vcmp.eq.s32.totalorder %v7472_v54, %v7999_v61  ;;  %v11028_v38 = vmov 0 }
 0x1fb   : > { %vm8060_vm5 = vmor %vm11024_vm13, %vm11023_vm12  ;;  %v8064_v15 = vadd.f32 %v2609_v1, %v2441_v49  ;;  %vm586_vm13 = vcmp.eq.s32.totalorder %v7485_v4, %v7757_v20  ;;  %v11030_v29 = vmov 0  ;;  %vm538_vm10 = vcmp.eq.s32.totalorder %v7485_v4, %v7325_v43 }
 0x1fc   : > { %vm1344_vm9 = vmor %vm576_vm15, %vm1088_vm4  ;;  %vm1098_vm15 = vcmp.eq.s32.totalorder %v7485_v4, %v7999_v61  ;;  %v11036_v44 = vmov 0 }
 0x1fd   : > { %11027 = vst [vmem:[#allocation107_spill] sm:$0xff] %v8064_v15  ;;  %vm5267_vm1 = vmpackc.low %vm7951_vm3, %vm7913_vm7 }
 0x1fe   : > { %vm5331_vm12 = vmpackc.low %vm8060_vm5, %vm1344_vm9  ;;  %vm1049_vm5 = vcmp.eq.s32.totalorder %v7472_v54, %v7386_v52  ;;  %vm11032_vm9 = vnez %v11011_v28 }
 0x1ff   : > { %vm8080_vm4 = vmor %vm585_vm8, %vm1097_vm14  ;;  %v8173_v49 = vpop.f32.mrf.mxu3 }
 0x200   : > { %v11029_v38 = vsel %vm8080_vm4, 4294967295, %v11028_v38  ;;  %5268 = vmatmul.msk.bf16.gmra.mxu0 %vm5267_vm1, %v10860_v22  ;;  %vm8091_vm7 = vmor %vm586_vm13, %vm1098_vm15  ;;  %vm537_vm1 = vcmp.eq.s32.totalorder %v7472_v54, %v7325_v43  ;;  %vm1105_vm13 = vcmp.eq.s32.totalorder %v7472_v54, %v8102_v62  ;;  %vm11033_vm15 = vnez %v11018_v7  ;;  %v8145_v43 = vpop.f32.mrf.mxu2  ;;  %11046 = vst [vmem:[#allocation109_spill] sm:$0xff] %v8173_v49  ;;  %v8175_v26 = vpop.f32.mrf.mxu0 }
 0x201   : > { %v11031_v29 = vsel %vm8091_vm7, 4294967295, %v11030_v29  ;;  %v8095_v33 = vpop.permute.xlu1 %374  ;;  %vm5383_vm8 = vmpackc.low %vm11032_vm9, %vm8006_vm2  ;;  %vm1050_vm7 = vcmp.eq.s32.totalorder %v7485_v4, %v7386_v52  ;;  %vm1106_vm2 = vcmp.eq.s32.totalorder %v7485_v4, %v8102_v62  ;;  %vm541_vm9 = vcmp.eq.s32.totalorder %v7472_v54, %v7453_v3  ;;  %11040 = vst [vmem:[#allocation108_spill] sm:$0xff] %v8145_v43 }
 0x202   : > { %5332 = vmatmul.msk.bf16.gmra.mxu1 %vm5331_vm12, %v10860_v22  ;;  %vm593_vm14 = vcmp.eq.s32.totalorder %v7472_v54, %v8095_v33  ;;  %vm594_vm12 = vcmp.eq.s32.totalorder %v7485_v4, %v8095_v33  ;;  %vm8130_vm0 = vmor %vm537_vm1, %vm1049_vm5  ;;  %v11038_v52 = vmov 0  ;;  %vm587_vm1 = vcmp.eq.s32.totalorder %v6409_v6, %v7834_v55  ;;  %11047 = vst [vmem:[#allocation110_spill] sm:$0xff] %v8175_v26  ;;  %v8198_v7 = vpop.f32.mrf.mxu1 }
 0x203   : > { %vm8134_vm4 = vmor %vm593_vm14, %vm1105_vm13  ;;  %vm1099_vm5 = vcmp.eq.s32.totalorder %v6409_v6, %v7836_v48  ;;  %vm1053_vm14 = vcmp.eq.s32.totalorder %v7472_v54, %v7448_v53  ;;  %11053 = vst [vmem:[#allocation111_spill] sm:$0xff] %v8198_v7  ;;  %v11059_v43 = vmov 0 }
 0x204   : > { %v11037_v44 = vsel %vm8134_vm4, 4294967295, %v11036_v44  ;;  %vm8141_vm11 = vmor %vm594_vm12, %vm1106_vm2  ;;  %vm588_vm12 = vcmp.eq.s32.totalorder %v6417_v11, %v7834_v55  ;;  %vm1100_vm2 = vcmp.eq.s32.totalorder %v6417_v11, %v7836_v48  ;;  %v11049_v55 = vmov 0 }
 0x205   : > { %v11039_v52 = vsel %vm8141_vm11, 4294967295, %v11038_v52  ;;  %vm8153_vm13 = vmor %vm538_vm10, %vm1050_vm7  ;;  %vm1054_vm10 = vcmp.eq.s32.totalorder %v7485_v4, %v7448_v53  ;;  %vm1095_vm7 = vcmp.eq.s32.totalorder %v6409_v6, %v7999_v61  ;;  %vm1096_vm11 = vcmp.eq.s32.totalorder %v6417_v11, %v7999_v61  ;;  %v8196_v53 = vpop.permute.xlu2 %380 }
 0x206   : > { %5384 = vmatmul.msk.bf16.gmra.mxu2 %vm5383_vm8, %v10860_v22  ;;  %vm11043_vm8 = vmpackc.low %vm8045_vm6, %vm11033_vm15  ;;  %vm583_vm6 = vcmp.eq.s32.totalorder %v6409_v6, %v7757_v20  ;;  %vm11048_vm15 = vcmp.eq.s32.totalorder %v7485_v4, %v7453_v3  ;;  %v5503_v3 = vld [vmem:[%s10585_s3] sm:$0xf] }
 0x207   : > { %vm8167_vm3 = vmor %vm541_vm9, %vm1053_vm14 }
 0x208   : > { %5448 = vmatmul.msk.bf16.gmra.mxu3 %vm11043_vm8, %v10860_v22  ;;  %vm8184_vm9 = vmor %vm11048_vm15, %vm1054_vm10  ;;  %vm584_vm8 = vcmp.eq.s32.totalorder %v6417_v11, %v7757_v20  ;;  %vm597_vm15 = vcmp.eq.s32.totalorder %v7472_v54, %v8089_v14 }
 0x209   : > { %v11050_v55 = vsel %vm8184_vm9, 4294967295, %v11049_v55  ;;  %vm8188_vm14 = vmor %vm587_vm1, %vm1099_vm5 }
 0x20a   : > { %vm8200_vm4 = vmor %vm588_vm12, %vm1100_vm2  ;;  %v890_v1 = vpop.permute.xlu1 %889 }
 0x20b   : > { %vm1351_vm10 = vmor %vm583_vm6, %vm1095_vm7  ;;  %vm1109_vm9 = vcmp.eq.s32.totalorder %v7472_v54, %v890_v1  ;;  %vm1107_vm2 = vcmp.eq.s32.totalorder %v6409_v6, %v890_v1  ;;  %vm1108_vm5 = vcmp.eq.s32.totalorder %v6417_v11, %v890_v1 }
 0x20c   : > { %vm8204_vm1 = vmor %vm584_vm8, %vm1096_vm11  ;;  %vm11058_vm11 = vnez %v11050_v55  ;;  %vm1110_vm8 = vcmp.eq.s32.totalorder %v7485_v4, %v890_v1  ;;  %v11081_v55 = vmov 0 }
 0x20d   : > { %vm5269_vm12 = vmpackc.low %vm8188_vm14, %vm1351_vm10  ;;  %vm598_vm14 = vcmp.eq.s32.totalorder %v7485_v4, %v8089_v14  ;;  %v8264_v7 = vpop.permute.xlu2 %892 }
 0x20e   : > { %vm5333_vm6 = vmpackc.low %vm8200_vm4, %vm8204_vm1  ;;  %vm591_vm4 = vcmp.eq.s32.totalorder %v6409_v6, %v8095_v33  ;;  %vm596_vm1 = vcmp.eq.s32.totalorder %v6417_v11, %v8089_v14 }
 0x20f   : > { %v2570_v20 = vpop.f32.mrf.mxu2  ;;  %vm8227_vm7 = vmor %vm597_vm15, %vm1109_vm9  ;;  %vm1103_vm9 = vcmp.eq.s32.totalorder %v6409_v6, %v8102_v62 }
 0x210   : > { %v2571_v61 = vadd.f32 %v7578_v32, %v2570_v20  ;;  %5270 = vmatmul.msk.bf16.gmra.mxu0 %vm5269_vm12, %v10860_v22  ;;  %v11060_v43 = vsel %vm8227_vm7, 4294967295, %v11059_v43  ;;  %v5604_v20 = vld [vmem:[%s10585_s3 + $0x4] sm:$0xf0]  ;;  %vm8274_vm10 = vmor %vm598_vm14, %vm1110_vm8  ;;  %vm11068_vm8 = vcmp.eq.s32.totalorder %v6417_v11, %v8102_v62  ;;  %vm1061_vm7 = vcmp.eq.s32.totalorder %v7472_v54, %v7555_v34 }
 0x211   : > { %v2739_v35 = vpop.f32.mrf.mxu3  ;;  %v2445_v49 = vpop.f32.mrf.mxu0  ;;  %vm8284_vm12 = vmor %vm591_vm4, %vm1103_vm9  ;;  %vm11069_vm4 = vcmp.eq.s32.totalorder %v6417_v11, %v8095_v33 }
 0x212   : > { %v8234_v48 = vadd.f32 %v2739_v35, %v2571_v61  ;;  %5334 = vmatmul.msk.bf16.gmra.mxu1 %vm5333_vm6, %v10860_v22  ;;  %v2446_v2 = vadd.f32 %v7578_v32, %v2445_v49  ;;  %v5603_v35 = vld [vmem:[%s10585_s3 + $0x4] sm:$0xf]  ;;  %v5504_v49 = vor.u32 %v5604_v20, %v5503_v3  ;;  %vm595_vm6 = vcmp.eq.s32.totalorder %v6409_v6, %v8089_v14  ;;  %vm11067_vm14 = vmpackc.low %vm8167_vm3, %vm8130_vm0 }
 0x213   : > { %v2614_v61 = vpop.f32.mrf.mxu1  ;;  %v11063_v3 = vmov 0  ;;  %vm8305_vm9 = vmor %vm11069_vm4, %vm11068_vm8  ;;  %v8309_v1 = vpop.permute.xlu1 %383  ;;  %vm601_vm0 = vcmp.eq.s32.totalorder %v7472_v54, %v8196_v53  ;;  %vm1113_vm3 = vcmp.eq.s32.totalorder %v7472_v54, %v8264_v7 }
 0x214   : > { %11061 = vst [vmem:[#allocation112_spill] sm:$0xff] %v8234_v48  ;;  %v5505_v48 = vld [vmem:[%s10585_s3 + $0x8] sm:$0xf0]  ;;  %v8262_v15 = vadd.f32 %v2614_v61, %v2446_v2  ;;  %v11064_v3 = vsel %vm8274_vm10, 4294967295, %v11063_v3  ;;  %3292 = vmatpush.bf16.msrb.mxu0 %v5504_v49  ;;  %vm8311_vm15 = vmor %vm595_vm6, %vm1107_vm2  ;;  %vm605_vm2 = vcmp.eq.s32.totalorder %v7472_v54, %v8309_v1  ;;  %vm1058_vm10 = vcmp.eq.s32.totalorder %v7485_v4, %v7532_v31 }
 0x215   : > { %v5508_v26 = vor.u32 %v5603_v35, %v5505_v48  ;;  %v8291_v48 = vpop.permute.xlu0 %895  ;;  %vm8326_vm8 = vmor %vm596_vm1, %vm1108_vm5  ;;  %vm602_vm1 = vcmp.eq.s32.totalorder %v7485_v4, %v8196_v53 }
 0x216   : > { %5386 = vmatmul.msk.bf16.gmra.mxu2 %vm11067_vm14, %v10860_v22  ;;  %vm11074_vm14 = vmpackc.low %vm11058_vm11, %vm8153_vm13  ;;  %vm1117_vm6 = vcmp.eq.s32.totalorder %v7472_v54, %v8291_v48  ;;  %vm549_vm11 = vcmp.eq.s32.totalorder %v7472_v54, %v7399_v63 }
 0x217   : > { %3461 = vmatpush.bf16.msrb.mxu1 %v5508_v26  ;;  %v2572_v20 = vpop.f32.mrf.mxu2  ;;  %vm8340_vm13 = vmor %vm601_vm0, %vm1113_vm3  ;;  %v11079_v26 = vmov 0  ;;  %vm606_vm3 = vcmp.eq.s32.totalorder %v7485_v4, %v8309_v1 }
 0x218   : > { %5450 = vmatmul.msk.bf16.gmra.mxu3 %vm11074_vm14, %v10860_v22  ;;  %v2573_v33 = vadd.f32 %v7578_v32, %v2572_v20  ;;  %v11080_v26 = vsel %vm8340_vm13, 4294967295, %v11079_v26  ;;  %vm8344_vm5 = vmor %vm605_vm2, %vm1117_vm6  ;;  %vm1114_vm14 = vcmp.eq.s32.totalorder %v7485_v4, %v8264_v7  ;;  %vm1118_vm2 = vcmp.eq.s32.totalorder %v7485_v4, %v8291_v48 }
 0x219   : > { %v2741_v25 = vpop.f32.mrf.mxu3  ;;  %v11082_v55 = vsel %vm8344_vm5, 4294967295, %v11081_v55  ;;  %vm5271_vm0 = vmpackc.low %vm8311_vm15, %vm8284_vm12  ;;  %vm545_vm15 = vcmp.eq.s32.totalorder %v7472_v54, %v7513_v60  ;;  %v8396_v49 = vpop.f32.mrf.mxu0 }
 0x21a   : > { %v8338_v50 = vadd.f32 %v2741_v25, %v2573_v33  ;;  %vm5335_vm6 = vmpackc.low %vm8326_vm8, %vm8305_vm9  ;;  %vm550_vm9 = vcmp.eq.s32.totalorder %v7485_v4, %v7399_v63  ;;  %vm1062_vm8 = vcmp.eq.s32.totalorder %v7485_v4, %v7555_v34 }
 0x21b   : > { %vm8372_vm13 = vmor %vm602_vm1, %vm1114_vm14  ;;  %vm1057_vm14 = vcmp.eq.s32.totalorder %v7472_v54, %v7532_v31  ;;  %v8400_v63 = vpop.f32.mrf.mxu1  ;;  %v8425_v14 = vpop.permute.xlu1 %386 }
 0x21c   : > { %11078 = vst [vmem:[#allocation113_spill] sm:$0xff] %v8338_v50  ;;  %vm8379_vm12 = vmor %vm606_vm3, %vm1118_vm2  ;;  %vm546_vm2 = vcmp.eq.s32.totalorder %v7485_v4, %v7513_v60 }
 0x21d   : > { %vm1313_vm3 = vmor %vm545_vm15, %vm1057_vm14  ;;  %vm603_vm15 = vcmp.eq.s32.totalorder %v6409_v6, %v8309_v1 }
 0x21e   : > { %vm1318_vm5 = vmor %vm550_vm9, %vm1062_vm8  ;;  %vm1115_vm9 = vcmp.eq.s32.totalorder %v6409_v6, %v8291_v48  ;;  %vm604_vm8 = vcmp.eq.s32.totalorder %v6417_v11, %v8309_v1 }
 0x21f   : > { %vm1371_vm14 = vmor %vm603_vm15, %vm1115_vm9  ;;  %vm558_vm9 = vcmp.eq.s32.totalorder %v7485_v4, %v7602_v17 }
 0x220   : > { %5272 = vmatmul.msk.bf16.gmra.mxu0 %vm5271_vm0, %v10860_v22  ;;  %vm1317_vm0 = vmor %vm549_vm11, %vm1061_vm7  ;;  %vm599_vm7 = vcmp.eq.s32.totalorder %v6409_v6, %v8196_v53  ;;  %vm1111_vm11 = vcmp.eq.s32.totalorder %v6409_v6, %v8264_v7 }
 0x221   : > { %vm5387_vm4 = vmpackc.low %vm1317_vm0, %vm1313_vm3  ;;  %vm557_vm3 = vcmp.eq.s32.totalorder %v7472_v54, %v7602_v17 }
 0x222   : > { %5336 = vmatmul.msk.bf16.gmra.mxu1 %vm5335_vm6, %v10860_v22  ;;  %vm1314_vm6 = vmor %vm546_vm2, %vm1058_vm10  ;;  %vm600_vm10 = vcmp.eq.s32.totalorder %v6417_v11, %v8196_v53  ;;  %vm1069_vm2 = vcmp.eq.s32.totalorder %v7472_v54, %v7495_v9 }
 0x223   : > { %vm5451_vm1 = vmpackc.low %vm1318_vm5, %vm1314_vm6 }
 0x224   : > { %vm8417_vm5 = vmor %vm599_vm7, %vm1111_vm11  ;;  %vm1065_vm11 = vcmp.eq.s32.totalorder %v7472_v54, %v7608_v39 }
 0x225   : > { %vm5273_vm7 = vmpackc.low %vm1371_vm14, %vm8417_vm5  ;;  %vm553_vm5 = vcmp.eq.s32.totalorder %v7472_v54, %v7434_v13  ;;  %vm554_vm14 = vcmp.eq.s32.totalorder %v7485_v4, %v7434_v13 }
 0x226   : > { %5388 = vmatmul.msk.bf16.gmra.mxu2 %vm5387_vm4, %v10860_v22  ;;  %vm1112_vm4 = vcmp.eq.s32.totalorder %v6417_v11, %v8264_v7  ;;  %vm8445_vm15 = vmor %vm557_vm3, %vm1069_vm2 }
 0x227   : > { %vm8430_vm0 = vmor %vm600_vm10, %vm1112_vm4  ;;  %vm1070_vm10 = vcmp.eq.s32.totalorder %v7485_v4, %v7495_v9 }
 0x228   : > { %5452 = vmatmul.msk.bf16.gmra.mxu3 %vm5451_vm1, %v10860_v22  ;;  %vm1116_vm1 = vcmp.eq.s32.totalorder %v6417_v11, %v8291_v48  ;;  %vm1326_vm3 = vmor %vm558_vm9, %vm1070_vm10 }
 0x229   : > { %v2575_v60 = vpop.f32.mrf.mxu2  ;;  %vm1372_vm6 = vmor %vm604_vm8, %vm1116_vm1  ;;  %vm1066_vm8 = vcmp.eq.s32.totalorder %v7485_v4, %v7608_v39  ;;  %v8470_v39 = vpop.permute.xlu1 %901 }
 0x22a   : > { %v2576_v31 = vadd.f32 %v7578_v32, %v2575_v60  ;;  %vm5337_vm4 = vmpackc.low %vm1372_vm6, %vm8430_vm0 }
 0x22b   : > { %v2744_v34 = vpop.f32.mrf.mxu3  ;;  %vm1321_vm1 = vmor %vm553_vm5, %vm1065_vm11  ;;  %vm1123_vm11 = vcmp.eq.s32.totalorder %v6409_v6, %v8470_v39 }
 0x22c   : > { %v8427_v20 = vadd.f32 %v2744_v34, %v2576_v31  ;;  %v2450_v28 = vpop.f32.mrf.mxu0  ;;  %vm1322_vm0 = vmor %vm554_vm14, %vm1066_vm8  ;;  %v8465_v31 = vpop.permute.xlu2 %389 }
 0x22d   : > { %v2451_v53 = vadd.f32 %v7578_v32, %v2450_v28  ;;  %vm5389_vm2 = vmpackc.low %vm8445_vm15, %vm1321_vm1  ;;  %v8473_v28 = vpop.permute.xlu0 %898  ;;  %vm607_vm15 = vcmp.eq.s32.totalorder %v6409_v6, %v8425_v14  ;;  %vm612_vm10 = vcmp.eq.s32.totalorder %v6417_v11, %v8465_v31  ;;  %vm608_vm1 = vcmp.eq.s32.totalorder %v6417_v11, %v8425_v14 }
 0x22e   : > { %11089 = vst [vmem:[#allocation114_spill] sm:$0xff] %v8427_v20  ;;  %v2619_v1 = vpop.f32.mrf.mxu1  ;;  %vm5453_vm6 = vmpackc.low %vm1326_vm3, %vm1322_vm0  ;;  %vm1119_vm9 = vcmp.eq.s32.totalorder %v6409_v6, %v8473_v28  ;;  %vm1120_vm14 = vcmp.eq.s32.totalorder %v6417_v11, %v8473_v28  ;;  %v11188_v20 = vld [vmem:[#allocation47_spill] sm:$0xff] }
 0x22f   : > { %v8438_v48 = vadd.f32 %v2619_v1, %v2451_v53  ;;  %v2423_v1 = vadd.f32 %v7578_v32, %v7415_v41  ;;  %vm1375_vm8 = vmor %vm607_vm15, %vm1119_vm9  ;;  %vm1073_vm15 = vcmp.eq.s32.totalorder %v7472_v54, %v7663_v51 }
 0x230   : > { %5274 = vmatmul.msk.bf16.gmra.mxu0 %vm5273_vm7, %v10860_v22  ;;  %vm611_vm7 = vcmp.eq.s32.totalorder %v6409_v6, %v8465_v31 }
 0x231   : > { %v2577_v62 = vpop.f32.mrf.mxu2  ;;  %vm1379_vm5 = vmor %vm611_vm7, %vm1123_vm11  ;;  %v2592_v41 = vadd.f32 %v7421_v21, %v2423_v1  ;;  %vm561_vm11 = vcmp.eq.s32.totalorder %v7472_v54, %v7655_v36 }
 0x232   : > { %5338 = vmatmul.msk.bf16.gmra.mxu1 %vm5337_vm4, %v10860_v22  ;;  %v2578_v25 = vadd.f32 %v7578_v32, %v2577_v62  ;;  %vm1124_vm4 = vcmp.eq.s32.totalorder %v6417_v11, %v8470_v39  ;;  %vm5275_vm0 = vmpackc.low %vm1379_vm5, %vm1375_vm8 }
 0x233   : > { %v2746_v60 = vpop.f32.mrf.mxu3  ;;  %vm8497_vm3 = vmor %vm612_vm10, %vm1124_vm4  ;;  %vm566_vm10 = vcmp.eq.s32.totalorder %v7485_v4, %v7543_v37  ;;  %vm1078_vm4 = vcmp.eq.s32.totalorder %v7485_v4, %v7698_v59 }
 0x234   : > { %v8463_v9 = vadd.f32 %v2746_v60, %v2578_v25  ;;  %v2452_v17 = vpop.f32.mrf.mxu0  ;;  %vm1376_vm7 = vmor %vm608_vm1, %vm1120_vm14  ;;  %vm562_vm1 = vcmp.eq.s32.totalorder %v7485_v4, %v7655_v36  ;;  %vm1074_vm14 = vcmp.eq.s32.totalorder %v7485_v4, %v7663_v51 }
 0x235   : > { %v2453_v34 = vadd.f32 %v7578_v32, %v2452_v17  ;;  %vm5339_vm9 = vmpackc.low %vm8497_vm3, %vm1376_vm7 }
 0x236   : > { %11094 = vst [vmem:[#allocation115_spill] sm:$0xff] %v8463_v9  ;;  %v2621_v2 = vpop.f32.mrf.mxu1  ;;  %5390 = vmatmul.msk.bf16.gmra.mxu2 %vm5389_vm2, %v10860_v22  ;;  %vm565_vm2 = vcmp.eq.s32.totalorder %v7472_v54, %v7543_v37  ;;  %vm1329_vm8 = vmor %vm561_vm11, %vm1073_vm15  ;;  %vm569_vm11 = vcmp.eq.s32.totalorder %v7472_v54, %v7606_v46  ;;  %vm1081_vm15 = vcmp.eq.s32.totalorder %v7472_v54, %v7666_v40 }
 0x237   : > { %v8475_v13 = vadd.f32 %v2621_v2, %v2453_v34  ;;  %vm1334_vm3 = vmor %vm566_vm10, %vm1078_vm4  ;;  %vm574_vm10 = vcmp.eq.s32.totalorder %v7485_v4, %v7752_v23 }
 0x238   : > { %5454 = vmatmul.msk.bf16.gmra.mxu3 %vm5453_vm6, %v10860_v22  ;;  %vm1077_vm6 = vcmp.eq.s32.totalorder %v7472_v54, %v7698_v59  ;;  %vm1330_vm7 = vmor %vm562_vm1, %vm1074_vm14  ;;  %vm1082_vm1 = vcmp.eq.s32.totalorder %v7485_v4, %v7666_v40  ;;  %vm1086_vm14 = vcmp.eq.s32.totalorder %v7485_v4, %v7707_v10 }
 0x239   : > { %v2758_v53 = vpop.f32.mrf.mxu2  ;;  %vm1333_vm5 = vmor %vm565_vm2, %vm1077_vm6  ;;  %vm573_vm6 = vcmp.eq.s32.totalorder %v7472_v54, %v7752_v23 }
 0x23a   : > { %v2759_v34 = vadd.f32 %v2758_v53, %v7379_v24  ;;  %vm5455_vm2 = vmpackc.low %vm1334_vm3, %vm1330_vm7  ;;  %v2428_v24 = vadd.f32 %v7578_v32, %v7553_v12 }
 0x23b   : > { %v2927_v7 = vpop.f32.mrf.mxu3  ;;  %vm1342_vm3 = vmor %vm574_vm10, %vm1086_vm14  ;;  %vm11101_vm10 = vnez %v10994_v18  ;;  %vm11106_vm14 = vnez %v10988_v19 }
 0x23d   : > { %v2455_v33 = vpop.f32.mrf.mxu0 }
 0x23e   : > { %v2456_v6 = vadd.f32 %v7578_v32, %v2455_v33  ;;  %v2928_v33 = vadd.f32 %v2927_v7, %v2759_v34  ;;  %v2597_v7 = vadd.f32 %v7573_v56, %v2428_v24 }
 0x23f   : > { %v2624_v25 = vpop.f32.mrf.mxu1 }
 0x240   : > { %v8506_v60 = vadd.f32 %v2624_v25, %v2456_v6  ;;  %5276 = vmatmul.msk.bf16.gmra.mxu0 %vm5275_vm0, %v10860_v22  ;;  %vm5391_vm0 = vmpackc.low %vm1333_vm5, %vm1329_vm8  ;;  %v3087_v53 = vmax.f32 %v2928_v33, 0.0  ;;  %vm570_vm8 = vcmp.eq.s32.totalorder %v7485_v4, %v7606_v46 }
 0x241   : > { %v2760_v11 = vpop.f32.mrf.mxu2  ;;  %vm1337_vm5 = vmor %vm569_vm11, %vm1081_vm15  ;;  %vm11098_vm11 = vnez %v10992_v5 }
 0x242   : > { %5340 = vmatmul.msk.bf16.gmra.mxu1 %vm5339_vm9, %v10860_v22  ;;  %v2761_v21 = vadd.f32 %v2760_v11, %v2592_v41  ;;  %vm1085_vm9 = vcmp.eq.s32.totalorder %v7472_v54, %v7707_v10  ;;  %vm1338_vm7 = vmor %vm570_vm8, %vm1082_vm1  ;;  %vm11104_vm8 = vnez %v11029_v38 }
 0x243   : > { %v2929_v17 = vpop.f32.mrf.mxu3  ;;  %vm1341_vm4 = vmor %vm573_vm6, %vm1085_vm9  ;;  %vm11097_vm6 = vnez %v11002_v16  ;;  %vm11100_vm9 = vnez %v11015_v47 }
 0x244   : > { %v2930_v37 = vadd.f32 %v2929_v17, %v2761_v21  ;;  %vm11099_vm15 = vmpackc.low %vm11097_vm6, %vm11098_vm11  ;;  %vm11115_vm11 = vnez %v11064_v3 }
 0x245   : > { %v2457_v2 = vpop.f32.mrf.mxu0 }
 0x246   : > { %v2458_v59 = vadd.f32 %v7578_v32, %v2457_v2  ;;  %5392 = vmatmul.msk.bf16.gmra.mxu2 %vm5391_vm0, %v10860_v22  ;;  %v3088_v51 = vmax.f32 %v2930_v37, 0.0  ;;  %vm5393_vm0 = vmpackc.low %vm1341_vm4, %vm1337_vm5  ;;  %vm11103_vm5 = vnez %v10986_v0 }
 0x247   : > { %v2626_v1 = vpop.f32.mrf.mxu1  ;;  %vm11102_vm4 = vmpackc.low %vm11100_vm9, %vm11101_vm10  ;;  %vm11118_vm10 = vnez %v11082_v55 }
 0x248   : > { %v8527_v6 = vadd.f32 %v2626_v1, %v2458_v59  ;;  %5456 = vmatmul.msk.bf16.gmra.mxu3 %vm5455_vm2, %v10860_v22  ;;  %v3151_v41 = vpack.c.bf16 %v3088_v51, %v3087_v53  ;;  %vm5457_vm2 = vmpackc.low %vm1342_vm3, %vm1338_vm7  ;;  %vm11107_vm3 = vnez %v11031_v29  ;;  %vm11112_vm7 = vnez %v11060_v43 }
 0x249   : > { %v2763_v36 = vpop.f32.mrf.mxu2  ;;  %vm11105_vm1 = vmpackc.low %vm11103_vm5, %vm11104_vm8 }
 0x24a   : > { %v2764_v2 = vadd.f32 %v2763_v36, %v7459_v58  ;;  %v8561_v58 = vld [vmem:[%s10584_s2] ss:$0 sm:$0xff]  ;;  %vm11121_vm8 = vmpackc.low %vm8379_vm12, %vm8372_vm13  ;;  %vm609_vm13 = vcmp.eq.s32.totalorder %v7472_v54, %v8425_v14  ;;  %vm1121_vm12 = vcmp.eq.s32.totalorder %v7472_v54, %v8473_v28 }
 0x24b   : > { %v2932_v62 = vpop.f32.mrf.mxu3  ;;  %v2438_v16 = vadd.f32 %v8561_v58, %v7876_v45  ;;  %v2448_v43 = vadd.f32 %v8561_v58, %v8396_v49 }
 0x24c   : > { %v2933_v46 = vadd.f32 %v2932_v62, %v2764_v2 }
 0x24d   : > { %v2460_v25 = vpop.f32.mrf.mxu0 }
 0x24e   : > { %v2461_v11 = vadd.f32 %v7578_v32, %v2460_v25  ;;  %v3089_v36 = vmax.f32 %v2933_v46, 0.0 }
 0x24f   : > { %v2629_v21 = vpop.f32.mrf.mxu1 }
 0x250   : > { %v8536_v17 = vadd.f32 %v2629_v21, %v2461_v11  ;;  %3293 = vmatmul.bf16.vlgmr.msrb.gmra.mxu0 %v3151_v41 }
 0x251   : > { %v2765_v12 = vpop.f32.mrf.mxu2 }
 0x252   : > { %3462 = vmatmul.bf16.vlgmr.msrb.gmra.mxu1 %v3151_v41  ;;  %v2766_v34 = vadd.f32 %v2765_v12, %v2597_v7 }
 0x253   : > { %v2934_v56 = vpop.f32.mrf.mxu3 }
 0x254   : > { %v2935_v23 = vadd.f32 %v2934_v56, %v2766_v34 }
 0x255   : > { %v2462_v37 = vpop.f32.mrf.mxu0 }
 0x256   : > { %v2463_v59 = vadd.f32 %v7578_v32, %v2462_v37  ;;  %5394 = vmatmul.msk.bf16.gmra.mxu2 %vm5393_vm0, %v10860_v22  ;;  %v3090_v10 = vmax.f32 %v2935_v23, 0.0  ;;  %v2433_v32 = vadd.f32 %v8561_v58, %v7694_v8  ;;  %vm11108_vm0 = vmpackc.low %vm11106_vm14, %vm11107_vm3  ;;  %vm1125_vm14 = vcmp.eq.s32.totalorder %v7472_v54, %v8470_v39 }
 0x257   : > { %v2631_v1 = vpop.f32.mrf.mxu1  ;;  %vm614_vm3 = vcmp.eq.s32.totalorder %v7485_v4, %v8465_v31 }
 0x258   : > { %v8555_v33 = vadd.f32 %v2631_v1, %v2463_v59  ;;  %5458 = vmatmul.msk.bf16.gmra.mxu3 %vm5457_vm2, %v10860_v22  ;;  %v3152_v62 = vpack.c.bf16 %v3090_v10, %v3089_v36  ;;  %v2602_v41 = vadd.f32 %v7703_v30, %v2433_v32  ;;  %v2607_v32 = vadd.f32 %v7893_v42, %v2438_v16  ;;  %v11111_v16 = vld [vmem:[#allocation107_spill] sm:$0xff] }
 0x259   : > { %v2768_v40 = vpop.f32.mrf.mxu2  ;;  %vm11113_vm2 = vnez %v11037_v44 }
 0x25a   : > { %v2769_v34 = vadd.f32 %v2768_v40, %v7616_v27  ;;  %vm11114_vm6 = vmpackc.low %vm11112_vm7, %vm11113_vm2 }
 0x25b   : > { %v2937_v51 = vpop.f32.mrf.mxu3  ;;  %vm1377_vm2 = vmor %vm609_vm13, %vm1121_vm12 }
 0x25c   : > { %v2938_v37 = vadd.f32 %v2937_v51, %v2769_v34  ;;  %v11109_v34 = vld [vmem:[#allocation110_spill] sm:$0xff] }
 0x25d   : > { %v2465_v24 = vpop.f32.mrf.mxu0  ;;  %v2443_v0 = vadd.f32 %v8561_v58, %v11109_v34 }
 0x25e   : > { %v2466_v53 = vadd.f32 %v8561_v58, %v2465_v24  ;;  %v3091_v5 = vmax.f32 %v2938_v37, 0.0  ;;  %v11110_v37 = vld [vmem:[#allocation111_spill] sm:$0xff] }
 0x25f   : > { %v2634_v25 = vpop.f32.mrf.mxu1 }
 0x260   : > { %v8567_v11 = vadd.f32 %v2634_v25, %v2466_v53  ;;  %3298 = vmatmul.bf16.gmra.mxu0 %v3152_v62 }
 0x261   : > { %v2770_v21 = vpop.f32.mrf.mxu2 }
 0x262   : > { %3467 = vmatmul.bf16.gmra.mxu1 %v3152_v62  ;;  %v2771_v7 = vadd.f32 %v2770_v21, %v2602_v41 }
 0x263   : > { %v2939_v12 = vpop.f32.mrf.mxu3 }
 0x264   : > { %v2940_v2 = vadd.f32 %v2939_v12, %v2771_v7 }
 0x265   : > { %v2467_v56 = vpop.f32.mrf.mxu0 }
 0x266   : > { %v2468_v8 = vadd.f32 %v8561_v58, %v2467_v56  ;;  %5396 = vmatmul.msk.bf16.gmra.mxu2 %vm11099_vm15, %v10860_v22  ;;  %v3092_v59 = vmax.f32 %v2940_v2, 0.0  ;;  %vm11116_vm15 = vnez %v11039_v52 }
 0x267   : > { %v2636_v30 = vpop.f32.mrf.mxu1  ;;  %vm11117_vm9 = vmpackc.low %vm11115_vm11, %vm11116_vm15  ;;  %vm1122_vm11 = vcmp.eq.s32.totalorder %v7485_v4, %v8473_v28 }
 0x268   : > { %v8577_v23 = vadd.f32 %v2636_v30, %v2468_v8  ;;  %5460 = vmatmul.msk.bf16.gmra.mxu3 %vm11102_vm4, %v10860_v22  ;;  %v3153_v10 = vpack.c.bf16 %v3092_v59, %v3091_v5  ;;  %vm11119_vm4 = vnez %v11080_v26 }
 0x269   : > { %v2773_v27 = vpop.f32.mrf.mxu2  ;;  %vm11120_vm5 = vmpackc.low %vm11118_vm10, %vm11119_vm4 }
 0x26a   : > { %v2774_v53 = vadd.f32 %v2773_v27, %v7748_v57  ;;  %v2612_v27 = vadd.f32 %v11110_v37, %v2443_v0 }
 0x26b   : > { %v2942_v1 = vpop.f32.mrf.mxu3 }
 0x26c   : > { %v2943_v41 = vadd.f32 %v2942_v1, %v2774_v53 }
 0x26d   : > { %v2470_v46 = vpop.f32.mrf.mxu0 }
 0x26e   : > { %v2471_v40 = vadd.f32 %v8561_v58, %v2470_v46  ;;  %v3093_v38 = vmax.f32 %v2943_v41, 0.0  ;;  %v2617_v41 = vadd.f32 %v8400_v63, %v2448_v43  ;;  %v11123_v43 = vld [vmem:[#allocation12_spill] sm:$0xff] }
 0x26f   : > { %v2639_v51 = vpop.f32.mrf.mxu1  ;;  %vm1134_vm12 = vcmp.eq.s32.totalorder %v7485_v4, %v11123_v43 }
 0x270   : > { %v8589_v36 = vadd.f32 %v2639_v51, %v2471_v40  ;;  %3303 = vmatmul.bf16.gmra.mxu0 %v3153_v10 }
 0x271   : > { %v2775_v18 = vpop.f32.mrf.mxu2 }
 0x272   : > { %3472 = vmatmul.bf16.gmra.mxu1 %v3153_v10  ;;  %v2776_v47 = vadd.f32 %v2775_v18, %v2607_v32 }
 0x273   : > { %v2944_v24 = vpop.f32.mrf.mxu3 }
 0x274   : > { %v2945_v25 = vadd.f32 %v2944_v24, %v2776_v47 }
 0x275   : > { %v2472_v62 = vpop.f32.mrf.mxu0 }
 0x276   : > { %v2473_v45 = vadd.f32 %v8561_v58, %v2472_v62  ;;  %5398 = vmatmul.msk.bf16.gmra.mxu2 %vm11105_vm1, %v10860_v22  ;;  %v3094_v7 = vmax.f32 %v2945_v25, 0.0  ;;  %vm613_vm1 = vcmp.eq.s32.totalorder %v7472_v54, %v8465_v31 }
 0x277   : > { %v2641_v42 = vpop.f32.mrf.mxu1  ;;  %vm1381_vm7 = vmor %vm613_vm1, %vm1125_vm14 }
 0x278   : > { %v8599_v21 = vadd.f32 %v2641_v42, %v2473_v45  ;;  %5462 = vmatmul.msk.bf16.gmra.mxu3 %vm11108_vm0, %v10860_v22  ;;  %v3154_v8 = vpack.c.bf16 %v3094_v7, %v3093_v38  ;;  %vm1126_vm0 = vcmp.eq.s32.totalorder %v7485_v4, %v8470_v39 }
 0x279   : > { %v2778_v57 = vpop.f32.mrf.mxu2  ;;  %vm1382_vm15 = vmor %vm614_vm3, %vm1126_vm0 }
 0x27a   : > { %v2779_v5 = vadd.f32 %v2778_v57, %v11111_v16 }
 0x27b   : > { %v2947_v12 = vpop.f32.mrf.mxu3 }
 0x27c   : > { %v2948_v32 = vadd.f32 %v2947_v12, %v2779_v5 }
 0x27d   : > { %v2475_v56 = vpop.f32.mrf.mxu0 }
 0x27e   : > { %v2476_v2 = vadd.f32 %v8561_v58, %v2475_v56  ;;  %v3095_v44 = vmax.f32 %v2948_v32, 0.0 }
 0x27f   : > { %v2644_v30 = vpop.f32.mrf.mxu1 }
 0x280   : > { %v8611_v59 = vadd.f32 %v2644_v30, %v2476_v2  ;;  %3308 = vmatmul.bf16.gmra.mxu0 %v3154_v8 }
 0x281   : > { %v2780_v19 = vpop.f32.mrf.mxu2 }
 0x282   : > { %3477 = vmatmul.bf16.gmra.mxu1 %v3154_v8  ;;  %v2781_v29 = vadd.f32 %v2780_v19, %v2612_v27 }
 0x283   : > { %v2949_v1 = vpop.f32.mrf.mxu3 }
 0x284   : > { %v2950_v40 = vadd.f32 %v2949_v1, %v2781_v29 }
 0x285   : > { %v2477_v46 = vpop.f32.mrf.mxu0 }
 0x286   : > { %v2478_v10 = vadd.f32 %v8561_v58, %v2477_v46  ;;  %5400 = vmatmul.msk.bf16.gmra.mxu2 %vm11114_vm6, %v10860_v22  ;;  %v3096_v24 = vmax.f32 %v2950_v40, 0.0  ;;  %vm610_vm6 = vcmp.eq.s32.totalorder %v7485_v4, %v8425_v14 }
 0x287   : > { %v2646_v51 = vpop.f32.mrf.mxu1  ;;  %vm1378_vm10 = vmor %vm610_vm6, %vm1122_vm11 }
 0x288   : > { %v8621_v18 = vadd.f32 %v2646_v51, %v2478_v10  ;;  %5464 = vmatmul.msk.bf16.gmra.mxu3 %vm11117_vm9, %v10860_v22  ;;  %v3155_v45 = vpack.c.bf16 %v3096_v24, %v3095_v44  ;;  %vm5403_vm9 = vmpackc.low %vm1381_vm7, %vm1377_vm2 }
 0x289   : > { %v2783_v47 = vpop.f32.mrf.mxu2  ;;  %vm5467_vm4 = vmpackc.low %vm1382_vm15, %vm1378_vm10 }
 0x28a   : > { %v2784_v12 = vadd.f32 %v2783_v47, %v8262_v15 }
 0x28b   : > { %v2952_v53 = vpop.f32.mrf.mxu3 }
 0x28c   : > { %v2953_v38 = vadd.f32 %v2952_v53, %v2784_v12  ;;  %v11122_v53 = vld [vmem:[#allocation11_spill] sm:$0xff] }
 0x28d   : > { %v2480_v62 = vpop.f32.mrf.mxu0  ;;  %vm622_vm13 = vcmp.eq.s32.totalorder %v7485_v4, %v11122_v53 }
 0x28e   : > { %v2481_v25 = vadd.f32 %v8561_v58, %v2480_v62  ;;  %v3097_v30 = vmax.f32 %v2953_v38, 0.0  ;;  %v11124_v62 = vld [vmem:[#allocation8_spill] sm:$0xff]  ;;  %vm1390_vm6 = vmor %vm622_vm13, %vm1134_vm12 }
 0x28f   : > { %v2649_v42 = vpop.f32.mrf.mxu1  ;;  %vm617_vm1 = vcmp.eq.s32.totalorder %v7472_v54, %v11124_v62  ;;  %vm618_vm7 = vcmp.eq.s32.totalorder %v7485_v4, %v11124_v62  ;;  %v11132_v62 = vld [vmem:[#allocation17_spill] sm:$0xff] }
 0x290   : > { %v8633_v57 = vadd.f32 %v2649_v42, %v2481_v25  ;;  %3313 = vmatmul.bf16.gmra.mxu0 %v3155_v45  ;;  %v11125_v25 = vld [vmem:[#allocation9_spill] sm:$0xff] }
 0x291   : > { %v2785_v52 = vpop.f32.mrf.mxu2  ;;  %vm1129_vm14 = vcmp.eq.s32.totalorder %v7472_v54, %v11125_v25  ;;  %vm1130_vm2 = vcmp.eq.s32.totalorder %v7485_v4, %v11125_v25  ;;  %v11133_v25 = vld [vmem:[#allocation19_spill] sm:$0xff] }
 0x292   : > { %3482 = vmatmul.bf16.gmra.mxu1 %v3155_v45  ;;  %v2786_v3 = vadd.f32 %v2785_v52, %v2617_v41  ;;  %vm1385_vm0 = vmor %vm617_vm1, %vm1129_vm14 }
 0x293   : > { %v2954_v7 = vpop.f32.mrf.mxu3  ;;  %vm1386_vm15 = vmor %vm618_vm7, %vm1130_vm2 }
 0x294   : > { %v2955_v0 = vadd.f32 %v2954_v7, %v2786_v3 }
 0x295   : > { %v2482_v34 = vpop.f32.mrf.mxu0 }
 0x296   : > { %v2483_v49 = vadd.f32 %v8561_v58, %v2482_v34  ;;  %5402 = vmatmul.msk.bf16.gmra.mxu2 %vm11120_vm5, %v10860_v22  ;;  %v3098_v2 = vmax.f32 %v2955_v0, 0.0  ;;  %vm621_vm5 = vcmp.eq.s32.totalorder %v7472_v54, %v11122_v53 }
 0x297   : > { %v2651_v63 = vpop.f32.mrf.mxu1 }
 0x298   : > { %v8643_v56 = vadd.f32 %v2651_v63, %v2483_v49  ;;  %5466 = vmatmul.msk.bf16.gmra.mxu3 %vm11121_vm8, %v10860_v22  ;;  %v3156_v27 = vpack.c.bf16 %v3098_v2, %v3097_v30  ;;  %vm1133_vm8 = vcmp.eq.s32.totalorder %v7472_v54, %v11123_v43  ;;  %v11126_v30 = vld [vmem:[#allocation16_spill] sm:$0xff] }
 0x299   : > { %v2788_v15 = vpop.f32.mrf.mxu2  ;;  %vm1389_vm3 = vmor %vm621_vm5, %vm1133_vm8  ;;  %vm1137_vm10 = vcmp.eq.s32.totalorder %v7472_v54, %v11126_v30  ;;  %vm1138_vm8 = vcmp.eq.s32.totalorder %v7485_v4, %v11126_v30 }
 0x29a   : > { %v2789_v26 = vadd.f32 %v2788_v15, %v8438_v48  ;;  %vm5405_vm11 = vmpackc.low %vm1389_vm3, %vm1385_vm0 }
 0x29b   : > { %v2957_v8 = vpop.f32.mrf.mxu3 }
 0x29c   : > { %v2958_v48 = vadd.f32 %v2957_v8, %v2789_v26  ;;  %v11127_v26 = vld [vmem:[#allocation14_spill] sm:$0xff] }
 0x29d   : > { %v2485_v55 = vpop.f32.mrf.mxu0  ;;  %vm1142_vm13 = vcmp.eq.s32.totalorder %v7485_v4, %v11127_v26 }
 0x29e   : > { %v2486_v37 = vadd.f32 %v8561_v58, %v2485_v55  ;;  %v3099_v31 = vmax.f32 %v2958_v48, 0.0 }
 0x29f   : > { %v2654_v19 = vpop.f32.mrf.mxu1 }
 0x2a0   : > { %v8657_v35 = vadd.f32 %v2654_v19, %v2486_v37  ;;  %3318 = vmatmul.bf16.gmra.mxu0 %v3156_v27 }
 0x2a1   : > { %v2790_v61 = vpop.f32.mrf.mxu2 }
 0x2a2   : > { %3487 = vmatmul.bf16.gmra.mxu1 %v3156_v27  ;;  %v2791_v29 = vadd.f32 %v2790_v61, %v8475_v13  ;;  %v11128_v27 = vld [vmem:[#allocation5_spill] sm:$0xff] }
 0x2a3   : > { %v2959_v1 = vpop.f32.mrf.mxu3  ;;  %vm625_vm5 = vcmp.eq.s32.totalorder %v7472_v54, %v11128_v27  ;;  %vm626_vm3 = vcmp.eq.s32.totalorder %v7485_v4, %v11128_v27 }
 0x2a4   : > { %v2960_v16 = vadd.f32 %v2959_v1, %v2791_v29  ;;  %vm8717_vm14 = vmor %vm625_vm5, %vm1137_vm10  ;;  %vm638_vm5 = vcmp.eq.s32.totalorder %v7485_v4, %v11132_v62 }
 0x2a5   : > { %v2487_v5 = vpop.f32.mrf.mxu0  ;;  %vm1394_vm7 = vmor %vm626_vm3, %vm1138_vm8  ;;  %vm1150_vm8 = vcmp.eq.s32.totalorder %v7485_v4, %v11133_v25 }
 0x2a6   : > { %v3100_v46 = vmax.f32 %v2960_v16, 0.0  ;;  %v2488_v39 = vadd.f32 %v8561_v58, %v2487_v5  ;;  %5404 = vmatmul.msk.bf16.gmra.mxu2 %vm5403_vm9, %v10860_v22  ;;  %vm5469_vm9 = vmpackc.low %vm1390_vm6, %vm1386_vm15  ;;  %vm637_vm15 = vcmp.eq.s32.totalorder %v7472_v54, %v11132_v62 }
 0x2a7   : > { %v2656_v13 = vpop.f32.mrf.mxu1  ;;  %vm1406_vm3 = vmor %vm638_vm5, %vm1150_vm8 }
 0x2a8   : > { %v8674_v40 = vadd.f32 %v2656_v13, %v2488_v39  ;;  %5468 = vmatmul.msk.bf16.gmra.mxu3 %vm5467_vm4, %v10860_v22  ;;  %v3157_v14 = vpack.c.bf16 %v3100_v46, %v3099_v31  ;;  %vm1141_vm4 = vcmp.eq.s32.totalorder %v7472_v54, %v11127_v26  ;;  %v3199_v13 = vld [vmem:[%s10586_s4] sm:$0x3] }
 0x2a9   : > { %v2793_v10 = vpop.f32.mrf.mxu2 }
 0x2aa   : > { %v2794_v32 = vadd.f32 %v2793_v10, %v8506_v60 }
 0x2ab   : > { %v2962_v28 = vpop.f32.mrf.mxu3 }
 0x2ac   : > { %v2963_v60 = vadd.f32 %v2962_v28, %v2794_v32 }
 0x2ad   : > { %v2490_v51 = vpop.f32.mrf.mxu0 }
 0x2ae   : > { %v2491_v47 = vadd.f32 %v8561_v58, %v2490_v51  ;;  %v3101_v7 = vmax.f32 %v2963_v60, 0.0  ;;  %v8738_v51 = vperm.slane %v3199_v13, 0  ;;  %v11134_v60 = vld [vmem:[#allocation7_spill] sm:$0xff] }
 0x2af   : > { %v2659_v24 = vpop.f32.mrf.mxu1  ;;  %vm633_vm10 = vcmp.eq.s32.totalorder %v7472_v54, %v11134_v60 }
 0x2b0   : > { %v8683_v44 = vadd.f32 %v2659_v24, %v2491_v47  ;;  %3323 = vmatmul.bf16.gmra.mxu0 %v3157_v14  ;;  %v8740_v47 = vperm.slane %v3199_v13, 1 }
 0x2b1   : > { %v2795_v45 = vpop.f32.mrf.mxu2 }
 0x2b2   : > { %3492 = vmatmul.bf16.gmra.mxu1 %v3157_v14  ;;  %v2796_v42 = vadd.f32 %v2795_v45, %v8527_v6 }
 0x2b3   : > { %v2964_v41 = vpop.f32.mrf.mxu3 }
 0x2b4   : > { %v2965_v52 = vadd.f32 %v2964_v41, %v2796_v42  ;;  %v11135_v42 = vld [vmem:[#allocation10_spill] sm:$0xff] }
 0x2b5   : > { %v2492_v3 = vpop.f32.mrf.mxu0 }
 0x2b6   : > { %v3102_v12 = vmax.f32 %v2965_v52, 0.0  ;;  %v2493_v34 = vadd.f32 %v8561_v58, %v2492_v3  ;;  %5406 = vmatmul.msk.bf16.gmra.mxu2 %vm5405_vm11, %v10860_v22 }
 0x2b7   : > { %v2661_v6 = vpop.f32.mrf.mxu1 }
 0x2b8   : > { %v8700_v0 = vadd.f32 %v2661_v6, %v2493_v34  ;;  %5470 = vmatmul.msk.bf16.gmra.mxu3 %vm5469_vm9, %v10860_v22  ;;  %v3158_v49 = vpack.c.bf16 %v3102_v12, %v3101_v7  ;;  %vm1149_vm9 = vcmp.eq.s32.totalorder %v7472_v54, %v11133_v25 }
 0x2b9   : > { %v2798_v63 = vpop.f32.mrf.mxu2 }
 0x2ba   : > { %v2799_v2 = vadd.f32 %v2798_v63, %v8536_v17  ;;  %v11129_v17 = vld [vmem:[#allocation6_spill] sm:$0xff] }
 0x2bb   : > { %v2967_v38 = vpop.f32.mrf.mxu3  ;;  %vm629_vm1 = vcmp.eq.s32.totalorder %v7472_v54, %v11129_v17  ;;  %vm630_vm0 = vcmp.eq.s32.totalorder %v7485_v4, %v11129_v17  ;;  %v11136_v17 = vld [vmem:[#allocation22_spill] sm:$0xff] }
 0x2bc   : > { %v2968_v48 = vadd.f32 %v2967_v38, %v2799_v2  ;;  %vm1397_vm12 = vmor %vm629_vm1, %vm1141_vm4  ;;  %vm1145_vm4 = vcmp.eq.s32.totalorder %v7472_v54, %v11135_v42 }
 0x2bd   : > { %v2495_v15 = vpop.f32.mrf.mxu0  ;;  %vm1398_vm2 = vmor %vm630_vm0, %vm1142_vm13  ;;  %vm634_vm13 = vcmp.eq.s32.totalorder %v7485_v4, %v11134_v60 }
 0x2be   : > { %v2496_v8 = vadd.f32 %v8561_v58, %v2495_v15  ;;  %vm5407_vm6 = vmpackc.low %vm1397_vm12, %vm8717_vm14  ;;  %v3103_v31 = vmax.f32 %v2968_v48, 0.0  ;;  %vm1146_vm12 = vcmp.eq.s32.totalorder %v7485_v4, %v11135_v42  ;;  %v11137_v48 = vld [vmem:[#allocation20_spill] sm:$0xff] }
 0x2bf   : > { %v2664_v55 = vpop.f32.mrf.mxu1  ;;  %vm5471_vm11 = vmpackc.low %vm1398_vm2, %vm1394_vm7  ;;  %vm642_vm8 = vcmp.eq.s32.totalorder %v7485_v4, %v11137_v48 }
 0x2c0   : > { %v8709_v37 = vadd.f32 %v2664_v55, %v2496_v8  ;;  %3328 = vmatmul.bf16.gmra.mxu0 %v3158_v49  ;;  %vm1405_vm1 = vmor %vm637_vm15, %vm1149_vm9 }
 0x2c1   : > { %v2800_v19 = vpop.f32.mrf.mxu2  ;;  %vm1401_vm14 = vmor %vm633_vm10, %vm1145_vm4  ;;  %vm1158_vm10 = vcmp.eq.s32.totalorder %v7485_v4, %v11136_v17 }
 0x2c2   : > { %3497 = vmatmul.bf16.gmra.mxu1 %v3158_v49  ;;  %v2801_v29 = vadd.f32 %v2800_v19, %v8555_v33  ;;  %vm5409_vm0 = vmpackc.low %vm1405_vm1, %vm1401_vm14 }
 0x2c3   : > { %v2969_v1 = vpop.f32.mrf.mxu3  ;;  %vm1402_vm7 = vmor %vm634_vm13, %vm1146_vm12 }
 0x2c4   : > { %v2970_v16 = vadd.f32 %v2969_v1, %v2801_v29  ;;  %vm5473_vm2 = vmpackc.low %vm1406_vm3, %vm1402_vm7  ;;  %v11138_v29 = vld [vmem:[#allocation24_spill] sm:$0xff] }
 0x2c5   : > { %v2497_v5 = vpop.f32.mrf.mxu0  ;;  %vm1153_vm15 = vcmp.eq.s32.totalorder %v7472_v54, %v11138_v29  ;;  %vm1154_vm14 = vcmp.eq.s32.totalorder %v7485_v4, %v11138_v29 }
 0x2c6   : > { %v3104_v46 = vmax.f32 %v2970_v16, 0.0  ;;  %v2498_v39 = vadd.f32 %v8561_v58, %v2497_v5  ;;  %5408 = vmatmul.msk.bf16.gmra.mxu2 %vm5407_vm6, %v10860_v22  ;;  %vm1157_vm6 = vcmp.eq.s32.totalorder %v7472_v54, %v11136_v17  ;;  %v11139_v16 = vld [vmem:[#allocation13_spill] sm:$0xff]  ;;  %vm1410_vm3 = vmor %vm642_vm8, %vm1154_vm14 }
 0x2c7   : > { %v2666_v33 = vpop.f32.mrf.mxu1  ;;  %vm645_vm9 = vcmp.eq.s32.totalorder %v7472_v54, %v11139_v16  ;;  %vm646_vm1 = vcmp.eq.s32.totalorder %v7485_v4, %v11139_v16 }
 0x2c8   : > { %v8735_v14 = vadd.f32 %v2666_v33, %v2498_v39  ;;  %5472 = vmatmul.msk.bf16.gmra.mxu3 %vm5471_vm11, %v10860_v22  ;;  %v3159_v10 = vpack.c.bf16 %v3104_v46, %v3103_v31  ;;  %vm641_vm11 = vcmp.eq.s32.totalorder %v7472_v54, %v11137_v48  ;;  %vm1413_vm4 = vmor %vm645_vm9, %vm1157_vm6 }
 0x2c9   : > { %v2803_v28 = vpop.f32.mrf.mxu2  ;;  %vm1409_vm5 = vmor %vm641_vm11, %vm1153_vm15 }
 0x2ca   : > { %v2804_v24 = vadd.f32 %v2803_v28, %v8567_v11  ;;  %vm1414_vm13 = vmor %vm646_vm1, %vm1158_vm10 }
 0x2cb   : > { %v2972_v32 = vpop.f32.mrf.mxu3  ;;  %vm5411_vm12 = vmpackc.low %vm1413_vm4, %vm1409_vm5 }
 0x2cc   : > { %v2973_v41 = vadd.f32 %v2972_v32, %v2804_v24 }
 0x2cd   : > { %v3294_v58 = vpop.f32.mrf.mxu0 }
 0x2ce   : > { %v8744_v53 = vadd.f32 %v3294_v58, %v8738_v51  ;;  %v3105_v6 = vmax.f32 %v2973_v41, 0.0 }
 0x2cf   : > { %v3463_v43 = vpop.f32.mrf.mxu1 }
 0x2d0   : > { %v8751_v45 = vadd.f32 %v3463_v43, %v8740_v47  ;;  %3333 = vmatmul.bf16.gmra.mxu0 %v3159_v10 }
 0x2d1   : > { %v2805_v11 = vpop.f32.mrf.mxu2 }
 0x2d2   : > { %3502 = vmatmul.bf16.gmra.mxu1 %v3159_v10  ;;  %v2806_v52 = vadd.f32 %v2805_v11, %v8577_v23  ;;  %v3623_v3 = vmax.f32 %v8744_v53, %v8751_v45  ;;  %v11140_v11 = vld [vmem:[#allocation25_spill] sm:$0xff] }
 0x2d3   : > { %v2974_v7 = vpop.f32.mrf.mxu3  ;;  %vm1161_vm7 = vcmp.eq.s32.totalorder %v7472_v54, %v11140_v11  ;;  %vm1162_vm15 = vcmp.eq.s32.totalorder %v7485_v4, %v11140_v11 }
 0x2d4   : > { %v2975_v12 = vadd.f32 %v2974_v7, %v2806_v52  ;;  %3624 = vmax.xlane.f32.xlu2 %v3623_v3  ;;  %v11141_v52 = vld [vmem:[#allocation26_spill] sm:$0xff] }
 0x2d5   : > { %v3296_v34 = vpop.f32.mrf.mxu0  ;;  %v11142_v3 = vld [vmem:[#allocation18_spill] sm:$0xff]  ;;  %vm654_vm10 = vcmp.eq.s32.totalorder %v7485_v4, %v11141_v52 }
 0x2d6   : > { %v3106_v49 = vmax.f32 %v2975_v12, 0.0  ;;  %v8769_v23 = vadd.f32 %v3296_v34, %v8738_v51  ;;  %5410 = vmatmul.msk.bf16.gmra.mxu2 %vm5409_vm0, %v10860_v22  ;;  %vm5475_vm0 = vmpackc.low %vm1414_vm13, %vm1410_vm3  ;;  %vm1165_vm6 = vcmp.eq.s32.totalorder %v7472_v54, %v11142_v3  ;;  %v11143_v12 = vld [vmem:[#allocation15_spill] sm:$0xff]  ;;  %vm1166_vm4 = vcmp.eq.s32.totalorder %v7485_v4, %v11142_v3 }
 0x2d7   : > { %v3465_v63 = vpop.f32.mrf.mxu1  ;;  %vm649_vm11 = vcmp.eq.s32.totalorder %v7472_v54, %v11143_v12  ;;  %vm650_vm8 = vcmp.eq.s32.totalorder %v7485_v4, %v11143_v12  ;;  %vm1422_vm14 = vmor %vm654_vm10, %vm1166_vm4 }
 0x2d8   : > { %v8773_v38 = vadd.f32 %v3465_v63, %v8740_v47  ;;  %5474 = vmatmul.msk.bf16.gmra.mxu3 %vm5473_vm2, %v10860_v22  ;;  %v3160_v15 = vpack.c.bf16 %v3106_v49, %v3105_v6  ;;  %vm653_vm2 = vcmp.eq.s32.totalorder %v7472_v54, %v11141_v52  ;;  %vm8831_vm9 = vmor %vm649_vm11, %vm1161_vm7 }
 0x2d9   : > { %v2808_v2 = vpop.f32.mrf.mxu2  ;;  %vm1421_vm5 = vmor %vm653_vm2, %vm1165_vm6 }
 0x2da   : > { %v3626_v8 = vmax.f32 %v8769_v23, %v8773_v38  ;;  %v2809_v26 = vadd.f32 %v2808_v2, %v8589_v36  ;;  %vm1418_vm1 = vmor %vm650_vm8, %vm1162_vm15 }
 0x2db   : > { %v2977_v30 = vpop.f32.mrf.mxu3  ;;  %vm5413_vm13 = vmpackc.low %vm1421_vm5, %vm8831_vm9 }
 0x2dc   : > { %3627 = vmax.xlane.f32.xlu0 %v3626_v8  ;;  %v2978_v36 = vadd.f32 %v2977_v30, %v2809_v26 }
 0x2dd   : > { %v3299_v55 = vpop.f32.mrf.mxu0 }
 0x2de   : > { %v8780_v27 = vadd.f32 %v3299_v55, %v8738_v51 }
 0x2df   : > { %v3468_v19 = vpop.f32.mrf.mxu1 }
 0x2e0   : > { %v8785_v61 = vadd.f32 %v3468_v19, %v8740_v47  ;;  %3338 = vmatmul.bf16.gmra.mxu0 %v3160_v15 }
 0x2e1   : > { %v2810_v1 = vpop.f32.mrf.mxu2 }
 0x2e2   : > { %3507 = vmatmul.bf16.gmra.mxu1 %v3160_v15  ;;  %v2811_v5 = vadd.f32 %v2810_v1, %v8599_v21  ;;  %v3629_v31 = vmax.f32 %v8780_v27, %v8785_v61  ;;  %v3107_v21 = vmax.f32 %v2978_v36, 0.0 }
 0x2e3   : > { %v2979_v46 = vpop.f32.mrf.mxu3 }
 0x2e4   : > { %v2980_v39 = vadd.f32 %v2979_v46, %v2811_v5  ;;  %3630 = vmax.xlane.f32.xlu1 %v3629_v31  ;;  %v11146_v46 = vld [vmem:[#allocation31_spill] sm:$0xff] }
 0x2e5   : > { %v3301_v33 = vpop.f32.mrf.mxu0  ;;  %vm1173_vm3 = vcmp.eq.s32.totalorder %v7472_v54, %v11146_v46  ;;  %vm1174_vm6 = vcmp.eq.s32.totalorder %v7485_v4, %v11146_v46 }
 0x2e6   : > { %v3108_v13 = vmax.f32 %v2980_v39, 0.0  ;;  %v8805_v10 = vadd.f32 %v3301_v33, %v8738_v51  ;;  %5412 = vmatmul.msk.bf16.gmra.mxu2 %vm5411_vm12, %v10860_v22  ;;  %vm5477_vm12 = vmpackc.low %vm1422_vm14, %vm1418_vm1  ;;  %v11147_v33 = vld [vmem:[#allocation28_spill] sm:$0xff] }
 0x2e7   : > { %v3470_v28 = vpop.f32.mrf.mxu1  ;;  %vm658_vm9 = vcmp.eq.s32.totalorder %v7485_v4, %v11147_v33 }
 0x2e8   : > { %v8809_v32 = vadd.f32 %v3470_v28, %v8740_v47  ;;  %5476 = vmatmul.msk.bf16.gmra.mxu3 %vm5475_vm0, %v10860_v22  ;;  %v3161_v58 = vpack.c.bf16 %v3108_v13, %v3107_v21  ;;  %vm657_vm0 = vcmp.eq.s32.totalorder %v7472_v54, %v11147_v33  ;;  %v11148_v21 = vld [vmem:[#allocation30_spill] sm:$0xff]  ;;  %v11149_v28 = vld [vmem:[#allocation21_spill] sm:$0xff] }
 0x2e9   : > { %v2813_v24 = vpop.f32.mrf.mxu2  ;;  %vm1169_vm7 = vcmp.eq.s32.totalorder %v7472_v54, %v11148_v21  ;;  %vm661_vm2 = vcmp.eq.s32.totalorder %v7472_v54, %v11149_v28  ;;  %vm662_vm10 = vcmp.eq.s32.totalorder %v7485_v4, %v11149_v28  ;;  %vm1170_vm4 = vcmp.eq.s32.totalorder %v7485_v4, %v11148_v21 }
 0x2ea   : > { %v3632_v43 = vmax.f32 %v8805_v10, %v8809_v32  ;;  %v2814_v60 = vadd.f32 %v2813_v24, %v8611_v59  ;;  %vm1429_vm11 = vmor %vm661_vm2, %vm1173_vm3 }
 0x2eb   : > { %v2982_v62 = vpop.f32.mrf.mxu3  ;;  %vm1425_vm15 = vmor %vm657_vm0, %vm1169_vm7 }
 0x2ec   : > { %3633 = vmax.xlane.f32.xlu2 %v3632_v43  ;;  %v2983_v6 = vadd.f32 %v2982_v62, %v2814_v60  ;;  %vm1430_vm5 = vmor %vm662_vm10, %vm1174_vm6 }
 0x2ed   : > { %v3304_v25 = vpop.f32.mrf.mxu0  ;;  %vm5415_vm8 = vmpackc.low %vm1429_vm11, %vm1425_vm15 }
 0x2ee   : > { %v8816_v42 = vadd.f32 %v3304_v25, %v8738_v51  ;;  %v3109_v30 = vmax.f32 %v2983_v6, 0.0  ;;  %vm1426_vm1 = vmor %vm658_vm9, %vm1170_vm4 }
 0x2ef   : > { %v3473_v41 = vpop.f32.mrf.mxu1  ;;  %vm5479_vm14 = vmpackc.low %vm1430_vm5, %vm1426_vm1 }
 0x2f0   : > { %v8825_v7 = vadd.f32 %v3473_v41, %v8740_v47  ;;  %3343 = vmatmul.bf16.gmra.mxu0 %v3161_v58 }
 0x2f1   : > { %v2815_v59 = vpop.f32.mrf.mxu2 }
 0x2f2   : > { %v3635_v49 = vmax.f32 %v8816_v42, %v8825_v7  ;;  %3512 = vmatmul.bf16.gmra.mxu1 %v3161_v58  ;;  %v2816_v63 = vadd.f32 %v2815_v59, %v8621_v18 }
 0x2f3   : > { %v2984_v15 = vpop.f32.mrf.mxu3 }
 0x2f4   : > { %v2985_v2 = vadd.f32 %v2984_v15, %v2816_v63  ;;  %3636 = vmax.xlane.f32.xlu2 %v3635_v49 }
 0x2f5   : > { %v3306_v8 = vpop.f32.mrf.mxu0 }
 0x2f6   : > { %v3110_v55 = vmax.f32 %v2985_v2, 0.0  ;;  %v8847_v26 = vadd.f32 %v3306_v8, %v8738_v51  ;;  %5414 = vmatmul.msk.bf16.gmra.mxu2 %vm5413_vm13, %v10860_v22  ;;  %v11150_v2 = vld [vmem:[#allocation34_spill] sm:$0xff]  ;;  %v11151_v8 = vld [vmem:[#allocation33_spill] sm:$0xff] }
 0x2f7   : > { %v3475_v18 = vpop.f32.mrf.mxu1  ;;  %vm669_vm13 = vcmp.eq.s32.totalorder %v7472_v54, %v11150_v2  ;;  %vm670_vm7 = vcmp.eq.s32.totalorder %v7485_v4, %v11150_v2  ;;  %vm1182_vm2 = vcmp.eq.s32.totalorder %v7485_v4, %v11151_v8 }
 0x2f8   : > { %v8851_v19 = vadd.f32 %v3475_v18, %v8740_v47  ;;  %5478 = vmatmul.msk.bf16.gmra.mxu3 %vm5477_vm12, %v10860_v22  ;;  %v3162_v17 = vpack.c.bf16 %v3110_v55, %v3109_v30  ;;  %vm1181_vm12 = vcmp.eq.s32.totalorder %v7472_v54, %v11151_v8  ;;  %v11152_v55 = vld [vmem:[#allocation23_spill] sm:$0xff]  ;;  %vm1438_vm10 = vmor %vm670_vm7, %vm1182_vm2 }
 0x2f9   : > { %v2818_v48 = vpop.f32.mrf.mxu2  ;;  %vm665_vm3 = vcmp.eq.s32.totalorder %v7472_v54, %v11152_v55  ;;  %v11153_v18 = vld [vmem:[#allocation27_spill] sm:$0xff]  ;;  %vm1437_vm6 = vmor %vm669_vm13, %vm1181_vm12  ;;  %vm666_vm15 = vcmp.eq.s32.totalorder %v7485_v4, %v11152_v55 }
 0x2fa   : > { %v3638_v29 = vmax.f32 %v8847_v26, %v8851_v19  ;;  %v2819_v36 = vadd.f32 %v2818_v48, %v8633_v57  ;;  %vm1177_vm0 = vcmp.eq.s32.totalorder %v7472_v54, %v11153_v18  ;;  %vm1178_vm9 = vcmp.eq.s32.totalorder %v7485_v4, %v11153_v18 }
 0x2fb   : > { %v2987_v1 = vpop.f32.mrf.mxu3  ;;  %vm1433_vm11 = vmor %vm665_vm3, %vm1177_vm0 }
 0x2fc   : > { %3639 = vmax.xlane.f32.xlu0 %v3638_v29  ;;  %v2988_v57 = vadd.f32 %v2987_v1, %v2819_v36  ;;  %vm5417_vm4 = vmpackc.low %vm1437_vm6, %vm1433_vm11 }
 0x2fd   : > { %v3309_v16 = vpop.f32.mrf.mxu0  ;;  %vm1434_vm5 = vmor %vm666_vm15, %vm1178_vm9 }
 0x2fe   : > { %v8858_v5 = vadd.f32 %v3309_v16, %v8738_v51  ;;  %v3111_v60 = vmax.f32 %v2988_v57, 0.0 }
 0x2ff   : > { %v3478_v31 = vpop.f32.mrf.mxu1 }
 0x300   : > { %v8863_v39 = vadd.f32 %v3478_v31, %v8740_v47  ;;  %3348 = vmatmul.bf16.gmra.mxu0 %v3162_v17 }
 0x301   : > { %v2820_v13 = vpop.f32.mrf.mxu2 }
 0x302   : > { %v3641_v58 = vmax.f32 %v8858_v5, %v8863_v39  ;;  %3517 = vmatmul.bf16.gmra.mxu1 %v3162_v17  ;;  %v2821_v24 = vadd.f32 %v2820_v13, %v8643_v56 }
 0x303   : > { %v2989_v43 = vpop.f32.mrf.mxu3 }
 0x304   : > { %v2990_v62 = vadd.f32 %v2989_v43, %v2821_v24  ;;  %3642 = vmax.xlane.f32.xlu1 %v3641_v58 }
 0x305   : > { %v3311_v25 = vpop.f32.mrf.mxu0 }
 0x306   : > { %v3112_v11 = vmax.f32 %v2990_v62, 0.0  ;;  %v8883_v56 = vadd.f32 %v3311_v25, %v8738_v51  ;;  %5416 = vmatmul.msk.bf16.gmra.mxu2 %vm5415_vm8, %v10860_v22  ;;  %vm5481_vm8 = vmpackc.low %vm1438_vm10, %vm1434_vm5 }
 0x307   : > { %v3480_v41 = vpop.f32.mrf.mxu1 }
 0x308   : > { %v8887_v52 = vadd.f32 %v3480_v41, %v8740_v47  ;;  %5480 = vmatmul.msk.bf16.gmra.mxu3 %vm5479_vm14, %v10860_v22  ;;  %v3163_v3 = vpack.c.bf16 %v3112_v11, %v3111_v60  ;;  %v11154_v60 = vld [vmem:[#allocation40_spill] sm:$0xff]  ;;  %v11155_v41 = vld [vmem:[#allocation37_spill] sm:$0xff] }
 0x309   : > { %v2823_v12 = vpop.f32.mrf.mxu2  ;;  %vm1189_vm1 = vcmp.eq.s32.totalorder %v7472_v54, %v11154_v60  ;;  %vm673_vm14 = vcmp.eq.s32.totalorder %v7472_v54, %v11155_v41  ;;  %vm1190_vm3 = vcmp.eq.s32.totalorder %v7485_v4, %v11154_v60  ;;  %vm674_vm2 = vcmp.eq.s32.totalorder %v7485_v4, %v11155_v41 }
 0x30a   : > { %v3644_v59 = vmax.f32 %v8883_v56, %v8887_v52  ;;  %v2824_v49 = vadd.f32 %v2823_v12, %v8657_v35 }
 0x30b   : > { %v2992_v34 = vpop.f32.mrf.mxu3 }
 0x30c   : > { %3645 = vmax.xlane.f32.xlu2 %v3644_v59  ;;  %v2993_v17 = vadd.f32 %v2992_v34, %v2824_v49  ;;  %v11157_v59 = vld [vmem:[#allocation29_spill] sm:$0xff] }
 0x30d   : > { %v3314_v6 = vpop.f32.mrf.mxu0  ;;  %vm677_vm12 = vcmp.eq.s32.totalorder %v7472_v54, %v11157_v59  ;;  %vm678_vm6 = vcmp.eq.s32.totalorder %v7485_v4, %v11157_v59 }
 0x30e   : > { %v8894_v63 = vadd.f32 %v3314_v6, %v8738_v51  ;;  %v3113_v31 = vmax.f32 %v2993_v17, 0.0  ;;  %vm1445_vm0 = vmor %vm677_vm12, %vm1189_vm1 }
 0x30f   : > { %v3483_v15 = vpop.f32.mrf.mxu1  ;;  %vm1446_vm15 = vmor %vm678_vm6, %vm1190_vm3 }
 0x310   : > { %v8901_v30 = vadd.f32 %v3483_v15, %v8740_v47  ;;  %3353 = vmatmul.bf16.gmra.mxu0 %v3163_v3 }
 0x311   : > { %v2825_v35 = vpop.f32.mrf.mxu2 }
 0x312   : > { %3522 = vmatmul.bf16.gmra.mxu1 %v3163_v3  ;;  %v2826_v48 = vadd.f32 %v2825_v35, %v8674_v40  ;;  %v3647_v29 = vmax.f32 %v8894_v63, %v8901_v30  ;;  %v11156_v3 = vld [vmem:[#allocation36_spill] sm:$0xff] }
 0x313   : > { %v2994_v1 = vpop.f32.mrf.mxu3  ;;  %vm1185_vm13 = vcmp.eq.s32.totalorder %v7472_v54, %v11156_v3  ;;  %vm1186_vm11 = vcmp.eq.s32.totalorder %v7485_v4, %v11156_v3 }
 0x314   : > { %v2995_v16 = vadd.f32 %v2994_v1, %v2826_v48  ;;  %3648 = vmax.xlane.f32.xlu0 %v3647_v29  ;;  %vm1441_vm7 = vmor %vm673_vm14, %vm1185_vm13 }
 0x315   : > { %v3316_v36 = vpop.f32.mrf.mxu0  ;;  %vm5419_vm9 = vmpackc.low %vm1445_vm0, %vm1441_vm7 }
 0x316   : > { %v3114_v46 = vmax.f32 %v2995_v16, 0.0  ;;  %v8919_v40 = vadd.f32 %v3316_v36, %v8738_v51  ;;  %5418 = vmatmul.msk.bf16.gmra.mxu2 %vm5417_vm4, %v10860_v22  ;;  %vm1442_vm10 = vmor %vm674_vm2, %vm1186_vm11 }
 0x317   : > { %v3485_v33 = vpop.f32.mrf.mxu1  ;;  %vm5483_vm4 = vmpackc.low %vm1446_vm15, %vm1442_vm10 }
 0x318   : > { %v8923_v21 = vadd.f32 %v3485_v33, %v8740_v47  ;;  %5482 = vmatmul.msk.bf16.gmra.mxu3 %vm5481_vm8, %v10860_v22  ;;  %v3164_v13 = vpack.c.bf16 %v3114_v46, %v3113_v31  ;;  %v11158_v46 = vld [vmem:[#allocation39_spill] sm:$0xff] }
 0x319   : > { %v2828_v28 = vpop.f32.mrf.mxu2  ;;  %vm685_vm5 = vcmp.eq.s32.totalorder %v7472_v54, %v11158_v46  ;;  %v11159_v33 = vld [vmem:[#allocation35_spill] sm:$0xff]  ;;  %vm686_vm14 = vcmp.eq.s32.totalorder %v7485_v4, %v11158_v46  ;;  %v11167_v46 = vld [vmem:[#allocation44_spill] sm:$0xff] }
 0x31a   : > { %v3650_v57 = vmax.f32 %v8919_v40, %v8923_v21  ;;  %v2829_v43 = vadd.f32 %v2828_v28, %v8683_v44  ;;  %vm1197_vm8 = vcmp.eq.s32.totalorder %v7472_v54, %v11159_v33  ;;  %v11160_v28 = vld [vmem:[#allocation41_spill] sm:$0xff]  ;;  %vm1198_vm13 = vcmp.eq.s32.totalorder %v7485_v4, %v11159_v33 }
 0x31b   : > { %v2997_v58 = vpop.f32.mrf.mxu3  ;;  %vm1193_vm1 = vcmp.eq.s32.totalorder %v7472_v54, %v11160_v28  ;;  %vm8983_vm3 = vmor %vm685_vm5, %vm1197_vm8  ;;  %vm1194_vm0 = vcmp.eq.s32.totalorder %v7485_v4, %v11160_v28  ;;  %vm1201_vm5 = vcmp.eq.s32.totalorder %v7472_v54, %v11167_v46 }
 0x31c   : > { %3651 = vmax.xlane.f32.xlu1 %v3650_v57  ;;  %v2998_v44 = vadd.f32 %v2997_v58, %v2829_v43  ;;  %v11161_v58 = vld [vmem:[#allocation32_spill] sm:$0xff]  ;;  %vm1454_vm6 = vmor %vm686_vm14, %vm1198_vm13 }
 0x31d   : > { %v3319_v24 = vpop.f32.mrf.mxu0  ;;  %vm681_vm12 = vcmp.eq.s32.totalorder %v7472_v54, %v11161_v58  ;;  %vm682_vm2 = vcmp.eq.s32.totalorder %v7485_v4, %v11161_v58 }
 0x31e   : > { %v8930_v62 = vadd.f32 %v3319_v24, %v8738_v51  ;;  %v3115_v8 = vmax.f32 %v2998_v44, 0.0  ;;  %vm1449_vm7 = vmor %vm681_vm12, %vm1193_vm1 }
 0x31f   : > { %v3488_v25 = vpop.f32.mrf.mxu1  ;;  %vm1450_vm11 = vmor %vm682_vm2, %vm1194_vm0  ;;  %vm1202_vm0 = vcmp.eq.s32.totalorder %v7485_v4, %v11167_v46 }
 0x320   : > { %v8935_v11 = vadd.f32 %v3488_v25, %v8740_v47  ;;  %3358 = vmatmul.bf16.gmra.mxu0 %v3164_v13  ;;  %vm5421_vm15 = vmpackc.low %vm8983_vm3, %vm1449_vm7 }
 0x321   : > { %v2830_v12 = vpop.f32.mrf.mxu2 }
 0x322   : > { %v3653_v34 = vmax.f32 %v8930_v62, %v8935_v11  ;;  %3527 = vmatmul.bf16.gmra.mxu1 %v3164_v13  ;;  %v2831_v6 = vadd.f32 %v2830_v12, %v8700_v0 }
 0x323   : > { %v2999_v49 = vpop.f32.mrf.mxu3 }
 0x324   : > { %v3000_v15 = vadd.f32 %v2999_v49, %v2831_v6  ;;  %3654 = vmax.xlane.f32.xlu2 %v3653_v34 }
 0x325   : > { %v3321_v2 = vpop.f32.mrf.mxu0 }
 0x326   : > { %v3116_v55 = vmax.f32 %v3000_v15, 0.0  ;;  %v8955_v0 = vadd.f32 %v3321_v2, %v8738_v51  ;;  %5420 = vmatmul.msk.bf16.gmra.mxu2 %vm5419_vm9, %v10860_v22  ;;  %vm5485_vm9 = vmpackc.low %vm1454_vm6, %vm1450_vm11 }
 0x327   : > { %v3490_v18 = vpop.f32.mrf.mxu1 }
 0x328   : > { %v8959_v35 = vadd.f32 %v3490_v18, %v8740_v47  ;;  %5484 = vmatmul.msk.bf16.gmra.mxu3 %vm5483_vm4, %v10860_v22  ;;  %v3165_v17 = vpack.c.bf16 %v3116_v55, %v3115_v8  ;;  %v11164_v18 = vld [vmem:[#allocation48_spill] sm:$0xff] }
 0x329   : > { %v2833_v48 = vpop.f32.mrf.mxu2 }
 0x32a   : > { %v3656_v29 = vmax.f32 %v8955_v0, %v8959_v35  ;;  %v2834_v36 = vadd.f32 %v2833_v48, %v8709_v37 }
 0x32b   : > { %v3002_v1 = vpop.f32.mrf.mxu3 }
 0x32c   : > { %3657 = vmax.xlane.f32.xlu0 %v3656_v29  ;;  %v3003_v43 = vadd.f32 %v3002_v1, %v2834_v36  ;;  %v11165_v1 = vld [vmem:[#allocation45_spill] sm:$0xff]  ;;  %v11166_v36 = vld [vmem:[#allocation42_spill] sm:$0xff] }
 0x32d   : > { %v3324_v16 = vpop.f32.mrf.mxu0  ;;  %vm1205_vm10 = vcmp.eq.s32.totalorder %v7472_v54, %v11165_v1  ;;  %vm689_vm4 = vcmp.eq.s32.totalorder %v7472_v54, %v11166_v36  ;;  %vm1206_vm1 = vcmp.eq.s32.totalorder %v7485_v4, %v11165_v1  ;;  %vm690_vm12 = vcmp.eq.s32.totalorder %v7485_v4, %v11166_v36  ;;  %v11170_v36 = vld [vmem:[#allocation52_spill] sm:$0xff] }
 0x32e   : > { %v8966_v31 = vadd.f32 %v3324_v16, %v8738_v51  ;;  %v3117_v59 = vmax.f32 %v3003_v43, 0.0  ;;  %vm1457_vm13 = vmor %vm689_vm4, %vm1201_vm5 }
 0x32f   : > { %v3493_v13 = vpop.f32.mrf.mxu1  ;;  %vm1458_vm6 = vmor %vm690_vm12, %vm1202_vm0 }
 0x330   : > { %v8975_v57 = vadd.f32 %v3493_v13, %v8740_v47  ;;  %3363 = vmatmul.bf16.gmra.mxu0 %v3165_v17  ;;  %v11168_v13 = vld [vmem:[#allocation38_spill] sm:$0xff] }
 0x331   : > { %v2835_v37 = vpop.f32.mrf.mxu2  ;;  %vm693_vm8 = vcmp.eq.s32.totalorder %v7472_v54, %v11168_v13  ;;  %vm694_vm3 = vcmp.eq.s32.totalorder %v7485_v4, %v11168_v13 }
 0x332   : > { %v3659_v25 = vmax.f32 %v8966_v31, %v8975_v57  ;;  %3532 = vmatmul.bf16.gmra.mxu1 %v3165_v17  ;;  %v2836_v60 = vadd.f32 %v2835_v37, %v8735_v14  ;;  %v11169_v37 = vld [vmem:[#allocation50_spill] sm:$0xff]  ;;  %vm1461_vm14 = vmor %vm693_vm8, %vm1205_vm10 }
 0x333   : > { %v3004_v41 = vpop.f32.mrf.mxu3  ;;  %vm1462_vm7 = vmor %vm694_vm3, %vm1206_vm1 }
 0x334   : > { %v3005_v3 = vadd.f32 %v3004_v41, %v2836_v60  ;;  %3660 = vmax.xlane.f32.xlu1 %v3659_v25  ;;  %vm5423_vm2 = vmpackc.low %vm1461_vm14, %vm1457_vm13 }
 0x335   : > { %v3326_v12 = vpop.f32.mrf.mxu0  ;;  %vm5487_vm11 = vmpackc.low %vm1462_vm7, %vm1458_vm6 }
 0x336   : > { %v3118_v44 = vmax.f32 %v3005_v3, 0.0  ;;  %v8997_v34 = vadd.f32 %v3326_v12, %v8738_v51  ;;  %5422 = vmatmul.msk.bf16.gmra.mxu2 %vm5421_vm15, %v10860_v22 }
 0x337   : > { %v3495_v14 = vpop.f32.mrf.mxu1 }
 0x338   : > { %v9001_v6 = vadd.f32 %v3495_v14, %v8740_v47  ;;  %5486 = vmatmul.msk.bf16.gmra.mxu3 %vm5485_vm9, %v10860_v22  ;;  %v3166_v49 = vpack.c.bf16 %v3118_v44, %v3117_v59 }
 0x339   : > { %v2838_v15 = vpop.f32.mrf.mxu2 }
 0x33a   : > { %v3662_v2 = vmax.f32 %v8997_v34, %v9001_v6  ;;  %v2839_v17 = vadd.f32 %v2838_v15, %v11164_v18 }
 0x33b   : > { %v3007_v8 = vpop.f32.mrf.mxu3 }
 0x33c   : > { %3663 = vmax.xlane.f32.xlu2 %v3662_v2  ;;  %v3008_v28 = vadd.f32 %v3007_v8, %v2839_v17 }
 0x33d   : > { %v3329_v55 = vpop.f32.mrf.mxu0 }
 0x33e   : > { %v9008_v48 = vadd.f32 %v3329_v55, %v8738_v51  ;;  %v3119_v41 = vmax.f32 %v3008_v28, 0.0  ;;  %v11172_v28 = vld [vmem:[#allocation49_spill] sm:$0xff] }
 0x33f   : > { %v3498_v29 = vpop.f32.mrf.mxu1  ;;  %vm1213_vm9 = vcmp.eq.s32.totalorder %v7472_v54, %v11172_v28  ;;  %vm1214_vm5 = vcmp.eq.s32.totalorder %v7485_v4, %v11172_v28 }
 0x340   : > { %v9013_v16 = vadd.f32 %v3498_v29, %v8740_v47  ;;  %3368 = vmatmul.bf16.gmra.mxu0 %v3166_v49 }
 0x341   : > { %v2840_v33 = vpop.f32.mrf.mxu2 }
 0x342   : > { %3537 = vmatmul.bf16.gmra.mxu1 %v3166_v49  ;;  %v2841_v58 = vadd.f32 %v2840_v33, %v11169_v37  ;;  %v3665_v24 = vmax.f32 %v9008_v48, %v9013_v16 }
 0x343   : > { %v3009_v43 = vpop.f32.mrf.mxu3 }
 0x344   : > { %v3010_v25 = vadd.f32 %v3009_v43, %v2841_v58  ;;  %3666 = vmax.xlane.f32.xlu0 %v3665_v24  ;;  %v11173_v24 = vld [vmem:[#allocation46_spill] sm:$0xff] }
 0x345   : > { %v3331_v60 = vpop.f32.mrf.mxu0  ;;  %vm697_vm10 = vcmp.eq.s32.totalorder %v7472_v54, %v11173_v24  ;;  %vm698_vm14 = vcmp.eq.s32.totalorder %v7485_v4, %v11173_v24 }
 0x346   : > { %v3120_v3 = vmax.f32 %v3010_v25, 0.0  ;;  %v9033_v12 = vadd.f32 %v3331_v60, %v8738_v51  ;;  %5424 = vmatmul.msk.bf16.gmra.mxu2 %vm5423_vm2, %v10860_v22  ;;  %v11174_v60 = vld [vmem:[#allocation43_spill] sm:$0xff] }
 0x347   : > { %v3500_v59 = vpop.f32.mrf.mxu1  ;;  %v3625_v44 = vpop.xlane.xlu2 %3624  ;;  %vm701_vm4 = vcmp.eq.s32.totalorder %v7472_v54, %v11174_v60  ;;  %vm702_vm13 = vcmp.eq.s32.totalorder %v7485_v4, %v11174_v60 }
 0x348   : > { %v9037_v14 = vadd.f32 %v3500_v59, %v8740_v47  ;;  %v9040_v49 = vsub.f32 %v8744_v53, %v3625_v44  ;;  %5488 = vmatmul.msk.bf16.gmra.mxu3 %vm5487_vm11, %v10860_v22  ;;  %v3167_v15 = vpack.c.bf16 %v3120_v3, %v3119_v41  ;;  %v9044_v2 = vsub.f32 %v8751_v45, %v3625_v44  ;;  %v11171_v45 = vld [vmem:[#allocation51_spill] sm:$0xff]  ;;  %v11175_v3 = vld [vmem:[#allocation56_spill] sm:$0xff]  ;;  %vm9079_vm8 = vmor %vm701_vm4, %vm1213_vm9 }
 0x349   : > { %v2843_v8 = vpop.f32.mrf.mxu2  ;;  %vm1209_vm15 = vcmp.eq.s32.totalorder %v7472_v54, %v11171_v45  ;;  %vm1210_vm12 = vcmp.eq.s32.totalorder %v7485_v4, %v11171_v45  ;;  %vm9097_vm3 = vmor %vm702_vm13, %vm1214_vm5  ;;  %vm709_vm9 = vcmp.eq.s32.totalorder %v7472_v54, %v11188_v20 }
 0x34a   : > { %v3668_v55 = vmax.f32 %v9033_v12, %v9037_v14  ;;  %v3943_v17 = vmul.f32 1.442695, %v9040_v49  ;;  %v3945_v29 = vmul.f32 1.442695, %v9044_v2  ;;  %v2844_v53 = vadd.f32 %v2843_v8, %v11170_v36  ;;  %vm9086_vm1 = vmor %vm697_vm10, %vm1209_vm15 }
 0x34b   : > { %v3012_v18 = vpop.f32.mrf.mxu3  ;;  %vm5425_vm0 = vmpackc.low %vm9079_vm8, %vm9086_vm1  ;;  %vm710_vm1 = vcmp.eq.s32.totalorder %v7485_v4, %v11188_v20 }
 0x34c   : > { %3669 = vmax.xlane.f32.xlu1 %v3668_v55  ;;  %5756 = vpow2.f32 %v3943_v17  ;;  %v3013_v41 = vadd.f32 %v3012_v18, %v2844_v53  ;;  %vm1466_vm7 = vmor %vm698_vm14, %vm1210_vm12 }
 0x34d   : > { %v3334_v1 = vpop.f32.mrf.mxu0  ;;  %5758 = vpow2.f32 %v3945_v29  ;;  %vm5489_vm2 = vmpackc.low %vm9097_vm3, %vm1466_vm7 }
 0x34e   : > { %v9052_v46 = vadd.f32 %v3334_v1, %v8738_v51  ;;  %v3121_v36 = vmax.f32 %v3013_v41, 0.0 }
 0x34f   : > { %v3503_v33 = vpop.f32.mrf.mxu1  ;;  %v3628_v13 = vpop.xlane.xlu0 %3627 }
 0x350   : > { %v9059_v37 = vadd.f32 %v3503_v33, %v8740_v47  ;;  %v9062_v58 = vsub.f32 %v8769_v23, %v3628_v13  ;;  %3373 = vmatmul.bf16.gmra.mxu0 %v3167_v15  ;;  %v9067_v43 = vsub.f32 %v8773_v38, %v3628_v13 }
 0x351   : > { %v2845_v25 = vpop.f32.mrf.mxu2 }
 0x352   : > { %v3671_v23 = vmax.f32 %v9052_v46, %v9059_v37  ;;  %3542 = vmatmul.bf16.gmra.mxu1 %v3167_v15  ;;  %v2846_v59 = vadd.f32 %v2845_v25, %v11175_v3  ;;  %v3947_v15 = vmul.f32 1.442695, %v9062_v58  ;;  %v3949_v17 = vmul.f32 1.442695, %v9067_v43  ;;  %v5757_v1 = vpop.eup %5756 }
 0x353   : > { %v3014_v44 = vpop.f32.mrf.mxu3  ;;  %v5759_v13 = vpop.eup %5758 }
 0x354   : > { %v3015_v55 = vadd.f32 %v3014_v44, %v2846_v59  ;;  %3672 = vmax.xlane.f32.xlu2 %v3671_v23  ;;  %5760 = vpow2.f32 %v3947_v15  ;;  %v4199_v59 = vadd.f32 %v5759_v13, %v5757_v1  ;;  %v9130_v44 = vld [vmem:[%s10584_s2] ss:$0 sm:$0xff]  ;;  %v11184_v13 = vld [vmem:[#allocation55_spill] sm:$0xff] }
 0x355   : > { %v3336_v29 = vpop.f32.mrf.mxu0  ;;  %5762 = vpow2.f32 %v3949_v17  ;;  %vm1217_vm11 = vcmp.eq.s32.totalorder %v7472_v54, %v11184_v13  ;;  %vm1218_vm14 = vcmp.eq.s32.totalorder %v7485_v4, %v11184_v13 }
 0x356   : > { %v3122_v53 = vmax.f32 %v3015_v55, 0.0  ;;  %v9107_v33 = vadd.f32 %v3336_v29, %v8738_v51  ;;  %5426 = vmatmul.msk.bf16.gmra.mxu2 %vm5425_vm0, %v10860_v22 }
 0x357   : > { %v3505_v45 = vpop.f32.mrf.mxu1  ;;  %v3631_v28 = vpop.xlane.xlu1 %3630 }
 0x358   : > { %v9116_v25 = vadd.f32 %v3505_v45, %v8740_v47  ;;  %v9119_v60 = vsub.f32 %v8780_v27, %v3631_v28  ;;  %5490 = vmatmul.msk.bf16.gmra.mxu3 %vm5489_vm2, %v10860_v22  ;;  %v3168_v41 = vpack.c.bf16 %v3122_v53, %v3121_v36  ;;  %v9123_v24 = vsub.f32 %v8785_v61, %v3631_v28  ;;  %v11182_v27 = vld [vmem:[#allocation59_spill] sm:$0xff]  ;;  %v11183_v53 = vld [vmem:[#allocation53_spill] sm:$0xff]  ;;  %v11186_v28 = vld [vmem:[#allocation60_spill] sm:$0xff] }
 0x359   : > { %v2848_v23 = vpop.f32.mrf.mxu2  ;;  %v2513_v8 = vadd.f32 %v9130_v44, %v11182_v27  ;;  %vm705_vm6 = vcmp.eq.s32.totalorder %v7472_v54, %v11183_v53  ;;  %v11185_v45 = vld [vmem:[#allocation57_spill] sm:$0xff]  ;;  %vm706_vm8 = vcmp.eq.s32.totalorder %v7485_v4, %v11183_v53 }
 0x35a   : > { %v3674_v3 = vmax.f32 %v9107_v33, %v9116_v25  ;;  %v3951_v15 = vmul.f32 1.442695, %v9119_v60  ;;  %v3953_v61 = vmul.f32 1.442695, %v9123_v24  ;;  %v5761_v18 = vpop.eup %5760  ;;  %vm1221_vm15 = vcmp.eq.s32.totalorder %v7472_v54, %v11185_v45  ;;  %vm9174_vm5 = vmor %vm705_vm6, %vm1217_vm11 }
 0x35b   : > { %v3017_v38 = vpop.f32.mrf.mxu3  ;;  %v5763_v29 = vpop.eup %5762  ;;  %vm1222_vm10 = vcmp.eq.s32.totalorder %v7485_v4, %v11185_v45  ;;  %vm9164_vm4 = vmor %vm709_vm9, %vm1221_vm15 }
 0x35c   : > { %3675 = vmax.xlane.f32.xlu0 %v3674_v3  ;;  %4200 = vadd.xlane.f32.xlu2 %v4199_v59  ;;  %v2682_v3 = vadd.f32 %v11186_v28, %v2513_v8  ;;  %5764 = vpow2.f32 %v3951_v15  ;;  %vm9189_vm13 = vmor %vm710_vm1, %vm1222_vm10 }
 0x35d   : > { %v3339_v55 = vpop.f32.mrf.mxu0  ;;  %5766 = vpow2.f32 %v3953_v61  ;;  %vm5427_vm12 = vmpackc.low %vm9164_vm4, %vm9174_vm5 }
 0x35e   : > { %v9137_v17 = vadd.f32 %v3339_v55, %v8738_v51  ;;  %vm1474_vm3 = vmor %vm706_vm8, %vm1218_vm14 }
 0x35f   : > { %v3508_v1 = vpop.f32.mrf.mxu1  ;;  %v3634_v36 = vpop.xlane.xlu2 %3633  ;;  %vm5491_vm0 = vmpackc.low %vm9189_vm13, %vm1474_vm3 }
 0x360   : > { %v9147_v59 = vadd.f32 %v3508_v1, %v8740_v47  ;;  %v9150_v27 = vsub.f32 %v8805_v10, %v3634_v36  ;;  %3378 = vmatmul.bf16.gmra.mxu0 %v3168_v41  ;;  %v9153_v55 = vsub.f32 %v8809_v32, %v3634_v36  ;;  %v4202_v1 = vadd.f32 %v5763_v29, %v5761_v18 }
 0x361   : > { %v2850_v9 = vpop.f32.mrf.mxu2 }
 0x362   : > { %11187 = vst [vmem:[#allocation110_spill] sm:$0xff] %v9153_v55  ;;  %v3677_v8 = vmax.f32 %v9137_v17, %v9147_v59  ;;  %3547 = vmatmul.bf16.gmra.mxu1 %v3168_v41  ;;  %v2851_v15 = vadd.f32 %v2850_v9, %v2682_v3  ;;  %v11193_v9 = vld [vmem:[#allocation58_spill] sm:$0xff]  ;;  %v3955_v18 = vmul.f32 1.442695, %v9150_v27  ;;  %v3957_v36 = vmul.f32 1.442695, %v9153_v55  ;;  %v5765_v20 = vpop.eup %5764 }
 0x363   : > { %v3019_v32 = vpop.f32.mrf.mxu3  ;;  %v2849_v41 = vadd.f32 %v2848_v23, %v11193_v9  ;;  %v5767_v45 = vpop.eup %5766 }
 0x364   : > { %3678 = vmax.xlane.f32.xlu1 %v3677_v8  ;;  %4203 = vadd.xlane.f32.xlu0 %v4202_v1  ;;  %v3020_v23 = vadd.f32 %v3019_v32, %v2851_v15  ;;  %5768 = vpow2.f32 %v3955_v18  ;;  %v4205_v29 = vadd.f32 %v5767_v45, %v5765_v20  ;;  %v11199_v45 = vld [vmem:[#allocation61_spill] sm:$0xff] }
 0x365   : > { %v3341_v28 = vpop.f32.mrf.mxu0  ;;  %v3018_v1 = vadd.f32 %v3017_v38, %v2849_v41  ;;  %5770 = vpow2.f32 %v3957_v36  ;;  %v11198_v41 = vld [vmem:[#allocation66_spill] sm:$0xff]  ;;  %vm713_vm7 = vcmp.eq.s32.totalorder %v7472_v54, %v11199_v45  ;;  %vm714_vm4 = vcmp.eq.s32.totalorder %v7485_v4, %v11199_v45 }
 0x366   : > { %v9199_v13 = vadd.f32 %v3341_v28, %v8738_v51  ;;  %5428 = vmatmul.msk.bf16.gmra.mxu2 %vm5427_vm12, %v10860_v22  ;;  %v3124_v61 = vmax.f32 %v3020_v23, 0.0  ;;  %v2518_v18 = vadd.f32 %v9130_v44, %v11198_v41  ;;  %v11200_v41 = vld [vmem:[#allocation64_spill] sm:$0xff] }
 0x367   : > { %v3510_v3 = vpop.f32.mrf.mxu1  ;;  %v3637_v8 = vpop.xlane.xlu2 %3636  ;;  %v3123_v28 = vmax.f32 %v3018_v1, 0.0  ;;  %vm1229_vm2 = vcmp.eq.s32.totalorder %v7472_v54, %v11200_v41  ;;  %v11201_v1 = vld [vmem:[#allocation67_spill] sm:$0xff]  ;;  %vm1230_vm11 = vcmp.eq.s32.totalorder %v7485_v4, %v11200_v41 }
 0x368   : > { %v9208_v10 = vadd.f32 %v3510_v3, %v8740_v47  ;;  %v9211_v15 = vsub.f32 %v8816_v42, %v3637_v8  ;;  %5492 = vmatmul.msk.bf16.gmra.mxu3 %vm5491_vm0, %v10860_v22  ;;  %v9215_v53 = vsub.f32 %v8825_v7, %v3637_v8 }
 0x369   : > { %v2853_v32 = vpop.f32.mrf.mxu2  ;;  %v3169_v23 = vpack.c.bf16 %v3124_v61, %v3123_v28 }
 0x36a   : > { %11196 = vst [vmem:[#allocation111_spill] sm:$0xff] %v9211_v15  ;;  %v3680_v9 = vmax.f32 %v9199_v13, %v9208_v10  ;;  %v3959_v42 = vmul.f32 1.442695, %v9211_v15  ;;  %v3961_v36 = vmul.f32 1.442695, %v9215_v53  ;;  %v5769_v7 = vpop.eup %5768 }
 0x36b   : > { %11197 = vst [vmem:[#allocation107_spill] sm:$0xff] %v9215_v53  ;;  %v3022_v38 = vpop.f32.mrf.mxu3  ;;  %v5771_v50 = vpop.eup %5770 }
 0x36c   : > { %4206 = vadd.xlane.f32.xlu1 %v4205_v29  ;;  %3681 = vmax.xlane.f32.xlu2 %v3680_v9  ;;  %v2687_v29 = vadd.f32 %v11201_v1, %v2518_v18  ;;  %5772 = vpow2.f32 %v3959_v42  ;;  %v4208_v42 = vadd.f32 %v5771_v50, %v5769_v7  ;;  %v11210_v50 = vld [vmem:[#allocation63_spill] sm:$0xff] }
 0x36d   : > { %v3344_v3 = vpop.f32.mrf.mxu0  ;;  %5774 = vpow2.f32 %v3961_v36  ;;  %v2854_v7 = vadd.f32 %v2853_v32, %v11210_v50 }
 0x36e   : > { %v9224_v8 = vadd.f32 %v3344_v3, %v8738_v51  ;;  %v11204_v3 = vld [vmem:[#allocation54_spill] sm:$0xff] }
 0x36f   : > { %v3513_v55 = vpop.f32.mrf.mxu1  ;;  %v3640_v20 = vpop.xlane.xlu0 %3639  ;;  %vm717_vm6 = vcmp.eq.s32.totalorder %v7472_v54, %v11204_v3  ;;  %vm718_vm5 = vcmp.eq.s32.totalorder %v7485_v4, %v11204_v3 }
 0x370   : > { %v9232_v9 = vadd.f32 %v3513_v55, %v8740_v47  ;;  %v9235_v53 = vsub.f32 %v8847_v26, %v3640_v20  ;;  %3383 = vmatmul.bf16.gmra.mxu0 %v3169_v23  ;;  %v9238_v61 = vsub.f32 %v8851_v19, %v3640_v20  ;;  %v11205_v26 = vld [vmem:[#allocation65_spill] sm:$0xff]  ;;  %vm9251_vm9 = vmor %vm717_vm6, %vm1229_vm2  ;;  %v3023_v19 = vadd.f32 %v3022_v38, %v2854_v7 }
 0x371   : > { %v2855_v28 = vpop.f32.mrf.mxu2  ;;  %vm1225_vm15 = vcmp.eq.s32.totalorder %v7472_v54, %v11205_v26  ;;  %vm9271_vm8 = vmor %vm718_vm5, %vm1230_vm11  ;;  %vm1226_vm14 = vcmp.eq.s32.totalorder %v7485_v4, %v11205_v26  ;;  %v11215_v7 = vld [vmem:[#allocation69_spill] sm:$0xff] }
 0x372   : > { %11202 = vst [vmem:[#allocation11_spill] sm:$0xff] %v9235_v53  ;;  %3552 = vmatmul.bf16.gmra.mxu1 %v3169_v23  ;;  %v2856_v18 = vadd.f32 %v2855_v28, %v2687_v29  ;;  %v3683_v55 = vmax.f32 %v9224_v8, %v9232_v9  ;;  %vm9258_vm10 = vmor %vm713_vm7, %vm1225_vm15  ;;  %v3963_v20 = vmul.f32 1.442695, %v9235_v53  ;;  %v3965_v29 = vmul.f32 1.442695, %v9238_v61  ;;  %v5773_v32 = vpop.eup %5772 }
 0x373   : > { %11203 = vst [vmem:[#allocation12_spill] sm:$0xff] %v9238_v61  ;;  %v3024_v36 = vpop.f32.mrf.mxu3  ;;  %vm5429_vm1 = vmpackc.low %vm9251_vm9, %vm9258_vm10  ;;  %v5775_v41 = vpop.eup %5774 }
 0x374   : > { %3684 = vmax.xlane.f32.xlu0 %v3683_v55  ;;  %4209 = vadd.xlane.f32.xlu2 %v4208_v42  ;;  %v3025_v3 = vadd.f32 %v3024_v36, %v2856_v18  ;;  %vm1482_vm13 = vmor %vm714_vm4, %vm1226_vm14  ;;  %5776 = vpow2.f32 %v3963_v20  ;;  %v2523_v20 = vadd.f32 %v9130_v44, %v11215_v7  ;;  %v11217_v7 = vld [vmem:[#allocation74_spill] sm:$0xff] }
 0x375   : > { %v3346_v28 = vpop.f32.mrf.mxu0  ;;  %vm5493_vm12 = vmpackc.low %vm9271_vm8, %vm1482_vm13  ;;  %5778 = vpow2.f32 %v3965_v29  ;;  %vm1237_vm0 = vcmp.eq.s32.totalorder %v7472_v54, %v11217_v7  ;;  %vm1238_vm2 = vcmp.eq.s32.totalorder %v7485_v4, %v11217_v7 }
 0x376   : > { %v9283_v55 = vadd.f32 %v3346_v28, %v8738_v51  ;;  %5430 = vmatmul.msk.bf16.gmra.mxu2 %vm5429_vm1, %v10860_v22  ;;  %v3126_v50 = vmax.f32 %v3025_v3, 0.0  ;;  %v4211_v28 = vadd.f32 %v5775_v41, %v5773_v32  ;;  %v11216_v41 = vld [vmem:[#allocation70_spill] sm:$0xff] }
 0x377   : > { %v3515_v42 = vpop.f32.mrf.mxu1  ;;  %v3643_v23 = vpop.xlane.xlu1 %3642  ;;  %vm721_vm3 = vcmp.eq.s32.totalorder %v7472_v54, %v11216_v41  ;;  %vm722_vm9 = vcmp.eq.s32.totalorder %v7485_v4, %v11216_v41 }
 0x378   : > { %v9292_v26 = vadd.f32 %v3515_v42, %v8740_v47  ;;  %v9295_v18 = vsub.f32 %v8858_v5, %v3643_v23  ;;  %5494 = vmatmul.msk.bf16.gmra.mxu3 %vm5493_vm12, %v10860_v22  ;;  %v9299_v45 = vsub.f32 %v8863_v39, %v3643_v23  ;;  %v3125_v42 = vmax.f32 %v3023_v19, 0.0  ;;  %v11218_v19 = vld [vmem:[#allocation72_spill] sm:$0xff] }
 0x379   : > { %v2858_v36 = vpop.f32.mrf.mxu2 }
 0x37a   : > { %11213 = vst [vmem:[#allocation8_spill] sm:$0xff] %v9295_v18  ;;  %v3686_v1 = vmax.f32 %v9283_v55, %v9292_v26  ;;  %v3967_v5 = vmul.f32 1.442695, %v9295_v18  ;;  %v3969_v29 = vmul.f32 1.442695, %v9299_v45  ;;  %v5777_v39 = vpop.eup %5776  ;;  %v3170_v3 = vpack.c.bf16 %v3126_v50, %v3125_v42  ;;  %v11221_v42 = vld [vmem:[#allocation62_spill] sm:$0xff] }
 0x37b   : > { %11214 = vst [vmem:[#allocation9_spill] sm:$0xff] %v9299_v45  ;;  %v3027_v38 = vpop.f32.mrf.mxu3  ;;  %v5779_v53 = vpop.eup %5778  ;;  %vm725_vm7 = vcmp.eq.s32.totalorder %v7472_v54, %v11221_v42  ;;  %vm726_vm10 = vcmp.eq.s32.totalorder %v7485_v4, %v11221_v42 }
 0x37c   : > { %3687 = vmax.xlane.f32.xlu1 %v3686_v1  ;;  %4212 = vadd.xlane.f32.xlu0 %v4211_v28  ;;  %v2692_v1 = vadd.f32 %v11218_v19, %v2523_v20  ;;  %5780 = vpow2.f32 %v3967_v5  ;;  %v4214_v5 = vadd.f32 %v5779_v53, %v5777_v39  ;;  %vm9335_vm11 = vmor %vm725_vm7, %vm1237_vm0  ;;  %v11227_v53 = vld [vmem:[#allocation68_spill] sm:$0xff] }
 0x37d   : > { %v3349_v61 = vpop.f32.mrf.mxu0  ;;  %5782 = vpow2.f32 %v3969_v29  ;;  %v2859_v39 = vadd.f32 %v2858_v36, %v11227_v53  ;;  %vm9355_vm4 = vmor %vm726_vm10, %vm1238_vm2 }
 0x37e   : > { %v9308_v23 = vadd.f32 %v3349_v61, %v8738_v51 }
 0x37f   : > { %v3518_v15 = vpop.f32.mrf.mxu1  ;;  %v3646_v32 = vpop.xlane.xlu2 %3645 }
 0x380   : > { %v9316_v28 = vadd.f32 %v3518_v15, %v8740_v47  ;;  %v9319_v45 = vsub.f32 %v8883_v56, %v3646_v32  ;;  %3388 = vmatmul.bf16.gmra.mxu0 %v3170_v3  ;;  %v9322_v61 = vsub.f32 %v8887_v52, %v3646_v32  ;;  %v11222_v56 = vld [vmem:[#allocation73_spill] sm:$0xff]  ;;  %v3028_v52 = vadd.f32 %v3027_v38, %v2859_v39  ;;  %v11233_v38 = vld [vmem:[#allocation76_spill] sm:$0xff] }
 0x381   : > { %v2860_v50 = vpop.f32.mrf.mxu2  ;;  %vm1233_vm6 = vcmp.eq.s32.totalorder %v7472_v54, %v11222_v56  ;;  %vm1234_vm8 = vcmp.eq.s32.totalorder %v7485_v4, %v11222_v56  ;;  %v2528_v39 = vadd.f32 %v9130_v44, %v11233_v38  ;;  %v11235_v38 = vld [vmem:[#allocation84_spill] sm:$0xff] }
 0x382   : > { %11219 = vst [vmem:[#allocation16_spill] sm:$0xff] %v9319_v45  ;;  %v3689_v20 = vmax.f32 %v9308_v23, %v9316_v28  ;;  %3557 = vmatmul.bf16.gmra.mxu1 %v3170_v3  ;;  %v2861_v15 = vadd.f32 %v2860_v50, %v2692_v1  ;;  %vm9342_vm15 = vmor %vm721_vm3, %vm1233_vm6  ;;  %v3971_v3 = vmul.f32 1.442695, %v9319_v45  ;;  %v3973_v1 = vmul.f32 1.442695, %v9322_v61  ;;  %v5781_v36 = vpop.eup %5780 }
 0x383   : > { %11220 = vst [vmem:[#allocation14_spill] sm:$0xff] %v9322_v61  ;;  %v3029_v29 = vpop.f32.mrf.mxu3  ;;  %vm5431_vm5 = vmpackc.low %vm9335_vm11, %vm9342_vm15  ;;  %v5783_v7 = vpop.eup %5782  ;;  %vm1245_vm13 = vcmp.eq.s32.totalorder %v7472_v54, %v11235_v38  ;;  %vm1246_vm0 = vcmp.eq.s32.totalorder %v7485_v4, %v11235_v38 }
 0x384   : > { %4215 = vadd.xlane.f32.xlu1 %v4214_v5  ;;  %3690 = vmax.xlane.f32.xlu2 %v3689_v20  ;;  %v3030_v42 = vadd.f32 %v3029_v29, %v2861_v15  ;;  %vm1490_vm1 = vmor %vm722_vm9, %vm1234_vm8  ;;  %5784 = vpow2.f32 %v3971_v3 }
 0x385   : > { %v3351_v50 = vpop.f32.mrf.mxu0  ;;  %vm5495_vm14 = vmpackc.low %vm9355_vm4, %vm1490_vm1  ;;  %5786 = vpow2.f32 %v3973_v1 }
 0x386   : > { %v9367_v20 = vadd.f32 %v3351_v50, %v8738_v51  ;;  %5432 = vmatmul.msk.bf16.gmra.mxu2 %vm5431_vm5, %v10860_v22  ;;  %v3128_v53 = vmax.f32 %v3030_v42, 0.0  ;;  %v4217_v50 = vadd.f32 %v5783_v7, %v5781_v36  ;;  %v11234_v7 = vld [vmem:[#allocation77_spill] sm:$0xff] }
 0x387   : > { %v3520_v5 = vpop.f32.mrf.mxu1  ;;  %v3649_v32 = vpop.xlane.xlu0 %3648  ;;  %v2697_v45 = vadd.f32 %v11234_v7, %v2528_v39  ;;  %v11239_v39 = vld [vmem:[#allocation71_spill] sm:$0xff] }
 0x388   : > { %v9376_v56 = vadd.f32 %v3520_v5, %v8740_v47  ;;  %v9379_v15 = vsub.f32 %v8894_v63, %v3649_v32  ;;  %5496 = vmatmul.msk.bf16.gmra.mxu3 %vm5495_vm14, %v10860_v22  ;;  %v9383_v41 = vsub.f32 %v8901_v30, %v3649_v32  ;;  %v3127_v5 = vmax.f32 %v3028_v52, 0.0 }
 0x389   : > { %v2863_v29 = vpop.f32.mrf.mxu2  ;;  %vm733_vm3 = vcmp.eq.s32.totalorder %v7472_v54, %v11239_v39  ;;  %vm734_vm15 = vcmp.eq.s32.totalorder %v7485_v4, %v11239_v39 }
 0x38a   : > { %11230 = vst [vmem:[#allocation5_spill] sm:$0xff] %v9376_v56  ;;  %v3692_v19 = vmax.f32 %v9367_v20, %v9376_v56  ;;  %v3975_v63 = vmul.f32 1.442695, %v9379_v15  ;;  %v3977_v1 = vmul.f32 1.442695, %v9383_v41  ;;  %v5785_v30 = vpop.eup %5784  ;;  %v3171_v32 = vpack.c.bf16 %v3128_v53, %v3127_v5  ;;  %v11237_v53 = vld [vmem:[#allocation78_spill] sm:$0xff]  ;;  %vm9419_vm2 = vmor %vm733_vm3, %vm1245_vm13 }
 0x38b   : > { %11231 = vst [vmem:[#allocation6_spill] sm:$0xff] %v9379_v15  ;;  %v3032_v3 = vpop.f32.mrf.mxu3  ;;  %v5787_v36 = vpop.eup %5786  ;;  %vm729_vm12 = vcmp.eq.s32.totalorder %v7472_v54, %v11237_v53  ;;  %vm730_vm11 = vcmp.eq.s32.totalorder %v7485_v4, %v11237_v53  ;;  %vm9436_vm9 = vmor %vm734_vm15, %vm1246_vm0 }
 0x38c   : > { %11232 = vst [vmem:[#allocation17_spill] sm:$0xff] %v9383_v41  ;;  %4218 = vadd.xlane.f32.xlu2 %v4217_v50  ;;  %3693 = vmax.xlane.f32.xlu0 %v3692_v19  ;;  %5788 = vpow2.f32 %v3975_v63  ;;  %v4220_v5 = vadd.f32 %v5787_v36, %v5785_v30  ;;  %v11240_v63 = vld [vmem:[#allocation81_spill] sm:$0xff]  ;;  %v11249_v41 = vld [vmem:[#allocation83_spill] sm:$0xff] }
 0x38d   : > { %v3354_v61 = vpop.f32.mrf.mxu0  ;;  %5790 = vpow2.f32 %v3977_v1  ;;  %vm1241_vm7 = vcmp.eq.s32.totalorder %v7472_v54, %v11240_v63  ;;  %vm1242_vm4 = vcmp.eq.s32.totalorder %v7485_v4, %v11240_v63 }
 0x38e   : > { %v9392_v42 = vadd.f32 %v3354_v61, %v8738_v51  ;;  %vm9423_vm6 = vmor %vm729_vm12, %vm1241_vm7 }
 0x38f   : > { %v3523_v18 = vpop.f32.mrf.mxu1  ;;  %v3652_v56 = vpop.xlane.xlu1 %3651  ;;  %vm5433_vm10 = vmpackc.low %vm9419_vm2, %vm9423_vm6 }
 0x390   : > { %v9398_v52 = vadd.f32 %v3523_v18, %v8740_v47  ;;  %v9401_v50 = vsub.f32 %v8919_v40, %v3652_v56  ;;  %3393 = vmatmul.bf16.gmra.mxu0 %v3171_v32  ;;  %v9406_v61 = vsub.f32 %v8923_v21, %v3652_v56  ;;  %vm1498_vm5 = vmor %vm730_vm11, %vm1242_vm4 }
 0x391   : > { %v2865_v19 = vpop.f32.mrf.mxu2  ;;  %vm5497_vm8 = vmpackc.low %vm9436_vm9, %vm1498_vm5 }
 0x392   : > { %11236 = vst [vmem:[#allocation19_spill] sm:$0xff] %v9401_v50  ;;  %v3695_v18 = vmax.f32 %v9392_v42, %v9398_v52  ;;  %3562 = vmatmul.bf16.gmra.mxu1 %v3171_v32  ;;  %v2866_v40 = vadd.f32 %v2865_v19, %v2697_v45  ;;  %v11245_v45 = vld [vmem:[#allocation75_spill] sm:$0xff]  ;;  %v3979_v32 = vmul.f32 1.442695, %v9401_v50  ;;  %v3981_v7 = vmul.f32 1.442695, %v9406_v61 }
 0x393   : > { %11238 = vst [vmem:[#allocation7_spill] sm:$0xff] %v9406_v61  ;;  %v3034_v56 = vpop.f32.mrf.mxu3  ;;  %v2864_v30 = vadd.f32 %v2863_v29, %v11245_v45  ;;  %v5789_v29 = vpop.eup %5788 }
 0x394   : > { %3696 = vmax.xlane.f32.xlu1 %v3695_v18  ;;  %4221 = vadd.xlane.f32.xlu0 %v4220_v5  ;;  %v3035_v39 = vadd.f32 %v3034_v56, %v2866_v40  ;;  %v5791_v38 = vpop.eup %5790  ;;  %5792 = vpow2.f32 %v3979_v32 }
 0x395   : > { %v3356_v19 = vpop.f32.mrf.mxu0  ;;  %v3033_v21 = vadd.f32 %v3032_v3, %v2864_v30  ;;  %5794 = vpow2.f32 %v3981_v7  ;;  %v11248_v3 = vld [vmem:[#allocation82_spill] sm:$0xff] }
 0x396   : > { %v9448_v18 = vadd.f32 %v3356_v19, %v8738_v51  ;;  %5434 = vmatmul.msk.bf16.gmra.mxu2 %vm5433_vm10, %v10860_v22  ;;  %v3130_v45 = vmax.f32 %v3035_v39, 0.0  ;;  %v4223_v19 = vadd.f32 %v5791_v38, %v5789_v29  ;;  %v2533_v30 = vadd.f32 %v9130_v44, %v11248_v3  ;;  %v11250_v3 = vld [vmem:[#allocation89_spill] sm:$0xff] }
 0x397   : > { %v3525_v5 = vpop.f32.mrf.mxu1  ;;  %v3655_v1 = vpop.xlane.xlu2 %3654  ;;  %vm1249_vm1 = vcmp.eq.s32.totalorder %v7472_v54, %v11250_v3  ;;  %vm1250_vm11 = vcmp.eq.s32.totalorder %v7485_v4, %v11250_v3 }
 0x398   : > { %v9457_v63 = vadd.f32 %v3525_v5, %v8740_v47  ;;  %v9460_v40 = vsub.f32 %v8930_v62, %v3655_v1  ;;  %5498 = vmatmul.msk.bf16.gmra.mxu3 %vm5497_vm8, %v10860_v22  ;;  %v9464_v53 = vsub.f32 %v8935_v11, %v3655_v1  ;;  %v3129_v5 = vmax.f32 %v3033_v21, 0.0  ;;  %v11251_v21 = vld [vmem:[#allocation91_spill] sm:$0xff] }
 0x399   : > { %v2868_v56 = vpop.f32.mrf.mxu2  ;;  %v2702_v29 = vadd.f32 %v11249_v41, %v2533_v30  ;;  %vm1253_vm14 = vcmp.eq.s32.totalorder %v7472_v54, %v11251_v21  ;;  %v11255_v30 = vld [vmem:[#allocation80_spill] sm:$0xff]  ;;  %vm1254_vm3 = vcmp.eq.s32.totalorder %v7485_v4, %v11251_v21 }
 0x39a   : > { %v3698_v36 = vmax.f32 %v9448_v18, %v9457_v63  ;;  %v3983_v62 = vmul.f32 1.442695, %v9460_v40  ;;  %v3985_v7 = vmul.f32 1.442695, %v9464_v53  ;;  %v5793_v11 = vpop.eup %5792  ;;  %v3172_v1 = vpack.c.bf16 %v3130_v45, %v3129_v5 }
 0x39b   : > { %v3037_v32 = vpop.f32.mrf.mxu3  ;;  %v5795_v50 = vpop.eup %5794  ;;  %vm741_vm12 = vcmp.eq.s32.totalorder %v7472_v54, %v11255_v30  ;;  %vm742_vm6 = vcmp.eq.s32.totalorder %v7485_v4, %v11255_v30 }
 0x39c   : > { %4224 = vadd.xlane.f32.xlu1 %v4223_v19  ;;  %3699 = vmax.xlane.f32.xlu2 %v3698_v36  ;;  %5796 = vpow2.f32 %v3983_v62  ;;  %v4226_v62 = vadd.f32 %v5795_v50, %v5793_v11  ;;  %vm9500_vm0 = vmor %vm741_vm12, %vm1253_vm14  ;;  %v11260_v50 = vld [vmem:[#allocation79_spill] sm:$0xff] }
 0x39d   : > { %v3359_v61 = vpop.f32.mrf.mxu0  ;;  %5798 = vpow2.f32 %v3985_v7  ;;  %v2869_v11 = vadd.f32 %v2868_v56, %v11260_v50  ;;  %vm9522_vm15 = vmor %vm742_vm6, %vm1254_vm3 }
 0x39e   : > { %v9473_v39 = vadd.f32 %v3359_v61, %v8738_v51  ;;  %v11253_v61 = vld [vmem:[#allocation88_spill] sm:$0xff] }
 0x39f   : > { %v3528_v38 = vpop.f32.mrf.mxu1  ;;  %v3658_v15 = vpop.xlane.xlu0 %3657  ;;  %vm737_vm13 = vcmp.eq.s32.totalorder %v7472_v54, %v11253_v61  ;;  %vm738_vm2 = vcmp.eq.s32.totalorder %v7485_v4, %v11253_v61 }
 0x3a0   : > { %v9481_v36 = vadd.f32 %v3528_v38, %v8740_v47  ;;  %v9484_v45 = vsub.f32 %v8955_v0, %v3658_v15  ;;  %3398 = vmatmul.bf16.gmra.mxu0 %v3172_v1  ;;  %v9489_v41 = vsub.f32 %v8959_v35, %v3658_v15  ;;  %vm9507_vm7 = vmor %vm737_vm13, %vm1249_vm1 }
 0x3a1   : > { %v2870_v19 = vpop.f32.mrf.mxu2  ;;  %vm5435_vm9 = vmpackc.low %vm9500_vm0, %vm9507_vm7 }
 0x3a2   : > { %11252 = vst [vmem:[#allocation10_spill] sm:$0xff] %v9484_v45  ;;  %3567 = vmatmul.bf16.gmra.mxu1 %v3172_v1  ;;  %v2871_v5 = vadd.f32 %v2870_v19, %v2702_v29  ;;  %v3701_v0 = vmax.f32 %v9473_v39, %v9481_v36  ;;  %v3987_v1 = vmul.f32 1.442695, %v9484_v45  ;;  %v3989_v29 = vmul.f32 1.442695, %v9489_v41  ;;  %v5797_v56 = vpop.eup %5796  ;;  %vm1506_vm10 = vmor %vm738_vm2, %vm1250_vm11 }
 0x3a3   : > { %11254 = vst [vmem:[#allocation22_spill] sm:$0xff] %v9489_v41  ;;  %v3039_v35 = vpop.f32.mrf.mxu3  ;;  %v5799_v21 = vpop.eup %5798  ;;  %vm5499_vm4 = vmpackc.low %vm9522_vm15, %vm1506_vm10 }
 0x3a4   : > { %4227 = vadd.xlane.f32.xlu2 %v4226_v62  ;;  %3702 = vmax.xlane.f32.xlu0 %v3701_v0  ;;  %v3040_v3 = vadd.f32 %v3039_v35, %v2871_v5  ;;  %v3038_v0 = vadd.f32 %v3037_v32, %v2869_v11  ;;  %5800 = vpow2.f32 %v3987_v1  ;;  %v4229_v50 = vadd.f32 %v5799_v21, %v5797_v56  ;;  %v11265_v11 = vld [vmem:[#allocation86_spill] sm:$0xff]  ;;  %v11266_v21 = vld [vmem:[#allocation87_spill] sm:$0xff] }
 0x3a5   : > { %v3361_v38 = vpop.f32.mrf.mxu0  ;;  %5802 = vpow2.f32 %v3989_v29  ;;  %v2538_v1 = vadd.f32 %v9130_v44, %v11265_v11 }
 0x3a6   : > { %v9532_v19 = vadd.f32 %v3361_v38, %v8738_v51  ;;  %5436 = vmatmul.msk.bf16.gmra.mxu2 %vm5435_vm9, %v10860_v22  ;;  %v3132_v35 = vmax.f32 %v3040_v3, 0.0  ;;  %v3131_v54 = vmax.f32 %v3038_v0, 0.0 }
 0x3a7   : > { %v3530_v30 = vpop.f32.mrf.mxu1  ;;  %v3661_v62 = vpop.xlane.xlu1 %3660  ;;  %v2707_v41 = vadd.f32 %v11266_v21, %v2538_v1 }
 0x3a8   : > { %v9541_v7 = vadd.f32 %v3530_v30, %v8740_v47  ;;  %v9544_v5 = vsub.f32 %v8966_v31, %v3661_v62  ;;  %5500 = vmatmul.msk.bf16.gmra.mxu3 %vm5499_vm4, %v10860_v22  ;;  %v9548_v4 = vsub.f32 %v8975_v57, %v3661_v62  ;;  %v3173_v38 = vpack.c.bf16 %v3132_v35, %v3131_v54 }
 0x3a9   : > { %v2873_v61 = vpop.f32.mrf.mxu2 }
 0x3aa   : > { %11263 = vst [vmem:[#allocation20_spill] sm:$0xff] %v9544_v5  ;;  %v3704_v15 = vmax.f32 %v9532_v19, %v9541_v7  ;;  %v3991_v31 = vmul.f32 1.442695, %v9544_v5  ;;  %v3993_v22 = vmul.f32 1.442695, %v9548_v4  ;;  %v5801_v57 = vpop.eup %5800 }
 0x3ab   : > { %11264 = vst [vmem:[#allocation24_spill] sm:$0xff] %v9548_v4  ;;  %v3042_v32 = vpop.f32.mrf.mxu3  ;;  %v5803_v30 = vpop.eup %5802 }
 0x3ac   : > { %3705 = vmax.xlane.f32.xlu1 %v3704_v15  ;;  %4230 = vadd.xlane.f32.xlu0 %v4229_v50  ;;  %5804 = vpow2.f32 %v3991_v31  ;;  %v11269_v31 = vld [vmem:[#allocation85_spill] sm:$0xff] }
 0x3ad   : > { %v3364_v29 = vpop.f32.mrf.mxu0  ;;  %5806 = vpow2.f32 %v3993_v22  ;;  %v2874_v21 = vadd.f32 %v2873_v61, %v11269_v31  ;;  %v11272_v31 = vld [vmem:[#allocation92_spill] sm:$0xff] }
 0x3ae   : > { %v9557_v3 = vadd.f32 %v3364_v29, %v8738_v51  ;;  %v4232_v29 = vadd.f32 %v5803_v30, %v5801_v57 }
 0x3af   : > { %v3533_v62 = vpop.f32.mrf.mxu1  ;;  %v3664_v56 = vpop.xlane.xlu2 %3663 }
 0x3b0   : > { %v9561_v0 = vadd.f32 %v3533_v62, %v8740_v47  ;;  %v9564_v15 = vsub.f32 %v8997_v34, %v3664_v56  ;;  %3403 = vmatmul.bf16.gmra.mxu0 %v3173_v38  ;;  %v9567_v50 = vsub.f32 %v9001_v6, %v3664_v56 }
 0x3b1   : > { %v2875_v35 = vpop.f32.mrf.mxu2 }
 0x3b2   : > { %11267 = vst [vmem:[#allocation13_spill] sm:$0xff] %v9564_v15  ;;  %v3707_v11 = vmax.f32 %v9557_v3, %v9561_v0  ;;  %3572 = vmatmul.bf16.gmra.mxu1 %v3173_v38  ;;  %v2876_v54 = vadd.f32 %v2875_v35, %v2707_v41  ;;  %v3995_v62 = vmul.f32 1.442695, %v9564_v15  ;;  %v3997_v34 = vmul.f32 1.442695, %v9567_v50  ;;  %v5805_v4 = vpop.eup %5804 }
 0x3b3   : > { %11268 = vst [vmem:[#allocation25_spill] sm:$0xff] %v9567_v50  ;;  %v3044_v1 = vpop.f32.mrf.mxu3  ;;  %v5807_v5 = vpop.eup %5806  ;;  %v3043_v41 = vadd.f32 %v3042_v32, %v2874_v21  ;;  %v2543_v32 = vadd.f32 %v9130_v44, %v11272_v31 }
 0x3b4   : > { %4233 = vadd.xlane.f32.xlu1 %v4232_v29  ;;  %3708 = vmax.xlane.f32.xlu2 %v3707_v11  ;;  %v3045_v6 = vadd.f32 %v3044_v1, %v2876_v54  ;;  %5808 = vpow2.f32 %v3995_v62  ;;  %v4235_v54 = vadd.f32 %v5807_v5, %v5805_v4 }
 0x3b5   : > { %v3366_v22 = vpop.f32.mrf.mxu0  ;;  %5810 = vpow2.f32 %v3997_v34  ;;  %v3133_v21 = vmax.f32 %v3043_v41, 0.0 }
 0x3b6   : > { %v9575_v56 = vadd.f32 %v3366_v22, %v8738_v51  ;;  %v3134_v11 = vmax.f32 %v3045_v6, 0.0 }
 0x3b7   : > { %v3535_v45 = vpop.f32.mrf.mxu1  ;;  %v3667_v38 = vpop.xlane.xlu0 %3666 }
 0x3b8   : > { %v9578_v57 = vadd.f32 %v3535_v45, %v8740_v47  ;;  %v9581_v61 = vsub.f32 %v9008_v48, %v3667_v38  ;;  %v9584_v30 = vsub.f32 %v9013_v16, %v3667_v38  ;;  %v3174_v34 = vpack.c.bf16 %v3134_v11, %v3133_v21  ;;  %v11273_v38 = vld [vmem:[#allocation93_spill] sm:$0xff] }
 0x3b9   : > { %v2878_v35 = vpop.f32.mrf.mxu2  ;;  %v2712_v50 = vadd.f32 %v11273_v38, %v2543_v32 }
 0x3ba   : > { %11270 = vst [vmem:[#allocation26_spill] sm:$0xff] %v9581_v61  ;;  %v3710_v29 = vmax.f32 %v9575_v56, %v9578_v57  ;;  %v3999_v45 = vmul.f32 1.442695, %v9581_v61  ;;  %v4001_v48 = vmul.f32 1.442695, %v9584_v30  ;;  %v5809_v16 = vpop.eup %5808 }
 0x3bb   : > { %11271 = vst [vmem:[#allocation18_spill] sm:$0xff] %v9584_v30  ;;  %v3047_v1 = vpop.f32.mrf.mxu3  ;;  %v5811_v5 = vpop.eup %5810 }
 0x3bc   : > { %4236 = vadd.xlane.f32.xlu2 %v4235_v54  ;;  %3711 = vmax.xlane.f32.xlu0 %v3710_v29  ;;  %5812 = vpow2.f32 %v3999_v45  ;;  %v11275_v45 = vld [vmem:[#allocation90_spill] sm:$0xff] }
 0x3bd   : > { %v3369_v62 = vpop.f32.mrf.mxu0  ;;  %5814 = vpow2.f32 %v4001_v48  ;;  %v2879_v38 = vadd.f32 %v2878_v35, %v11275_v45  ;;  %v11277_v45 = vld [vmem:[#allocation95_spill] sm:$0xff] }
 0x3be   : > { %v9593_v22 = vadd.f32 %v3369_v62, %v8738_v51  ;;  %v4238_v62 = vadd.f32 %v5811_v5, %v5809_v16 }
 0x3bf   : > { %v3670_v4 = vpop.xlane.xlu1 %3669  ;;  %v3538_v6 = vpop.f32.mrf.mxu1 }
 0x3c0   : > { %v9597_v41 = vsub.f32 %v9033_v12, %v3670_v4  ;;  %v9600_v54 = vadd.f32 %v3538_v6, %v8740_v47  ;;  %3408 = vmatmul.bf16.gmra.mxu0 %v3174_v34  ;;  %v9603_v29 = vsub.f32 %v9037_v14, %v3670_v4 }
 0x3c1   : > { %v2880_v11 = vpop.f32.mrf.mxu2 }
 0x3c2   : > { %11274 = vst [vmem:[#allocation15_spill] sm:$0xff] %v9603_v29  ;;  %v3713_v31 = vmax.f32 %v9593_v22, %v9600_v54  ;;  %3577 = vmatmul.bf16.gmra.mxu1 %v3174_v34  ;;  %v2881_v21 = vadd.f32 %v2880_v11, %v2712_v50  ;;  %v4003_v12 = vmul.f32 1.442695, %v9597_v41  ;;  %v4005_v6 = vmul.f32 1.442695, %v9603_v29  ;;  %v5813_v30 = vpop.eup %5812 }
 0x3c3   : > { %v3049_v32 = vpop.f32.mrf.mxu3  ;;  %v5815_v61 = vpop.eup %5814  ;;  %v3048_v50 = vadd.f32 %v3047_v1, %v2879_v38  ;;  %v2548_v1 = vadd.f32 %v9130_v44, %v11277_v45 }
 0x3c4   : > { %4239 = vadd.xlane.f32.xlu0 %v4238_v62  ;;  %3714 = vmax.xlane.f32.xlu1 %v3713_v31  ;;  %v3050_v14 = vadd.f32 %v3049_v32, %v2881_v21  ;;  %5816 = vpow2.f32 %v4003_v12  ;;  %v4241_v62 = vadd.f32 %v5815_v61, %v5813_v30  ;;  %v11278_v30 = vld [vmem:[#allocation96_spill] sm:$0xff] }
 0x3c5   : > { %v3371_v48 = vpop.f32.mrf.mxu0  ;;  %5818 = vpow2.f32 %v4005_v6  ;;  %v3135_v38 = vmax.f32 %v3048_v50, 0.0  ;;  %v2717_v29 = vadd.f32 %v11278_v30, %v2548_v1  ;;  %v11281_v30 = vld [vmem:[#allocation94_spill] sm:$0xff] }
 0x3c6   : > { %v9611_v4 = vadd.f32 %v3371_v48, %v8738_v51  ;;  %v3136_v11 = vmax.f32 %v3050_v14, 0.0 }
 0x3c7   : > { %v3673_v15 = vpop.xlane.xlu2 %3672  ;;  %v3540_v34 = vpop.f32.mrf.mxu1 }
 0x3c8   : > { %v9614_v16 = vadd.f32 %v3540_v34, %v8740_v47  ;;  %v9617_v35 = vsub.f32 %v9052_v46, %v3673_v15  ;;  %v9620_v31 = vsub.f32 %v9059_v37, %v3673_v15  ;;  %v3175_v48 = vpack.c.bf16 %v3136_v11, %v3135_v38 }
 0x3c9   : > { %v2883_v5 = vpop.f32.mrf.mxu2 }
 0x3ca   : > { %11276 = vst [vmem:[#allocation31_spill] sm:$0xff] %v9620_v31  ;;  %v3716_v21 = vmax.f32 %v9611_v4, %v9614_v16  ;;  %v4007_v12 = vmul.f32 1.442695, %v9617_v35  ;;  %v5817_v6 = vpop.eup %5816  ;;  %v4009_v37 = vmul.f32 1.442695, %v9620_v31 }
 0x3cb   : > { %v3052_v32 = vpop.f32.mrf.mxu3  ;;  %v5819_v15 = vpop.eup %5818 }
 0x3cc   : > { %3717 = vmax.xlane.f32.xlu2 %v3716_v21  ;;  %4242 = vadd.xlane.f32.xlu1 %v4241_v62  ;;  %v4244_v1 = vadd.f32 %v5819_v15, %v5817_v6 }
 0x3cd   : > { %v3374_v46 = vpop.f32.mrf.mxu0 }
 0x3ce   : > { %v9629_v61 = vadd.f32 %v3374_v46, %v8738_v51 }
 0x3cf   : > { %v3676_v14 = vpop.xlane.xlu0 %3675  ;;  %v4201_v34 = vpop.xlane.xlu2 %4200 }
 0x3d0   : > { %v9633_v50 = vsub.f32 %v9107_v33, %v3676_v14  ;;  %5820 = vlog2.f32 %v4201_v34  ;;  %v3543_v21 = vpop.f32.mrf.mxu1  ;;  %3413 = vmatmul.bf16.gmra.mxu0 %v3175_v48  ;;  %v9639_v45 = vsub.f32 %v9116_v25, %v3676_v14 }
 0x3d1   : > { %5822 = vpow2.f32 %v4007_v12  ;;  %v9636_v11 = vadd.f32 %v3543_v21, %v8740_v47  ;;  %v2885_v62 = vpop.f32.mrf.mxu2  ;;  %v2884_v12 = vadd.f32 %v2883_v5, %v11281_v30 }
 0x3d2   : > { %11279 = vst [vmem:[#allocation28_spill] sm:$0xff] %v9633_v50  ;;  %5824 = vpow2.f32 %v4009_v37  ;;  %3582 = vmatmul.bf16.gmra.mxu1 %v3175_v48  ;;  %v2886_v38 = vadd.f32 %v2885_v62, %v2717_v29  ;;  %v4011_v33 = vmul.f32 1.442695, %v9633_v50  ;;  %v4013_v25 = vmul.f32 1.442695, %v9639_v45 }
 0x3d3   : > { %11280 = vst [vmem:[#allocation30_spill] sm:$0xff] %v9639_v45  ;;  %v3054_v46 = vpop.f32.mrf.mxu3  ;;  %v3719_v34 = vmax.f32 %v9629_v61, %v9636_v11  ;;  %v3053_v31 = vadd.f32 %v3052_v32, %v2884_v12  ;;  %v11282_v32 = vld [vmem:[#allocation98_spill] sm:$0xff] }
 0x3d4   : > { %4245 = vadd.xlane.f32.xlu2 %v4244_v1  ;;  %v3055_v14 = vadd.f32 %v3054_v46, %v2886_v38  ;;  %5826 = vpow2.f32 %v4011_v33  ;;  %v2553_v12 = vadd.f32 %v9130_v44, %v11282_v32 }
 0x3d5   : > { %3720 = vmax.xlane.f32.xlu0 %v3719_v34  ;;  %v3376_v37 = vpop.f32.mrf.mxu0 }
 0x3d6   : > { %v5821_v21 = vpop.eup %5820  ;;  %v9650_v62 = vadd.f32 %v3376_v37, %v8738_v51  ;;  %v3138_v46 = vmax.f32 %v3055_v14, 0.0 }
 0x3d7   : > { %v5823_v48 = vpop.eup %5822  ;;  %v4392_v29 = vmul.f32 0.6931472, %v5821_v21  ;;  %v3679_v6 = vpop.xlane.xlu1 %3678  ;;  %v3137_v21 = vmax.f32 %v3053_v31, 0.0  ;;  %v11283_v31 = vld [vmem:[#allocation99_spill] sm:$0xff] }
 0x3d8   : > { %v4204_v15 = vpop.xlane.xlu0 %4203  ;;  %v5825_v50 = vpop.eup %5824  ;;  %v9655_v30 = vsub.f32 %v9137_v17, %v3679_v6  ;;  %v9661_v37 = vsub.f32 %v9147_v59, %v3679_v6 }
 0x3d9   : > { %5828 = vlog2.f32 %v4204_v15  ;;  %v3545_v5 = vpop.f32.mrf.mxu1  ;;  %v4519_v1 = vsub.f32 %v9040_v49, %v4392_v29  ;;  %v4520_v34 = vsub.f32 %v9044_v2, %v4392_v29  ;;  %v2888_v33 = vpop.f32.mrf.mxu2  ;;  %v4247_v17 = vadd.f32 %v5825_v50, %v5823_v48 }
 0x3da   : > { %v9658_v38 = vadd.f32 %v3545_v5, %v8740_v47  ;;  %5830 = vpow2.f32 %v4013_v25  ;;  %v5827_v25 = vpop.eup %5826  ;;  %v4015_v14 = vmul.f32 1.442695, %v9655_v30  ;;  %v3176_v6 = vpack.c.bf16 %v3138_v46, %v3137_v21 }
 0x3db   : > { %4647 = vst [vmem:[%s9663_s12] sm:$0xff] %v4519_v1  ;;  %v3057_v2 = vpop.f32.mrf.mxu3  ;;  %v4017_v15 = vmul.f32 1.442695, %v9661_v37  ;;  %v2722_v48 = vadd.f32 %v11283_v31, %v2553_v12 }
 0x3dc   : > { %v3722_v49 = vmax.f32 %v9650_v62, %v9658_v38  ;;  %4648 = vst [vmem:[%s9663_s12 + $0x8] sm:$0xff] %v4520_v34 }
 0x3dd   : > { %4248 = vadd.xlane.f32.xlu0 %v4247_v17  ;;  %v3379_v59 = vpop.f32.mrf.mxu0 }
 0x3de   : > { %3723 = vmax.xlane.f32.xlu1 %v3722_v49  ;;  %v9674_v50 = vadd.f32 %v3379_v59, %v8738_v51 }
 0x3df   : > { %v5829_v29 = vpop.eup %5828  ;;  %v4207_v1 = vpop.xlane.xlu1 %4206 }
 0x3e0   : > { %v4394_v5 = vmul.f32 0.6931472, %v5829_v29  ;;  %v3682_v45 = vpop.xlane.xlu2 %3681  ;;  %v5831_v44 = vpop.eup %5830  ;;  %5832 = vlog2.f32 %v4207_v1  ;;  %3418 = vmatmul.bf16.gmra.mxu0 %v3176_v6 }
 0x3e1   : > { %v9678_v34 = vsub.f32 %v9199_v13, %v3682_v45  ;;  %v3548_v49 = vpop.f32.mrf.mxu1  ;;  %5834 = vpow2.f32 %v4015_v14  ;;  %v2890_v21 = vpop.f32.mrf.mxu2  ;;  %v9686_v59 = vsub.f32 %v9208_v10, %v3682_v45 }
 0x3e2   : > { %v4521_v46 = vsub.f32 %v9062_v58, %v4394_v5  ;;  %v4522_v17 = vsub.f32 %v9067_v43, %v4394_v5  ;;  %v9683_v32 = vadd.f32 %v3548_v49, %v8740_v47  ;;  %5836 = vpow2.f32 %v4017_v15  ;;  %3587 = vmatmul.bf16.gmra.mxu1 %v3176_v6  ;;  %v11284_v43 = vld [vmem:[#allocation97_spill] sm:$0xff] }
 0x3e3   : > { %v2891_v12 = vadd.f32 %v2890_v21, %v2722_v48  ;;  %v4019_v13 = vmul.f32 1.442695, %v9678_v34  ;;  %v3059_v29 = vpop.f32.mrf.mxu3  ;;  %v4250_v58 = vadd.f32 %v5831_v44, %v5827_v25  ;;  %v2889_v5 = vadd.f32 %v2888_v33, %v11284_v43 }
 0x3e4   : > { %4649 = vst [vmem:[%s9663_s12 + $0x10] sm:$0xff] %v4521_v46  ;;  %v3725_v14 = vmax.f32 %v9674_v50, %v9683_v32  ;;  %v4021_v10 = vmul.f32 1.442695, %v9686_v59 }
 0x3e5   : > { %4650 = vst [vmem:[%s9663_s12 + $0x18] sm:$0xff] %v4522_v17  ;;  %v3381_v1 = vpop.f32.mrf.mxu0  ;;  %v3060_v45 = vadd.f32 %v3059_v29, %v2891_v12  ;;  %5838 = vpow2.f32 %v4019_v13  ;;  %v3058_v44 = vadd.f32 %v3057_v2, %v2889_v5 }
 0x3e6   : > { %3726 = vmax.xlane.f32.xlu2 %v3725_v14  ;;  %4251 = vadd.xlane.f32.xlu1 %v4250_v58  ;;  %v5833_v15 = vpop.eup %5832  ;;  %v9696_v46 = vadd.f32 %v3381_v1, %v8738_v51 }
 0x3e7   : > { %v5835_v6 = vpop.eup %5834  ;;  %v4396_v31 = vmul.f32 0.6931472, %v5833_v15  ;;  %v3685_v48 = vpop.xlane.xlu0 %3684  ;;  %v3140_v29 = vmax.f32 %v3060_v45, 0.0  ;;  %v3139_v1 = vmax.f32 %v3058_v44, 0.0  ;;  %v11288_v44 = vld [vmem:[#allocation102_spill] sm:$0xff] }
 0x3e8   : > { %v4210_v49 = vpop.xlane.xlu2 %4209  ;;  %v5837_v25 = vpop.eup %5836  ;;  %v9701_v12 = vsub.f32 %v9224_v8, %v3685_v48  ;;  %v9707_v58 = vsub.f32 %v9232_v9, %v3685_v48  ;;  %v11287_v8 = vld [vmem:[#allocation101_spill] sm:$0xff] }
 0x3e9   : > { %5840 = vlog2.f32 %v4210_v49  ;;  %v3550_v33 = vpop.f32.mrf.mxu1  ;;  %v4523_v17 = vsub.f32 %v9119_v60, %v4396_v31  ;;  %v4524_v21 = vsub.f32 %v9123_v24, %v4396_v31  ;;  %v2893_v14 = vpop.f32.mrf.mxu2  ;;  %v4253_v60 = vadd.f32 %v5837_v25, %v5835_v6  ;;  %v9715_v24 = vld [vmem:[%s10584_s2] ss:$0 sm:$0xff] }
 0x3ea   : > { %11285 = vst [vmem:[#allocation21_spill] sm:$0xff] %v9701_v12  ;;  %v9704_v13 = vadd.f32 %v3550_v33, %v8740_v47  ;;  %5842 = vpow2.f32 %v4021_v10  ;;  %v2558_v5 = vadd.f32 %v9715_v24, %v11287_v8  ;;  %v4023_v9 = vmul.f32 1.442695, %v9701_v12 }
 0x3eb   : > { %11286 = vst [vmem:[#allocation34_spill] sm:$0xff] %v9707_v58  ;;  %v3062_v43 = vpop.f32.mrf.mxu3  ;;  %v5839_v15 = vpop.eup %5838  ;;  %v3177_v31 = vpack.c.bf16 %v3140_v29, %v3139_v1  ;;  %v4025_v6 = vmul.f32 1.442695, %v9707_v58 }
 0x3ec   : > { %4651 = vst [vmem:[%s9663_s12 + $0x20] sm:$0xff] %v4523_v17  ;;  %v3728_v2 = vmax.f32 %v9696_v46, %v9704_v13 }
 0x3ed   : > { %4652 = vst [vmem:[%s9663_s12 + $0x28] sm:$0xff] %v4524_v21  ;;  %v3384_v10 = vpop.f32.mrf.mxu0  ;;  %v2727_v21 = vadd.f32 %v11288_v44, %v2558_v5 }
 0x3ee   : > { %3729 = vmax.xlane.f32.xlu0 %v3728_v2  ;;  %4254 = vadd.xlane.f32.xlu2 %v4253_v60  ;;  %v9723_v33 = vadd.f32 %v3384_v10, %v8738_v51  ;;  %v11290_v60 = vld [vmem:[#allocation110_spill] sm:$0xff] }
 0x3ef   : > { %v5841_v45 = vpop.eup %5840  ;;  %v3688_v49 = vpop.xlane.xlu1 %3687 }
 0x3f0   : > { %v4398_v48 = vmul.f32 0.6931472, %v5841_v45  ;;  %v4213_v25 = vpop.xlane.xlu0 %4212  ;;  %v5843_v17 = vpop.eup %5842  ;;  %v9727_v8 = vsub.f32 %v9283_v55, %v3688_v49  ;;  %3423 = vmatmul.bf16.gmra.mxu0 %v3177_v31  ;;  %v9735_v58 = vsub.f32 %v9292_v26, %v3688_v49 }
 0x3f1   : > { %5844 = vlog2.f32 %v4213_v25  ;;  %v3553_v2 = vpop.f32.mrf.mxu1  ;;  %v2895_v10 = vpop.f32.mrf.mxu2 }
 0x3f2   : > { %11289 = vst [vmem:[#allocation33_spill] sm:$0xff] %v9727_v8  ;;  %5846 = vpow2.f32 %v4023_v9  ;;  %v4525_v29 = vsub.f32 %v9150_v27, %v4398_v48  ;;  %v4526_v1 = vsub.f32 %v11290_v60, %v4398_v48  ;;  %v9732_v45 = vadd.f32 %v3553_v2, %v8740_v47  ;;  %3592 = vmatmul.bf16.gmra.mxu1 %v3177_v31  ;;  %v11292_v48 = vld [vmem:[#allocation100_spill] sm:$0xff] }
 0x3f3   : > { %5848 = vpow2.f32 %v4025_v6  ;;  %11291 = vst [vmem:[#allocation23_spill] sm:$0xff] %v9735_v58  ;;  %v2896_v55 = vadd.f32 %v2895_v10, %v2727_v21  ;;  %v4027_v5 = vmul.f32 1.442695, %v9727_v8  ;;  %v3064_v25 = vpop.f32.mrf.mxu3  ;;  %v4256_v27 = vadd.f32 %v5843_v17, %v5839_v15 }
 0x3f4   : > { %4653 = vst [vmem:[%s9663_s12 + $0x30] sm:$0xff] %v4525_v29  ;;  %v3731_v9 = vmax.f32 %v9723_v33, %v9732_v45  ;;  %v2894_v44 = vadd.f32 %v2893_v14, %v11292_v48  ;;  %v4029_v26 = vmul.f32 1.442695, %v9735_v58 }
 0x3f5   : > { %4654 = vst [vmem:[%s9663_s12 + $0x38] sm:$0xff] %v4526_v1  ;;  %v3386_v2 = vpop.f32.mrf.mxu0  ;;  %v3065_v49 = vadd.f32 %v3064_v25, %v2896_v55  ;;  %5850 = vpow2.f32 %v4027_v5  ;;  %v11293_v1 = vld [vmem:[#allocation111_spill] sm:$0xff] }
 0x3f6   : > { %4257 = vadd.xlane.f32.xlu0 %v4256_v27  ;;  %3732 = vmax.xlane.f32.xlu1 %v3731_v9  ;;  %v9745_v10 = vadd.f32 %v3386_v2, %v8738_v51  ;;  %v3063_v17 = vadd.f32 %v3062_v43, %v2894_v44  ;;  %v11294_v27 = vld [vmem:[#allocation107_spill] sm:$0xff] }
 0x3f7   : > { %v5845_v6 = vpop.eup %5844  ;;  %v4216_v29 = vpop.xlane.xlu1 %4215 }
 0x3f8   : > { %v5847_v31 = vpop.eup %5846  ;;  %v4400_v21 = vmul.f32 0.6931472, %v5845_v6  ;;  %v3691_v60 = vpop.xlane.xlu2 %3690  ;;  %5852 = vlog2.f32 %v4216_v29  ;;  %v3142_v6 = vmax.f32 %v3065_v49, 0.0 }
 0x3f9   : > { %v5849_v15 = vpop.eup %5848  ;;  %v3555_v14 = vpop.f32.mrf.mxu1  ;;  %v9750_v55 = vsub.f32 %v9308_v23, %v3691_v60  ;;  %5854 = vpow2.f32 %v4029_v26  ;;  %v9756_v2 = vsub.f32 %v9316_v28, %v3691_v60  ;;  %v3141_v23 = vmax.f32 %v3063_v17, 0.0  ;;  %v11298_v17 = vld [vmem:[#allocation105_spill] sm:$0xff] }
 0x3fa   : > { %v4527_v9 = vsub.f32 %v11293_v1, %v4400_v21  ;;  %v4528_v48 = vsub.f32 %v11294_v27, %v4400_v21  ;;  %v9753_v5 = vadd.f32 %v3555_v14, %v8740_v47  ;;  %v2898_v25 = vpop.f32.mrf.mxu2  ;;  %v4259_v29 = vadd.f32 %v5849_v15, %v5847_v31  ;;  %v11297_v1 = vld [vmem:[#allocation104_spill] sm:$0xff] }
 0x3fb   : > { %11295 = vst [vmem:[#allocation27_spill] sm:$0xff] %v9750_v55  ;;  %v3067_v44 = vpop.f32.mrf.mxu3  ;;  %v2563_v21 = vadd.f32 %v9715_v24, %v11297_v1  ;;  %v5851_v27 = vpop.eup %5850  ;;  %v4031_v14 = vmul.f32 1.442695, %v9750_v55  ;;  %v3178_v28 = vpack.c.bf16 %v3142_v6, %v3141_v23  ;;  %v4033_v60 = vmul.f32 1.442695, %v9756_v2  ;;  %v11300_v6 = vld [vmem:[#allocation11_spill] sm:$0xff] }
 0x3fc   : > { %11296 = vst [vmem:[#allocation40_spill] sm:$0xff] %v9756_v2  ;;  %v3734_v43 = vmax.f32 %v9745_v10, %v9753_v5  ;;  %v11301_v23 = vld [vmem:[#allocation12_spill] sm:$0xff]  ;;  %v11302_v55 = vld [vmem:[#allocation5_spill] sm:$0xff] }
 0x3fd   : > { %4655 = vst [vmem:[%s9663_s12 + $0x40] sm:$0xff] %v4527_v9  ;;  %v3389_v26 = vpop.f32.mrf.mxu0 }
 0x3fe   : > { %4656 = vst [vmem:[%s9663_s12 + $0x48] sm:$0xff] %v4528_v48  ;;  %3735 = vmax.xlane.f32.xlu2 %v3734_v43  ;;  %4260 = vadd.xlane.f32.xlu1 %v4259_v29  ;;  %v5853_v49 = vpop.eup %5852  ;;  %v9767_v31 = vadd.f32 %v3389_v26, %v8738_v51  ;;  %v2732_v48 = vadd.f32 %v11298_v17, %v2563_v21 }
 0x3ff   : > { %v4402_v9 = vmul.f32 0.6931472, %v5853_v49  ;;  %v3694_v58 = vpop.xlane.xlu0 %3693  ;;  %v5855_v15 = vpop.eup %5854 }
 0x400   : > { %v4219_v8 = vpop.xlane.xlu2 %4218  ;;  %v9771_v1 = vsub.f32 %v9367_v20, %v3694_v58  ;;  %3428 = vmatmul.bf16.gmra.mxu0 %v3178_v28  ;;  %v9779_v12 = vsub.f32 %v11302_v55, %v3694_v58 }
 0x401   : > { %5856 = vlog2.f32 %v4219_v8  ;;  %v3558_v43 = vpop.f32.mrf.mxu1  ;;  %v4529_v29 = vsub.f32 %v11300_v6, %v4402_v9  ;;  %v4530_v49 = vsub.f32 %v11301_v23, %v4402_v9  ;;  %v4262_v6 = vadd.f32 %v5855_v15, %v5851_v27 }
 0x402   : > { %11299 = vst [vmem:[#allocation37_spill] sm:$0xff] %v9771_v1  ;;  %5858 = vpow2.f32 %v4031_v14  ;;  %v9776_v2 = vadd.f32 %v3558_v43, %v8740_v47  ;;  %v2900_v26 = vpop.f32.mrf.mxu2  ;;  %3597 = vmatmul.bf16.gmra.mxu1 %v3178_v28  ;;  %v4035_v8 = vmul.f32 1.442695, %v9771_v1  ;;  %v11304_v14 = vld [vmem:[#allocation103_spill] sm:$0xff]  ;;  %v4037_v58 = vmul.f32 1.442695, %v9779_v12 }
 0x403   : > { %5860 = vpow2.f32 %v4033_v60  ;;  %11303 = vst [vmem:[#allocation36_spill] sm:$0xff] %v9779_v12  ;;  %v2901_v20 = vadd.f32 %v2900_v26, %v2732_v48  ;;  %v3069_v17 = vpop.f32.mrf.mxu3  ;;  %v2899_v9 = vadd.f32 %v2898_v25, %v11304_v14 }
 0x404   : > { %4657 = vst [vmem:[%s9663_s12 + $0x50] sm:$0xff] %v4529_v29  ;;  %v3737_v21 = vmax.f32 %v9767_v31, %v9776_v2  ;;  %5862 = vpow2.f32 %v4035_v8 }
 0x405   : > { %4658 = vst [vmem:[%s9663_s12 + $0x58] sm:$0xff] %v4530_v49  ;;  %v3391_v43 = vpop.f32.mrf.mxu0  ;;  %v3070_v55 = vadd.f32 %v3069_v17, %v2901_v20  ;;  %v3068_v15 = vadd.f32 %v3067_v44, %v2899_v9  ;;  %v11305_v49 = vld [vmem:[#allocation8_spill] sm:$0xff] }
 0x406   : > { %3738 = vmax.xlane.f32.xlu0 %v3737_v21  ;;  %4263 = vadd.xlane.f32.xlu2 %v4262_v6  ;;  %v9789_v26 = vadd.f32 %v3391_v43, %v8738_v51  ;;  %v11306_v6 = vld [vmem:[#allocation9_spill] sm:$0xff] }
 0x407   : > { %v5857_v60 = vpop.eup %5856  ;;  %v3697_v29 = vpop.xlane.xlu1 %3696 }
 0x408   : > { %v5859_v28 = vpop.eup %5858  ;;  %v4404_v48 = vmul.f32 0.6931472, %v5857_v60  ;;  %v4222_v23 = vpop.xlane.xlu0 %4221  ;;  %v9794_v20 = vsub.f32 %v9392_v42, %v3697_v29  ;;  %v3144_v60 = vmax.f32 %v3070_v55, 0.0  ;;  %v9800_v43 = vsub.f32 %v9398_v52, %v3697_v29 }
 0x409   : > { %v5861_v27 = vpop.eup %5860  ;;  %5864 = vlog2.f32 %v4222_v23  ;;  %v3560_v25 = vpop.f32.mrf.mxu1  ;;  %v3143_v42 = vmax.f32 %v3068_v15, 0.0 }
 0x40a   : > { %v4531_v21 = vsub.f32 %v11305_v49, %v4404_v48  ;;  %v4532_v14 = vsub.f32 %v11306_v6, %v4404_v48  ;;  %11307 = vst [vmem:[#allocation29_spill] sm:$0xff] %v9794_v20  ;;  %v9797_v8 = vadd.f32 %v3560_v25, %v8740_v47  ;;  %v2903_v17 = vpop.f32.mrf.mxu2  ;;  %5866 = vpow2.f32 %v4037_v58  ;;  %v11309_v49 = vld [vmem:[#allocation108_spill] sm:$0xff]  ;;  %v5863_v6 = vpop.eup %5862 }
 0x40b   : > { %11308 = vst [vmem:[#allocation39_spill] sm:$0xff] %v9800_v43  ;;  %v3072_v9 = vpop.f32.mrf.mxu3  ;;  %v4265_v23 = vadd.f32 %v5861_v27, %v5859_v28  ;;  %v2568_v48 = vadd.f32 %v9715_v24, %v11309_v49  ;;  %v4039_v25 = vmul.f32 1.442695, %v9794_v20  ;;  %v3179_v52 = vpack.c.bf16 %v3144_v60, %v3143_v42  ;;  %v11310_v27 = vld [vmem:[#allocation109_spill] sm:$0xff]  ;;  %v11312_v60 = vld [vmem:[#allocation16_spill] sm:$0xff]  ;;  %v11313_v49 = vld [vmem:[#allocation14_spill] sm:$0xff] }
 0x40c   : > { %4659 = vst [vmem:[%s9663_s12 + $0x60] sm:$0xff] %v4531_v21  ;;  %v3740_v44 = vmax.f32 %v9789_v26, %v9797_v8  ;;  %v4041_v29 = vmul.f32 1.442695, %v9800_v43 }
 0x40d   : > { %4660 = vst [vmem:[%s9663_s12 + $0x68] sm:$0xff] %v4532_v14  ;;  %v3394_v58 = vpop.f32.mrf.mxu0  ;;  %v2737_v15 = vadd.f32 %v11310_v27, %v2568_v48 }
 0x40e   : > { %4266 = vadd.xlane.f32.xlu0 %v4265_v23  ;;  %3741 = vmax.xlane.f32.xlu1 %v3740_v44  ;;  %v9811_v28 = vadd.f32 %v3394_v58, %v8738_v51 }
 0x40f   : > { %v5865_v55 = vpop.eup %5864  ;;  %v4225_v12 = vpop.xlane.xlu1 %4224 }
 0x410   : > { %v4406_v21 = vmul.f32 0.6931472, %v5865_v55  ;;  %v3700_v1 = vpop.xlane.xlu2 %3699  ;;  %v5867_v24 = vpop.eup %5866  ;;  %5868 = vlog2.f32 %v4225_v12  ;;  %3433 = vmatmul.bf16.gmra.mxu0 %v3179_v52 }
 0x411   : > { %v9815_v14 = vsub.f32 %v9448_v18, %v3700_v1  ;;  %v3563_v44 = vpop.f32.mrf.mxu1  ;;  %5870 = vpow2.f32 %v4039_v25  ;;  %v9823_v43 = vsub.f32 %v9457_v63, %v3700_v1  ;;  %v4268_v27 = vadd.f32 %v5867_v24, %v5863_v6 }
 0x412   : > { %v4533_v23 = vsub.f32 %v11312_v60, %v4406_v21  ;;  %v4534_v42 = vsub.f32 %v11313_v49, %v4406_v21  ;;  %v9820_v55 = vadd.f32 %v3563_v44, %v8740_v47  ;;  %v2905_v58 = vpop.f32.mrf.mxu2  ;;  %5872 = vpow2.f32 %v4041_v29  ;;  %3602 = vmatmul.bf16.gmra.mxu1 %v3179_v52  ;;  %v11315_v21 = vld [vmem:[#allocation106_spill] sm:$0xff] }
 0x413   : > { %11311 = vst [vmem:[#allocation35_spill] sm:$0xff] %v9815_v14  ;;  %v2906_v12 = vadd.f32 %v2905_v58, %v2737_v15  ;;  %v4043_v18 = vmul.f32 1.442695, %v9815_v14  ;;  %v3074_v25 = vpop.f32.mrf.mxu3  ;;  %v2904_v60 = vadd.f32 %v2903_v17, %v11315_v21  ;;  %v4045_v63 = vmul.f32 1.442695, %v9823_v43 }
 0x414   : > { %11314 = vst [vmem:[#allocation41_spill] sm:$0xff] %v9823_v43  ;;  %v3743_v48 = vmax.f32 %v9811_v28, %v9820_v55 }
 0x415   : > { %4661 = vst [vmem:[%s9663_s12 + $0x70] sm:$0xff] %v4533_v23  ;;  %v3396_v44 = vpop.f32.mrf.mxu0  ;;  %v3075_v1 = vadd.f32 %v3074_v25, %v2906_v12  ;;  %5874 = vpow2.f32 %v4043_v18  ;;  %v3073_v24 = vadd.f32 %v3072_v9, %v2904_v60 }
 0x416   : > { %4662 = vst [vmem:[%s9663_s12 + $0x78] sm:$0xff] %v4534_v42  ;;  %3744 = vmax.xlane.f32.xlu2 %v3743_v48  ;;  %4269 = vadd.xlane.f32.xlu1 %v4268_v27  ;;  %v5869_v29 = vpop.eup %5868  ;;  %v9833_v58 = vadd.f32 %v3396_v44, %v8738_v51  ;;  %v11316_v42 = vld [vmem:[#allocation6_spill] sm:$0xff]  ;;  %v11317_v27 = vld [vmem:[#allocation17_spill] sm:$0xff] }
 0x417   : > { %v5871_v52 = vpop.eup %5870  ;;  %v4408_v15 = vmul.f32 0.6931472, %v5869_v29  ;;  %v3703_v23 = vpop.xlane.xlu0 %3702  ;;  %v3146_v29 = vmax.f32 %v3075_v1, 0.0 }
 0x418   : > { %v4228_v49 = vpop.xlane.xlu2 %4227  ;;  %v5873_v6 = vpop.eup %5872  ;;  %v9838_v12 = vsub.f32 %v9473_v39, %v3703_v23  ;;  %v9844_v44 = vsub.f32 %v9481_v36, %v3703_v23  ;;  %v11318_v36 = vld [vmem:[#allocation112_spill] sm:$0xff] }
 0x419   : > { %5876 = vlog2.f32 %v4228_v49  ;;  %v3565_v17 = vpop.f32.mrf.mxu1  ;;  %v4535_v48 = vsub.f32 %v11316_v42, %v4408_v15  ;;  %v4536_v21 = vsub.f32 %v11317_v27, %v4408_v15  ;;  %v4271_v49 = vadd.f32 %v5873_v6, %v5871_v52 }
 0x41a   : > { %v9841_v18 = vadd.f32 %v3565_v17, %v8740_v47  ;;  %v2908_v25 = vpop.f32.mrf.mxu2  ;;  %5878 = vpow2.f32 %v4045_v63  ;;  %v3145_v42 = vmax.f32 %v3073_v24, 0.0  ;;  %v4047_v39 = vmul.f32 1.442695, %v9838_v12 }
 0x41b   : > { %4663 = vst [vmem:[%s9663_s12 + $0x80] sm:$0xff] %v4535_v48  ;;  %v3077_v60 = vpop.f32.mrf.mxu3  ;;  %v5875_v15 = vpop.eup %5874  ;;  %v4049_v1 = vmul.f32 1.442695, %v9844_v44  ;;  %v2909_v23 = vadd.f32 %v2908_v25, %v11318_v36 }
 0x41c   : > { %v3746_v9 = vmax.f32 %v9833_v58, %v9841_v18  ;;  %4664 = vst [vmem:[%s9663_s12 + $0x88] sm:$0xff] %v4536_v21  ;;  %v3180_v63 = vpack.c.bf16 %v3146_v29, %v3145_v42  ;;  %v11319_v21 = vld [vmem:[#allocation19_spill] sm:$0xff] }
 0x41d   : > { %v3399_v17 = vpop.f32.mrf.mxu0 }
 0x41e   : > { %3747 = vmax.xlane.f32.xlu0 %v3746_v9  ;;  %4272 = vadd.xlane.f32.xlu2 %v4271_v49  ;;  %v9854_v20 = vadd.f32 %v3399_v17, %v8738_v51  ;;  %v11320_v9 = vld [vmem:[#allocation7_spill] sm:$0xff]  ;;  %v3078_v17 = vadd.f32 %v3077_v60, %v2909_v23 }
 0x41f   : > { %v5877_v27 = vpop.eup %5876  ;;  %v3706_v43 = vpop.xlane.xlu1 %3705 }
 0x420   : > { %v4410_v48 = vmul.f32 0.6931472, %v5877_v27  ;;  %v4231_v14 = vpop.xlane.xlu0 %4230  ;;  %v5879_v52 = vpop.eup %5878  ;;  %v9857_v6 = vsub.f32 %v9532_v19, %v3706_v43  ;;  %3438 = vmatmul.bf16.gmra.mxu0 %v3180_v63  ;;  %v9865_v27 = vsub.f32 %v9541_v7, %v3706_v43  ;;  %v11321_v19 = vld [vmem:[#allocation113_spill] sm:$0xff]  ;;  %v3147_v23 = vmax.f32 %v3078_v17, 0.0 }
 0x421   : > { %5880 = vlog2.f32 %v4231_v14  ;;  %v3568_v24 = vpop.f32.mrf.mxu1 }
 0x422   : > { %5882 = vpow2.f32 %v4047_v39  ;;  %v4537_v29 = vsub.f32 %v11319_v21, %v4410_v48  ;;  %v4538_v25 = vsub.f32 %v11320_v9, %v4410_v48  ;;  %v9862_v49 = vadd.f32 %v3568_v24, %v8740_v47  ;;  %v2910_v42 = vpop.f32.mrf.mxu2  ;;  %3607 = vmatmul.bf16.gmra.mxu1 %v3180_v63 }
 0x423   : > { %5884 = vpow2.f32 %v4049_v1  ;;  %v2911_v14 = vadd.f32 %v2910_v42, %v11321_v19  ;;  %v4051_v36 = vmul.f32 1.442695, %v9857_v6  ;;  %v3079_v21 = vpop.f32.mrf.mxu3  ;;  %v4274_v48 = vadd.f32 %v5879_v52, %v5875_v15 }
 0x424   : > { %4665 = vst [vmem:[%s9663_s12 + $0x90] sm:$0xff] %v4537_v29  ;;  %v3749_v39 = vmax.f32 %v9854_v20, %v9862_v49  ;;  %v4053_v7 = vmul.f32 1.442695, %v9865_v27 }
 0x425   : > { %4666 = vst [vmem:[%s9663_s12 + $0x98] sm:$0xff] %v4538_v25  ;;  %v3080_v24 = vadd.f32 %v3079_v21, %v2911_v14  ;;  %v3401_v1 = vpop.f32.mrf.mxu0  ;;  %5886 = vpow2.f32 %v4051_v36 }
 0x426   : > { %4275 = vadd.xlane.f32.xlu0 %v4274_v48  ;;  %3750 = vmax.xlane.f32.xlu1 %v3749_v39  ;;  %v9875_v19 = vadd.f32 %v3401_v1, %v8738_v51 }
 0x427   : > { %v5881_v60 = vpop.eup %5880  ;;  %v3148_v43 = vmax.f32 %v3080_v24, 0.0  ;;  %v4234_v9 = vpop.xlane.xlu1 %4233 }
 0x428   : > { %v5883_v63 = vpop.eup %5882  ;;  %v4412_v29 = vmul.f32 0.6931472, %v5881_v60  ;;  %v3709_v42 = vpop.xlane.xlu2 %3708  ;;  %5888 = vlog2.f32 %v4234_v9 }
 0x429   : > { %v5885_v15 = vpop.eup %5884  ;;  %v3181_v52 = vpack.c.bf16 %v3148_v43, %v3147_v23  ;;  %v3570_v25 = vpop.f32.mrf.mxu1  ;;  %v9880_v39 = vsub.f32 %v9557_v3, %v3709_v42  ;;  %5890 = vpow2.f32 %v4053_v7  ;;  %v9886_v48 = vsub.f32 %v9561_v0, %v3709_v42  ;;  %v11324_v7 = vld [vmem:[#allocation114_spill] sm:$0xff] }
 0x42a   : > { %v4539_v14 = vsub.f32 %v9460_v40, %v4412_v29  ;;  %v4540_v17 = vsub.f32 %v9464_v53, %v4412_v29  ;;  %v9883_v36 = vadd.f32 %v3570_v25, %v8740_v47  ;;  %v2913_v21 = vpop.f32.mrf.mxu2  ;;  %v4277_v60 = vadd.f32 %v5885_v15, %v5883_v63 }
 0x42b   : > { %11322 = vst [vmem:[#allocation32_spill] sm:$0xff] %v9880_v39  ;;  %v3082_v1 = vpop.f32.mrf.mxu3  ;;  %v5887_v40 = vpop.eup %5886  ;;  %v4055_v53 = vmul.f32 1.442695, %v9880_v39  ;;  %v4057_v43 = vmul.f32 1.442695, %v9886_v48  ;;  %v2914_v29 = vadd.f32 %v2913_v21, %v11324_v7 }
 0x42c   : > { %11323 = vst [vmem:[#allocation48_spill] sm:$0xff] %v9886_v48  ;;  %v3752_v24 = vmax.f32 %v9875_v19, %v9883_v36 }
 0x42d   : > { %4667 = vst [vmem:[%s9663_s12 + $0xa0] sm:$0xff] %v4539_v14  ;;  %v3404_v3 = vpop.f32.mrf.mxu0 }
 0x42e   : > { %4668 = vst [vmem:[%s9663_s12 + $0xa8] sm:$0xff] %v4540_v17  ;;  %3753 = vmax.xlane.f32.xlu2 %v3752_v24  ;;  %4278 = vadd.xlane.f32.xlu1 %v4277_v60  ;;  %v5889_v23 = vpop.eup %5888  ;;  %v9896_v25 = vadd.f32 %v3404_v3, %v8738_v51  ;;  %v11325_v17 = vld [vmem:[#allocation10_spill] sm:$0xff]  ;;  %v3083_v3 = vadd.f32 %v3082_v1, %v2914_v29 }
 0x42f   : > { %v4414_v0 = vmul.f32 0.6931472, %v5889_v23  ;;  %v3712_v9 = vpop.xlane.xlu0 %3711  ;;  %v5891_v63 = vpop.eup %5890  ;;  %v11326_v60 = vld [vmem:[#allocation22_spill] sm:$0xff] }
 0x430   : > { %v4237_v42 = vpop.xlane.xlu2 %4236  ;;  %v9899_v15 = vsub.f32 %v9575_v56, %v3712_v9  ;;  %3443 = vmatmul.bf16.gmra.mxu0 %v3181_v52  ;;  %v9907_v7 = vsub.f32 %v9578_v57, %v3712_v9  ;;  %v11327_v56 = vld [vmem:[#allocation115_spill] sm:$0xff]  ;;  %v3149_v29 = vmax.f32 %v3083_v3, 0.0  ;;  %v11329_v3 = vld [vmem:[#allocation24_spill] sm:$0xff] }
 0x431   : > { %5892 = vlog2.f32 %v4237_v42  ;;  %v3573_v14 = vpop.f32.mrf.mxu1  ;;  %v4541_v24 = vsub.f32 %v11325_v17, %v4414_v0  ;;  %v4542_v48 = vsub.f32 %v11326_v60, %v4414_v0 }
 0x432   : > { %5894 = vpow2.f32 %v4055_v53  ;;  %v9904_v21 = vadd.f32 %v3573_v14, %v8740_v47  ;;  %v2915_v23 = vpop.f32.mrf.mxu2  ;;  %3612 = vmatmul.bf16.gmra.mxu1 %v3181_v52  ;;  %v4059_v39 = vmul.f32 1.442695, %v9899_v15  ;;  %v4280_v53 = vadd.f32 %v5891_v63, %v5887_v40 }
 0x433   : > { %5896 = vpow2.f32 %v4057_v43  ;;  %v2916_v42 = vadd.f32 %v2915_v23, %v11327_v56  ;;  %4669 = vst [vmem:[%s9663_s12 + $0xb0] sm:$0xff] %v4541_v24  ;;  %v3084_v0 = vpop.f32.mrf.mxu3  ;;  %v4061_v57 = vmul.f32 1.442695, %v9907_v7 }
 0x434   : > { %v3755_v17 = vmax.f32 %v9896_v25, %v9904_v21  ;;  %4670 = vst [vmem:[%s9663_s12 + $0xb8] sm:$0xff] %v4542_v48  ;;  %5898 = vpow2.f32 %v4059_v39 }
 0x435   : > { %v3085_v14 = vadd.f32 %v3084_v0, %v2916_v42  ;;  %v3406_v43 = vpop.f32.mrf.mxu0  ;;  %v11328_v42 = vld [vmem:[#allocation20_spill] sm:$0xff] }
 0x436   : > { %3756 = vmax.xlane.f32.xlu0 %v3755_v17  ;;  %4281 = vadd.xlane.f32.xlu2 %v4280_v53  ;;  %v9917_v23 = vadd.f32 %v3406_v43, %v8738_v51 }
 0x437   : > { %v5893_v1 = vpop.eup %5892  ;;  %v3150_v52 = vmax.f32 %v3085_v14, 0.0  ;;  %v4240_v60 = vpop.xlane.xlu0 %4239 }
 0x438   : > { %v5895_v9 = vpop.eup %5894  ;;  %v4416_v24 = vmul.f32 0.6931472, %v5893_v1  ;;  %v3715_v40 = vpop.xlane.xlu1 %3714  ;;  %5900 = vlog2.f32 %v4240_v60 }
 0x439   : > { %v5897_v48 = vpop.eup %5896  ;;  %v3182_v63 = vpack.c.bf16 %v3150_v52, %v3149_v29  ;;  %v3575_v56 = vpop.f32.mrf.mxu1  ;;  %v9925_v39 = vsub.f32 %v9593_v22, %v3715_v40  ;;  %5902 = vpow2.f32 %v4061_v57  ;;  %v9928_v14 = vsub.f32 %v9600_v54, %v3715_v40 }
 0x43a   : > { %v4543_v17 = vsub.f32 %v11328_v42, %v4416_v24  ;;  %v4544_v0 = vsub.f32 %v11329_v3, %v4416_v24  ;;  %v9922_v53 = vadd.f32 %v3575_v56, %v8740_v47  ;;  %v4283_v1 = vadd.f32 %v5897_v48, %v5895_v9  ;;  %v5899_v29 = vpop.eup %5898 }
 0x43b   : > { %v4063_v52 = vmul.f32 1.442695, %v9925_v39  ;;  %v4065_v22 = vmul.f32 1.442695, %v9928_v14 }
 0x43c   : > { %4671 = vst [vmem:[%s9663_s12 + $0xc0] sm:$0xff] %v4543_v17  ;;  %v3758_v43 = vmax.f32 %v9917_v23, %v9922_v53  ;;  %v11330_v17 = vld [vmem:[#allocation13_spill] sm:$0xff] }
 0x43d   : > { %4672 = vst [vmem:[%s9663_s12 + $0xc8] sm:$0xff] %v4544_v0  ;;  %v3409_v24 = vpop.f32.mrf.mxu0  ;;  %v11331_v0 = vld [vmem:[#allocation25_spill] sm:$0xff] }
 0x43e   : > { %4284 = vadd.xlane.f32.xlu0 %v4283_v1  ;;  %3759 = vmax.xlane.f32.xlu1 %v3758_v43  ;;  %v5901_v60 = vpop.eup %5900  ;;  %v9937_v54 = vadd.f32 %v3409_v24, %v8738_v51 }
 0x43f   : > { %v4418_v56 = vmul.f32 0.6931472, %v5901_v60  ;;  %v3718_v57 = vpop.xlane.xlu2 %3717  ;;  %v5903_v42 = vpop.eup %5902 }
 0x440   : > { %v4243_v40 = vpop.xlane.xlu1 %4242  ;;  %v9940_v48 = vsub.f32 %v9611_v4, %v3718_v57  ;;  %3448 = vmatmul.bf16.gmra.mxu0 %v3182_v63  ;;  %v9948_v24 = vsub.f32 %v9614_v16, %v3718_v57 }
 0x441   : > { %v3578_v9 = vpop.f32.mrf.mxu1  ;;  %5904 = vlog2.f32 %v4243_v40  ;;  %v4545_v3 = vsub.f32 %v11330_v17, %v4418_v56  ;;  %v4546_v43 = vsub.f32 %v11331_v0, %v4418_v56  ;;  %v4286_v40 = vadd.f32 %v5903_v42, %v5899_v29  ;;  %v11333_v29 = vld [vmem:[#allocation26_spill] sm:$0xff] }
 0x442   : > { %5906 = vpow2.f32 %v4063_v52  ;;  %v9945_v1 = vadd.f32 %v3578_v9, %v8740_v47  ;;  %11332 = vst [vmem:[#allocation45_spill] sm:$0xff] %v9948_v24  ;;  %3617 = vmatmul.bf16.gmra.mxu1 %v3182_v63  ;;  %v4067_v60 = vmul.f32 1.442695, %v9940_v48  ;;  %v4069_v9 = vmul.f32 1.442695, %v9948_v24 }
 0x443   : > { %5908 = vpow2.f32 %v4065_v22  ;;  %4673 = vst [vmem:[%s9663_s12 + $0xd0] sm:$0xff] %v4545_v3 }
 0x444   : > { %v3761_v4 = vmax.f32 %v9937_v54, %v9945_v1  ;;  %4674 = vst [vmem:[%s9663_s12 + $0xd8] sm:$0xff] %v4546_v43  ;;  %5910 = vpow2.f32 %v4067_v60  ;;  %v11334_v43 = vld [vmem:[#allocation18_spill] sm:$0xff] }
 0x445   : > { %v3411_v56 = vpop.f32.mrf.mxu0 }
 0x446   : > { %3762 = vmax.xlane.f32.xlu2 %v3761_v4  ;;  %4287 = vadd.xlane.f32.xlu1 %v4286_v40  ;;  %v9957_v63 = vadd.f32 %v3411_v56, %v8738_v51 }
 0x447   : > { %v5905_v52 = vpop.eup %5904  ;;  %v4246_v57 = vpop.xlane.xlu2 %4245 }
 0x448   : > { %v5907_v22 = vpop.eup %5906  ;;  %v4420_v16 = vmul.f32 0.6931472, %v5905_v52  ;;  %v3721_v0 = vpop.xlane.xlu0 %3720  ;;  %5912 = vlog2.f32 %v4246_v57 }
 0x449   : > { %v5909_v17 = vpop.eup %5908  ;;  %v3580_v3 = vpop.f32.mrf.mxu1  ;;  %v9965_v24 = vsub.f32 %v9629_v61, %v3721_v0  ;;  %5914 = vpow2.f32 %v4069_v9  ;;  %v9968_v60 = vsub.f32 %v9636_v11, %v3721_v0 }
 0x44a   : > { %v4547_v42 = vsub.f32 %v11333_v29, %v4420_v16  ;;  %v4548_v4 = vsub.f32 %v11334_v43, %v4420_v16  ;;  %v9962_v40 = vadd.f32 %v3580_v3, %v8740_v47  ;;  %v4289_v52 = vadd.f32 %v5909_v17, %v5907_v22  ;;  %v5911_v29 = vpop.eup %5910  ;;  %v11336_v43 = vld [vmem:[#allocation15_spill] sm:$0xff] }
 0x44b   : > { %11335 = vst [vmem:[#allocation42_spill] sm:$0xff] %v9968_v60  ;;  %v4071_v57 = vmul.f32 1.442695, %v9965_v24  ;;  %v4073_v61 = vmul.f32 1.442695, %v9968_v60 }
 0x44c   : > { %4675 = vst [vmem:[%s9663_s12 + $0xe0] sm:$0xff] %v4547_v42  ;;  %v3764_v56 = vmax.f32 %v9957_v63, %v9962_v40 }
 0x44d   : > { %4676 = vst [vmem:[%s9663_s12 + $0xe8] sm:$0xff] %v4548_v4  ;;  %v3414_v16 = vpop.f32.mrf.mxu0  ;;  %5916 = vpow2.f32 %v4071_v57 }
 0x44e   : > { %3765 = vmax.xlane.f32.xlu0 %v3764_v56  ;;  %4290 = vadd.xlane.f32.xlu2 %v4289_v52  ;;  %v5913_v3 = vpop.eup %5912  ;;  %v9977_v11 = vadd.f32 %v3414_v16, %v8738_v51 }
 0x44f   : > { %v4422_v9 = vmul.f32 0.6931472, %v5913_v3  ;;  %v5915_v0 = vpop.eup %5914 }
 0x450   : > { %v4249_v22 = vpop.xlane.xlu0 %4248  ;;  %v4292_v60 = vadd.f32 %v5915_v0, %v5911_v29 }
 0x451   : > { %v3583_v42 = vpop.f32.mrf.mxu1  ;;  %v4549_v17 = vsub.f32 %v9597_v41, %v4422_v9  ;;  %v4550_v4 = vsub.f32 %v11336_v43, %v4422_v9  ;;  %5918 = vlog2.f32 %v4249_v22  ;;  %v3724_v52 = vpop.xlane.xlu1 %3723 }
 0x452   : > { %v9982_v56 = vadd.f32 %v3583_v42, %v8740_v47  ;;  %5920 = vpow2.f32 %v4073_v61  ;;  %v9985_v3 = vsub.f32 %v9650_v62, %v3724_v52  ;;  %v9988_v16 = vsub.f32 %v9658_v38, %v3724_v52 }
 0x453   : > { %4677 = vst [vmem:[%s9663_s12 + $0xf0] sm:$0xff] %v4549_v17  ;;  %v5917_v61 = vpop.eup %5916 }
 0x454   : > { %11337 = vst [vmem:[#allocation44_spill] sm:$0xff] %v9988_v16  ;;  %v3767_v57 = vmax.f32 %v9977_v11, %v9982_v56  ;;  %v4075_v41 = vmul.f32 1.442695, %v9985_v3  ;;  %v4077_v9 = vmul.f32 1.442695, %v9988_v16 }
 0x455   : > { %4678 = vst [vmem:[%s9663_s12 + $0xf8] sm:$0xff] %v4550_v4  ;;  %v3416_v42 = vpop.f32.mrf.mxu0 }
 0x456   : > { %4293 = vadd.xlane.f32.xlu0 %v4292_v60  ;;  %3768 = vmax.xlane.f32.xlu1 %v3767_v57  ;;  %v9997_v62 = vadd.f32 %v3416_v42, %v8738_v51  ;;  %5922 = vpow2.f32 %v4075_v41  ;;  %v11340_v42 = vld [vmem:[#allocation31_spill] sm:$0xff] }
 0x457   : > { %v5919_v22 = vpop.eup %5918  ;;  %5924 = vpow2.f32 %v4077_v9 }
 0x458   : > { %v5921_v38 = vpop.eup %5920  ;;  %v4424_v17 = vmul.f32 0.6931472, %v5919_v22 }
 0x459   : > { %v3585_v43 = vpop.f32.mrf.mxu1  ;;  %v3727_v29 = vpop.xlane.xlu2 %3726  ;;  %v4295_v22 = vadd.f32 %v5921_v38, %v5917_v61 }
 0x45a   : > { %v10000_v0 = vadd.f32 %v3585_v43, %v8740_v47  ;;  %v10003_v60 = vsub.f32 %v9674_v50, %v3727_v29  ;;  %v10006_v4 = vsub.f32 %v9683_v32, %v3727_v29  ;;  %v4252_v52 = vpop.xlane.xlu1 %4251  ;;  %v4551_v57 = vsub.f32 %v9617_v35, %v4424_v17 }
 0x45b   : > { %v4552_v16 = vsub.f32 %v11340_v42, %v4424_v17  ;;  %5926 = vlog2.f32 %v4252_v52 }
 0x45c   : > { %11338 = vst [vmem:[#allocation38_spill] sm:$0xff] %v10003_v60  ;;  %v3770_v41 = vmax.f32 %v9997_v62, %v10000_v0  ;;  %v4079_v9 = vmul.f32 1.442695, %v10003_v60  ;;  %v4081_v50 = vmul.f32 1.442695, %v10006_v4  ;;  %v5923_v43 = vpop.eup %5922 }
 0x45d   : > { %11339 = vst [vmem:[#allocation50_spill] sm:$0xff] %v10006_v4  ;;  %v3419_v32 = vpop.f32.mrf.mxu0  ;;  %v5925_v29 = vpop.eup %5924  ;;  %v11342_v4 = vld [vmem:[#allocation30_spill] sm:$0xff] }
 0x45e   : > { %4679 = vst [vmem:[%s9663_s12 + $0x100] sm:$0xff] %v4551_v57  ;;  %4296 = vadd.xlane.f32.xlu1 %v4295_v22  ;;  %3771 = vmax.xlane.f32.xlu2 %v3770_v41  ;;  %v10017_v35 = vadd.f32 %v3419_v32, %v8738_v51  ;;  %5928 = vpow2.f32 %v4079_v9  ;;  %v11341_v22 = vld [vmem:[#allocation28_spill] sm:$0xff] }
 0x45f   : > { %4680 = vst [vmem:[%s9663_s12 + $0x108] sm:$0xff] %v4552_v16  ;;  %5930 = vpow2.f32 %v4081_v50 }
 0x461   : > { %v5927_v17 = vpop.eup %5926  ;;  %v3588_v52 = vpop.f32.mrf.mxu1 }
 0x462   : > { %v3730_v42 = vpop.xlane.xlu0 %3729  ;;  %v4426_v61 = vmul.f32 0.6931472, %v5927_v17  ;;  %v10020_v16 = vadd.f32 %v3588_v52, %v8740_v47  ;;  %v4255_v57 = vpop.xlane.xlu2 %4254  ;;  %v4298_v17 = vadd.f32 %v5925_v29, %v5923_v43 }
 0x463   : > { %v10023_v38 = vsub.f32 %v9696_v46, %v3730_v42  ;;  %v10026_v41 = vsub.f32 %v9704_v13, %v3730_v42  ;;  %5932 = vlog2.f32 %v4255_v57 }
 0x464   : > { %v4553_v32 = vsub.f32 %v11341_v22, %v4426_v61  ;;  %v4554_v9 = vsub.f32 %v11342_v4, %v4426_v61  ;;  %v3773_v50 = vmax.f32 %v10017_v35, %v10020_v16  ;;  %v5929_v52 = vpop.eup %5928 }
 0x465   : > { %v4083_v60 = vmul.f32 1.442695, %v10023_v38  ;;  %v3421_v46 = vpop.f32.mrf.mxu0  ;;  %v4085_v13 = vmul.f32 1.442695, %v10026_v41  ;;  %v5931_v42 = vpop.eup %5930 }
 0x466   : > { %4681 = vst [vmem:[%s9663_s12 + $0x110] sm:$0xff] %v4553_v32  ;;  %3774 = vmax.xlane.f32.xlu0 %v3773_v50  ;;  %4299 = vadd.xlane.f32.xlu2 %v4298_v17  ;;  %v10037_v57 = vadd.f32 %v3421_v46, %v8738_v51 }
 0x467   : > { %4682 = vst [vmem:[%s9663_s12 + $0x118] sm:$0xff] %v4554_v9  ;;  %5934 = vpow2.f32 %v4083_v60 }
 0x469   : > { %v5933_v22 = vpop.eup %5932  ;;  %v3590_v4 = vpop.f32.mrf.mxu1 }
 0x46a   : > { %v4258_v61 = vpop.xlane.xlu0 %4257  ;;  %v4428_v43 = vmul.f32 0.6931472, %v5933_v22  ;;  %v10040_v29 = vadd.f32 %v3590_v4, %v8740_v47  ;;  %v3733_v32 = vpop.xlane.xlu1 %3732  ;;  %v4301_v22 = vadd.f32 %v5931_v42, %v5929_v52 }
 0x46b   : > { %5936 = vlog2.f32 %v4258_v61  ;;  %v10043_v9 = vsub.f32 %v9723_v33, %v3733_v32  ;;  %v10046_v50 = vsub.f32 %v9732_v45, %v3733_v32 }
 0x46c   : > { %5938 = vpow2.f32 %v4085_v13  ;;  %v4555_v17 = vsub.f32 %v9655_v30, %v4428_v43  ;;  %v4556_v60 = vsub.f32 %v9661_v37, %v4428_v43  ;;  %v3776_v46 = vmax.f32 %v10037_v57, %v10040_v29 }
 0x46d   : > { %v4087_v4 = vmul.f32 1.442695, %v10043_v9  ;;  %v4089_v61 = vmul.f32 1.442695, %v10046_v50  ;;  %v3424_v33 = vpop.f32.mrf.mxu0  ;;  %v5935_v13 = vpop.eup %5934 }
 0x46e   : > { %4683 = vst [vmem:[%s9663_s12 + $0x120] sm:$0xff] %v4555_v17  ;;  %4302 = vadd.xlane.f32.xlu0 %v4301_v22  ;;  %3777 = vmax.xlane.f32.xlu1 %v3776_v46  ;;  %v10057_v32 = vadd.f32 %v3424_v33, %v8738_v51 }
 0x46f   : > { %4684 = vst [vmem:[%s9663_s12 + $0x128] sm:$0xff] %v4556_v60  ;;  %5940 = vpow2.f32 %v4087_v4 }
 0x470   : > { %5942 = vpow2.f32 %v4089_v61 }
 0x471   : > { %v5937_v45 = vpop.eup %5936  ;;  %v3593_v52 = vpop.f32.mrf.mxu1 }
 0x472   : > { %v5939_v30 = vpop.eup %5938  ;;  %v4430_v37 = vmul.f32 0.6931472, %v5937_v45  ;;  %v3736_v42 = vpop.xlane.xlu2 %3735  ;;  %v10060_v43 = vadd.f32 %v3593_v52, %v8740_v47 }
 0x473   : > { %v10063_v17 = vsub.f32 %v9745_v10, %v3736_v42  ;;  %v10066_v60 = vsub.f32 %v9753_v5, %v3736_v42  ;;  %v4261_v46 = vpop.xlane.xlu1 %4260  ;;  %v4304_v45 = vadd.f32 %v5939_v30, %v5935_v13 }
 0x474   : > { %v4557_v22 = vsub.f32 %v9678_v34, %v4430_v37  ;;  %v4558_v33 = vsub.f32 %v9686_v59, %v4430_v37  ;;  %5944 = vlog2.f32 %v4261_v46  ;;  %v3779_v4 = vmax.f32 %v10057_v32, %v10060_v43 }
 0x475   : > { %11343 = vst [vmem:[#allocation52_spill] sm:$0xff] %v10063_v17  ;;  %v4091_v61 = vmul.f32 1.442695, %v10063_v17  ;;  %v4093_v10 = vmul.f32 1.442695, %v10066_v60  ;;  %v3426_v5 = vpop.f32.mrf.mxu0  ;;  %v5941_v52 = vpop.eup %5940 }
 0x476   : > { %11344 = vst [vmem:[#allocation51_spill] sm:$0xff] %v10066_v60  ;;  %4305 = vadd.xlane.f32.xlu1 %v4304_v45  ;;  %3780 = vmax.xlane.f32.xlu2 %v3779_v4  ;;  %v5943_v42 = vpop.eup %5942  ;;  %v10077_v34 = vadd.f32 %v3426_v5, %v8738_v51  ;;  %v11347_v45 = vld [vmem:[#allocation21_spill] sm:$0xff]  ;;  %v11348_v60 = vld [vmem:[#allocation34_spill] sm:$0xff] }
 0x477   : > { %4685 = vst [vmem:[%s9663_s12 + $0x130] sm:$0xff] %v4557_v22  ;;  %5946 = vpow2.f32 %v4091_v61 }
 0x478   : > { %4686 = vst [vmem:[%s9663_s12 + $0x138] sm:$0xff] %v4558_v33  ;;  %5948 = vpow2.f32 %v4093_v10 }
 0x479   : > { %v3595_v37 = vpop.f32.mrf.mxu1  ;;  %v3739_v46 = vpop.xlane.xlu0 %3738 }
 0x47a   : > { %v5945_v59 = vpop.eup %5944  ;;  %v10080_v30 = vadd.f32 %v3595_v37, %v8740_v47  ;;  %v10083_v22 = vsub.f32 %v9767_v31, %v3739_v46  ;;  %v4264_v33 = vpop.xlane.xlu2 %4263  ;;  %v10086_v4 = vsub.f32 %v9776_v2, %v3739_v46 }
 0x47b   : > { %v4432_v13 = vmul.f32 0.6931472, %v5945_v59  ;;  %5950 = vlog2.f32 %v4264_v33  ;;  %v4307_v59 = vadd.f32 %v5943_v42, %v5941_v52 }
 0x47c   : > { %11345 = vst [vmem:[#allocation49_spill] sm:$0xff] %v10083_v22  ;;  %v3782_v10 = vmax.f32 %v10077_v34, %v10080_v30  ;;  %v4095_v17 = vmul.f32 1.442695, %v10083_v22  ;;  %v4097_v2 = vmul.f32 1.442695, %v10086_v4 }
 0x47d   : > { %11346 = vst [vmem:[#allocation46_spill] sm:$0xff] %v10086_v4  ;;  %v4559_v5 = vsub.f32 %v11347_v45, %v4432_v13  ;;  %v4560_v61 = vsub.f32 %v11348_v60, %v4432_v13  ;;  %v3429_v31 = vpop.f32.mrf.mxu0  ;;  %v5947_v37 = vpop.eup %5946  ;;  %v11352_v4 = vld [vmem:[#allocation23_spill] sm:$0xff] }
 0x47e   : > { %3783 = vmax.xlane.f32.xlu0 %v3782_v10  ;;  %4308 = vadd.xlane.f32.xlu2 %v4307_v59  ;;  %v5949_v46 = vpop.eup %5948  ;;  %v10097_v33 = vadd.f32 %v3429_v31, %v8738_v51  ;;  %5952 = vpow2.f32 %v4095_v17  ;;  %v11351_v59 = vld [vmem:[#allocation33_spill] sm:$0xff] }
 0x47f   : > { %4687 = vst [vmem:[%s9663_s12 + $0x140] sm:$0xff] %v4559_v5  ;;  %v4310_v22 = vadd.f32 %v5949_v46, %v5947_v37 }
 0x480   : > { %4688 = vst [vmem:[%s9663_s12 + $0x148] sm:$0xff] %v4560_v61 }
 0x481   : > { %v5951_v45 = vpop.eup %5950  ;;  %v3598_v60 = vpop.f32.mrf.mxu1 }
 0x482   : > { %v4267_v13 = vpop.xlane.xlu0 %4266  ;;  %v4434_v52 = vmul.f32 0.6931472, %v5951_v45  ;;  %v10100_v42 = vadd.f32 %v3598_v60, %v8740_v47  ;;  %v3742_v5 = vpop.xlane.xlu1 %3741 }
 0x483   : > { %5954 = vlog2.f32 %v4267_v13  ;;  %v10103_v61 = vsub.f32 %v9789_v26, %v3742_v5  ;;  %v10106_v10 = vsub.f32 %v9797_v8, %v3742_v5 }
 0x484   : > { %5956 = vpow2.f32 %v4097_v2  ;;  %v4561_v31 = vsub.f32 %v11351_v59, %v4434_v52  ;;  %v4562_v17 = vsub.f32 %v11352_v4, %v4434_v52  ;;  %v3785_v45 = vmax.f32 %v10097_v33, %v10100_v42  ;;  %v5953_v2 = vpop.eup %5952 }
 0x485   : > { %11349 = vst [vmem:[#allocation43_spill] sm:$0xff] %v10103_v61  ;;  %v4099_v60 = vmul.f32 1.442695, %v10103_v61  ;;  %v4101_v13 = vmul.f32 1.442695, %v10106_v10  ;;  %v3431_v26 = vpop.f32.mrf.mxu0 }
 0x486   : > { %11350 = vst [vmem:[#allocation56_spill] sm:$0xff] %v10106_v10  ;;  %4311 = vadd.xlane.f32.xlu0 %v4310_v22  ;;  %3786 = vmax.xlane.f32.xlu1 %v3785_v45  ;;  %v10117_v5 = vadd.f32 %v3431_v26, %v8738_v51  ;;  %v11355_v45 = vld [vmem:[#allocation27_spill] sm:$0xff]  ;;  %v11356_v10 = vld [vmem:[#allocation40_spill] sm:$0xff] }
 0x487   : > { %4689 = vst [vmem:[%s9663_s12 + $0x150] sm:$0xff] %v4561_v31  ;;  %5958 = vpow2.f32 %v4099_v60 }
 0x488   : > { %4690 = vst [vmem:[%s9663_s12 + $0x158] sm:$0xff] %v4562_v17  ;;  %5960 = vpow2.f32 %v4101_v13 }
 0x489   : > { %v5955_v8 = vpop.eup %5954  ;;  %v3600_v37 = vpop.f32.mrf.mxu1 }
 0x48a   : > { %v5957_v4 = vpop.eup %5956  ;;  %v4436_v52 = vmul.f32 0.6931472, %v5955_v8  ;;  %v3745_v46 = vpop.xlane.xlu2 %3744  ;;  %v10120_v59 = vadd.f32 %v3600_v37, %v8740_v47 }
 0x48b   : > { %v10123_v22 = vsub.f32 %v9811_v28, %v3745_v46  ;;  %v10126_v31 = vsub.f32 %v9820_v55, %v3745_v46  ;;  %v4270_v17 = vpop.xlane.xlu1 %4269  ;;  %v4313_v8 = vadd.f32 %v5957_v4, %v5953_v2 }
 0x48c   : > { %v4563_v26 = vsub.f32 %v11355_v45, %v4436_v52  ;;  %v4564_v61 = vsub.f32 %v11356_v10, %v4436_v52  ;;  %5962 = vlog2.f32 %v4270_v17  ;;  %v3788_v60 = vmax.f32 %v10117_v5, %v10120_v59 }
 0x48d   : > { %11353 = vst [vmem:[#allocation59_spill] sm:$0xff] %v10123_v22  ;;  %v4103_v13 = vmul.f32 1.442695, %v10123_v22  ;;  %v4105_v28 = vmul.f32 1.442695, %v10126_v31  ;;  %v3434_v55 = vpop.f32.mrf.mxu0  ;;  %v5959_v37 = vpop.eup %5958 }
 0x48e   : > { %11354 = vst [vmem:[#allocation53_spill] sm:$0xff] %v10126_v31  ;;  %4314 = vadd.xlane.f32.xlu1 %v4313_v8  ;;  %3789 = vmax.xlane.f32.xlu2 %v3788_v60  ;;  %v5961_v46 = vpop.eup %5960  ;;  %v10137_v45 = vadd.f32 %v3434_v55, %v8738_v51  ;;  %v11359_v8 = vld [vmem:[#allocation37_spill] sm:$0xff]  ;;  %v11360_v31 = vld [vmem:[#allocation36_spill] sm:$0xff] }
 0x48f   : > { %4691 = vst [vmem:[%s9663_s12 + $0x160] sm:$0xff] %v4563_v26  ;;  %5964 = vpow2.f32 %v4103_v13 }
 0x490   : > { %4692 = vst [vmem:[%s9663_s12 + $0x168] sm:$0xff] %v4564_v61  ;;  %5966 = vpow2.f32 %v4105_v28 }
 0x491   : > { %v3603_v52 = vpop.f32.mrf.mxu1  ;;  %v3748_v17 = vpop.xlane.xlu0 %3747 }
 0x492   : > { %v5963_v10 = vpop.eup %5962  ;;  %v10140_v61 = vadd.f32 %v3603_v52, %v8740_v47  ;;  %v10143_v4 = vsub.f32 %v9833_v58, %v3748_v17  ;;  %v4273_v26 = vpop.xlane.xlu2 %4272  ;;  %v10146_v60 = vsub.f32 %v9841_v18, %v3748_v17 }
 0x493   : > { %v4438_v2 = vmul.f32 0.6931472, %v5963_v10  ;;  %5968 = vlog2.f32 %v4273_v26  ;;  %v4316_v10 = vadd.f32 %v5961_v46, %v5959_v37 }
 0x494   : > { %11357 = vst [vmem:[#allocation55_spill] sm:$0xff] %v10143_v4  ;;  %v3791_v28 = vmax.f32 %v10137_v45, %v10140_v61  ;;  %v4107_v22 = vmul.f32 1.442695, %v10143_v4  ;;  %v4109_v18 = vmul.f32 1.442695, %v10146_v60 }
 0x495   : > { %11358 = vst [vmem:[#allocation57_spill] sm:$0xff] %v10146_v60  ;;  %v4565_v55 = vsub.f32 %v11359_v8, %v4438_v2  ;;  %v4566_v13 = vsub.f32 %v11360_v31, %v4438_v2  ;;  %v3436_v58 = vpop.f32.mrf.mxu0  ;;  %v5965_v52 = vpop.eup %5964  ;;  %v11365_v60 = vld [vmem:[#allocation39_spill] sm:$0xff] }
 0x496   : > { %3792 = vmax.xlane.f32.xlu0 %v3791_v28  ;;  %4317 = vadd.xlane.f32.xlu2 %v4316_v10  ;;  %v5967_v17 = vpop.eup %5966  ;;  %v10157_v26 = vadd.f32 %v3436_v58, %v8738_v51  ;;  %5970 = vpow2.f32 %v4107_v22  ;;  %v11364_v10 = vld [vmem:[#allocation29_spill] sm:$0xff] }
 0x497   : > { %4693 = vst [vmem:[%s9663_s12 + $0x170] sm:$0xff] %v4565_v55  ;;  %v4319_v4 = vadd.f32 %v5967_v17, %v5965_v52 }
 0x498   : > { %4694 = vst [vmem:[%s9663_s12 + $0x178] sm:$0xff] %v4566_v13 }
 0x499   : > { %v5969_v8 = vpop.eup %5968  ;;  %v3605_v31 = vpop.f32.mrf.mxu1 }
 0x49a   : > { %v4276_v2 = vpop.xlane.xlu0 %4275  ;;  %v4440_v37 = vmul.f32 0.6931472, %v5969_v8  ;;  %v10160_v46 = vadd.f32 %v3605_v31, %v8740_v47  ;;  %v3751_v55 = vpop.xlane.xlu1 %3750 }
 0x49b   : > { %5972 = vlog2.f32 %v4276_v2  ;;  %v10163_v13 = vsub.f32 %v9854_v20, %v3751_v55  ;;  %v10166_v28 = vsub.f32 %v9862_v49, %v3751_v55 }
 0x49c   : > { %11361 = vst [vmem:[#allocation60_spill] sm:$0xff] %v10160_v46  ;;  %5974 = vpow2.f32 %v4109_v18  ;;  %v4567_v58 = vsub.f32 %v11364_v10, %v4440_v37  ;;  %v4568_v22 = vsub.f32 %v11365_v60, %v4440_v37  ;;  %v3794_v8 = vmax.f32 %v10157_v26, %v10160_v46  ;;  %v5971_v18 = vpop.eup %5970 }
 0x49d   : > { %11362 = vst [vmem:[#allocation47_spill] sm:$0xff] %v10163_v13  ;;  %v4111_v31 = vmul.f32 1.442695, %v10163_v13  ;;  %v4113_v2 = vmul.f32 1.442695, %v10166_v28  ;;  %v3439_v20 = vpop.f32.mrf.mxu0 }
 0x49e   : > { %11363 = vst [vmem:[#allocation58_spill] sm:$0xff] %v10166_v28  ;;  %4320 = vadd.xlane.f32.xlu0 %v4319_v4  ;;  %3795 = vmax.xlane.f32.xlu1 %v3794_v8  ;;  %v10177_v55 = vadd.f32 %v3439_v20, %v8738_v51  ;;  %v11367_v28 = vld [vmem:[#allocation41_spill] sm:$0xff] }
 0x49f   : > { %4695 = vst [vmem:[%s9663_s12 + $0x180] sm:$0xff] %v4567_v58  ;;  %5976 = vpow2.f32 %v4111_v31  ;;  %v11366_v58 = vld [vmem:[#allocation35_spill] sm:$0xff] }
 0x4a0   : > { %4696 = vst [vmem:[%s9663_s12 + $0x188] sm:$0xff] %v4568_v22  ;;  %5978 = vpow2.f32 %v4113_v2 }
 0x4a1   : > { %v5973_v49 = vpop.eup %5972  ;;  %v3608_v52 = vpop.f32.mrf.mxu1 }
 0x4a2   : > { %v5975_v60 = vpop.eup %5974  ;;  %v4442_v37 = vmul.f32 0.6931472, %v5973_v49  ;;  %v3754_v17 = vpop.xlane.xlu2 %3753  ;;  %v10180_v10 = vadd.f32 %v3608_v52, %v8740_v47 }
 0x4a3   : > { %v4279_v4 = vpop.xlane.xlu1 %4278  ;;  %v4322_v20 = vadd.f32 %v5975_v60, %v5971_v18 }
 0x4a4   : > { %v4569_v8 = vsub.f32 %v11366_v58, %v4442_v37  ;;  %v4570_v22 = vsub.f32 %v11367_v28, %v4442_v37  ;;  %5980 = vlog2.f32 %v4279_v4  ;;  %v3797_v13 = vmax.f32 %v10177_v55, %v10180_v10 }
 0x4a5   : > { %v3441_v31 = vpop.f32.mrf.mxu0  ;;  %v5977_v2 = vpop.eup %5976 }
 0x4a6   : > { %4697 = vst [vmem:[%s9663_s12 + $0x190] sm:$0xff] %v4569_v8  ;;  %4323 = vadd.xlane.f32.xlu1 %v4322_v20  ;;  %3798 = vmax.xlane.f32.xlu2 %v3797_v13  ;;  %v5979_v49 = vpop.eup %5978  ;;  %v10189_v52 = vadd.f32 %v3441_v31, %v8738_v51 }
 0x4a7   : > { %4698 = vst [vmem:[%s9663_s12 + $0x198] sm:$0xff] %v4570_v22  ;;  %v4325_v22 = vadd.f32 %v5979_v49, %v5977_v2 }
 0x4a9   : > { %v3610_v46 = vpop.f32.mrf.mxu1  ;;  %v3757_v28 = vpop.xlane.xlu0 %3756 }
 0x4aa   : > { %v5981_v58 = vpop.eup %5980  ;;  %v10192_v4 = vadd.f32 %v3610_v46, %v8740_v47  ;;  %v4282_v18 = vpop.xlane.xlu2 %4281 }
 0x4ab   : > { %v4444_v37 = vmul.f32 0.6931472, %v5981_v58  ;;  %5982 = vlog2.f32 %v4282_v18 }
 0x4ac   : > { %v3800_v8 = vmax.f32 %v10189_v52, %v10192_v4 }
 0x4ad   : > { %v4571_v60 = vsub.f32 %v9838_v12, %v4444_v37  ;;  %v4572_v13 = vsub.f32 %v9844_v44, %v4444_v37  ;;  %v3444_v20 = vpop.f32.mrf.mxu0 }
 0x4ae   : > { %3801 = vmax.xlane.f32.xlu0 %v3800_v8  ;;  %4326 = vadd.xlane.f32.xlu2 %v4325_v22  ;;  %v10201_v31 = vadd.f32 %v3444_v20, %v8738_v51 }
 0x4af   : > { %4699 = vst [vmem:[%s9663_s12 + $0x1a0] sm:$0xff] %v4571_v60 }
 0x4b0   : > { %4700 = vst [vmem:[%s9663_s12 + $0x1a8] sm:$0xff] %v4572_v13 }
 0x4b1   : > { %v5983_v46 = vpop.eup %5982  ;;  %v3613_v58 = vpop.f32.mrf.mxu1 }
 0x4b2   : > { %v4285_v18 = vpop.xlane.xlu0 %4284  ;;  %v4446_v12 = vmul.f32 0.6931472, %v5983_v46  ;;  %v10204_v44 = vadd.f32 %v3613_v58, %v8740_v47  ;;  %v3760_v37 = vpop.xlane.xlu1 %3759 }
 0x4b3   : > { %5984 = vlog2.f32 %v4285_v18  ;;  %v10207_v2 = vsub.f32 %v9917_v23, %v3760_v37  ;;  %v10210_v49 = vsub.f32 %v9922_v53, %v3760_v37 }
 0x4b4   : > { %v4573_v60 = vsub.f32 %v9857_v6, %v4446_v12  ;;  %v4574_v13 = vsub.f32 %v9865_v27, %v4446_v12  ;;  %v3803_v8 = vmax.f32 %v10201_v31, %v10204_v44  ;;  %v10224_v6 = vsub.f32 %v9875_v19, %v3754_v17 }
 0x4b5   : > { %11368 = vst [vmem:[#allocation66_spill] sm:$0xff] %v10210_v49  ;;  %v4123_v22 = vmul.f32 1.442695, %v10207_v2  ;;  %v4125_v20 = vmul.f32 1.442695, %v10210_v49  ;;  %v3446_v46 = vpop.f32.mrf.mxu0  ;;  %v10227_v12 = vsub.f32 %v9883_v36, %v3754_v17 }
 0x4b6   : > { %4701 = vst [vmem:[%s9663_s12 + $0x1b0] sm:$0xff] %v4573_v60  ;;  %3804 = vmax.xlane.f32.xlu1 %v3803_v8  ;;  %v10221_v53 = vadd.f32 %v3446_v46, %v8738_v51  ;;  %v11372_v46 = vld [vmem:[#allocation48_spill] sm:$0xff] }
 0x4b7   : > { %4702 = vst [vmem:[%s9663_s12 + $0x1b8] sm:$0xff] %v4574_v13  ;;  %5986 = vpow2.f32 %v4123_v22  ;;  %v11371_v13 = vld [vmem:[#allocation32_spill] sm:$0xff]  ;;  %v4115_v22 = vmul.f32 1.442695, %v10224_v6 }
 0x4b8   : > { %11369 = vst [vmem:[#allocation61_spill] sm:$0xff] %v10224_v6  ;;  %5988 = vpow2.f32 %v4125_v20  ;;  %v10241_v20 = vsub.f32 %v9896_v25, %v3757_v28 }
 0x4b9   : > { %v5985_v23 = vpop.eup %5984  ;;  %v3615_v58 = vpop.f32.mrf.mxu1  ;;  %11370 = vst [vmem:[#allocation64_spill] sm:$0xff] %v10227_v12 }
 0x4ba   : > { %v4448_v27 = vmul.f32 0.6931472, %v5985_v23  ;;  %v3763_v18 = vpop.xlane.xlu2 %3762  ;;  %v10230_v37 = vadd.f32 %v3615_v58, %v8740_v47  ;;  %v4288_v60 = vpop.xlane.xlu1 %4287  ;;  %v4117_v23 = vmul.f32 1.442695, %v10227_v12  ;;  %11373 = vst [vmem:[#allocation67_spill] sm:$0xff] %v10241_v20  ;;  %v10244_v58 = vsub.f32 %v9904_v21, %v3757_v28 }
 0x4bb   : > { %5990 = vlog2.f32 %v4288_v60  ;;  %v4119_v21 = vmul.f32 1.442695, %v10241_v20 }
 0x4bc   : > { %v4575_v8 = vsub.f32 %v11371_v13, %v4448_v27  ;;  %v4576_v49 = vsub.f32 %v11372_v46, %v4448_v27  ;;  %v3806_v19 = vmax.f32 %v10221_v53, %v10230_v37  ;;  %5992 = vpow2.f32 %v4115_v22 }
 0x4bd   : > { %v3449_v36 = vpop.f32.mrf.mxu0  ;;  %v5987_v17 = vpop.eup %5986  ;;  %5994 = vpow2.f32 %v4117_v23  ;;  %v4121_v28 = vmul.f32 1.442695, %v10244_v58 }
 0x4be   : > { %4703 = vst [vmem:[%s9663_s12 + $0x1c0] sm:$0xff] %v4575_v8  ;;  %3807 = vmax.xlane.f32.xlu2 %v3806_v19  ;;  %v5989_v27 = vpop.eup %5988  ;;  %v10247_v60 = vadd.f32 %v3449_v36, %v8738_v51  ;;  %v10250_v8 = vsub.f32 %v9937_v54, %v3763_v18  ;;  %v10258_v36 = vsub.f32 %v9945_v1, %v3763_v18 }
 0x4bf   : > { %4704 = vst [vmem:[%s9663_s12 + $0x1c8] sm:$0xff] %v4576_v49 }
 0x4c0   : > { %v4129_v1 = vmul.f32 1.442695, %v10258_v36 }
 0x4c1   : > { %v5991_v13 = vpop.eup %5990  ;;  %v3618_v49 = vpop.f32.mrf.mxu1 }
 0x4c2   : > { %v3766_v46 = vpop.xlane.xlu0 %3765  ;;  %v4450_v19 = vmul.f32 0.6931472, %v5991_v13  ;;  %v10253_v25 = vadd.f32 %v3618_v49, %v8740_v47  ;;  %v4291_v12 = vpop.xlane.xlu2 %4290  ;;  %v4334_v13 = vadd.f32 %v5989_v27, %v5987_v17  ;;  %v4127_v49 = vmul.f32 1.442695, %v10250_v8 }
 0x4c3   : > { %5996 = vlog2.f32 %v4291_v12  ;;  %v5993_v6 = vpop.eup %5992  ;;  %v10272_v12 = vsub.f32 %v9957_v63, %v3766_v46 }
 0x4c4   : > { %v4577_v54 = vsub.f32 %v9899_v15, %v4450_v19  ;;  %v4578_v22 = vsub.f32 %v9907_v7, %v4450_v19  ;;  %v3809_v23 = vmax.f32 %v10247_v60, %v10253_v25  ;;  %5998 = vpow2.f32 %v4119_v21  ;;  %v5995_v18 = vpop.eup %5994 }
 0x4c5   : > { %v3451_v20 = vpop.f32.mrf.mxu0  ;;  %6000 = vpow2.f32 %v4121_v28  ;;  %v10275_v19 = vsub.f32 %v9962_v40, %v3766_v46 }
 0x4c6   : > { %4705 = vst [vmem:[%s9663_s12 + $0x1d0] sm:$0xff] %v4577_v54  ;;  %3810 = vmax.xlane.f32.xlu0 %v3809_v23  ;;  %4335 = vadd.xlane.f32.xlu2 %v4334_v13  ;;  %v10269_v15 = vadd.f32 %v3451_v20, %v8738_v51  ;;  %6002 = vpow2.f32 %v4127_v49  ;;  %v4131_v23 = vmul.f32 1.442695, %v10272_v12 }
 0x4c7   : > { %4706 = vst [vmem:[%s9663_s12 + $0x1d8] sm:$0xff] %v4578_v22 }
 0x4c9   : > { %v5997_v7 = vpop.eup %5996  ;;  %v3620_v17 = vpop.f32.mrf.mxu1 }
 0x4ca   : > { %v4294_v27 = vpop.xlane.xlu0 %4293  ;;  %v4452_v54 = vmul.f32 0.6931472, %v5997_v7  ;;  %v10278_v21 = vadd.f32 %v3620_v17, %v8740_v47  ;;  %v3769_v28 = vpop.xlane.xlu1 %3768  ;;  %v4328_v47 = vadd.f32 %v5995_v18, %v5993_v6 }
 0x4cb   : > { %6004 = vlog2.f32 %v4294_v27  ;;  %v10281_v51 = vsub.f32 %v9977_v11, %v3769_v28  ;;  %v10284_v63 = vsub.f32 %v9982_v56, %v3769_v28  ;;  %v5999_v22 = vpop.eup %5998  ;;  %v11374_v28 = vld [vmem:[#allocation45_spill] sm:$0xff] }
 0x4cc   : > { %6006 = vpow2.f32 %v4129_v1  ;;  %v4579_v20 = vsub.f32 %v9925_v39, %v4452_v54  ;;  %v4580_v40 = vsub.f32 %v9928_v14, %v4452_v54  ;;  %v3812_v46 = vmax.f32 %v10269_v15, %v10278_v21  ;;  %v6001_v49 = vpop.eup %6000 }
 0x4cd   : > { %v4135_v13 = vmul.f32 1.442695, %v10281_v51  ;;  %v4137_v11 = vmul.f32 1.442695, %v10284_v63  ;;  %v4133_v1 = vmul.f32 1.442695, %v10275_v19  ;;  %v6003_v39 = vpop.eup %6002 }
 0x4ce   : > { %4707 = vst [vmem:[%s9663_s12 + $0x1e0] sm:$0xff] %v4579_v20  ;;  %4329 = vadd.xlane.f32.xlu0 %v4328_v47  ;;  %3813 = vmax.xlane.f32.xlu1 %v3812_v46 }
 0x4cf   : > { %4708 = vst [vmem:[%s9663_s12 + $0x1e8] sm:$0xff] %v4580_v40  ;;  %6008 = vpow2.f32 %v4135_v13 }
 0x4d0   : > { %6010 = vpow2.f32 %v4137_v11 }
 0x4d1   : > { %v6005_v14 = vpop.eup %6004  ;;  %6012 = vpow2.f32 %v4131_v23  ;;  %v3772_v18 = vpop.xlane.xlu2 %3771  ;;  %v4331_v23 = vadd.f32 %v6001_v49, %v5999_v22 }
 0x4d2   : > { %v6007_v56 = vpop.eup %6006  ;;  %v4454_v6 = vmul.f32 0.6931472, %v6005_v14  ;;  %6014 = vpow2.f32 %v4133_v1  ;;  %v10297_v7 = vsub.f32 %v9997_v62, %v3772_v18  ;;  %v10300_v17 = vsub.f32 %v10000_v0, %v3772_v18  ;;  %v4297_v27 = vpop.xlane.xlu1 %4296 }
 0x4d3   : > { %6016 = vlog2.f32 %v4297_v27  ;;  %v4337_v47 = vadd.f32 %v6007_v56, %v6003_v39 }
 0x4d4   : > { %v4581_v54 = vsub.f32 %v9940_v48, %v4454_v6  ;;  %v4582_v20 = vsub.f32 %v11374_v28, %v4454_v6  ;;  %v4139_v40 = vmul.f32 1.442695, %v10297_v7  ;;  %v4141_v46 = vmul.f32 1.442695, %v10300_v17 }
 0x4d5   : > { %v6009_v13 = vpop.eup %6008 }
 0x4d6   : > { %4709 = vst [vmem:[%s9663_s12 + $0x1f0] sm:$0xff] %v4581_v54  ;;  %v6011_v11 = vpop.eup %6010  ;;  %6018 = vpow2.f32 %v4139_v40  ;;  %4338 = vadd.xlane.f32.xlu0 %v4337_v47  ;;  %4332 = vadd.xlane.f32.xlu1 %v4331_v23  ;;  %v11375_v54 = vld [vmem:[#allocation42_spill] sm:$0xff] }
 0x4d7   : > { %4710 = vst [vmem:[%s9663_s12 + $0x1f8] sm:$0xff] %v4582_v20  ;;  %v6013_v62 = vpop.eup %6012  ;;  %6020 = vpow2.f32 %v4141_v46  ;;  %v4343_v0 = vadd.f32 %v6011_v11, %v6009_v13 }
 0x4d8   : > { %v6015_v48 = vpop.eup %6014 }
 0x4d9   : > { %v6017_v1 = vpop.eup %6016  ;;  %4344 = vadd.xlane.f32.xlu2 %v4343_v0  ;;  %v3775_v14 = vpop.xlane.xlu0 %3774  ;;  %v4340_v39 = vadd.f32 %v6015_v48, %v6013_v62  ;;  %v11376_v0 = vld [vmem:[#allocation44_spill] sm:$0xff] }
 0x4da   : > { %v4300_v6 = vpop.xlane.xlu2 %4299  ;;  %v4456_v18 = vmul.f32 0.6931472, %v6017_v1  ;;  %v10309_v22 = vsub.f32 %v10017_v35, %v3775_v14  ;;  %v10312_v49 = vsub.f32 %v10020_v16, %v3775_v14 }
 0x4db   : > { %6022 = vlog2.f32 %v4300_v6 }
 0x4dc   : > { %v6019_v56 = vpop.eup %6018  ;;  %v4583_v27 = vsub.f32 %v9965_v24, %v4456_v18  ;;  %v4584_v28 = vsub.f32 %v11375_v54, %v4456_v18  ;;  %v4143_v20 = vmul.f32 1.442695, %v10309_v22  ;;  %v4145_v40 = vmul.f32 1.442695, %v10312_v49 }
 0x4dd   : > { %v6021_v46 = vpop.eup %6020 }
 0x4de   : > { %4711 = vst [vmem:[%s9663_s12 + $0x200] sm:$0xff] %v4583_v27  ;;  %6024 = vpow2.f32 %v4143_v20  ;;  %4341 = vadd.xlane.f32.xlu1 %v4340_v39  ;;  %v4346_v35 = vadd.f32 %v6021_v46, %v6019_v56 }
 0x4df   : > { %4712 = vst [vmem:[%s9663_s12 + $0x208] sm:$0xff] %v4584_v28  ;;  %6026 = vpow2.f32 %v4145_v40  ;;  %v11377_v28 = vld [vmem:[#allocation38_spill] sm:$0xff] }
 0x4e0   : > { %4347 = vadd.xlane.f32.xlu0 %v4346_v35  ;;  %v11378_v40 = vld [vmem:[#allocation50_spill] sm:$0xff] }
 0x4e1   : > { %v6023_v16 = vpop.eup %6022  ;;  %v4303_v23 = vpop.xlane.xlu0 %4302 }
 0x4e2   : > { %v4458_v47 = vmul.f32 0.6931472, %v6023_v16  ;;  %v3778_v24 = vpop.xlane.xlu1 %3777  ;;  %6028 = vlog2.f32 %v4303_v23 }
 0x4e3   : > { %v10321_v13 = vsub.f32 %v10037_v57, %v3778_v24  ;;  %v10324_v11 = vsub.f32 %v10040_v29, %v3778_v24 }
 0x4e4   : > { %v4585_v62 = vsub.f32 %v9985_v3, %v4458_v47  ;;  %v4586_v48 = vsub.f32 %v11376_v0, %v4458_v47  ;;  %v6025_v1 = vpop.eup %6024 }
 0x4e5   : > { %v4147_v14 = vmul.f32 1.442695, %v10321_v13  ;;  %v4149_v6 = vmul.f32 1.442695, %v10324_v11  ;;  %v6027_v18 = vpop.eup %6026 }
 0x4e6   : > { %4713 = vst [vmem:[%s9663_s12 + $0x210] sm:$0xff] %v4585_v62  ;;  %v4349_v39 = vadd.f32 %v6027_v18, %v6025_v1 }
 0x4e7   : > { %4714 = vst [vmem:[%s9663_s12 + $0x218] sm:$0xff] %v4586_v48  ;;  %6030 = vpow2.f32 %v4147_v14 }
 0x4e8   : > { %6032 = vpow2.f32 %v4149_v6  ;;  %v6029_v57 = vpop.eup %6028  ;;  %4350 = vadd.xlane.f32.xlu1 %v4349_v39 }
 0x4e9   : > { %v4460_v29 = vmul.f32 0.6931472, %v6029_v57  ;;  %v3781_v56 = vpop.xlane.xlu2 %3780 }
 0x4ea   : > { %v4306_v3 = vpop.xlane.xlu1 %4305  ;;  %v10333_v27 = vsub.f32 %v10057_v32, %v3781_v56  ;;  %v10336_v54 = vsub.f32 %v10060_v43, %v3781_v56 }
 0x4eb   : > { %6034 = vlog2.f32 %v4306_v3  ;;  %v4587_v20 = vsub.f32 %v11377_v28, %v4460_v29  ;;  %v4588_v46 = vsub.f32 %v11378_v40, %v4460_v29 }
 0x4ec   : > { %v4151_v16 = vmul.f32 1.442695, %v10333_v27  ;;  %v4153_v47 = vmul.f32 1.442695, %v10336_v54 }
 0x4ed   : > { %v6031_v35 = vpop.eup %6030  ;;  %4715 = vst [vmem:[%s9663_s12 + $0x220] sm:$0xff] %v4587_v20 }
 0x4ee   : > { %v6033_v23 = vpop.eup %6032  ;;  %4716 = vst [vmem:[%s9663_s12 + $0x228] sm:$0xff] %v4588_v46  ;;  %6036 = vpow2.f32 %v4151_v16 }
 0x4ef   : > { %v4352_v24 = vadd.f32 %v6033_v23, %v6031_v35  ;;  %6038 = vpow2.f32 %v4153_v47 }
 0x4f1   : > { %v6035_v32 = vpop.eup %6034  ;;  %4353 = vadd.xlane.f32.xlu2 %v4352_v24  ;;  %v3784_v62 = vpop.xlane.xlu0 %3783 }
 0x4f2   : > { %v4462_v43 = vmul.f32 0.6931472, %v6035_v32  ;;  %v4309_v0 = vpop.xlane.xlu2 %4308  ;;  %v10345_v48 = vsub.f32 %v10077_v34, %v3784_v62  ;;  %v10348_v1 = vsub.f32 %v10080_v30, %v3784_v62 }
 0x4f3   : > { %6040 = vlog2.f32 %v4309_v0  ;;  %v11380_v0 = vld [vmem:[#allocation51_spill] sm:$0xff] }
 0x4f4   : > { %v4589_v14 = vsub.f32 %v10023_v38, %v4462_v43  ;;  %v4590_v6 = vsub.f32 %v10026_v41, %v4462_v43  ;;  %v6037_v18 = vpop.eup %6036  ;;  %v4155_v39 = vmul.f32 1.442695, %v10345_v48  ;;  %v4157_v57 = vmul.f32 1.442695, %v10348_v1  ;;  %v11379_v43 = vld [vmem:[#allocation52_spill] sm:$0xff] }
 0x4f5   : > { %v6039_v29 = vpop.eup %6038 }
 0x4f6   : > { %4717 = vst [vmem:[%s9663_s12 + $0x230] sm:$0xff] %v4589_v14  ;;  %6042 = vpow2.f32 %v4155_v39  ;;  %v4355_v56 = vadd.f32 %v6039_v29, %v6037_v18 }
 0x4f7   : > { %4718 = vst [vmem:[%s9663_s12 + $0x238] sm:$0xff] %v4590_v6  ;;  %6044 = vpow2.f32 %v4157_v57 }
 0x4f8   : > { %4356 = vadd.xlane.f32.xlu0 %v4355_v56 }
 0x4f9   : > { %v6041_v34 = vpop.eup %6040  ;;  %v4312_v3 = vpop.xlane.xlu0 %4311 }
 0x4fa   : > { %v4464_v30 = vmul.f32 0.6931472, %v6041_v34  ;;  %v3787_v38 = vpop.xlane.xlu1 %3786  ;;  %6046 = vlog2.f32 %v4312_v3 }
 0x4fb   : > { %v10357_v41 = vsub.f32 %v10097_v33, %v3787_v38  ;;  %v10360_v28 = vsub.f32 %v10100_v42, %v3787_v38  ;;  %v11381_v38 = vld [vmem:[#allocation49_spill] sm:$0xff] }
 0x4fc   : > { %v4591_v20 = vsub.f32 %v10043_v9, %v4464_v30  ;;  %v4592_v40 = vsub.f32 %v10046_v50, %v4464_v30  ;;  %v6043_v46 = vpop.eup %6042 }
 0x4fd   : > { %v4159_v35 = vmul.f32 1.442695, %v10357_v41  ;;  %v4161_v16 = vmul.f32 1.442695, %v10360_v28  ;;  %v6045_v47 = vpop.eup %6044 }
 0x4fe   : > { %4719 = vst [vmem:[%s9663_s12 + $0x240] sm:$0xff] %v4591_v20  ;;  %v4358_v23 = vadd.f32 %v6045_v47, %v6043_v46 }
 0x4ff   : > { %4720 = vst [vmem:[%s9663_s12 + $0x248] sm:$0xff] %v4592_v40  ;;  %6048 = vpow2.f32 %v4159_v35  ;;  %v11382_v40 = vld [vmem:[#allocation46_spill] sm:$0xff] }
 0x500   : > { %6050 = vpow2.f32 %v4161_v16  ;;  %v6047_v33 = vpop.eup %6046  ;;  %4359 = vadd.xlane.f32.xlu1 %v4358_v23 }
 0x501   : > { %v4466_v42 = vmul.f32 0.6931472, %v6047_v33  ;;  %v3790_v24 = vpop.xlane.xlu2 %3789 }
 0x502   : > { %v4315_v9 = vpop.xlane.xlu1 %4314  ;;  %v10369_v50 = vsub.f32 %v10117_v5, %v3790_v24  ;;  %v10372_v32 = vsub.f32 %v10120_v59, %v3790_v24 }
 0x503   : > { %6052 = vlog2.f32 %v4315_v9  ;;  %v4593_v62 = vsub.f32 %v11379_v43, %v4466_v42  ;;  %v4594_v14 = vsub.f32 %v11380_v0, %v4466_v42  ;;  %v11383_v43 = vld [vmem:[#allocation60_spill] sm:$0xff]  ;;  %v11384_v0 = vld [vmem:[#allocation43_spill] sm:$0xff] }
 0x504   : > { %v4163_v18 = vmul.f32 1.442695, %v10369_v50  ;;  %v4165_v39 = vmul.f32 1.442695, %v10372_v32 }
 0x505   : > { %v6049_v6 = vpop.eup %6048  ;;  %4721 = vst [vmem:[%s9663_s12 + $0x250] sm:$0xff] %v4593_v62 }
 0x506   : > { %v6051_v57 = vpop.eup %6050  ;;  %4722 = vst [vmem:[%s9663_s12 + $0x258] sm:$0xff] %v4594_v14  ;;  %6054 = vpow2.f32 %v4163_v18 }
 0x507   : > { %v4361_v29 = vadd.f32 %v6051_v57, %v6049_v6  ;;  %6056 = vpow2.f32 %v4165_v39  ;;  %v11385_v6 = vld [vmem:[#allocation56_spill] sm:$0xff] }
 0x509   : > { %v6053_v5 = vpop.eup %6052  ;;  %4362 = vadd.xlane.f32.xlu2 %v4361_v29  ;;  %v3793_v56 = vpop.xlane.xlu0 %3792 }
 0x50a   : > { %v4468_v59 = vmul.f32 0.6931472, %v6053_v5  ;;  %v4318_v34 = vpop.xlane.xlu2 %4317  ;;  %v10381_v30 = vsub.f32 %v10137_v45, %v3793_v56  ;;  %v10384_v3 = vsub.f32 %v10140_v61, %v3793_v56 }
 0x50b   : > { %6058 = vlog2.f32 %v4318_v34 }
 0x50c   : > { %v4595_v20 = vsub.f32 %v11381_v38, %v4468_v59  ;;  %v4596_v46 = vsub.f32 %v11382_v40, %v4468_v59  ;;  %v6055_v35 = vpop.eup %6054  ;;  %v4167_v16 = vmul.f32 1.442695, %v10381_v30  ;;  %v4169_v47 = vmul.f32 1.442695, %v10384_v3 }
 0x50d   : > { %v6057_v23 = vpop.eup %6056 }
 0x50e   : > { %4723 = vst [vmem:[%s9663_s12 + $0x260] sm:$0xff] %v4595_v20  ;;  %6060 = vpow2.f32 %v4167_v16  ;;  %v4364_v33 = vadd.f32 %v6057_v23, %v6055_v35  ;;  %v11387_v16 = vld [vmem:[#allocation53_spill] sm:$0xff] }
 0x50f   : > { %4724 = vst [vmem:[%s9663_s12 + $0x268] sm:$0xff] %v4596_v46  ;;  %6062 = vpow2.f32 %v4169_v47  ;;  %v11386_v46 = vld [vmem:[#allocation59_spill] sm:$0xff] }
 0x510   : > { %4365 = vadd.xlane.f32.xlu0 %v4364_v33 }
 0x511   : > { %v6059_v45 = vpop.eup %6058  ;;  %v4321_v42 = vpop.xlane.xlu0 %4320 }
 0x512   : > { %v4470_v61 = vmul.f32 0.6931472, %v6059_v45  ;;  %v3796_v24 = vpop.xlane.xlu1 %3795  ;;  %6064 = vlog2.f32 %v4321_v42 }
 0x513   : > { %v10393_v9 = vsub.f32 %v10157_v26, %v3796_v24  ;;  %v10396_v62 = vsub.f32 %v11383_v43, %v3796_v24 }
 0x514   : > { %v4597_v14 = vsub.f32 %v11384_v0, %v4470_v61  ;;  %v4598_v18 = vsub.f32 %v11385_v6, %v4470_v61  ;;  %v6061_v39 = vpop.eup %6060  ;;  %v11388_v6 = vld [vmem:[#allocation55_spill] sm:$0xff] }
 0x515   : > { %v4171_v57 = vmul.f32 1.442695, %v10393_v9  ;;  %v4173_v29 = vmul.f32 1.442695, %v10396_v62  ;;  %v6063_v5 = vpop.eup %6062 }
 0x516   : > { %4725 = vst [vmem:[%s9663_s12 + $0x270] sm:$0xff] %v4597_v14  ;;  %v4367_v59 = vadd.f32 %v6063_v5, %v6061_v39  ;;  %v11389_v39 = vld [vmem:[#allocation57_spill] sm:$0xff] }
 0x517   : > { %4726 = vst [vmem:[%s9663_s12 + $0x278] sm:$0xff] %v4598_v18  ;;  %6066 = vpow2.f32 %v4171_v57 }
 0x518   : > { %6068 = vpow2.f32 %v4173_v29  ;;  %v6065_v26 = vpop.eup %6064  ;;  %4368 = vadd.xlane.f32.xlu1 %v4367_v59 }
 0x519   : > { %v4472_v56 = vmul.f32 0.6931472, %v6065_v26  ;;  %v3799_v34 = vpop.xlane.xlu2 %3798 }
 0x51a   : > { %v4324_v38 = vpop.xlane.xlu1 %4323  ;;  %v10405_v20 = vsub.f32 %v10177_v55, %v3799_v34  ;;  %v10408_v40 = vsub.f32 %v10180_v10, %v3799_v34 }
 0x51b   : > { %6070 = vlog2.f32 %v4324_v38  ;;  %v4599_v35 = vsub.f32 %v11386_v46, %v4472_v56  ;;  %v4600_v47 = vsub.f32 %v11387_v16, %v4472_v56 }
 0x51c   : > { %v4175_v33 = vmul.f32 1.442695, %v10405_v20  ;;  %v4177_v45 = vmul.f32 1.442695, %v10408_v40 }
 0x51d   : > { %v6067_v23 = vpop.eup %6066  ;;  %4727 = vst [vmem:[%s9663_s12 + $0x280] sm:$0xff] %v4599_v35  ;;  %v11390_v35 = vld [vmem:[#allocation47_spill] sm:$0xff] }
 0x51e   : > { %v6069_v61 = vpop.eup %6068  ;;  %4728 = vst [vmem:[%s9663_s12 + $0x288] sm:$0xff] %v4600_v47  ;;  %6072 = vpow2.f32 %v4175_v33  ;;  %v11391_v47 = vld [vmem:[#allocation58_spill] sm:$0xff] }
 0x51f   : > { %v4370_v42 = vadd.f32 %v6069_v61, %v6067_v23  ;;  %6074 = vpow2.f32 %v4177_v45 }
 0x521   : > { %v6071_v55 = vpop.eup %6070  ;;  %4371 = vadd.xlane.f32.xlu2 %v4370_v42  ;;  %v3802_v24 = vpop.xlane.xlu0 %3801 }
 0x522   : > { %v4474_v10 = vmul.f32 0.6931472, %v6071_v55  ;;  %v4327_v43 = vpop.xlane.xlu2 %4326  ;;  %v10417_v0 = vsub.f32 %v10189_v52, %v3802_v24  ;;  %v10420_v14 = vsub.f32 %v10192_v4, %v3802_v24 }
 0x523   : > { %6076 = vlog2.f32 %v4327_v43 }
 0x524   : > { %v4601_v18 = vsub.f32 %v11388_v6, %v4474_v10  ;;  %v4602_v57 = vsub.f32 %v11389_v39, %v4474_v10  ;;  %v6073_v29 = vpop.eup %6072  ;;  %v4179_v5 = vmul.f32 1.442695, %v10417_v0  ;;  %v4181_v59 = vmul.f32 1.442695, %v10420_v14 }
 0x525   : > { %v6075_v26 = vpop.eup %6074 }
 0x526   : > { %4729 = vst [vmem:[%s9663_s12 + $0x290] sm:$0xff] %v4601_v18  ;;  %6078 = vpow2.f32 %v4179_v5  ;;  %v4373_v52 = vadd.f32 %v6075_v26, %v6073_v29 }
 0x527   : > { %4730 = vst [vmem:[%s9663_s12 + $0x298] sm:$0xff] %v4602_v57  ;;  %6080 = vpow2.f32 %v4181_v59 }
 0x528   : > { %4374 = vadd.xlane.f32.xlu0 %v4373_v52 }
 0x529   : > { %v6077_v4 = vpop.eup %6076  ;;  %v3805_v34 = vpop.xlane.xlu1 %3804 }
 0x52a   : > { %v4476_v56 = vmul.f32 0.6931472, %v6077_v4  ;;  %v10429_v38 = vsub.f32 %v10201_v31, %v3805_v34  ;;  %v10432_v46 = vsub.f32 %v10204_v44, %v3805_v34 }
 0x52c   : > { %v4603_v16 = vsub.f32 %v11390_v35, %v4476_v56  ;;  %v4604_v23 = vsub.f32 %v11391_v47, %v4476_v56  ;;  %v6079_v33 = vpop.eup %6078  ;;  %v4183_v45 = vmul.f32 1.442695, %v10429_v38  ;;  %v4185_v61 = vmul.f32 1.442695, %v10432_v46 }
 0x52d   : > { %v6081_v42 = vpop.eup %6080 }
 0x52e   : > { %4731 = vst [vmem:[%s9663_s12 + $0x2a0] sm:$0xff] %v4603_v16  ;;  %6082 = vpow2.f32 %v4183_v45  ;;  %v4376_v55 = vadd.f32 %v6081_v42, %v6079_v33 }
 0x52f   : > { %4732 = vst [vmem:[%s9663_s12 + $0x2a8] sm:$0xff] %v4604_v23  ;;  %6084 = vpow2.f32 %v4185_v61  ;;  %v11392_v23 = vld [vmem:[#allocation66_spill] sm:$0xff] }
 0x530   : > { %4377 = vadd.xlane.f32.xlu1 %v4376_v55 }
 0x531   : > { %v3808_v31 = vpop.xlane.xlu2 %3807 }
 0x532   : > { %v10441_v44 = vsub.f32 %v10221_v53, %v3808_v31  ;;  %v10444_v10 = vsub.f32 %v10230_v37, %v3808_v31 }
 0x534   : > { %v6083_v24 = vpop.eup %6082  ;;  %v4187_v43 = vmul.f32 1.442695, %v10441_v44  ;;  %v4189_v6 = vmul.f32 1.442695, %v10444_v10 }
 0x535   : > { %v6085_v18 = vpop.eup %6084 }
 0x536   : > { %6086 = vpow2.f32 %v4187_v43  ;;  %v4379_v39 = vadd.f32 %v6085_v18, %v6083_v24  ;;  %v11393_v43 = vld [vmem:[#allocation61_spill] sm:$0xff]  ;;  %v11394_v18 = vld [vmem:[#allocation64_spill] sm:$0xff] }
 0x537   : > { %6088 = vpow2.f32 %v4189_v6 }
 0x538   : > { %4380 = vadd.xlane.f32.xlu2 %v4379_v39 }
 0x539   : > { %v3811_v57 = vpop.xlane.xlu0 %3810  ;;  %v4336_v29 = vpop.xlane.xlu2 %4335 }
 0x53a   : > { %v10449_v5 = vsub.f32 %v10247_v60, %v3811_v57  ;;  %v10452_v53 = vsub.f32 %v10253_v25, %v3811_v57  ;;  %6090 = vlog2.f32 %v4336_v29 }
 0x53c   : > { %v6087_v37 = vpop.eup %6086  ;;  %v4191_v59 = vmul.f32 1.442695, %v10449_v5  ;;  %v4193_v26 = vmul.f32 1.442695, %v10452_v53 }
 0x53d   : > { %v6089_v52 = vpop.eup %6088 }
 0x53e   : > { %6092 = vpow2.f32 %v4191_v59  ;;  %v4382_v4 = vadd.f32 %v6089_v52, %v6087_v37 }
 0x53f   : > { %6094 = vpow2.f32 %v4193_v26 }
 0x540   : > { %v6091_v56 = vpop.eup %6090  ;;  %4383 = vadd.xlane.f32.xlu0 %v4382_v4 }
 0x541   : > { %v4482_v34 = vmul.f32 0.6931472, %v6091_v56  ;;  %v4330_v60 = vpop.xlane.xlu0 %4329  ;;  %v3814_v35 = vpop.xlane.xlu1 %3813 }
 0x542   : > { %6096 = vlog2.f32 %v4330_v60  ;;  %v10457_v25 = vsub.f32 %v10269_v15, %v3814_v35  ;;  %v10460_v16 = vsub.f32 %v10278_v21, %v3814_v35 }
 0x543   : > { %v4609_v47 = vsub.f32 %v10207_v2, %v4482_v34  ;;  %v4610_v33 = vsub.f32 %v11392_v23, %v4482_v34 }
 0x544   : > { %v6093_v45 = vpop.eup %6092  ;;  %v4195_v61 = vmul.f32 1.442695, %v10457_v25  ;;  %v4197_v42 = vmul.f32 1.442695, %v10460_v16 }
 0x545   : > { %v6095_v55 = vpop.eup %6094  ;;  %4737 = vst [vmem:[%s9663_s12 + $0x2d0] sm:$0xff] %v4609_v47 }
 0x546   : > { %4738 = vst [vmem:[%s9663_s12 + $0x2d8] sm:$0xff] %v4610_v33  ;;  %6098 = vpow2.f32 %v4195_v61  ;;  %v4385_v31 = vadd.f32 %v6095_v55, %v6093_v45  ;;  %v11395_v33 = vld [vmem:[#allocation67_spill] sm:$0xff] }
 0x547   : > { %6100 = vpow2.f32 %v4197_v42 }
 0x548   : > { %v6097_v15 = vpop.eup %6096  ;;  %4386 = vadd.xlane.f32.xlu1 %v4385_v31 }
 0x549   : > { %v4478_v21 = vmul.f32 0.6931472, %v6097_v15  ;;  %v4339_v24 = vpop.xlane.xlu0 %4338  ;;  %v4333_v2 = vpop.xlane.xlu1 %4332 }
 0x54a   : > { %6102 = vlog2.f32 %v4339_v24 }
 0x54b   : > { %v4605_v6 = vsub.f32 %v11393_v43, %v4478_v21  ;;  %v4606_v39 = vsub.f32 %v11394_v18, %v4478_v21  ;;  %6104 = vlog2.f32 %v4333_v2 }
 0x54c   : > { %v6099_v57 = vpop.eup %6098  ;;  %v4345_v29 = vpop.xlane.xlu2 %4344 }
 0x54d   : > { %v6101_v37 = vpop.eup %6100  ;;  %4733 = vst [vmem:[%s9663_s12 + $0x2b0] sm:$0xff] %v4605_v6  ;;  %6106 = vlog2.f32 %v4345_v29 }
 0x54e   : > { %4734 = vst [vmem:[%s9663_s12 + $0x2b8] sm:$0xff] %v4606_v39  ;;  %v4388_v59 = vadd.f32 %v6101_v37, %v6099_v57 }
 0x550   : > { %v6103_v26 = vpop.eup %6102  ;;  %4389 = vadd.xlane.f32.xlu2 %v4388_v59 }
 0x551   : > { %v6105_v52 = vpop.eup %6104  ;;  %v4484_v4 = vmul.f32 0.6931472, %v6103_v26  ;;  %v4342_v56 = vpop.xlane.xlu1 %4341 }
 0x552   : > { %v4480_v34 = vmul.f32 0.6931472, %v6105_v52  ;;  %6108 = vlog2.f32 %v4342_v56 }
 0x553   : > { %v6107_v60 = vpop.eup %6106  ;;  %v4611_v35 = vsub.f32 %v10250_v8, %v4484_v4  ;;  %v4612_v47 = vsub.f32 %v10258_v36, %v4484_v4  ;;  %v4348_v23 = vpop.xlane.xlu0 %4347 }
 0x554   : > { %v4607_v45 = vsub.f32 %v11395_v33, %v4480_v34  ;;  %v4608_v61 = vsub.f32 %v10244_v58, %v4480_v34  ;;  %v4488_v42 = vmul.f32 0.6931472, %v6107_v60  ;;  %6110 = vlog2.f32 %v4348_v23 }
 0x555   : > { %4739 = vst [vmem:[%s9663_s12 + $0x2e0] sm:$0xff] %v4611_v35 }
 0x556   : > { %4740 = vst [vmem:[%s9663_s12 + $0x2e8] sm:$0xff] %v4612_v47  ;;  %v4615_v55 = vsub.f32 %v10281_v51, %v4488_v42  ;;  %v4616_v31 = vsub.f32 %v10284_v63, %v4488_v42 }
 0x557   : > { %4735 = vst [vmem:[%s9663_s12 + $0x2c0] sm:$0xff] %v4607_v45 }
 0x558   : > { %v6109_v8 = vpop.eup %6108  ;;  %4736 = vst [vmem:[%s9663_s12 + $0x2c8] sm:$0xff] %v4608_v61 }
 0x559   : > { %4743 = vst [vmem:[%s9663_s12 + $0x300] sm:$0xff] %v4615_v55  ;;  %v4486_v36 = vmul.f32 0.6931472, %v6109_v8 }
 0x55a   : > { %v6111_v15 = vpop.eup %6110  ;;  %4744 = vst [vmem:[%s9663_s12 + $0x308] sm:$0xff] %v4616_v31 }
 0x55b   : > { %v4613_v58 = vsub.f32 %v10272_v12, %v4486_v36  ;;  %v4614_v21 = vsub.f32 %v10275_v19, %v4486_v36  ;;  %v4490_v24 = vmul.f32 0.6931472, %v6111_v15  ;;  %v4351_v51 = vpop.xlane.xlu1 %4350 }
 0x55c   : > { %6112 = vlog2.f32 %v4351_v51 }
 0x55d   : > { %4741 = vst [vmem:[%s9663_s12 + $0x2f0] sm:$0xff] %v4613_v58  ;;  %v4617_v63 = vsub.f32 %v10297_v7, %v4490_v24  ;;  %v4618_v2 = vsub.f32 %v10300_v17, %v4490_v24 }
 0x55e   : > { %4742 = vst [vmem:[%s9663_s12 + $0x2f8] sm:$0xff] %v4614_v21 }
 0x55f   : > { %4745 = vst [vmem:[%s9663_s12 + $0x310] sm:$0xff] %v4617_v63 }
 0x560   : > { %4746 = vst [vmem:[%s9663_s12 + $0x318] sm:$0xff] %v4618_v2 }
 0x562   : > { %v6113_v43 = vpop.eup %6112 }
 0x563   : > { %v4492_v6 = vmul.f32 0.6931472, %v6113_v43 }
 0x564   : > { %v4354_v12 = vpop.xlane.xlu2 %4353 }
 0x565   : > { %6114 = vlog2.f32 %v4354_v12  ;;  %v4619_v19 = vsub.f32 %v10309_v22, %v4492_v6  ;;  %v4620_v18 = vsub.f32 %v10312_v49, %v4492_v6 }
 0x567   : > { %4747 = vst [vmem:[%s9663_s12 + $0x320] sm:$0xff] %v4619_v19 }
 0x568   : > { %4748 = vst [vmem:[%s9663_s12 + $0x328] sm:$0xff] %v4620_v18 }
 0x56b   : > { %v6115_v7 = vpop.eup %6114  ;;  %v4357_v17 = vpop.xlane.xlu0 %4356 }
 0x56c   : > { %v4494_v39 = vmul.f32 0.6931472, %v6115_v7  ;;  %6116 = vlog2.f32 %v4357_v17 }
 0x56e   : > { %v4621_v57 = vsub.f32 %v10321_v13, %v4494_v39  ;;  %v4622_v29 = vsub.f32 %v10324_v11, %v4494_v39 }
 0x570   : > { %4749 = vst [vmem:[%s9663_s12 + $0x330] sm:$0xff] %v4621_v57 }
 0x571   : > { %4750 = vst [vmem:[%s9663_s12 + $0x338] sm:$0xff] %v4622_v29 }
 0x572   : > { %v6117_v37 = vpop.eup %6116 }
 0x573   : > { %v4496_v22 = vmul.f32 0.6931472, %v6117_v37  ;;  %v4360_v59 = vpop.xlane.xlu1 %4359 }
 0x574   : > { %6118 = vlog2.f32 %v4360_v59 }
 0x575   : > { %v4623_v49 = vsub.f32 %v10333_v27, %v4496_v22  ;;  %v4624_v26 = vsub.f32 %v10336_v54, %v4496_v22 }
 0x577   : > { %4751 = vst [vmem:[%s9663_s12 + $0x340] sm:$0xff] %v4623_v49 }
 0x578   : > { %4752 = vst [vmem:[%s9663_s12 + $0x348] sm:$0xff] %v4624_v26 }
 0x57a   : > { %v6119_v52 = vpop.eup %6118 }
 0x57b   : > { %v4498_v13 = vmul.f32 0.6931472, %v6119_v52 }
 0x57c   : > { %v4363_v4 = vpop.xlane.xlu2 %4362 }
 0x57d   : > { %6120 = vlog2.f32 %v4363_v4  ;;  %v4625_v11 = vsub.f32 %v10345_v48, %v4498_v13  ;;  %v4626_v56 = vsub.f32 %v10348_v1, %v4498_v13 }
 0x57f   : > { %4753 = vst [vmem:[%s9663_s12 + $0x350] sm:$0xff] %v4625_v11 }
 0x580   : > { %4754 = vst [vmem:[%s9663_s12 + $0x358] sm:$0xff] %v4626_v56 }
 0x583   : > { %v6121_v34 = vpop.eup %6120  ;;  %v4366_v60 = vpop.xlane.xlu0 %4365 }
 0x584   : > { %v4500_v27 = vmul.f32 0.6931472, %v6121_v34  ;;  %6122 = vlog2.f32 %v4366_v60 }
 0x586   : > { %v4627_v54 = vsub.f32 %v10357_v41, %v4500_v27  ;;  %v4628_v35 = vsub.f32 %v10360_v28, %v4500_v27 }
 0x588   : > { %4755 = vst [vmem:[%s9663_s12 + $0x360] sm:$0xff] %v4627_v54 }
 0x589   : > { %4756 = vst [vmem:[%s9663_s12 + $0x368] sm:$0xff] %v4628_v35 }
 0x58a   : > { %v6123_v47 = vpop.eup %6122 }
 0x58b   : > { %v4502_v48 = vmul.f32 0.6931472, %v6123_v47  ;;  %v4369_v23 = vpop.xlane.xlu1 %4368 }
 0x58c   : > { %6124 = vlog2.f32 %v4369_v23 }
 0x58d   : > { %v4629_v1 = vsub.f32 %v10369_v50, %v4502_v48  ;;  %v4630_v33 = vsub.f32 %v10372_v32, %v4502_v48 }
 0x58f   : > { %4757 = vst [vmem:[%s9663_s12 + $0x370] sm:$0xff] %v4629_v1 }
 0x590   : > { %4758 = vst [vmem:[%s9663_s12 + $0x378] sm:$0xff] %v4630_v33 }
 0x592   : > { %v6125_v45 = vpop.eup %6124 }
 0x593   : > { %v4504_v41 = vmul.f32 0.6931472, %v6125_v45 }
 0x594   : > { %v4372_v61 = vpop.xlane.xlu2 %4371 }
 0x595   : > { %6126 = vlog2.f32 %v4372_v61  ;;  %v4631_v28 = vsub.f32 %v10381_v30, %v4504_v41  ;;  %v4632_v42 = vsub.f32 %v10384_v3, %v4504_v41 }
 0x597   : > { %4759 = vst [vmem:[%s9663_s12 + $0x380] sm:$0xff] %v4631_v28 }
 0x598   : > { %4760 = vst [vmem:[%s9663_s12 + $0x388] sm:$0xff] %v4632_v42 }
 0x59b   : > { %v6127_v55 = vpop.eup %6126  ;;  %v4375_v31 = vpop.xlane.xlu0 %4374 }
 0x59c   : > { %v4506_v50 = vmul.f32 0.6931472, %v6127_v55  ;;  %6128 = vlog2.f32 %v4375_v31 }
 0x59e   : > { %v4633_v32 = vsub.f32 %v10393_v9, %v4506_v50  ;;  %v4634_v8 = vsub.f32 %v10396_v62, %v4506_v50 }
 0x5a0   : > { %4761 = vst [vmem:[%s9663_s12 + $0x390] sm:$0xff] %v4633_v32 }
 0x5a1   : > { %4762 = vst [vmem:[%s9663_s12 + $0x398] sm:$0xff] %v4634_v8 }
 0x5a2   : > { %v6129_v36 = vpop.eup %6128 }
 0x5a3   : > { %v4508_v30 = vmul.f32 0.6931472, %v6129_v36  ;;  %v4378_v15 = vpop.xlane.xlu1 %4377 }
 0x5a4   : > { %6130 = vlog2.f32 %v4378_v15 }
 0x5a5   : > { %v4635_v3 = vsub.f32 %v10405_v20, %v4508_v30  ;;  %v4636_v58 = vsub.f32 %v10408_v40, %v4508_v30 }
 0x5a7   : > { %4763 = vst [vmem:[%s9663_s12 + $0x3a0] sm:$0xff] %v4635_v3 }
 0x5a8   : > { %4764 = vst [vmem:[%s9663_s12 + $0x3a8] sm:$0xff] %v4636_v58 }
 0x5aa   : > { %v6131_v21 = vpop.eup %6130 }
 0x5ab   : > { %v4510_v9 = vmul.f32 0.6931472, %v6131_v21  ;;  %v4381_v24 = vpop.xlane.xlu2 %4380 }
 0x5ac   : > { %6132 = vlog2.f32 %v4381_v24 }
 0x5ad   : > { %v4637_v62 = vsub.f32 %v10417_v0, %v4510_v9  ;;  %v4638_v51 = vsub.f32 %v10420_v14, %v4510_v9 }
 0x5af   : > { %4765 = vst [vmem:[%s9663_s12 + $0x3b0] sm:$0xff] %v4637_v62 }
 0x5b0   : > { %4766 = vst [vmem:[%s9663_s12 + $0x3b8] sm:$0xff] %v4638_v51 }
 0x5b2   : > { %v6133_v63 = vpop.eup %6132 }
 0x5b3   : > { %v4512_v20 = vmul.f32 0.6931472, %v6133_v63  ;;  %v4384_v2 = vpop.xlane.xlu0 %4383 }
 0x5b4   : > { %6134 = vlog2.f32 %v4384_v2 }
 0x5b5   : > { %v4639_v40 = vsub.f32 %v10429_v38, %v4512_v20  ;;  %v4640_v43 = vsub.f32 %v10432_v46, %v4512_v20 }
 0x5b7   : > { %4767 = vst [vmem:[%s9663_s12 + $0x3c0] sm:$0xff] %v4639_v40 }
 0x5b8   : > { %4768 = vst [vmem:[%s9663_s12 + $0x3c8] sm:$0xff] %v4640_v43 }
 0x5ba   : > { %v6135_v6 = vpop.eup %6134 }
 0x5bb   : > { %v4514_v0 = vmul.f32 0.6931472, %v6135_v6  ;;  %v4387_v14 = vpop.xlane.xlu1 %4386 }
 0x5bc   : > { %6136 = vlog2.f32 %v4387_v14 }
 0x5bd   : > { %v4641_v12 = vsub.f32 %v10441_v44, %v4514_v0  ;;  %v4642_v19 = vsub.f32 %v10444_v10, %v4514_v0 }
 0x5bf   : > { %4769 = vst [vmem:[%s9663_s12 + $0x3d0] sm:$0xff] %v4641_v12 }
 0x5c0   : > { %4770 = vst [vmem:[%s9663_s12 + $0x3d8] sm:$0xff] %v4642_v19 }
 0x5c2   : > { %v6137_v18 = vpop.eup %6136 }
 0x5c3   : > { %v4516_v38 = vmul.f32 0.6931472, %v6137_v18  ;;  %v4390_v7 = vpop.xlane.xlu2 %4389 }
 0x5c4   : > { %6138 = vlog2.f32 %v4390_v7 }
 0x5c5   : > { %v4643_v46 = vsub.f32 %v10449_v5, %v4516_v38  ;;  %v4644_v39 = vsub.f32 %v10452_v53, %v4516_v38 }
 0x5c7   : > { %4771 = vst [vmem:[%s9663_s12 + $0x3e0] sm:$0xff] %v4643_v46 }
 0x5c8   : > { %4772 = vst [vmem:[%s9663_s12 + $0x3e8] sm:$0xff] %v4644_v39 }
 0x5ca   : > { %v6139_v44 = vpop.eup %6138 }
 0x5cb   : > { %v4518_v10 = vmul.f32 0.6931472, %v6139_v44 }
 0x5cd   : > { %v4645_v17 = vsub.f32 %v10457_v25, %v4518_v10  ;;  %v4646_v57 = vsub.f32 %v10460_v16, %v4518_v10 }
 0x5cf   : > { %4773 = vst [vmem:[%s9663_s12 + $0x3f0] sm:$0xff] %v4645_v17 }
 0x5d0   : > { %4774 = vst [vmem:[%s9663_s12 + $0x3f8] sm:$0xff] %v4646_v57 }
 0x5d1   : > { %6171 = shalt.err (!%p6168_p3)
}
 0x5d2   : > { %s6211_s10 = smov 256   ;;  %s6212_s12 = smov 16  }
 0x5d3   : > { %5637 = dma.vmem_to_hbm [thread:$0]  (%p6281_p5), %s4790_s23, 16384, %s4792_s25, %s4776_s22, %s6211_s10, %s6211_s10, %s6212_s12  }
 0x5d4 PF: > { %p5643_p4 = scmp.ge.s32.totalorder %s6206_s21, 2  ;;  %s4806_s14 = sand.u32 1, %s6194_s18  }
 0x5d5   : > { %s4807_s15 = scalar_lea.sflag [#allocation3], %s4806_s14 }
 0x5d6   : > { %p5640_p7 = pnand %p5643_p4, %p6285_p6 }
 0x5d8   : > { %p5641_p8 = pneg %p5640_p7 }
 0x5da   : > { %6189 = dma.done.wait (%p5641_p8), %s4807_s15, 16384  }
 0x5db   : > { %6191 = vsyncadd (%p5641_p8), %s4807_s15, 4294950912  ;;  %p15_p9 = scmp.ge.s32.totalorder %s6268_s24, 4   ;;  %s11396_s18 = smov %s6198_s19 }
 0x5dc   : > { %s11397_s19 = smov %s6202_s20  ;;  %s11398_s20 = smov %s6279_s27 }
 0x5dd   : > { %s11399_s21 = smov %s6268_s24  ;;  %17 = sbr.rel (!%p15_p9) target bundleno = 3 (0x3), region = 75 }
 0x5e2   :  { %4813 = vsyncpa [#allocation3], 1 }
 0x5e3   :  { %4815 = vsyncpa [#allocation3 + $0x1], 1 }

</bundles_post_ra>
